<compile_context>
chip_gen: v6e
topology: v6e:2x2x1
jax: 0.10.0
libtpu: 0.0.40
codegen_flags: <defaults>
</compile_context>

<pallas_src>
import functools

import jax
import jax.numpy as jnp
from jax.experimental import pallas as pl
from jax.experimental.pallas import tpu as pltpu

LANE = 128   # vreg lane width
CPAD = 8     # sublane padding used for conv1/conv2 input channels


# ----------------------------------------------------------------------------
# Fused LeNet kernel: one batch *tile* per grid step, everything in VMEM.
# ----------------------------------------------------------------------------
def _lenet_fused_kernel(
    x_ref,                       # (1, CPAD, XW)    B images, per-image stride LSTR
    w1_ref, b1_ref,              # (8, 200),   (8, 1)
    w2_ref, b2_ref,              # (16, 200),  (16, 1)
    w3_ref, b3_ref,              # (120, 144), (120, 1)
    w4_ref, b4_ref,              # (84, 120),  (84, 1)
    w5_ref, b5_ref,              # (Cout, 84), (Cout, 1)
    out_ref,                     # (1, Cout, B)
    pat1_s, a1_s, p1_s, pat2_s, a2_s, p2_s, pat3_s,
    *, geom):
    W, LSTR, WIDE, LPW, P1W, B = geom
    f32 = jnp.float32
    C2 = w2_ref.shape[0]         # 16

    # ---- conv1 (5x5, valid) as implicit GEMM: taps folded into K ----------
    # Activation layout per image: element (h, w) at flat index h*W + w; the
    # batch tile is concatenated on lanes with stride LSTR, so one contiguous
    # slice at offset i*W + j covers tap (i, j) of every image at once.
    # Tap copies are full-8-sublane, lane-dense stores (channels pre-padded).
    t = 0
    for i in range(5):
        for j in range(5):
            off = i * W + j
            pat1_s[t * CPAD:(t + 1) * CPAD, :] = x_ref[0, :, off:off + WIDE]
            t += 1
    a1_s[...] = jnp.maximum(
        jnp.dot(w1_ref[...], pat1_s[...], preferred_element_type=f32)
        + b1_ref[...], 0.0)                                        # (8, WIDE)

    # ---- maxpool 2x2/2: same flat addresses, doubled strides ---------------
    p1_s[:, :LPW] = jnp.maximum(
        jnp.maximum(a1_s[:, 0:LPW], a1_s[:, 1:1 + LPW]),
        jnp.maximum(a1_s[:, W:W + LPW], a1_s[:, W + 1:W + 1 + LPW]))
    # zero tail so conv2's over-reading junk columns stay finite
    p1_s[:, LPW:] = jnp.zeros((CPAD, P1W - LPW), f32)

    # ---- conv2 (5x5) on dilated layout (row stride 2W, col stride 2) -------
    R1, s1 = 2 * W, 2
    t = 0
    for i in range(5):
        for j in range(5):
            off = i * R1 + j * s1
            pat2_s[t * CPAD:(t + 1) * CPAD, :] = p1_s[:, off:off + WIDE]
            t += 1
    a2_s[...] = jnp.maximum(
        jnp.dot(w2_ref[...], pat2_s[...], preferred_element_type=f32)
        + b2_ref[...], 0.0)                                        # (16, WIDE)

    # ---- maxpool 2x2/2 -> dilated layout (row stride 4W, col stride 4) -----
    p2_s[...] = jnp.maximum(
        jnp.maximum(a2_s[:, 0:LPW], a2_s[:, s1:s1 + LPW]),
        jnp.maximum(a2_s[:, R1:R1 + LPW], a2_s[:, R1 + s1:R1 + s1 + LPW]))

    # ---- gather each image's 3x3x16 valid field into a lane-dense (144, B)
    #      operand so the head runs as batched GEMMs -------------------------
    R2, s2 = 4 * W, 4
    for b in range(B):
        base = b * LSTR
        t = 0
        for i in range(3):
            for j in range(3):
                q = base + i * R2 + j * s2
                pat3_s[t * C2:(t + 1) * C2, b:b + 1] = p2_s[:, q:q + 1]
                t += 1

    # ---- conv3 (whole valid field) + linear1 + relu + linear2 --------------
    h3 = jnp.maximum(
        jnp.dot(w3_ref[...], pat3_s[...], preferred_element_type=f32)
        + b3_ref[...], 0.0)                                        # (120, B)
    h4 = jnp.maximum(
        jnp.dot(w4_ref[...], h3, preferred_element_type=f32)
        + b4_ref[...], 0.0)                                        # (84, B)
    out_ref[0] = (jnp.dot(w5_ref[...], h4, preferred_element_type=f32)
                  + b5_ref[...])                                   # (Cout, B)


# ----------------------------------------------------------------------------
# Wrapper: one-time layout plumbing (XLA) + single fused pallas_call.
# ----------------------------------------------------------------------------
def lenet_forward(params, x_nchw, *, b_tile=8):
    N, Cin, H, W = map(int, x_nchw.shape)
    assert Cin <= CPAD
    # Geometry implied by the module: flatten must yield 120 features,
    # i.e. conv3 output is 1x1  =>  24x24 inputs for this LeNet variant.
    H1, W1 = H - 4, W - 4
    assert H1 > 0 and W1 > 0 and H1 % 2 == 0 and W1 % 2 == 0
    Hp1, Wp1 = H1 // 2, W1 // 2
    H2, W2 = Hp1 - 4, Wp1 - 4
    assert H2 > 0 and W2 > 0 and H2 % 2 == 0 and W2 % 2 == 0
    Hp2, Wp2 = H2 // 2, W2 // 2
    assert Hp2 == 3 and Wp2 == 3, "linear1(120,.) requires 24x24 input"

    LV = H * W
    LSTR = -(-LV // LANE) * LANE        # per-image lane stride (640 for 24x24)
    B = max(1, min(int(b_tile), 16))    # batch tile (VMEM-bounded)
    Npad = -(-N // B) * B
    NT = Npad // B
    WIDE = B * LSTR                     # lane width of all wide buffers
    XW = WIDE + LANE                    # input tail covers conv1 tap overrun (4W+4)
    LPW = WIDE - LANE                   # pooled writeback width (lane aligned)
    P1W = WIDE + 2 * LANE               # pool1 buffer covers conv2 tap overrun (8W+8)

    # Layout margins: every read feeding a *valid* output position stays
    # inside written data (junk columns only ever read finite values).
    assert 4 * W + 4 <= LANE
    assert 8 * W + 8 <= 2 * LANE
    vmax = max((H1 - 2) * W + (W1 - 2),                        # last valid pool1 pos
               (H2 - 1) * 2 * W + (W2 - 1) * 2 + 8 * W + 8,    # last valid conv2 read
               (Hp2 - 1) * 4 * W + (Wp2 - 1) * 4)              # last valid pool2 pos
    assert vmax < LSTR - LANE

    # ---- input: pad channels to 8, batch to Npad, lay batch on lanes -------
    x = x_nchw.astype(jnp.float32).reshape(N, Cin, LV)
    x = jnp.pad(x, ((0, Npad - N), (0, CPAD - Cin), (0, LSTR - LV)))
    x = x.reshape(NT, B, CPAD, LSTR).transpose(0, 2, 1, 3).reshape(NT, CPAD, WIDE)
    x = jnp.pad(x, ((0, 0), (0, 0), (0, XW - WIDE)))           # (NT, CPAD, XW)

    # ---- weights: fold taps into K, pad channel dims (zero columns/rows) ---
    def conv_w(w, cpad):               # (Cout,Cin,KH,KW) -> (Cout, KH*KW*cpad)
        co, ci, kh, kw = w.shape
        w = jnp.transpose(w, (0, 2, 3, 1))
        w = jnp.pad(w, ((0, 0), (0, 0), (0, 0), (0, cpad - ci)))
        return w.reshape(co, kh * kw * cpad)

    w1 = jnp.pad(conv_w(params["conv1_w"], CPAD), ((0, CPAD - 6), (0, 0)))  # (8,200)
    b1 = jnp.pad(params["conv1_b"], (0, CPAD - 6)).reshape(-1, 1)           # (8,1)
    w2 = conv_w(params["conv2_w"], CPAD)                                    # (16,200)
    b2 = params["conv2_b"].reshape(-1, 1)
    w3 = conv_w(params["conv3_w"], 16)                                      # (120,144)
    b3 = params["conv3_b"].reshape(-1, 1)
    w4 = params["lin1_w"]
    b4 = params["lin1_b"].reshape(-1, 1)
    w5 = params["lin2_w"]
    b5 = params["lin2_b"].reshape(-1, 1)
    Cout = int(w5.shape[0])

    flops = 2 * NT * ((w1.shape[0] * w1.shape[1] + w2.shape[0] * w2.shape[1]) * WIDE
                      + (w3.shape[0] * w3.shape[1] + w4.shape[0] * w4.shape[1]
                         + w5.shape[0] * w5.shape[1]) * B)
    bytes_accessed = 4 * (x.size + w1.size + b1.size + w2.size + b2.size + w3.size
                          + b3.size + w4.size + b4.size + w5.size + b5.size
                          + NT * Cout * B)

    scratch = [
        pltpu.VMEM((25 * CPAD, WIDE), jnp.float32),   # conv1 im2col pattern
        pltpu.VMEM((CPAD, WIDE), jnp.float32),        # conv1 output (relu)
        pltpu.VMEM((CPAD, P1W), jnp.float32),         # pool1 output (+ zero tail)
        pltpu.VMEM((25 * CPAD, WIDE), jnp.float32),   # conv2 im2col pattern
        pltpu.VMEM((16, WIDE), jnp.float32),          # conv2 output (relu)
        pltpu.VMEM((16, LPW), jnp.float32),           # pool2 output
        pltpu.VMEM((144, B), jnp.float32),            # conv3 patch, batch on lanes
    ]
    scratch_bytes = 4 * (25 * CPAD * WIDE * 2 + CPAD * (WIDE + P1W)
                         + 16 * (WIDE + LPW) + 144 * max(B, LANE))
    vmem_limit = min(int(1.5 * (scratch_bytes + 2 * 4 * CPAD * XW)) + (8 << 20),
                     110 << 20)

    def full(a):                       # whole-array block, constant over the grid
        return pl.BlockSpec(a.shape, lambda t: (0, 0))

    out = pl.pallas_call(
        functools.partial(_lenet_fused_kernel,
                          geom=(W, LSTR, WIDE, LPW, P1W, B)),
        out_shape=jax.ShapeDtypeStruct((NT, Cout, B), jnp.float32),
        grid=(NT,),
        in_specs=[
            pl.BlockSpec((1, CPAD, XW), lambda t: (t, 0, 0)),
            full(w1), full(b1), full(w2), full(b2), full(w3), full(b3),
            full(w4), full(b4), full(w5), full(b5),
        ],
        out_specs=pl.BlockSpec((1, Cout, B), lambda t: (t, 0, 0)),
        scratch_shapes=scratch,
        compiler_params=pltpu.CompilerParams(
            dimension_semantics=("parallel",),
            vmem_limit_bytes=vmem_limit),
        cost_estimate=pl.CostEstimate(
            flops=flops, transcendentals=0, bytes_accessed=bytes_accessed),
    )(x, w1, b1, w2, b2, w3, b3, w4, b4, w5, b5)

    # (NT, Cout, B) -> (Npad, Cout) -> (N, Cout)
    return out.transpose(0, 2, 1).reshape(Npad, Cout)[:N]


# ----------------------------------------------------------------------------
# Deterministic parameter init (PyTorch default shapes; synthetic values)
# ----------------------------------------------------------------------------
def init_params(key, in_channels, out_channels):
    def u(k, shape, fan_in):
        bound = 1.0 / jnp.sqrt(jnp.float32(fan_in))
        return jax.random.uniform(k, shape, jnp.float32, -bound, bound)

    ks = jax.random.split(key, 10)
    return {
        "conv1_w": u(ks[0], (6, in_channels, 5, 5), in_channels * 25),
        "conv1_b": u(ks[1], (6,), in_channels * 25),
        "conv2_w": u(ks[2], (16, 6, 5, 5), 6 * 25),
        "conv2_b": u(ks[3], (16,), 6 * 25),
        "conv3_w": u(ks[4], (120, 16, 3, 3), 16 * 9),
        "conv3_b": u(ks[5], (120,), 16 * 9),
        "lin1_w": u(ks[6], (84, 120), 120),
        "lin1_b": u(ks[7], (84,), 120),
        "lin2_w": u(ks[8], (out_channels, 84), 84),
        "lin2_b": u(ks[9], (out_channels,), 84),
    }


# ----------------------------------------------------------------------------
# Pure-JAX reference (correctness spot check)
# ----------------------------------------------------------------------------
def lenet_reference(params, x):
    dn = ("NCHW", "OIHW", "NCHW")

    def conv(x, w, b):
        y = jax.lax.conv_general_dilated(
            x, w, (1, 1), "VALID", dimension_numbers=dn,
            precision=jax.lax.Precision.HIGHEST)
        return y + b.reshape(1, -1, 1, 1)

    def pool(x):
        return jax.lax.reduce_window(
            x, -jnp.inf, jax.lax.max, (1, 1, 2, 2), (1, 1, 2, 2), "VALID")

    x = pool(jnp.maximum(conv(x, params["conv1_w"], params["conv1_b"]), 0.0))
    x = pool(jnp.maximum(conv(x, params["conv2_w"], params["conv2_b"]), 0.0))
    x = jnp.maximum(conv(x, params["conv3_w"], params["conv3_b"]), 0.0)
    x = x.reshape(x.shape[0], -1)
    x = jnp.maximum(x @ params["lin1_w"].T + params["lin1_b"], 0.0)
    return x @ params["lin2_w"].T + params["lin2_b"]


if __name__ == "__main__":
    # 24x24 input => conv1->20->pool->10->conv2->6->pool->3->conv3->1x1x120,
    # which is what linear1(120, 84) requires.  N=8 with b_tile=4 gives a
    # 2-step grid (exercises batching + both v7x cores).
    N, C_IN, H, W, C_OUT = 8, 3, 24, 24, 10

    key = jax.random.PRNGKey(0)
    k_x, k_p = jax.random.split(key)
    x = jax.random.normal(k_x, (N, C_IN, H, W), jnp.float32)  # NCHW, like PyTorch
    params = init_params(k_p, C_IN, C_OUT)

    fwd = jax.jit(functools.partial(lenet_forward, b_tile=4))
    out = jax.block_until_ready(fwd(params, x))
    assert out.shape == (N, C_OUT), out.shape

    ref = jax.block_until_ready(lenet_reference(params, x))
    max_err = float(jnp.max(jnp.abs(out - ref)))
    assert bool(jnp.allclose(out, ref, atol=2e-3, rtol=2e-3)), (
        f"mismatch vs reference: max abs err = {max_err}")

    print("KERNEL_OK")
</pallas_src>

<mosaic_0001>
module attributes {stable_mosaic.version = 11 : i64} {
  func.func @_lenet_fused_kernel(%arg0: i32, %arg1: memref<1x8x2688xf32, #tpu.memory_space<vmem>>, %arg2: memref<8x200xf32, #tpu.memory_space<vmem>>, %arg3: memref<8x1xf32, #tpu.memory_space<vmem>>, %arg4: memref<16x200xf32, #tpu.memory_space<vmem>>, %arg5: memref<16x1xf32, #tpu.memory_space<vmem>>, %arg6: memref<120x144xf32, #tpu.memory_space<vmem>>, %arg7: memref<120x1xf32, #tpu.memory_space<vmem>>, %arg8: memref<84x120xf32, #tpu.memory_space<vmem>>, %arg9: memref<84x1xf32, #tpu.memory_space<vmem>>, %arg10: memref<10x84xf32, #tpu.memory_space<vmem>>, %arg11: memref<10x1xf32, #tpu.memory_space<vmem>>, %arg12: memref<1x10x4xf32, #tpu.memory_space<vmem>>, %arg13: memref<200x2560xf32, #tpu.memory_space<vmem>>, %arg14: memref<8x2560xf32, #tpu.memory_space<vmem>>, %arg15: memref<8x2816xf32, #tpu.memory_space<vmem>>, %arg16: memref<200x2560xf32, #tpu.memory_space<vmem>>, %arg17: memref<16x2560xf32, #tpu.memory_space<vmem>>, %arg18: memref<16x2432xf32, #tpu.memory_space<vmem>>, %arg19: memref<144x4xf32, #tpu.memory_space<vmem>>) attributes {dimension_semantics = [#tpu.dimension_semantics<parallel>], iteration_bounds = array<i64: 2>, scalar_prefetch = 0 : i64, scratch_operands = 7 : i64, tpu.core_type = #tpu.core_type<tc>, window_params = [{transform_indices = @transform_0, window_bounds = array<i64: 1, 8, 2688>}, {pipeline_mode = #tpu.pipeline_mode<synchronous>, transform_indices = @transform_1, window_bounds = array<i64: 8, 200>}, {pipeline_mode = #tpu.pipeline_mode<synchronous>, transform_indices = @transform_2, window_bounds = array<i64: 8, 1>}, {pipeline_mode = #tpu.pipeline_mode<synchronous>, transform_indices = @transform_3, window_bounds = array<i64: 16, 200>}, {pipeline_mode = #tpu.pipeline_mode<synchronous>, transform_indices = @transform_4, window_bounds = array<i64: 16, 1>}, {pipeline_mode = #tpu.pipeline_mode<synchronous>, transform_indices = @transform_5, window_bounds = array<i64: 120, 144>}, {pipeline_mode = #tpu.pipeline_mode<synchronous>, transform_indices = @transform_6, window_bounds = array<i64: 120, 1>}, {pipeline_mode = #tpu.pipeline_mode<synchronous>, transform_indices = @transform_7, window_bounds = array<i64: 84, 120>}, {pipeline_mode = #tpu.pipeline_mode<synchronous>, transform_indices = @transform_8, window_bounds = array<i64: 84, 1>}, {pipeline_mode = #tpu.pipeline_mode<synchronous>, transform_indices = @transform_9, window_bounds = array<i64: 10, 84>}, {pipeline_mode = #tpu.pipeline_mode<synchronous>, transform_indices = @transform_10, window_bounds = array<i64: 10, 1>}, {transform_indices = @transform_11, window_bounds = array<i64: 1, 10, 4>}]} {
    %c0 = arith.constant 0 : index
    %c0_0 = arith.constant 0 : index
    %c0_1 = arith.constant 0 : index
    %0 = vector.load %arg1[%c0, %c0_0, %c0_1] : memref<1x8x2688xf32, #tpu.memory_space<vmem>>, vector<1x8x2560xf32>
    %1 = vector.shape_cast %0 : vector<1x8x2560xf32> to vector<8x2560xf32>
    %c0_2 = arith.constant 0 : index
    %c0_3 = arith.constant 0 : index
    %2 = vector.load %arg13[%c0_2, %c0_3] : memref<200x2560xf32, #tpu.memory_space<vmem>>, vector<8x2560xf32>
    tpu.vector_store %arg13[%c0_2, %c0_3], %1 {strides = array<i32>} : memref<200x2560xf32, #tpu.memory_space<vmem>>, vector<8x2560xf32>,
    %c0_4 = arith.constant 0 : index
    %c0_5 = arith.constant 0 : index
    %c1 = arith.constant 1 : index
    %3 = vector.load %arg1[%c0_4, %c0_5, %c1] : memref<1x8x2688xf32, #tpu.memory_space<vmem>>, vector<1x8x2560xf32>
    %4 = vector.shape_cast %3 : vector<1x8x2560xf32> to vector<8x2560xf32>
    %c8 = arith.constant 8 : index
    %c0_6 = arith.constant 0 : index
    %5 = vector.load %arg13[%c8, %c0_6] : memref<200x2560xf32, #tpu.memory_space<vmem>>, vector<8x2560xf32>
    tpu.vector_store %arg13[%c8, %c0_6], %4 {strides = array<i32>} : memref<200x2560xf32, #tpu.memory_space<vmem>>, vector<8x2560xf32>,
    %c0_7 = arith.constant 0 : index
    %c0_8 = arith.constant 0 : index
    %c2 = arith.constant 2 : index
    %6 = vector.load %arg1[%c0_7, %c0_8, %c2] : memref<1x8x2688xf32, #tpu.memory_space<vmem>>, vector<1x8x2560xf32>
    %7 = vector.shape_cast %6 : vector<1x8x2560xf32> to vector<8x2560xf32>
    %c16 = arith.constant 16 : index
    %c0_9 = arith.constant 0 : index
    %8 = vector.load %arg13[%c16, %c0_9] : memref<200x2560xf32, #tpu.memory_space<vmem>>, vector<8x2560xf32>
    tpu.vector_store %arg13[%c16, %c0_9], %7 {strides = array<i32>} : memref<200x2560xf32, #tpu.memory_space<vmem>>, vector<8x2560xf32>,
    %c0_10 = arith.constant 0 : index
    %c0_11 = arith.constant 0 : index
    %c3 = arith.constant 3 : index
    %9 = vector.load %arg1[%c0_10, %c0_11, %c3] : memref<1x8x2688xf32, #tpu.memory_space<vmem>>, vector<1x8x2560xf32>
    %10 = vector.shape_cast %9 : vector<1x8x2560xf32> to vector<8x2560xf32>
    %c24 = arith.constant 24 : index
    %c0_12 = arith.constant 0 : index
    %11 = vector.load %arg13[%c24, %c0_12] : memref<200x2560xf32, #tpu.memory_space<vmem>>, vector<8x2560xf32>
    tpu.vector_store %arg13[%c24, %c0_12], %10 {strides = array<i32>} : memref<200x2560xf32, #tpu.memory_space<vmem>>, vector<8x2560xf32>,
    %c0_13 = arith.constant 0 : index
    %c0_14 = arith.constant 0 : index
    %c4 = arith.constant 4 : index
    %12 = vector.load %arg1[%c0_13, %c0_14, %c4] : memref<1x8x2688xf32, #tpu.memory_space<vmem>>, vector<1x8x2560xf32>
    %13 = vector.shape_cast %12 : vector<1x8x2560xf32> to vector<8x2560xf32>
    %c32 = arith.constant 32 : index
    %c0_15 = arith.constant 0 : index
    %14 = vector.load %arg13[%c32, %c0_15] : memref<200x2560xf32, #tpu.memory_space<vmem>>, vector<8x2560xf32>
    tpu.vector_store %arg13[%c32, %c0_15], %13 {strides = array<i32>} : memref<200x2560xf32, #tpu.memory_space<vmem>>, vector<8x2560xf32>,
    %c0_16 = arith.constant 0 : index
    %c0_17 = arith.constant 0 : index
    %c24_18 = arith.constant 24 : index
    %15 = vector.load %arg1[%c0_16, %c0_17, %c24_18] : memref<1x8x2688xf32, #tpu.memory_space<vmem>>, vector<1x8x2560xf32>
    %16 = vector.shape_cast %15 : vector<1x8x2560xf32> to vector<8x2560xf32>
    %c40 = arith.constant 40 : index
    %c0_19 = arith.constant 0 : index
    %17 = vector.load %arg13[%c40, %c0_19] : memref<200x2560xf32, #tpu.memory_space<vmem>>, vector<8x2560xf32>
    tpu.vector_store %arg13[%c40, %c0_19], %16 {strides = array<i32>} : memref<200x2560xf32, #tpu.memory_space<vmem>>, vector<8x2560xf32>,
    %c0_20 = arith.constant 0 : index
    %c0_21 = arith.constant 0 : index
    %c25 = arith.constant 25 : index
    %18 = vector.load %arg1[%c0_20, %c0_21, %c25] : memref<1x8x2688xf32, #tpu.memory_space<vmem>>, vector<1x8x2560xf32>
    %19 = vector.shape_cast %18 : vector<1x8x2560xf32> to vector<8x2560xf32>
    %c48 = arith.constant 48 : index
    %c0_22 = arith.constant 0 : index
    %20 = vector.load %arg13[%c48, %c0_22] : memref<200x2560xf32, #tpu.memory_space<vmem>>, vector<8x2560xf32>
    tpu.vector_store %arg13[%c48, %c0_22], %19 {strides = array<i32>} : memref<200x2560xf32, #tpu.memory_space<vmem>>, vector<8x2560xf32>,
    %c0_23 = arith.constant 0 : index
    %c0_24 = arith.constant 0 : index
    %c26 = arith.constant 26 : index
    %21 = vector.load %arg1[%c0_23, %c0_24, %c26] : memref<1x8x2688xf32, #tpu.memory_space<vmem>>, vector<1x8x2560xf32>
    %22 = vector.shape_cast %21 : vector<1x8x2560xf32> to vector<8x2560xf32>
    %c56 = arith.constant 56 : index
    %c0_25 = arith.constant 0 : index
    %23 = vector.load %arg13[%c56, %c0_25] : memref<200x2560xf32, #tpu.memory_space<vmem>>, vector<8x2560xf32>
    tpu.vector_store %arg13[%c56, %c0_25], %22 {strides = array<i32>} : memref<200x2560xf32, #tpu.memory_space<vmem>>, vector<8x2560xf32>,
    %c0_26 = arith.constant 0 : index
    %c0_27 = arith.constant 0 : index
    %c27 = arith.constant 27 : index
    %24 = vector.load %arg1[%c0_26, %c0_27, %c27] : memref<1x8x2688xf32, #tpu.memory_space<vmem>>, vector<1x8x2560xf32>
    %25 = vector.shape_cast %24 : vector<1x8x2560xf32> to vector<8x2560xf32>
    %c64 = arith.constant 64 : index
    %c0_28 = arith.constant 0 : index
    %26 = vector.load %arg13[%c64, %c0_28] : memref<200x2560xf32, #tpu.memory_space<vmem>>, vector<8x2560xf32>
    tpu.vector_store %arg13[%c64, %c0_28], %25 {strides = array<i32>} : memref<200x2560xf32, #tpu.memory_space<vmem>>, vector<8x2560xf32>,
    %c0_29 = arith.constant 0 : index
    %c0_30 = arith.constant 0 : index
    %c28 = arith.constant 28 : index
    %27 = vector.load %arg1[%c0_29, %c0_30, %c28] : memref<1x8x2688xf32, #tpu.memory_space<vmem>>, vector<1x8x2560xf32>
    %28 = vector.shape_cast %27 : vector<1x8x2560xf32> to vector<8x2560xf32>
    %c72 = arith.constant 72 : index
    %c0_31 = arith.constant 0 : index
    %29 = vector.load %arg13[%c72, %c0_31] : memref<200x2560xf32, #tpu.memory_space<vmem>>, vector<8x2560xf32>
    tpu.vector_store %arg13[%c72, %c0_31], %28 {strides = array<i32>} : memref<200x2560xf32, #tpu.memory_space<vmem>>, vector<8x2560xf32>,
    %c0_32 = arith.constant 0 : index
    %c0_33 = arith.constant 0 : index
    %c48_34 = arith.constant 48 : index
    %30 = vector.load %arg1[%c0_32, %c0_33, %c48_34] : memref<1x8x2688xf32, #tpu.memory_space<vmem>>, vector<1x8x2560xf32>
    %31 = vector.shape_cast %30 : vector<1x8x2560xf32> to vector<8x2560xf32>
    %c80 = arith.constant 80 : index
    %c0_35 = arith.constant 0 : index
    %32 = vector.load %arg13[%c80, %c0_35] : memref<200x2560xf32, #tpu.memory_space<vmem>>, vector<8x2560xf32>
    tpu.vector_store %arg13[%c80, %c0_35], %31 {strides = array<i32>} : memref<200x2560xf32, #tpu.memory_space<vmem>>, vector<8x2560xf32>,
    %c0_36 = arith.constant 0 : index
    %c0_37 = arith.constant 0 : index
    %c49 = arith.constant 49 : index
    %33 = vector.load %arg1[%c0_36, %c0_37, %c49] : memref<1x8x2688xf32, #tpu.memory_space<vmem>>, vector<1x8x2560xf32>
    %34 = vector.shape_cast %33 : vector<1x8x2560xf32> to vector<8x2560xf32>
    %c88 = arith.constant 88 : index
    %c0_38 = arith.constant 0 : index
    %35 = vector.load %arg13[%c88, %c0_38] : memref<200x2560xf32, #tpu.memory_space<vmem>>, vector<8x2560xf32>
    tpu.vector_store %arg13[%c88, %c0_38], %34 {strides = array<i32>} : memref<200x2560xf32, #tpu.memory_space<vmem>>, vector<8x2560xf32>,
    %c0_39 = arith.constant 0 : index
    %c0_40 = arith.constant 0 : index
    %c50 = arith.constant 50 : index
    %36 = vector.load %arg1[%c0_39, %c0_40, %c50] : memref<1x8x2688xf32, #tpu.memory_space<vmem>>, vector<1x8x2560xf32>
    %37 = vector.shape_cast %36 : vector<1x8x2560xf32> to vector<8x2560xf32>
    %c96 = arith.constant 96 : index
    %c0_41 = arith.constant 0 : index
    %38 = vector.load %arg13[%c96, %c0_41] : memref<200x2560xf32, #tpu.memory_space<vmem>>, vector<8x2560xf32>
    tpu.vector_store %arg13[%c96, %c0_41], %37 {strides = array<i32>} : memref<200x2560xf32, #tpu.memory_space<vmem>>, vector<8x2560xf32>,
    %c0_42 = arith.constant 0 : index
    %c0_43 = arith.constant 0 : index
    %c51 = arith.constant 51 : index
    %39 = vector.load %arg1[%c0_42, %c0_43, %c51] : memref<1x8x2688xf32, #tpu.memory_space<vmem>>, vector<1x8x2560xf32>
    %40 = vector.shape_cast %39 : vector<1x8x2560xf32> to vector<8x2560xf32>
    %c104 = arith.constant 104 : index
    %c0_44 = arith.constant 0 : index
    %41 = vector.load %arg13[%c104, %c0_44] : memref<200x2560xf32, #tpu.memory_space<vmem>>, vector<8x2560xf32>
    tpu.vector_store %arg13[%c104, %c0_44], %40 {strides = array<i32>} : memref<200x2560xf32, #tpu.memory_space<vmem>>, vector<8x2560xf32>,
    %c0_45 = arith.constant 0 : index
    %c0_46 = arith.constant 0 : index
    %c52 = arith.constant 52 : index
    %42 = vector.load %arg1[%c0_45, %c0_46, %c52] : memref<1x8x2688xf32, #tpu.memory_space<vmem>>, vector<1x8x2560xf32>
    %43 = vector.shape_cast %42 : vector<1x8x2560xf32> to vector<8x2560xf32>
    %c112 = arith.constant 112 : index
    %c0_47 = arith.constant 0 : index
    %44 = vector.load %arg13[%c112, %c0_47] : memref<200x2560xf32, #tpu.memory_space<vmem>>, vector<8x2560xf32>
    tpu.vector_store %arg13[%c112, %c0_47], %43 {strides = array<i32>} : memref<200x2560xf32, #tpu.memory_space<vmem>>, vector<8x2560xf32>,
    %c0_48 = arith.constant 0 : index
    %c0_49 = arith.constant 0 : index
    %c72_50 = arith.constant 72 : index
    %45 = vector.load %arg1[%c0_48, %c0_49, %c72_50] : memref<1x8x2688xf32, #tpu.memory_space<vmem>>, vector<1x8x2560xf32>
    %46 = vector.shape_cast %45 : vector<1x8x2560xf32> to vector<8x2560xf32>
    %c120 = arith.constant 120 : index
    %c0_51 = arith.constant 0 : index
    %47 = vector.load %arg13[%c120, %c0_51] : memref<200x2560xf32, #tpu.memory_space<vmem>>, vector<8x2560xf32>
    tpu.vector_store %arg13[%c120, %c0_51], %46 {strides = array<i32>} : memref<200x2560xf32, #tpu.memory_space<vmem>>, vector<8x2560xf32>,
    %c0_52 = arith.constant 0 : index
    %c0_53 = arith.constant 0 : index
    %c73 = arith.constant 73 : index
    %48 = vector.load %arg1[%c0_52, %c0_53, %c73] : memref<1x8x2688xf32, #tpu.memory_space<vmem>>, vector<1x8x2560xf32>
    %49 = vector.shape_cast %48 : vector<1x8x2560xf32> to vector<8x2560xf32>
    %c128 = arith.constant 128 : index
    %c0_54 = arith.constant 0 : index
    %50 = vector.load %arg13[%c128, %c0_54] : memref<200x2560xf32, #tpu.memory_space<vmem>>, vector<8x2560xf32>
    tpu.vector_store %arg13[%c128, %c0_54], %49 {strides = array<i32>} : memref<200x2560xf32, #tpu.memory_space<vmem>>, vector<8x2560xf32>,
    %c0_55 = arith.constant 0 : index
    %c0_56 = arith.constant 0 : index
    %c74 = arith.constant 74 : index
    %51 = vector.load %arg1[%c0_55, %c0_56, %c74] : memref<1x8x2688xf32, #tpu.memory_space<vmem>>, vector<1x8x2560xf32>
    %52 = vector.shape_cast %51 : vector<1x8x2560xf32> to vector<8x2560xf32>
    %c136 = arith.constant 136 : index
    %c0_57 = arith.constant 0 : index
    %53 = vector.load %arg13[%c136, %c0_57] : memref<200x2560xf32, #tpu.memory_space<vmem>>, vector<8x2560xf32>
    tpu.vector_store %arg13[%c136, %c0_57], %52 {strides = array<i32>} : memref<200x2560xf32, #tpu.memory_space<vmem>>, vector<8x2560xf32>,
    %c0_58 = arith.constant 0 : index
    %c0_59 = arith.constant 0 : index
    %c75 = arith.constant 75 : index
    %54 = vector.load %arg1[%c0_58, %c0_59, %c75] : memref<1x8x2688xf32, #tpu.memory_space<vmem>>, vector<1x8x2560xf32>
    %55 = vector.shape_cast %54 : vector<1x8x2560xf32> to vector<8x2560xf32>
    %c144 = arith.constant 144 : index
    %c0_60 = arith.constant 0 : index
    %56 = vector.load %arg13[%c144, %c0_60] : memref<200x2560xf32, #tpu.memory_space<vmem>>, vector<8x2560xf32>
    tpu.vector_store %arg13[%c144, %c0_60], %55 {strides = array<i32>} : memref<200x2560xf32, #tpu.memory_space<vmem>>, vector<8x2560xf32>,
    %c0_61 = arith.constant 0 : index
    %c0_62 = arith.constant 0 : index
    %c76 = arith.constant 76 : index
    %57 = vector.load %arg1[%c0_61, %c0_62, %c76] : memref<1x8x2688xf32, #tpu.memory_space<vmem>>, vector<1x8x2560xf32>
    %58 = vector.shape_cast %57 : vector<1x8x2560xf32> to vector<8x2560xf32>
    %c152 = arith.constant 152 : index
    %c0_63 = arith.constant 0 : index
    %59 = vector.load %arg13[%c152, %c0_63] : memref<200x2560xf32, #tpu.memory_space<vmem>>, vector<8x2560xf32>
    tpu.vector_store %arg13[%c152, %c0_63], %58 {strides = array<i32>} : memref<200x2560xf32, #tpu.memory_space<vmem>>, vector<8x2560xf32>,
    %c0_64 = arith.constant 0 : index
    %c0_65 = arith.constant 0 : index
    %c96_66 = arith.constant 96 : index
    %60 = vector.load %arg1[%c0_64, %c0_65, %c96_66] : memref<1x8x2688xf32, #tpu.memory_space<vmem>>, vector<1x8x2560xf32>
    %61 = vector.shape_cast %60 : vector<1x8x2560xf32> to vector<8x2560xf32>
    %c160 = arith.constant 160 : index
    %c0_67 = arith.constant 0 : index
    %62 = vector.load %arg13[%c160, %c0_67] : memref<200x2560xf32, #tpu.memory_space<vmem>>, vector<8x2560xf32>
    tpu.vector_store %arg13[%c160, %c0_67], %61 {strides = array<i32>} : memref<200x2560xf32, #tpu.memory_space<vmem>>, vector<8x2560xf32>,
    %c0_68 = arith.constant 0 : index
    %c0_69 = arith.constant 0 : index
    %c97 = arith.constant 97 : index
    %63 = vector.load %arg1[%c0_68, %c0_69, %c97] : memref<1x8x2688xf32, #tpu.memory_space<vmem>>, vector<1x8x2560xf32>
    %64 = vector.shape_cast %63 : vector<1x8x2560xf32> to vector<8x2560xf32>
    %c168 = arith.constant 168 : index
    %c0_70 = arith.constant 0 : index
    %65 = vector.load %arg13[%c168, %c0_70] : memref<200x2560xf32, #tpu.memory_space<vmem>>, vector<8x2560xf32>
    tpu.vector_store %arg13[%c168, %c0_70], %64 {strides = array<i32>} : memref<200x2560xf32, #tpu.memory_space<vmem>>, vector<8x2560xf32>,
    %c0_71 = arith.constant 0 : index
    %c0_72 = arith.constant 0 : index
    %c98 = arith.constant 98 : index
    %66 = vector.load %arg1[%c0_71, %c0_72, %c98] : memref<1x8x2688xf32, #tpu.memory_space<vmem>>, vector<1x8x2560xf32>
    %67 = vector.shape_cast %66 : vector<1x8x2560xf32> to vector<8x2560xf32>
    %c176 = arith.constant 176 : index
    %c0_73 = arith.constant 0 : index
    %68 = vector.load %arg13[%c176, %c0_73] : memref<200x2560xf32, #tpu.memory_space<vmem>>, vector<8x2560xf32>
    tpu.vector_store %arg13[%c176, %c0_73], %67 {strides = array<i32>} : memref<200x2560xf32, #tpu.memory_space<vmem>>, vector<8x2560xf32>,
    %c0_74 = arith.constant 0 : index
    %c0_75 = arith.constant 0 : index
    %c99 = arith.constant 99 : index
    %69 = vector.load %arg1[%c0_74, %c0_75, %c99] : memref<1x8x2688xf32, #tpu.memory_space<vmem>>, vector<1x8x2560xf32>
    %70 = vector.shape_cast %69 : vector<1x8x2560xf32> to vector<8x2560xf32>
    %c184 = arith.constant 184 : index
    %c0_76 = arith.constant 0 : index
    %71 = vector.load %arg13[%c184, %c0_76] : memref<200x2560xf32, #tpu.memory_space<vmem>>, vector<8x2560xf32>
    tpu.vector_store %arg13[%c184, %c0_76], %70 {strides = array<i32>} : memref<200x2560xf32, #tpu.memory_space<vmem>>, vector<8x2560xf32>,
    %c0_77 = arith.constant 0 : index
    %c0_78 = arith.constant 0 : index
    %c100 = arith.constant 100 : index
    %72 = vector.load %arg1[%c0_77, %c0_78, %c100] : memref<1x8x2688xf32, #tpu.memory_space<vmem>>, vector<1x8x2560xf32>
    %73 = vector.shape_cast %72 : vector<1x8x2560xf32> to vector<8x2560xf32>
    %c192 = arith.constant 192 : index
    %c0_79 = arith.constant 0 : index
    %74 = vector.load %arg13[%c192, %c0_79] : memref<200x2560xf32, #tpu.memory_space<vmem>>, vector<8x2560xf32>
    tpu.vector_store %arg13[%c192, %c0_79], %73 {strides = array<i32>} : memref<200x2560xf32, #tpu.memory_space<vmem>>, vector<8x2560xf32>,
    %c0_80 = arith.constant 0 : index
    %c0_81 = arith.constant 0 : index
    %75 = vector.load %arg2[%c0_80, %c0_81] : memref<8x200xf32, #tpu.memory_space<vmem>>, vector<8x200xf32>
    %c0_82 = arith.constant 0 : index
    %c0_83 = arith.constant 0 : index
    %76 = vector.load %arg13[%c0_82, %c0_83] : memref<200x2560xf32, #tpu.memory_space<vmem>>, vector<200x2560xf32>
    %cst = arith.constant dense<0.000000e+00> : vector<8x2560xf32>
    %77 = tpu.matmul %75, %76, %cst {dimension_numbers = #tpu.dot_dimension_numbers<[1], [0], [0], [1], [0, 0, 1, 1], [], []>} : vector<8x200xf32>, vector<200x2560xf32>, vector<8x2560xf32> -> vector<8x2560xf32>
    %c0_84 = arith.constant 0 : index
    %c0_85 = arith.constant 0 : index
    %78 = vector.load %arg3[%c0_84, %c0_85] : memref<8x1xf32, #tpu.memory_space<vmem>>, vector<8x1xf32>
    %79 = vector.broadcast %78 : vector<8x1xf32> to vector<8x2560xf32>
    %80 = arith.addf %77, %79 : vector<8x2560xf32>
    %cst_86 = arith.constant 0.000000e+00 : f32
    %81 = vector.broadcast %cst_86 : f32 to vector<8x2560xf32>
    %82 = arith.maximumf %80, %81 : vector<8x2560xf32>
    %c0_87 = arith.constant 0 : index
    %c0_88 = arith.constant 0 : index
    %83 = vector.load %arg14[%c0_87, %c0_88] : memref<8x2560xf32, #tpu.memory_space<vmem>>, vector<8x2560xf32>
    tpu.vector_store %arg14[%c0_87, %c0_88], %82 {strides = array<i32>} : memref<8x2560xf32, #tpu.memory_space<vmem>>, vector<8x2560xf32>,
    %c0_89 = arith.constant 0 : index
    %c0_90 = arith.constant 0 : index
    %84 = vector.load %arg14[%c0_89, %c0_90] : memref<8x2560xf32, #tpu.memory_space<vmem>>, vector<8x2432xf32>
    %c0_91 = arith.constant 0 : index
    %c1_92 = arith.constant 1 : index
    %85 = vector.load %arg14[%c0_91, %c1_92] : memref<8x2560xf32, #tpu.memory_space<vmem>>, vector<8x2432xf32>
    %86 = arith.maximumf %84, %85 : vector<8x2432xf32>
    %c0_93 = arith.constant 0 : index
    %c24_94 = arith.constant 24 : index
    %87 = vector.load %arg14[%c0_93, %c24_94] : memref<8x2560xf32, #tpu.memory_space<vmem>>, vector<8x2432xf32>
    %c0_95 = arith.constant 0 : index
    %c25_96 = arith.constant 25 : index
    %88 = vector.load %arg14[%c0_95, %c25_96] : memref<8x2560xf32, #tpu.memory_space<vmem>>, vector<8x2432xf32>
    %89 = arith.maximumf %87, %88 : vector<8x2432xf32>
    %90 = arith.maximumf %86, %89 : vector<8x2432xf32>
    %c0_97 = arith.constant 0 : index
    %c0_98 = arith.constant 0 : index
    %91 = vector.load %arg15[%c0_97, %c0_98] : memref<8x2816xf32, #tpu.memory_space<vmem>>, vector<8x2432xf32>
    tpu.vector_store %arg15[%c0_97, %c0_98], %90 {strides = array<i32>} : memref<8x2816xf32, #tpu.memory_space<vmem>>, vector<8x2432xf32>,
    %cst_99 = arith.constant 0.000000e+00 : f32
    %92 = vector.broadcast %cst_99 : f32 to vector<8x384xf32>
    %c0_100 = arith.constant 0 : index
    %c2432 = arith.constant 2432 : index
    %93 = vector.load %arg15[%c0_100, %c2432] : memref<8x2816xf32, #tpu.memory_space<vmem>>, vector<8x384xf32>
    tpu.vector_store %arg15[%c0_100, %c2432], %92 {strides = array<i32>} : memref<8x2816xf32, #tpu.memory_space<vmem>>, vector<8x384xf32>,
    %c0_101 = arith.constant 0 : index
    %c0_102 = arith.constant 0 : index
    %94 = vector.load %arg15[%c0_101, %c0_102] : memref<8x2816xf32, #tpu.memory_space<vmem>>, vector<8x2560xf32>
    %c0_103 = arith.constant 0 : index
    %c0_104 = arith.constant 0 : index
    %95 = vector.load %arg16[%c0_103, %c0_104] : memref<200x2560xf32, #tpu.memory_space<vmem>>, vector<8x2560xf32>
    tpu.vector_store %arg16[%c0_103, %c0_104], %94 {strides = array<i32>} : memref<200x2560xf32, #tpu.memory_space<vmem>>, vector<8x2560xf32>,
    %c0_105 = arith.constant 0 : index
    %c2_106 = arith.constant 2 : index
    %96 = vector.load %arg15[%c0_105, %c2_106] : memref<8x2816xf32, #tpu.memory_space<vmem>>, vector<8x2560xf32>
    %c8_107 = arith.constant 8 : index
    %c0_108 = arith.constant 0 : index
    %97 = vector.load %arg16[%c8_107, %c0_108] : memref<200x2560xf32, #tpu.memory_space<vmem>>, vector<8x2560xf32>
    tpu.vector_store %arg16[%c8_107, %c0_108], %96 {strides = array<i32>} : memref<200x2560xf32, #tpu.memory_space<vmem>>, vector<8x2560xf32>,
    %c0_109 = arith.constant 0 : index
    %c4_110 = arith.constant 4 : index
    %98 = vector.load %arg15[%c0_109, %c4_110] : memref<8x2816xf32, #tpu.memory_space<vmem>>, vector<8x2560xf32>
    %c16_111 = arith.constant 16 : index
    %c0_112 = arith.constant 0 : index
    %99 = vector.load %arg16[%c16_111, %c0_112] : memref<200x2560xf32, #tpu.memory_space<vmem>>, vector<8x2560xf32>
    tpu.vector_store %arg16[%c16_111, %c0_112], %98 {strides = array<i32>} : memref<200x2560xf32, #tpu.memory_space<vmem>>, vector<8x2560xf32>,
    %c0_113 = arith.constant 0 : index
    %c6 = arith.constant 6 : index
    %100 = vector.load %arg15[%c0_113, %c6] : memref<8x2816xf32, #tpu.memory_space<vmem>>, vector<8x2560xf32>
    %c24_114 = arith.constant 24 : index
    %c0_115 = arith.constant 0 : index
    %101 = vector.load %arg16[%c24_114, %c0_115] : memref<200x2560xf32, #tpu.memory_space<vmem>>, vector<8x2560xf32>
    tpu.vector_store %arg16[%c24_114, %c0_115], %100 {strides = array<i32>} : memref<200x2560xf32, #tpu.memory_space<vmem>>, vector<8x2560xf32>,
    %c0_116 = arith.constant 0 : index
    %c8_117 = arith.constant 8 : index
    %102 = vector.load %arg15[%c0_116, %c8_117] : memref<8x2816xf32, #tpu.memory_space<vmem>>, vector<8x2560xf32>
    %c32_118 = arith.constant 32 : index
    %c0_119 = arith.constant 0 : index
    %103 = vector.load %arg16[%c32_118, %c0_119] : memref<200x2560xf32, #tpu.memory_space<vmem>>, vector<8x2560xf32>
    tpu.vector_store %arg16[%c32_118, %c0_119], %102 {strides = array<i32>} : memref<200x2560xf32, #tpu.memory_space<vmem>>, vector<8x2560xf32>,
    %c0_120 = arith.constant 0 : index
    %c48_121 = arith.constant 48 : index
    %104 = vector.load %arg15[%c0_120, %c48_121] : memref<8x2816xf32, #tpu.memory_space<vmem>>, vector<8x2560xf32>
    %c40_122 = arith.constant 40 : index
    %c0_123 = arith.constant 0 : index
    %105 = vector.load %arg16[%c40_122, %c0_123] : memref<200x2560xf32, #tpu.memory_space<vmem>>, vector<8x2560xf32>
    tpu.vector_store %arg16[%c40_122, %c0_123], %104 {strides = array<i32>} : memref<200x2560xf32, #tpu.memory_space<vmem>>, vector<8x2560xf32>,
    %c0_124 = arith.constant 0 : index
    %c50_125 = arith.constant 50 : index
    %106 = vector.load %arg15[%c0_124, %c50_125] : memref<8x2816xf32, #tpu.memory_space<vmem>>, vector<8x2560xf32>
    %c48_126 = arith.constant 48 : index
    %c0_127 = arith.constant 0 : index
    %107 = vector.load %arg16[%c48_126, %c0_127] : memref<200x2560xf32, #tpu.memory_space<vmem>>, vector<8x2560xf32>
    tpu.vector_store %arg16[%c48_126, %c0_127], %106 {strides = array<i32>} : memref<200x2560xf32, #tpu.memory_space<vmem>>, vector<8x2560xf32>,
    %c0_128 = arith.constant 0 : index
    %c52_129 = arith.constant 52 : index
    %108 = vector.load %arg15[%c0_128, %c52_129] : memref<8x2816xf32, #tpu.memory_space<vmem>>, vector<8x2560xf32>
    %c56_130 = arith.constant 56 : index
    %c0_131 = arith.constant 0 : index
    %109 = vector.load %arg16[%c56_130, %c0_131] : memref<200x2560xf32, #tpu.memory_space<vmem>>, vector<8x2560xf32>
    tpu.vector_store %arg16[%c56_130, %c0_131], %108 {strides = array<i32>} : memref<200x2560xf32, #tpu.memory_space<vmem>>, vector<8x2560xf32>,
    %c0_132 = arith.constant 0 : index
    %c54 = arith.constant 54 : index
    %110 = vector.load %arg15[%c0_132, %c54] : memref<8x2816xf32, #tpu.memory_space<vmem>>, vector<8x2560xf32>
    %c64_133 = arith.constant 64 : index
    %c0_134 = arith.constant 0 : index
    %111 = vector.load %arg16[%c64_133, %c0_134] : memref<200x2560xf32, #tpu.memory_space<vmem>>, vector<8x2560xf32>
    tpu.vector_store %arg16[%c64_133, %c0_134], %110 {strides = array<i32>} : memref<200x2560xf32, #tpu.memory_space<vmem>>, vector<8x2560xf32>,
    %c0_135 = arith.constant 0 : index
    %c56_136 = arith.constant 56 : index
    %112 = vector.load %arg15[%c0_135, %c56_136] : memref<8x2816xf32, #tpu.memory_space<vmem>>, vector<8x2560xf32>
    %c72_137 = arith.constant 72 : index
    %c0_138 = arith.constant 0 : index
    %113 = vector.load %arg16[%c72_137, %c0_138] : memref<200x2560xf32, #tpu.memory_space<vmem>>, vector<8x2560xf32>
    tpu.vector_store %arg16[%c72_137, %c0_138], %112 {strides = array<i32>} : memref<200x2560xf32, #tpu.memory_space<vmem>>, vector<8x2560xf32>,
    %c0_139 = arith.constant 0 : index
    %c96_140 = arith.constant 96 : index
    %114 = vector.load %arg15[%c0_139, %c96_140] : memref<8x2816xf32, #tpu.memory_space<vmem>>, vector<8x2560xf32>
    %c80_141 = arith.constant 80 : index
    %c0_142 = arith.constant 0 : index
    %115 = vector.load %arg16[%c80_141, %c0_142] : memref<200x2560xf32, #tpu.memory_space<vmem>>, vector<8x2560xf32>
    tpu.vector_store %arg16[%c80_141, %c0_142], %114 {strides = array<i32>} : memref<200x2560xf32, #tpu.memory_space<vmem>>, vector<8x2560xf32>,
    %c0_143 = arith.constant 0 : index
    %c98_144 = arith.constant 98 : index
    %116 = vector.load %arg15[%c0_143, %c98_144] : memref<8x2816xf32, #tpu.memory_space<vmem>>, vector<8x2560xf32>
    %c88_145 = arith.constant 88 : index
    %c0_146 = arith.constant 0 : index
    %117 = vector.load %arg16[%c88_145, %c0_146] : memref<200x2560xf32, #tpu.memory_space<vmem>>, vector<8x2560xf32>
    tpu.vector_store %arg16[%c88_145, %c0_146], %116 {strides = array<i32>} : memref<200x2560xf32, #tpu.memory_space<vmem>>, vector<8x2560xf32>,
    %c0_147 = arith.constant 0 : index
    %c100_148 = arith.constant 100 : index
    %118 = vector.load %arg15[%c0_147, %c100_148] : memref<8x2816xf32, #tpu.memory_space<vmem>>, vector<8x2560xf32>
    %c96_149 = arith.constant 96 : index
    %c0_150 = arith.constant 0 : index
    %119 = vector.load %arg16[%c96_149, %c0_150] : memref<200x2560xf32, #tpu.memory_space<vmem>>, vector<8x2560xf32>
    tpu.vector_store %arg16[%c96_149, %c0_150], %118 {strides = array<i32>} : memref<200x2560xf32, #tpu.memory_space<vmem>>, vector<8x2560xf32>,
    %c0_151 = arith.constant 0 : index
    %c102 = arith.constant 102 : index
    %120 = vector.load %arg15[%c0_151, %c102] : memref<8x2816xf32, #tpu.memory_space<vmem>>, vector<8x2560xf32>
    %c104_152 = arith.constant 104 : index
    %c0_153 = arith.constant 0 : index
    %121 = vector.load %arg16[%c104_152, %c0_153] : memref<200x2560xf32, #tpu.memory_space<vmem>>, vector<8x2560xf32>
    tpu.vector_store %arg16[%c104_152, %c0_153], %120 {strides = array<i32>} : memref<200x2560xf32, #tpu.memory_space<vmem>>, vector<8x2560xf32>,
    %c0_154 = arith.constant 0 : index
    %c104_155 = arith.constant 104 : index
    %122 = vector.load %arg15[%c0_154, %c104_155] : memref<8x2816xf32, #tpu.memory_space<vmem>>, vector<8x2560xf32>
    %c112_156 = arith.constant 112 : index
    %c0_157 = arith.constant 0 : index
    %123 = vector.load %arg16[%c112_156, %c0_157] : memref<200x2560xf32, #tpu.memory_space<vmem>>, vector<8x2560xf32>
    tpu.vector_store %arg16[%c112_156, %c0_157], %122 {strides = array<i32>} : memref<200x2560xf32, #tpu.memory_space<vmem>>, vector<8x2560xf32>,
    %c0_158 = arith.constant 0 : index
    %c144_159 = arith.constant 144 : index
    %124 = vector.load %arg15[%c0_158, %c144_159] : memref<8x2816xf32, #tpu.memory_space<vmem>>, vector<8x2560xf32>
    %c120_160 = arith.constant 120 : index
    %c0_161 = arith.constant 0 : index
    %125 = vector.load %arg16[%c120_160, %c0_161] : memref<200x2560xf32, #tpu.memory_space<vmem>>, vector<8x2560xf32>
    tpu.vector_store %arg16[%c120_160, %c0_161], %124 {strides = array<i32>} : memref<200x2560xf32, #tpu.memory_space<vmem>>, vector<8x2560xf32>,
    %c0_162 = arith.constant 0 : index
    %c146 = arith.constant 146 : index
    %126 = vector.load %arg15[%c0_162, %c146] : memref<8x2816xf32, #tpu.memory_space<vmem>>, vector<8x2560xf32>
    %c128_163 = arith.constant 128 : index
    %c0_164 = arith.constant 0 : index
    %127 = vector.load %arg16[%c128_163, %c0_164] : memref<200x2560xf32, #tpu.memory_space<vmem>>, vector<8x2560xf32>
    tpu.vector_store %arg16[%c128_163, %c0_164], %126 {strides = array<i32>} : memref<200x2560xf32, #tpu.memory_space<vmem>>, vector<8x2560xf32>,
    %c0_165 = arith.constant 0 : index
    %c148 = arith.constant 148 : index
    %128 = vector.load %arg15[%c0_165, %c148] : memref<8x2816xf32, #tpu.memory_space<vmem>>, vector<8x2560xf32>
    %c136_166 = arith.constant 136 : index
    %c0_167 = arith.constant 0 : index
    %129 = vector.load %arg16[%c136_166, %c0_167] : memref<200x2560xf32, #tpu.memory_space<vmem>>, vector<8x2560xf32>
    tpu.vector_store %arg16[%c136_166, %c0_167], %128 {strides = array<i32>} : memref<200x2560xf32, #tpu.memory_space<vmem>>, vector<8x2560xf32>,
    %c0_168 = arith.constant 0 : index
    %c150 = arith.constant 150 : index
    %130 = vector.load %arg15[%c0_168, %c150] : memref<8x2816xf32, #tpu.memory_space<vmem>>, vector<8x2560xf32>
    %c144_169 = arith.constant 144 : index
    %c0_170 = arith.constant 0 : index
    %131 = vector.load %arg16[%c144_169, %c0_170] : memref<200x2560xf32, #tpu.memory_space<vmem>>, vector<8x2560xf32>
    tpu.vector_store %arg16[%c144_169, %c0_170], %130 {strides = array<i32>} : memref<200x2560xf32, #tpu.memory_space<vmem>>, vector<8x2560xf32>,
    %c0_171 = arith.constant 0 : index
    %c152_172 = arith.constant 152 : index
    %132 = vector.load %arg15[%c0_171, %c152_172] : memref<8x2816xf32, #tpu.memory_space<vmem>>, vector<8x2560xf32>
    %c152_173 = arith.constant 152 : index
    %c0_174 = arith.constant 0 : index
    %133 = vector.load %arg16[%c152_173, %c0_174] : memref<200x2560xf32, #tpu.memory_space<vmem>>, vector<8x2560xf32>
    tpu.vector_store %arg16[%c152_173, %c0_174], %132 {strides = array<i32>} : memref<200x2560xf32, #tpu.memory_space<vmem>>, vector<8x2560xf32>,
    %c0_175 = arith.constant 0 : index
    %c192_176 = arith.constant 192 : index
    %134 = vector.load %arg15[%c0_175, %c192_176] : memref<8x2816xf32, #tpu.memory_space<vmem>>, vector<8x2560xf32>
    %c160_177 = arith.constant 160 : index
    %c0_178 = arith.constant 0 : index
    %135 = vector.load %arg16[%c160_177, %c0_178] : memref<200x2560xf32, #tpu.memory_space<vmem>>, vector<8x2560xf32>
    tpu.vector_store %arg16[%c160_177, %c0_178], %134 {strides = array<i32>} : memref<200x2560xf32, #tpu.memory_space<vmem>>, vector<8x2560xf32>,
    %c0_179 = arith.constant 0 : index
    %c194 = arith.constant 194 : index
    %136 = vector.load %arg15[%c0_179, %c194] : memref<8x2816xf32, #tpu.memory_space<vmem>>, vector<8x2560xf32>
    %c168_180 = arith.constant 168 : index
    %c0_181 = arith.constant 0 : index
    %137 = vector.load %arg16[%c168_180, %c0_181] : memref<200x2560xf32, #tpu.memory_space<vmem>>, vector<8x2560xf32>
    tpu.vector_store %arg16[%c168_180, %c0_181], %136 {strides = array<i32>} : memref<200x2560xf32, #tpu.memory_space<vmem>>, vector<8x2560xf32>,
    %c0_182 = arith.constant 0 : index
    %c196 = arith.constant 196 : index
    %138 = vector.load %arg15[%c0_182, %c196] : memref<8x2816xf32, #tpu.memory_space<vmem>>, vector<8x2560xf32>
    %c176_183 = arith.constant 176 : index
    %c0_184 = arith.constant 0 : index
    %139 = vector.load %arg16[%c176_183, %c0_184] : memref<200x2560xf32, #tpu.memory_space<vmem>>, vector<8x2560xf32>
    tpu.vector_store %arg16[%c176_183, %c0_184], %138 {strides = array<i32>} : memref<200x2560xf32, #tpu.memory_space<vmem>>, vector<8x2560xf32>,
    %c0_185 = arith.constant 0 : index
    %c198 = arith.constant 198 : index
    %140 = vector.load %arg15[%c0_185, %c198] : memref<8x2816xf32, #tpu.memory_space<vmem>>, vector<8x2560xf32>
    %c184_186 = arith.constant 184 : index
    %c0_187 = arith.constant 0 : index
    %141 = vector.load %arg16[%c184_186, %c0_187] : memref<200x2560xf32, #tpu.memory_space<vmem>>, vector<8x2560xf32>
    tpu.vector_store %arg16[%c184_186, %c0_187], %140 {strides = array<i32>} : memref<200x2560xf32, #tpu.memory_space<vmem>>, vector<8x2560xf32>,
    %c0_188 = arith.constant 0 : index
    %c200 = arith.constant 200 : index
    %142 = vector.load %arg15[%c0_188, %c200] : memref<8x2816xf32, #tpu.memory_space<vmem>>, vector<8x2560xf32>
    %c192_189 = arith.constant 192 : index
    %c0_190 = arith.constant 0 : index
    %143 = vector.load %arg16[%c192_189, %c0_190] : memref<200x2560xf32, #tpu.memory_space<vmem>>, vector<8x2560xf32>
    tpu.vector_store %arg16[%c192_189, %c0_190], %142 {strides = array<i32>} : memref<200x2560xf32, #tpu.memory_space<vmem>>, vector<8x2560xf32>,
    %c0_191 = arith.constant 0 : index
    %c0_192 = arith.constant 0 : index
    %144 = vector.load %arg4[%c0_191, %c0_192] : memref<16x200xf32, #tpu.memory_space<vmem>>, vector<16x200xf32>
    %c0_193 = arith.constant 0 : index
    %c0_194 = arith.constant 0 : index
    %145 = vector.load %arg16[%c0_193, %c0_194] : memref<200x2560xf32, #tpu.memory_space<vmem>>, vector<200x2560xf32>
    %cst_195 = arith.constant dense<0.000000e+00> : vector<16x2560xf32>
    %146 = tpu.matmul %144, %145, %cst_195 {dimension_numbers = #tpu.dot_dimension_numbers<[1], [0], [0], [1], [0, 0, 1, 1], [], []>} : vector<16x200xf32>, vector<200x2560xf32>, vector<16x2560xf32> -> vector<16x2560xf32>
    %c0_196 = arith.constant 0 : index
    %c0_197 = arith.constant 0 : index
    %147 = vector.load %arg5[%c0_196, %c0_197] : memref<16x1xf32, #tpu.memory_space<vmem>>, vector<16x1xf32>
    %148 = vector.broadcast %147 : vector<16x1xf32> to vector<16x2560xf32>
    %149 = arith.addf %146, %148 : vector<16x2560xf32>
    %cst_198 = arith.constant 0.000000e+00 : f32
    %150 = vector.broadcast %cst_198 : f32 to vector<16x2560xf32>
    %151 = arith.maximumf %149, %150 : vector<16x2560xf32>
    %c0_199 = arith.constant 0 : index
    %c0_200 = arith.constant 0 : index
    %152 = vector.load %arg17[%c0_199, %c0_200] : memref<16x2560xf32, #tpu.memory_space<vmem>>, vector<16x2560xf32>
    tpu.vector_store %arg17[%c0_199, %c0_200], %151 {strides = array<i32>} : memref<16x2560xf32, #tpu.memory_space<vmem>>, vector<16x2560xf32>,
    %c0_201 = arith.constant 0 : index
    %c0_202 = arith.constant 0 : index
    %153 = vector.load %arg17[%c0_201, %c0_202] : memref<16x2560xf32, #tpu.memory_space<vmem>>, vector<16x2432xf32>
    %c0_203 = arith.constant 0 : index
    %c2_204 = arith.constant 2 : index
    %154 = vector.load %arg17[%c0_203, %c2_204] : memref<16x2560xf32, #tpu.memory_space<vmem>>, vector<16x2432xf32>
    %155 = arith.maximumf %153, %154 : vector<16x2432xf32>
    %c0_205 = arith.constant 0 : index
    %c48_206 = arith.constant 48 : index
    %156 = vector.load %arg17[%c0_205, %c48_206] : memref<16x2560xf32, #tpu.memory_space<vmem>>, vector<16x2432xf32>
    %c0_207 = arith.constant 0 : index
    %c50_208 = arith.constant 50 : index
    %157 = vector.load %arg17[%c0_207, %c50_208] : memref<16x2560xf32, #tpu.memory_space<vmem>>, vector<16x2432xf32>
    %158 = arith.maximumf %156, %157 : vector<16x2432xf32>
    %159 = arith.maximumf %155, %158 : vector<16x2432xf32>
    %c0_209 = arith.constant 0 : index
    %c0_210 = arith.constant 0 : index
    %160 = vector.load %arg18[%c0_209, %c0_210] : memref<16x2432xf32, #tpu.memory_space<vmem>>, vector<16x2432xf32>
    tpu.vector_store %arg18[%c0_209, %c0_210], %159 {strides = array<i32>} : memref<16x2432xf32, #tpu.memory_space<vmem>>, vector<16x2432xf32>,
    %c0_211 = arith.constant 0 : index
    %c0_212 = arith.constant 0 : index
    %161 = vector.load %arg18[%c0_211, %c0_212] : memref<16x2432xf32, #tpu.memory_space<vmem>>, vector<16x1xf32>
    %c0_213 = arith.constant 0 : index
    %c0_214 = arith.constant 0 : index
    %162 = vector.load %arg19[%c0_213, %c0_214] : memref<144x4xf32, #tpu.memory_space<vmem>>, vector<16x1xf32>
    tpu.vector_store %arg19[%c0_213, %c0_214], %161 {strides = array<i32>} : memref<144x4xf32, #tpu.memory_space<vmem>>, vector<16x1xf32>,
    %c0_215 = arith.constant 0 : index
    %c4_216 = arith.constant 4 : index
    %163 = vector.load %arg18[%c0_215, %c4_216] : memref<16x2432xf32, #tpu.memory_space<vmem>>, vector<16x1xf32>
    %c16_217 = arith.constant 16 : index
    %c0_218 = arith.constant 0 : index
    %164 = vector.load %arg19[%c16_217, %c0_218] : memref<144x4xf32, #tpu.memory_space<vmem>>, vector<16x1xf32>
    tpu.vector_store %arg19[%c16_217, %c0_218], %163 {strides = array<i32>} : memref<144x4xf32, #tpu.memory_space<vmem>>, vector<16x1xf32>,
    %c0_219 = arith.constant 0 : index
    %c8_220 = arith.constant 8 : index
    %165 = vector.load %arg18[%c0_219, %c8_220] : memref<16x2432xf32, #tpu.memory_space<vmem>>, vector<16x1xf32>
    %c32_221 = arith.constant 32 : index
    %c0_222 = arith.constant 0 : index
    %166 = vector.load %arg19[%c32_221, %c0_222] : memref<144x4xf32, #tpu.memory_space<vmem>>, vector<16x1xf32>
    tpu.vector_store %arg19[%c32_221, %c0_222], %165 {strides = array<i32>} : memref<144x4xf32, #tpu.memory_space<vmem>>, vector<16x1xf32>,
    %c0_223 = arith.constant 0 : index
    %c96_224 = arith.constant 96 : index
    %167 = vector.load %arg18[%c0_223, %c96_224] : memref<16x2432xf32, #tpu.memory_space<vmem>>, vector<16x1xf32>
    %c48_225 = arith.constant 48 : index
    %c0_226 = arith.constant 0 : index
    %168 = vector.load %arg19[%c48_225, %c0_226] : memref<144x4xf32, #tpu.memory_space<vmem>>, vector<16x1xf32>
    tpu.vector_store %arg19[%c48_225, %c0_226], %167 {strides = array<i32>} : memref<144x4xf32, #tpu.memory_space<vmem>>, vector<16x1xf32>,
    %c0_227 = arith.constant 0 : index
    %c100_228 = arith.constant 100 : index
    %169 = vector.load %arg18[%c0_227, %c100_228] : memref<16x2432xf32, #tpu.memory_space<vmem>>, vector<16x1xf32>
    %c64_229 = arith.constant 64 : index
    %c0_230 = arith.constant 0 : index
    %170 = vector.load %arg19[%c64_229, %c0_230] : memref<144x4xf32, #tpu.memory_space<vmem>>, vector<16x1xf32>
    tpu.vector_store %arg19[%c64_229, %c0_230], %169 {strides = array<i32>} : memref<144x4xf32, #tpu.memory_space<vmem>>, vector<16x1xf32>,
    %c0_231 = arith.constant 0 : index
    %c104_232 = arith.constant 104 : index
    %171 = vector.load %arg18[%c0_231, %c104_232] : memref<16x2432xf32, #tpu.memory_space<vmem>>, vector<16x1xf32>
    %c80_233 = arith.constant 80 : index
    %c0_234 = arith.constant 0 : index
    %172 = vector.load %arg19[%c80_233, %c0_234] : memref<144x4xf32, #tpu.memory_space<vmem>>, vector<16x1xf32>
    tpu.vector_store %arg19[%c80_233, %c0_234], %171 {strides = array<i32>} : memref<144x4xf32, #tpu.memory_space<vmem>>, vector<16x1xf32>,
    %c0_235 = arith.constant 0 : index
    %c192_236 = arith.constant 192 : index
    %173 = vector.load %arg18[%c0_235, %c192_236] : memref<16x2432xf32, #tpu.memory_space<vmem>>, vector<16x1xf32>
    %c96_237 = arith.constant 96 : index
    %c0_238 = arith.constant 0 : index
    %174 = vector.load %arg19[%c96_237, %c0_238] : memref<144x4xf32, #tpu.memory_space<vmem>>, vector<16x1xf32>
    tpu.vector_store %arg19[%c96_237, %c0_238], %173 {strides = array<i32>} : memref<144x4xf32, #tpu.memory_space<vmem>>, vector<16x1xf32>,
    %c0_239 = arith.constant 0 : index
    %c196_240 = arith.constant 196 : index
    %175 = vector.load %arg18[%c0_239, %c196_240] : memref<16x2432xf32, #tpu.memory_space<vmem>>, vector<16x1xf32>
    %c112_241 = arith.constant 112 : index
    %c0_242 = arith.constant 0 : index
    %176 = vector.load %arg19[%c112_241, %c0_242] : memref<144x4xf32, #tpu.memory_space<vmem>>, vector<16x1xf32>
    tpu.vector_store %arg19[%c112_241, %c0_242], %175 {strides = array<i32>} : memref<144x4xf32, #tpu.memory_space<vmem>>, vector<16x1xf32>,
    %c0_243 = arith.constant 0 : index
    %c200_244 = arith.constant 200 : index
    %177 = vector.load %arg18[%c0_243, %c200_244] : memref<16x2432xf32, #tpu.memory_space<vmem>>, vector<16x1xf32>
    %c128_245 = arith.constant 128 : index
    %c0_246 = arith.constant 0 : index
    %178 = vector.load %arg19[%c128_245, %c0_246] : memref<144x4xf32, #tpu.memory_space<vmem>>, vector<16x1xf32>
    tpu.vector_store %arg19[%c128_245, %c0_246], %177 {strides = array<i32>} : memref<144x4xf32, #tpu.memory_space<vmem>>, vector<16x1xf32>,
    %c0_247 = arith.constant 0 : index
    %c640 = arith.constant 640 : index
    %179 = vector.load %arg18[%c0_247, %c640] : memref<16x2432xf32, #tpu.memory_space<vmem>>, vector<16x1xf32>
    %c0_248 = arith.constant 0 : index
    %c1_249 = arith.constant 1 : index
    %180 = vector.load %arg19[%c0_248, %c1_249] : memref<144x4xf32, #tpu.memory_space<vmem>>, vector<16x1xf32>
    tpu.vector_store %arg19[%c0_248, %c1_249], %179 {strides = array<i32>} : memref<144x4xf32, #tpu.memory_space<vmem>>, vector<16x1xf32>,
    %c0_250 = arith.constant 0 : index
    %c644 = arith.constant 644 : index
    %181 = vector.load %arg18[%c0_250, %c644] : memref<16x2432xf32, #tpu.memory_space<vmem>>, vector<16x1xf32>
    %c16_251 = arith.constant 16 : index
    %c1_252 = arith.constant 1 : index
    %182 = vector.load %arg19[%c16_251, %c1_252] : memref<144x4xf32, #tpu.memory_space<vmem>>, vector<16x1xf32>
    tpu.vector_store %arg19[%c16_251, %c1_252], %181 {strides = array<i32>} : memref<144x4xf32, #tpu.memory_space<vmem>>, vector<16x1xf32>,
    %c0_253 = arith.constant 0 : index
    %c648 = arith.constant 648 : index
    %183 = vector.load %arg18[%c0_253, %c648] : memref<16x2432xf32, #tpu.memory_space<vmem>>, vector<16x1xf32>
    %c32_254 = arith.constant 32 : index
    %c1_255 = arith.constant 1 : index
    %184 = vector.load %arg19[%c32_254, %c1_255] : memref<144x4xf32, #tpu.memory_space<vmem>>, vector<16x1xf32>
    tpu.vector_store %arg19[%c32_254, %c1_255], %183 {strides = array<i32>} : memref<144x4xf32, #tpu.memory_space<vmem>>, vector<16x1xf32>,
    %c0_256 = arith.constant 0 : index
    %c736 = arith.constant 736 : index
    %185 = vector.load %arg18[%c0_256, %c736] : memref<16x2432xf32, #tpu.memory_space<vmem>>, vector<16x1xf32>
    %c48_257 = arith.constant 48 : index
    %c1_258 = arith.constant 1 : index
    %186 = vector.load %arg19[%c48_257, %c1_258] : memref<144x4xf32, #tpu.memory_space<vmem>>, vector<16x1xf32>
    tpu.vector_store %arg19[%c48_257, %c1_258], %185 {strides = array<i32>} : memref<144x4xf32, #tpu.memory_space<vmem>>, vector<16x1xf32>,
    %c0_259 = arith.constant 0 : index
    %c740 = arith.constant 740 : index
    %187 = vector.load %arg18[%c0_259, %c740] : memref<16x2432xf32, #tpu.memory_space<vmem>>, vector<16x1xf32>
    %c64_260 = arith.constant 64 : index
    %c1_261 = arith.constant 1 : index
    %188 = vector.load %arg19[%c64_260, %c1_261] : memref<144x4xf32, #tpu.memory_space<vmem>>, vector<16x1xf32>
    tpu.vector_store %arg19[%c64_260, %c1_261], %187 {strides = array<i32>} : memref<144x4xf32, #tpu.memory_space<vmem>>, vector<16x1xf32>,
    %c0_262 = arith.constant 0 : index
    %c744 = arith.constant 744 : index
    %189 = vector.load %arg18[%c0_262, %c744] : memref<16x2432xf32, #tpu.memory_space<vmem>>, vector<16x1xf32>
    %c80_263 = arith.constant 80 : index
    %c1_264 = arith.constant 1 : index
    %190 = vector.load %arg19[%c80_263, %c1_264] : memref<144x4xf32, #tpu.memory_space<vmem>>, vector<16x1xf32>
    tpu.vector_store %arg19[%c80_263, %c1_264], %189 {strides = array<i32>} : memref<144x4xf32, #tpu.memory_space<vmem>>, vector<16x1xf32>,
    %c0_265 = arith.constant 0 : index
    %c832 = arith.constant 832 : index
    %191 = vector.load %arg18[%c0_265, %c832] : memref<16x2432xf32, #tpu.memory_space<vmem>>, vector<16x1xf32>
    %c96_266 = arith.constant 96 : index
    %c1_267 = arith.constant 1 : index
    %192 = vector.load %arg19[%c96_266, %c1_267] : memref<144x4xf32, #tpu.memory_space<vmem>>, vector<16x1xf32>
    tpu.vector_store %arg19[%c96_266, %c1_267], %191 {strides = array<i32>} : memref<144x4xf32, #tpu.memory_space<vmem>>, vector<16x1xf32>,
    %c0_268 = arith.constant 0 : index
    %c836 = arith.constant 836 : index
    %193 = vector.load %arg18[%c0_268, %c836] : memref<16x2432xf32, #tpu.memory_space<vmem>>, vector<16x1xf32>
    %c112_269 = arith.constant 112 : index
    %c1_270 = arith.constant 1 : index
    %194 = vector.load %arg19[%c112_269, %c1_270] : memref<144x4xf32, #tpu.memory_space<vmem>>, vector<16x1xf32>
    tpu.vector_store %arg19[%c112_269, %c1_270], %193 {strides = array<i32>} : memref<144x4xf32, #tpu.memory_space<vmem>>, vector<16x1xf32>,
    %c0_271 = arith.constant 0 : index
    %c840 = arith.constant 840 : index
    %195 = vector.load %arg18[%c0_271, %c840] : memref<16x2432xf32, #tpu.memory_space<vmem>>, vector<16x1xf32>
    %c128_272 = arith.constant 128 : index
    %c1_273 = arith.constant 1 : index
    %196 = vector.load %arg19[%c128_272, %c1_273] : memref<144x4xf32, #tpu.memory_space<vmem>>, vector<16x1xf32>
    tpu.vector_store %arg19[%c128_272, %c1_273], %195 {strides = array<i32>} : memref<144x4xf32, #tpu.memory_space<vmem>>, vector<16x1xf32>,
    %c0_274 = arith.constant 0 : index
    %c1280 = arith.constant 1280 : index
    %197 = vector.load %arg18[%c0_274, %c1280] : memref<16x2432xf32, #tpu.memory_space<vmem>>, vector<16x1xf32>
    %c0_275 = arith.constant 0 : index
    %c2_276 = arith.constant 2 : index
    %198 = vector.load %arg19[%c0_275, %c2_276] : memref<144x4xf32, #tpu.memory_space<vmem>>, vector<16x1xf32>
    tpu.vector_store %arg19[%c0_275, %c2_276], %197 {strides = array<i32>} : memref<144x4xf32, #tpu.memory_space<vmem>>, vector<16x1xf32>,
    %c0_277 = arith.constant 0 : index
    %c1284 = arith.constant 1284 : index
    %199 = vector.load %arg18[%c0_277, %c1284] : memref<16x2432xf32, #tpu.memory_space<vmem>>, vector<16x1xf32>
    %c16_278 = arith.constant 16 : index
    %c2_279 = arith.constant 2 : index
    %200 = vector.load %arg19[%c16_278, %c2_279] : memref<144x4xf32, #tpu.memory_space<vmem>>, vector<16x1xf32>
    tpu.vector_store %arg19[%c16_278, %c2_279], %199 {strides = array<i32>} : memref<144x4xf32, #tpu.memory_space<vmem>>, vector<16x1xf32>,
    %c0_280 = arith.constant 0 : index
    %c1288 = arith.constant 1288 : index
    %201 = vector.load %arg18[%c0_280, %c1288] : memref<16x2432xf32, #tpu.memory_space<vmem>>, vector<16x1xf32>
    %c32_281 = arith.constant 32 : index
    %c2_282 = arith.constant 2 : index
    %202 = vector.load %arg19[%c32_281, %c2_282] : memref<144x4xf32, #tpu.memory_space<vmem>>, vector<16x1xf32>
    tpu.vector_store %arg19[%c32_281, %c2_282], %201 {strides = array<i32>} : memref<144x4xf32, #tpu.memory_space<vmem>>, vector<16x1xf32>,
    %c0_283 = arith.constant 0 : index
    %c1376 = arith.constant 1376 : index
    %203 = vector.load %arg18[%c0_283, %c1376] : memref<16x2432xf32, #tpu.memory_space<vmem>>, vector<16x1xf32>
    %c48_284 = arith.constant 48 : index
    %c2_285 = arith.constant 2 : index
    %204 = vector.load %arg19[%c48_284, %c2_285] : memref<144x4xf32, #tpu.memory_space<vmem>>, vector<16x1xf32>
    tpu.vector_store %arg19[%c48_284, %c2_285], %203 {strides = array<i32>} : memref<144x4xf32, #tpu.memory_space<vmem>>, vector<16x1xf32>,
    %c0_286 = arith.constant 0 : index
    %c1380 = arith.constant 1380 : index
    %205 = vector.load %arg18[%c0_286, %c1380] : memref<16x2432xf32, #tpu.memory_space<vmem>>, vector<16x1xf32>
    %c64_287 = arith.constant 64 : index
    %c2_288 = arith.constant 2 : index
    %206 = vector.load %arg19[%c64_287, %c2_288] : memref<144x4xf32, #tpu.memory_space<vmem>>, vector<16x1xf32>
    tpu.vector_store %arg19[%c64_287, %c2_288], %205 {strides = array<i32>} : memref<144x4xf32, #tpu.memory_space<vmem>>, vector<16x1xf32>,
    %c0_289 = arith.constant 0 : index
    %c1384 = arith.constant 1384 : index
    %207 = vector.load %arg18[%c0_289, %c1384] : memref<16x2432xf32, #tpu.memory_space<vmem>>, vector<16x1xf32>
    %c80_290 = arith.constant 80 : index
    %c2_291 = arith.constant 2 : index
    %208 = vector.load %arg19[%c80_290, %c2_291] : memref<144x4xf32, #tpu.memory_space<vmem>>, vector<16x1xf32>
    tpu.vector_store %arg19[%c80_290, %c2_291], %207 {strides = array<i32>} : memref<144x4xf32, #tpu.memory_space<vmem>>, vector<16x1xf32>,
    %c0_292 = arith.constant 0 : index
    %c1472 = arith.constant 1472 : index
    %209 = vector.load %arg18[%c0_292, %c1472] : memref<16x2432xf32, #tpu.memory_space<vmem>>, vector<16x1xf32>
    %c96_293 = arith.constant 96 : index
    %c2_294 = arith.constant 2 : index
    %210 = vector.load %arg19[%c96_293, %c2_294] : memref<144x4xf32, #tpu.memory_space<vmem>>, vector<16x1xf32>
    tpu.vector_store %arg19[%c96_293, %c2_294], %209 {strides = array<i32>} : memref<144x4xf32, #tpu.memory_space<vmem>>, vector<16x1xf32>,
    %c0_295 = arith.constant 0 : index
    %c1476 = arith.constant 1476 : index
    %211 = vector.load %arg18[%c0_295, %c1476] : memref<16x2432xf32, #tpu.memory_space<vmem>>, vector<16x1xf32>
    %c112_296 = arith.constant 112 : index
    %c2_297 = arith.constant 2 : index
    %212 = vector.load %arg19[%c112_296, %c2_297] : memref<144x4xf32, #tpu.memory_space<vmem>>, vector<16x1xf32>
    tpu.vector_store %arg19[%c112_296, %c2_297], %211 {strides = array<i32>} : memref<144x4xf32, #tpu.memory_space<vmem>>, vector<16x1xf32>,
    %c0_298 = arith.constant 0 : index
    %c1480 = arith.constant 1480 : index
    %213 = vector.load %arg18[%c0_298, %c1480] : memref<16x2432xf32, #tpu.memory_space<vmem>>, vector<16x1xf32>
    %c128_299 = arith.constant 128 : index
    %c2_300 = arith.constant 2 : index
    %214 = vector.load %arg19[%c128_299, %c2_300] : memref<144x4xf32, #tpu.memory_space<vmem>>, vector<16x1xf32>
    tpu.vector_store %arg19[%c128_299, %c2_300], %213 {strides = array<i32>} : memref<144x4xf32, #tpu.memory_space<vmem>>, vector<16x1xf32>,
    %c0_301 = arith.constant 0 : index
    %c1920 = arith.constant 1920 : index
    %215 = vector.load %arg18[%c0_301, %c1920] : memref<16x2432xf32, #tpu.memory_space<vmem>>, vector<16x1xf32>
    %c0_302 = arith.constant 0 : index
    %c3_303 = arith.constant 3 : index
    %216 = vector.load %arg19[%c0_302, %c3_303] : memref<144x4xf32, #tpu.memory_space<vmem>>, vector<16x1xf32>
    tpu.vector_store %arg19[%c0_302, %c3_303], %215 {strides = array<i32>} : memref<144x4xf32, #tpu.memory_space<vmem>>, vector<16x1xf32>,
    %c0_304 = arith.constant 0 : index
    %c1924 = arith.constant 1924 : index
    %217 = vector.load %arg18[%c0_304, %c1924] : memref<16x2432xf32, #tpu.memory_space<vmem>>, vector<16x1xf32>
    %c16_305 = arith.constant 16 : index
    %c3_306 = arith.constant 3 : index
    %218 = vector.load %arg19[%c16_305, %c3_306] : memref<144x4xf32, #tpu.memory_space<vmem>>, vector<16x1xf32>
    tpu.vector_store %arg19[%c16_305, %c3_306], %217 {strides = array<i32>} : memref<144x4xf32, #tpu.memory_space<vmem>>, vector<16x1xf32>,
    %c0_307 = arith.constant 0 : index
    %c1928 = arith.constant 1928 : index
    %219 = vector.load %arg18[%c0_307, %c1928] : memref<16x2432xf32, #tpu.memory_space<vmem>>, vector<16x1xf32>
    %c32_308 = arith.constant 32 : index
    %c3_309 = arith.constant 3 : index
    %220 = vector.load %arg19[%c32_308, %c3_309] : memref<144x4xf32, #tpu.memory_space<vmem>>, vector<16x1xf32>
    tpu.vector_store %arg19[%c32_308, %c3_309], %219 {strides = array<i32>} : memref<144x4xf32, #tpu.memory_space<vmem>>, vector<16x1xf32>,
    %c0_310 = arith.constant 0 : index
    %c2016 = arith.constant 2016 : index
    %221 = vector.load %arg18[%c0_310, %c2016] : memref<16x2432xf32, #tpu.memory_space<vmem>>, vector<16x1xf32>
    %c48_311 = arith.constant 48 : index
    %c3_312 = arith.constant 3 : index
    %222 = vector.load %arg19[%c48_311, %c3_312] : memref<144x4xf32, #tpu.memory_space<vmem>>, vector<16x1xf32>
    tpu.vector_store %arg19[%c48_311, %c3_312], %221 {strides = array<i32>} : memref<144x4xf32, #tpu.memory_space<vmem>>, vector<16x1xf32>,
    %c0_313 = arith.constant 0 : index
    %c2020 = arith.constant 2020 : index
    %223 = vector.load %arg18[%c0_313, %c2020] : memref<16x2432xf32, #tpu.memory_space<vmem>>, vector<16x1xf32>
    %c64_314 = arith.constant 64 : index
    %c3_315 = arith.constant 3 : index
    %224 = vector.load %arg19[%c64_314, %c3_315] : memref<144x4xf32, #tpu.memory_space<vmem>>, vector<16x1xf32>
    tpu.vector_store %arg19[%c64_314, %c3_315], %223 {strides = array<i32>} : memref<144x4xf32, #tpu.memory_space<vmem>>, vector<16x1xf32>,
    %c0_316 = arith.constant 0 : index
    %c2024 = arith.constant 2024 : index
    %225 = vector.load %arg18[%c0_316, %c2024] : memref<16x2432xf32, #tpu.memory_space<vmem>>, vector<16x1xf32>
    %c80_317 = arith.constant 80 : index
    %c3_318 = arith.constant 3 : index
    %226 = vector.load %arg19[%c80_317, %c3_318] : memref<144x4xf32, #tpu.memory_space<vmem>>, vector<16x1xf32>
    tpu.vector_store %arg19[%c80_317, %c3_318], %225 {strides = array<i32>} : memref<144x4xf32, #tpu.memory_space<vmem>>, vector<16x1xf32>,
    %c0_319 = arith.constant 0 : index
    %c2112 = arith.constant 2112 : index
    %227 = vector.load %arg18[%c0_319, %c2112] : memref<16x2432xf32, #tpu.memory_space<vmem>>, vector<16x1xf32>
    %c96_320 = arith.constant 96 : index
    %c3_321 = arith.constant 3 : index
    %228 = vector.load %arg19[%c96_320, %c3_321] : memref<144x4xf32, #tpu.memory_space<vmem>>, vector<16x1xf32>
    tpu.vector_store %arg19[%c96_320, %c3_321], %227 {strides = array<i32>} : memref<144x4xf32, #tpu.memory_space<vmem>>, vector<16x1xf32>,
    %c0_322 = arith.constant 0 : index
    %c2116 = arith.constant 2116 : index
    %229 = vector.load %arg18[%c0_322, %c2116] : memref<16x2432xf32, #tpu.memory_space<vmem>>, vector<16x1xf32>
    %c112_323 = arith.constant 112 : index
    %c3_324 = arith.constant 3 : index
    %230 = vector.load %arg19[%c112_323, %c3_324] : memref<144x4xf32, #tpu.memory_space<vmem>>, vector<16x1xf32>
    tpu.vector_store %arg19[%c112_323, %c3_324], %229 {strides = array<i32>} : memref<144x4xf32, #tpu.memory_space<vmem>>, vector<16x1xf32>,
    %c0_325 = arith.constant 0 : index
    %c2120 = arith.constant 2120 : index
    %231 = vector.load %arg18[%c0_325, %c2120] : memref<16x2432xf32, #tpu.memory_space<vmem>>, vector<16x1xf32>
    %c128_326 = arith.constant 128 : index
    %c3_327 = arith.constant 3 : index
    %232 = vector.load %arg19[%c128_326, %c3_327] : memref<144x4xf32, #tpu.memory_space<vmem>>, vector<16x1xf32>
    tpu.vector_store %arg19[%c128_326, %c3_327], %231 {strides = array<i32>} : memref<144x4xf32, #tpu.memory_space<vmem>>, vector<16x1xf32>,
    %c0_328 = arith.constant 0 : index
    %c0_329 = arith.constant 0 : index
    %233 = vector.load %arg6[%c0_328, %c0_329] : memref<120x144xf32, #tpu.memory_space<vmem>>, vector<120x144xf32>
    %c0_330 = arith.constant 0 : index
    %c0_331 = arith.constant 0 : index
    %234 = vector.load %arg19[%c0_330, %c0_331] : memref<144x4xf32, #tpu.memory_space<vmem>>, vector<144x4xf32>
    %cst_332 = arith.constant dense<0.000000e+00> : vector<120x4xf32>
    %235 = tpu.matmul %233, %234, %cst_332 {dimension_numbers = #tpu.dot_dimension_numbers<[1], [0], [0], [1], [0, 0, 1, 1], [], []>} : vector<120x144xf32>, vector<144x4xf32>, vector<120x4xf32> -> vector<120x4xf32>
    %c0_333 = arith.constant 0 : index
    %c0_334 = arith.constant 0 : index
    %236 = vector.load %arg7[%c0_333, %c0_334] : memref<120x1xf32, #tpu.memory_space<vmem>>, vector<120x1xf32>
    %237 = vector.broadcast %236 : vector<120x1xf32> to vector<120x4xf32>
    %238 = arith.addf %235, %237 : vector<120x4xf32>
    %cst_335 = arith.constant 0.000000e+00 : f32
    %239 = vector.broadcast %cst_335 : f32 to vector<120x4xf32>
    %240 = arith.maximumf %238, %239 : vector<120x4xf32>
    %c0_336 = arith.constant 0 : index
    %c0_337 = arith.constant 0 : index
    %241 = vector.load %arg8[%c0_336, %c0_337] : memref<84x120xf32, #tpu.memory_space<vmem>>, vector<84x120xf32>
    %cst_338 = arith.constant dense<0.000000e+00> : vector<84x4xf32>
    %242 = tpu.matmul %241, %240, %cst_338 {dimension_numbers = #tpu.dot_dimension_numbers<[1], [0], [0], [1], [0, 0, 1, 1], [], []>} : vector<84x120xf32>, vector<120x4xf32>, vector<84x4xf32> -> vector<84x4xf32>
    %c0_339 = arith.constant 0 : index
    %c0_340 = arith.constant 0 : index
    %243 = vector.load %arg9[%c0_339, %c0_340] : memref<84x1xf32, #tpu.memory_space<vmem>>, vector<84x1xf32>
    %244 = vector.broadcast %243 : vector<84x1xf32> to vector<84x4xf32>
    %245 = arith.addf %242, %244 : vector<84x4xf32>
    %cst_341 = arith.constant 0.000000e+00 : f32
    %246 = vector.broadcast %cst_341 : f32 to vector<84x4xf32>
    %247 = arith.maximumf %245, %246 : vector<84x4xf32>
    %c0_342 = arith.constant 0 : index
    %c0_343 = arith.constant 0 : index
    %248 = vector.load %arg10[%c0_342, %c0_343] : memref<10x84xf32, #tpu.memory_space<vmem>>, vector<10x84xf32>
    %cst_344 = arith.constant dense<0.000000e+00> : vector<10x4xf32>
    %249 = tpu.matmul %248, %247, %cst_344 {dimension_numbers = #tpu.dot_dimension_numbers<[1], [0], [0], [1], [0, 0, 1, 1], [], []>} : vector<10x84xf32>, vector<84x4xf32>, vector<10x4xf32> -> vector<10x4xf32>
    %c0_345 = arith.constant 0 : index
    %c0_346 = arith.constant 0 : index
    %250 = vector.load %arg11[%c0_345, %c0_346] : memref<10x1xf32, #tpu.memory_space<vmem>>, vector<10x1xf32>
    %251 = vector.broadcast %250 : vector<10x1xf32> to vector<10x4xf32>
    %252 = arith.addf %249, %251 : vector<10x4xf32>
    %c0_347 = arith.constant 0 : index
    %c0_348 = arith.constant 0 : index
    %c0_349 = arith.constant 0 : index
    %253 = vector.load %arg12[%c0_347, %c0_348, %c0_349] : memref<1x10x4xf32, #tpu.memory_space<vmem>>, vector<1x10x4xf32>
    %254 = vector.shape_cast %253 : vector<1x10x4xf32> to vector<10x4xf32>
    %255 = vector.shape_cast %252 : vector<10x4xf32> to vector<1x10x4xf32>
    tpu.vector_store %arg12[%c0_347, %c0_348, %c0_349], %255 {strides = array<i32>} : memref<1x10x4xf32, #tpu.memory_space<vmem>>, vector<1x10x4xf32>,
    return
  }
  func.func @transform_0(%arg0: i32) -> (i32, i32, i32) {
    %c0_i32 = arith.constant 0 : i32
    %c0_i32_0 = arith.constant 0 : i32
    %c0_i32_1 = arith.constant 0 : i32
    return %arg0, %c0_i32, %c0_i32_0 : i32, i32, i32
  }
  func.func @transform_1(%arg0: i32) -> (i32, i32) {
    %c0_i32 = arith.constant 0 : i32
    %c0_i32_0 = arith.constant 0 : i32
    %c0_i32_1 = arith.constant 0 : i32
    return %c0_i32, %c0_i32_0 : i32, i32
  }
  func.func @transform_2(%arg0: i32) -> (i32, i32) {
    %c0_i32 = arith.constant 0 : i32
    %c0_i32_0 = arith.constant 0 : i32
    %c0_i32_1 = arith.constant 0 : i32
    return %c0_i32, %c0_i32_0 : i32, i32
  }
  func.func @transform_3(%arg0: i32) -> (i32, i32) {
    %c0_i32 = arith.constant 0 : i32
    %c0_i32_0 = arith.constant 0 : i32
    %c0_i32_1 = arith.constant 0 : i32
    return %c0_i32, %c0_i32_0 : i32, i32
  }
  func.func @transform_4(%arg0: i32) -> (i32, i32) {
    %c0_i32 = arith.constant 0 : i32
    %c0_i32_0 = arith.constant 0 : i32
    %c0_i32_1 = arith.constant 0 : i32
    return %c0_i32, %c0_i32_0 : i32, i32
  }
  func.func @transform_5(%arg0: i32) -> (i32, i32) {
    %c0_i32 = arith.constant 0 : i32
    %c0_i32_0 = arith.constant 0 : i32
    %c0_i32_1 = arith.constant 0 : i32
    return %c0_i32, %c0_i32_0 : i32, i32
  }
  func.func @transform_6(%arg0: i32) -> (i32, i32) {
    %c0_i32 = arith.constant 0 : i32
    %c0_i32_0 = arith.constant 0 : i32
    %c0_i32_1 = arith.constant 0 : i32
    return %c0_i32, %c0_i32_0 : i32, i32
  }
  func.func @transform_7(%arg0: i32) -> (i32, i32) {
    %c0_i32 = arith.constant 0 : i32
    %c0_i32_0 = arith.constant 0 : i32
    %c0_i32_1 = arith.constant 0 : i32
    return %c0_i32, %c0_i32_0 : i32, i32
  }
  func.func @transform_8(%arg0: i32) -> (i32, i32) {
    %c0_i32 = arith.constant 0 : i32
    %c0_i32_0 = arith.constant 0 : i32
    %c0_i32_1 = arith.constant 0 : i32
    return %c0_i32, %c0_i32_0 : i32, i32
  }
  func.func @transform_9(%arg0: i32) -> (i32, i32) {
    %c0_i32 = arith.constant 0 : i32
    %c0_i32_0 = arith.constant 0 : i32
    %c0_i32_1 = arith.constant 0 : i32
    return %c0_i32, %c0_i32_0 : i32, i32
  }
  func.func @transform_10(%arg0: i32) -> (i32, i32) {
    %c0_i32 = arith.constant 0 : i32
    %c0_i32_0 = arith.constant 0 : i32
    %c0_i32_1 = arith.constant 0 : i32
    return %c0_i32, %c0_i32_0 : i32, i32
  }
  func.func @transform_11(%arg0: i32) -> (i32, i32, i32) {
    %c0_i32 = arith.constant 0 : i32
    %c0_i32_0 = arith.constant 0 : i32
    %c0_i32_1 = arith.constant 0 : i32
    return %arg0, %c0_i32, %c0_i32_0 : i32, i32, i32
  }
}

</mosaic_0001>

<bundles_post_ra>
// kernel: lenet_forward.1
= control target key start
LH: loop header
LB: loop body
LE: loop exit
PB: predicated region body
PF: predicated region fallthrough
CT: control target
= control target key end

     0   :  { %s12683_s17 = smov 0   ;;  %s19109_s0 = inlined_call_operand.vmem [shape: f32[2,8,2688], index: 0, kind: input, shape index: {}]   ;;  %s19110_s1 = inlined_call_operand.vmem [shape: f32[8,200], index: 1, kind: input, shape index: {}]   ;;  %s19111_s2 = inlined_call_operand.vmem [shape: f32[8,1], index: 2, kind: input, shape index: {}]   ;;  %s19112_s3 = inlined_call_operand.vmem [shape: f32[16,200], index: 3, kind: input, shape index: {}]   ;;  %s19113_s4 = inlined_call_operand.vmem [shape: f32[16,1], index: 4, kind: input, shape index: {}]   ;;  %s19114_s5 = inlined_call_operand.vmem [shape: f32[120,144], index: 5, kind: input, shape index: {}]   ;;  %s19115_s6 = inlined_call_operand.vmem [shape: f32[120,1], index: 6, kind: input, shape index: {}]   ;;  %s19116_s7 = inlined_call_operand.vmem [shape: f32[84,120], index: 7, kind: input, shape index: {}]   ;;  %s19117_s8 = inlined_call_operand.vmem [shape: f32[84,1], index: 8, kind: input, shape index: {}]   ;;  %s19118_s9 = inlined_call_operand.vmem [shape: f32[10,84], index: 9, kind: input, shape index: {}]   ;;  %s19119_s10 = inlined_call_operand.vmem [shape: f32[10,1], index: 10, kind: input, shape index: {}]   ;;  %s19120_s11 = inlined_call_operand.vmem [shape: f32[2,10,4], index: 11, kind: output, shape index: {}]  }
   0x1   :  { %19408 = sst [smem:[#allocation224_spill]] %s19109_s0 }
   0x2   :  { %19409 = sst [smem:[#allocation225_spill]] %s19110_s1 }
   0x3   :  { %19410 = sst [smem:[#allocation226_spill]] %s19111_s2 }
   0x4   :  { %19411 = sst [smem:[#allocation227_spill]] %s19114_s5 }
   0x5   :  { %19412 = sst [smem:[#allocation228_spill]] %s19116_s7 }
   0x6   :  { %19413 = sst [smem:[#allocation229_spill]] %s19117_s8 }
   0x7   :  { %19414 = sst [smem:[#allocation230_spill]] %s19118_s9 }
   0x8   :  { %19415 = sst [smem:[#allocation231_spill]] %s19119_s10 }
   0x9   :  { %19416 = sst [smem:[#allocation232_spill]] %s19120_s11 }
   0xa LB: > { %19417 = sst [smem:[#allocation9_spill]] %s12563_s17  ;;  %s12159_s18 = sadd.s32 4294967295, %s12563_s17   ;;  %s12563_s17 = sphi %s12683_s17, %s21_s17  }
   0xb   : > { %p12163_p0 = scmp.ge.s32.totalorder %s12563_s17, 1  ;;  %p337_p1 = scmp.lt.s32.totalorder %s12563_s17, 3 }
   0xd   : > { %p338_p2 = pnand %p12163_p0, %p337_p1 }
   0xf   : > { %341 = sbr.rel (%p338_p2) target bundleno = 3960 (0xf78), region = 64 }
  0x14   : > { %p377_p3 = scmp.lt.s32.totalorder %s12159_s18, 1  ;;  %s19419_s0 = sld [smem:[#allocation224_spill]]  ;;  %vm2541_vm0 = vcmask 457728   ;;  %vm4415_vm1 = vcmask 588800   ;;  %vm2396_vm2 = vcmask 621568   ;;  %vm2251_vm3 = vcmask 629760  }
  0x15   : > { %s19350_s23 = smov 127   ;;  %s19308_s24 = smov 126   ;;  %vm19340_vm4 = vcmask 637952   ;;  %vm19339_vm5 = vcmask 646144   ;;  %vm1816_vm6 = vcmask 654336   ;;  %vm19341_vm7 = vcmask 818176  }
  0x16   : > { %s20310_s18 = smov (!%p377_p3, %s12159_s18), 1  ;;  %s19302_s25 = smov 125   ;;  %vm1526_vm8 = vcmask 826368   ;;  %vm1381_vm9 = vcmask 834560   ;;  %vm19342_vm10 = vcmask 842752   ;;  %vm19330_vm11 = vcmask 850944  }
  0x17   : > { %19418 = sst [smem:[#allocation10_spill]] %s20310_s18  ;;  %s12356_s19 = smul.u32 168, %s20310_s18  ;;  %vm19331_vm12 = vcmask 1014784   ;;  %vm19332_vm13 = vcmask 1022976   ;;  %vm656_vm14 = vcmask 1031168   ;;  %vm19343_vm15 = vcmask 1039360  }
  0x18   : > { %s19315_s26 = smov 124   ;;  %s19362_s27 = smov 104  }
  0x19   : > { %s12570_s28 = smov 103   ;;  %s12571_s29 = smov 102  }
  0x1a   : > { %s12697_s22 = scalar_lea.vmem %s19419_s0, %s12356_s19  ;;  %s12572_s30 = smov 101  }
  0x1b   : > { %v12700_v0 = vld [vmem:[%s12697_s22 + $0x10] sm:$0xff]  ;;  %v12703_v1 = vld [vmem:[%s12697_s22] sm:$0xff]  ;;  %v12710_v2 = vld [vmem:[%s12697_s22 + $0x18] sm:$0xff]  ;;  %s12573_s12 = smov 100   ;;  %s19318_s13 = smov 80  }
  0x1c   : > { %473 = vrot.lane.b32.xlu1 %v12700_v0, %s19350_s23  ;;  %469 = vrot.lane.b32.xlu0 %v12703_v1, %s19350_s23  ;;  %v12713_v3 = vld [vmem:[%s12697_s22 + $0x8] sm:$0xff]  ;;  %v12723_v5 = vld [vmem:[%s12697_s22 + $0x20] sm:$0xff]  ;;  %s12575_s14 = smov 79   ;;  %s19320_s15 = smov 78  }
  0x1d   : > { %v12720_v4 = vld [vmem:[%s12697_s22 + $0x28] sm:$0xff]  ;;  %v12730_v6 = vld [vmem:[%s12697_s22 + $0x38] sm:$0xff]  ;;  %v12733_v7 = vld [vmem:[%s12697_s22 + $0x30] sm:$0xff]  ;;  %s12577_s16 = smov 77   ;;  %s19354_s19 = smov 56  }
  0x1e   : > { %v12740_v8 = vld [vmem:[%s12697_s22 + $0x48] sm:$0xff]  ;;  %v12743_v9 = vld [vmem:[%s12697_s22 + $0x40] sm:$0xff]  ;;  %v12750_v10 = vld [vmem:[%s12697_s22 + $0x58] sm:$0xff]  ;;  %s19372_s20 = smov 76   ;;  %s19386_s21 = smov 28  }
  0x1f   : > { %v12753_v11 = vld [vmem:[%s12697_s22 + $0x50] sm:$0xff]  ;;  %v12760_v12 = vld [vmem:[%s12697_s22 + $0x68] sm:$0xff]  ;;  %v12763_v13 = vld [vmem:[%s12697_s22 + $0x60] sm:$0xff]  ;;  %s19632_s1 = sld [smem:[#allocation225_spill]]  ;;  %s20125_s0 = smov 110  }
  0x20   : > { %475 = vrot.lane.b32.xlu1 %v12710_v2, %s19350_s23  ;;  %471 = vrot.lane.b32.xlu0 %v12713_v3, %s19350_s23  ;;  %v12770_v14 = vld [vmem:[%s12697_s22 + $0x78] sm:$0xff]  ;;  %v12773_v15 = vld [vmem:[%s12697_s22 + $0x70] sm:$0xff]  ;;  %s19943_s2 = sld [smem:[#allocation226_spill]]  ;;  %s20140_s17 = smov 72  }
  0x21   : > { %v12780_v16 = vld [vmem:[%s12697_s22 + $0x88] sm:$0xff]  ;;  %v12783_v17 = vld [vmem:[%s12697_s22 + $0x80] sm:$0xff]  ;;  %v12790_v18 = vld [vmem:[%s12697_s22 + $0x98] sm:$0xff]  ;;  %s20143_s11 = smov 74   ;;  %s20146_s18 = smov 76  }
  0x22   : > { %v12793_v19 = vld [vmem:[%s12697_s22 + $0x90] sm:$0xff]  ;;  %v12800_v20 = vld [vmem:[%s12697_s22 + $0xa0] sm:$0xff]  ;;  %s20180_s7 = smov 108   ;;  %s12605_s9 = smov 61  }
  0x23   : > { %s12610_s5 = smov 67   ;;  %s12611_s8 = smov 27  }
  0x24   : > { %479 = vrot.lane.b32.xlu1 %v12720_v4, %s19350_s23  ;;  %477 = vrot.lane.b32.xlu0 %v12723_v5, %s19350_s23  ;;  %s20301_s10 = sld [smem:[#allocation227_spill]] }
  0x28   : > { %483 = vrot.lane.b32.xlu1 %v12730_v6, %s19350_s23  ;;  %481 = vrot.lane.b32.xlu0 %v12733_v7, %s19350_s23 }
  0x2c   : > { %487 = vrot.lane.b32.xlu1 %v12740_v8, %s19350_s23  ;;  %485 = vrot.lane.b32.xlu0 %v12743_v9, %s19350_s23 }
  0x30   : > { %491 = vrot.lane.b32.xlu1 %v12750_v10, %s19350_s23  ;;  %489 = vrot.lane.b32.xlu0 %v12753_v11, %s19350_s23 }
  0x34   : > { %495 = vrot.lane.b32.xlu1 %v12760_v12, %s19350_s23  ;;  %493 = vrot.lane.b32.xlu0 %v12763_v13, %s19350_s23 }
  0x38   : > { %499 = vrot.lane.b32.xlu1 %v12770_v14, %s19350_s23  ;;  %497 = vrot.lane.b32.xlu0 %v12773_v15, %s19350_s23 }
  0x3c   : > { %503 = vrot.lane.b32.xlu1 %v12780_v16, %s19350_s23  ;;  %501 = vrot.lane.b32.xlu0 %v12783_v17, %s19350_s23 }
  0x40   : > { %507 = vrot.lane.b32.xlu1 %v12790_v18, %s19350_s23  ;;  %505 = vrot.lane.b32.xlu0 %v12793_v19, %s19350_s23 }
  0x44   : > { %614 = vrot.lane.b32.xlu1 %v12703_v1, %s19308_s24  ;;  %509 = vrot.lane.b32.xlu0 %v12800_v20, %s19350_s23 }
  0x48   : > { %618 = vrot.lane.b32.xlu1 %v12700_v0, %s19308_s24  ;;  %616 = vrot.lane.b32.xlu0 %v12713_v3, %s19308_s24 }
  0x4c   : > { %622 = vrot.lane.b32.xlu1 %v12723_v5, %s19308_s24  ;;  %620 = vrot.lane.b32.xlu0 %v12710_v2, %s19308_s24 }
  0x50   : > { %626 = vrot.lane.b32.xlu1 %v12733_v7, %s19308_s24  ;;  %624 = vrot.lane.b32.xlu0 %v12720_v4, %s19308_s24 }
  0x54   : > { %630 = vrot.lane.b32.xlu1 %v12743_v9, %s19308_s24  ;;  %628 = vrot.lane.b32.xlu0 %v12730_v6, %s19308_s24 }
  0x58   : > { %634 = vrot.lane.b32.xlu1 %v12753_v11, %s19308_s24  ;;  %632 = vrot.lane.b32.xlu0 %v12740_v8, %s19308_s24 }
  0x5c   : > { %638 = vrot.lane.b32.xlu1 %v12763_v13, %s19308_s24  ;;  %636 = vrot.lane.b32.xlu0 %v12750_v10, %s19308_s24 }
  0x60   : > { %642 = vrot.lane.b32.xlu1 %v12773_v15, %s19308_s24  ;;  %640 = vrot.lane.b32.xlu0 %v12760_v12, %s19308_s24 }
  0x64   : > { %646 = vrot.lane.b32.xlu1 %v12783_v17, %s19308_s24  ;;  %644 = vrot.lane.b32.xlu0 %v12770_v14, %s19308_s24 }
  0x68   : > { %650 = vrot.lane.b32.xlu1 %v12793_v19, %s19308_s24  ;;  %648 = vrot.lane.b32.xlu0 %v12780_v16, %s19308_s24 }
  0x6c   : > { %654 = vrot.lane.b32.xlu1 %v12800_v20, %s19308_s24  ;;  %652 = vrot.lane.b32.xlu0 %v12790_v18, %s19308_s24  ;;  %s12587_s24 = smov 54  }
  0x70   : > { %761 = vrot.lane.b32.xlu1 %v12713_v3, %s19302_s25  ;;  %759 = vrot.lane.b32.xlu0 %v12703_v1, %s19302_s25 }
  0x74   : > { %765 = vrot.lane.b32.xlu1 %v12710_v2, %s19302_s25  ;;  %763 = vrot.lane.b32.xlu0 %v12700_v0, %s19302_s25 }
  0x78   : > { %769 = vrot.lane.b32.xlu1 %v12720_v4, %s19302_s25  ;;  %767 = vrot.lane.b32.xlu0 %v12723_v5, %s19302_s25 }
  0x7c   : > { %773 = vrot.lane.b32.xlu1 %v12730_v6, %s19302_s25  ;;  %771 = vrot.lane.b32.xlu0 %v12733_v7, %s19302_s25 }
  0x80   : > { %777 = vrot.lane.b32.xlu1 %v12740_v8, %s19302_s25  ;;  %775 = vrot.lane.b32.xlu0 %v12743_v9, %s19302_s25 }
  0x84   : > { %781 = vrot.lane.b32.xlu1 %v12750_v10, %s19302_s25  ;;  %779 = vrot.lane.b32.xlu0 %v12753_v11, %s19302_s25 }
  0x88   : > { %785 = vrot.lane.b32.xlu1 %v12760_v12, %s19302_s25  ;;  %783 = vrot.lane.b32.xlu0 %v12763_v13, %s19302_s25 }
  0x8c   : > { %789 = vrot.lane.b32.xlu1 %v12770_v14, %s19302_s25  ;;  %787 = vrot.lane.b32.xlu0 %v12773_v15, %s19302_s25 }
  0x8e   : > { %v12878_v21 = vpop.permute.xlu1 %473  ;;  %v12880_v22 = vpop.permute.xlu0 %469 }
  0x8f   : > { %19420 = vst [vmem:[#allocation11_spill] sm:$0xff] %v12878_v21  ;;  %19421 = vst [vmem:[#allocation12_spill] sm:$0xff] %v12880_v22 }
  0x90   : > { %793 = vrot.lane.b32.xlu1 %v12780_v16, %s19302_s25  ;;  %791 = vrot.lane.b32.xlu0 %v12783_v17, %s19302_s25 }
  0x92   : > { %v12886_v23 = vpop.permute.xlu1 %475  ;;  %v12888_v24 = vpop.permute.xlu0 %471 }
  0x93   : > { %19422 = vst [vmem:[#allocation13_spill] sm:$0xff] %v12886_v23  ;;  %19423 = vst [vmem:[#allocation14_spill] sm:$0xff] %v12888_v24 }
  0x94   : > { %797 = vrot.lane.b32.xlu1 %v12790_v18, %s19302_s25  ;;  %795 = vrot.lane.b32.xlu0 %v12793_v19, %s19302_s25 }
  0x96   : > { %v12894_v25 = vpop.permute.xlu1 %479  ;;  %v12896_v26 = vpop.permute.xlu0 %477 }
  0x97   : > { %19424 = vst [vmem:[#allocation15_spill] sm:$0xff] %v12894_v25  ;;  %19425 = vst [vmem:[#allocation16_spill] sm:$0xff] %v12896_v26 }
  0x98   : > { %904 = vrot.lane.b32.xlu1 %v12703_v1, %s19315_s26  ;;  %799 = vrot.lane.b32.xlu0 %v12800_v20, %s19302_s25  ;;  %s12586_s25 = smov 53  }
  0x9a   : > { %v12902_v27 = vpop.permute.xlu1 %483  ;;  %v12904_v28 = vpop.permute.xlu0 %481 }
  0x9b   : > { %19426 = vst [vmem:[#allocation17_spill] sm:$0xff] %v12902_v27  ;;  %19427 = vst [vmem:[#allocation18_spill] sm:$0xff] %v12904_v28 }
  0x9c   : > { %908 = vrot.lane.b32.xlu1 %v12700_v0, %s19315_s26  ;;  %906 = vrot.lane.b32.xlu0 %v12713_v3, %s19315_s26 }
  0x9e   : > { %v12910_v29 = vpop.permute.xlu1 %487  ;;  %v12912_v30 = vpop.permute.xlu0 %485 }
  0x9f   : > { %19428 = vst [vmem:[#allocation19_spill] sm:$0xff] %v12910_v29  ;;  %19429 = vst [vmem:[#allocation20_spill] sm:$0xff] %v12912_v30 }
  0xa0   : > { %912 = vrot.lane.b32.xlu1 %v12723_v5, %s19315_s26  ;;  %910 = vrot.lane.b32.xlu0 %v12710_v2, %s19315_s26 }
  0xa2   : > { %v12918_v31 = vpop.permute.xlu1 %491  ;;  %v12920_v32 = vpop.permute.xlu0 %489 }
  0xa3   : > { %19430 = vst [vmem:[#allocation21_spill] sm:$0xff] %v12918_v31  ;;  %19431 = vst [vmem:[#allocation22_spill] sm:$0xff] %v12920_v32 }
  0xa4   : > { %916 = vrot.lane.b32.xlu1 %v12733_v7, %s19315_s26  ;;  %914 = vrot.lane.b32.xlu0 %v12720_v4, %s19315_s26 }
  0xa6   : > { %v12926_v33 = vpop.permute.xlu1 %495  ;;  %v12928_v34 = vpop.permute.xlu0 %493 }
  0xa7   : > { %19432 = vst [vmem:[#allocation23_spill] sm:$0xff] %v12926_v33  ;;  %19433 = vst [vmem:[#allocation24_spill] sm:$0xff] %v12928_v34 }
  0xa8   : > { %920 = vrot.lane.b32.xlu1 %v12743_v9, %s19315_s26  ;;  %918 = vrot.lane.b32.xlu0 %v12730_v6, %s19315_s26 }
  0xaa   : > { %v12934_v35 = vpop.permute.xlu1 %499  ;;  %v12936_v36 = vpop.permute.xlu0 %497 }
  0xab   : > { %19434 = vst [vmem:[#allocation25_spill] sm:$0xff] %v12934_v35  ;;  %19435 = vst [vmem:[#allocation26_spill] sm:$0xff] %v12936_v36 }
  0xac   : > { %924 = vrot.lane.b32.xlu1 %v12753_v11, %s19315_s26  ;;  %922 = vrot.lane.b32.xlu0 %v12740_v8, %s19315_s26 }
  0xae   : > { %v12942_v37 = vpop.permute.xlu1 %503  ;;  %v12944_v38 = vpop.permute.xlu0 %501 }
  0xaf   : > { %19436 = vst [vmem:[#allocation27_spill] sm:$0xff] %v12942_v37  ;;  %19437 = vst [vmem:[#allocation28_spill] sm:$0xff] %v12944_v38 }
  0xb0   : > { %928 = vrot.lane.b32.xlu1 %v12763_v13, %s19315_s26  ;;  %926 = vrot.lane.b32.xlu0 %v12750_v10, %s19315_s26 }
  0xb2   : > { %v12950_v39 = vpop.permute.xlu1 %507  ;;  %v12952_v40 = vpop.permute.xlu0 %505 }
  0xb3   : > { %19438 = vst [vmem:[#allocation29_spill] sm:$0xff] %v12950_v39  ;;  %19439 = vst [vmem:[#allocation30_spill] sm:$0xff] %v12952_v40 }
  0xb4   : > { %932 = vrot.lane.b32.xlu1 %v12773_v15, %s19315_s26  ;;  %930 = vrot.lane.b32.xlu0 %v12760_v12, %s19315_s26 }
  0xb6   : > { %v12958_v41 = vpop.permute.xlu1 %614  ;;  %v12960_v42 = vpop.permute.xlu0 %509 }
  0xb7   : > { %19440 = vst [vmem:[#allocation31_spill] sm:$0xff] %v12958_v41  ;;  %19441 = vst [vmem:[#allocation32_spill] sm:$0xff] %v12960_v42 }
  0xb8   : > { %936 = vrot.lane.b32.xlu1 %v12783_v17, %s19315_s26  ;;  %934 = vrot.lane.b32.xlu0 %v12770_v14, %s19315_s26 }
  0xba   : > { %v12966_v43 = vpop.permute.xlu1 %618  ;;  %v12968_v44 = vpop.permute.xlu0 %616 }
  0xbb   : > { %19442 = vst [vmem:[#allocation33_spill] sm:$0xff] %v12966_v43  ;;  %19443 = vst [vmem:[#allocation34_spill] sm:$0xff] %v12968_v44 }
  0xbc   : > { %940 = vrot.lane.b32.xlu1 %v12793_v19, %s19315_s26  ;;  %938 = vrot.lane.b32.xlu0 %v12780_v16, %s19315_s26 }
  0xbe   : > { %v12974_v45 = vpop.permute.xlu1 %622  ;;  %v12976_v46 = vpop.permute.xlu0 %620 }
  0xbf   : > { %19444 = vst [vmem:[#allocation35_spill] sm:$0xff] %v12974_v45  ;;  %19445 = vst [vmem:[#allocation36_spill] sm:$0xff] %v12976_v46 }
  0xc0   : > { %944 = vrot.lane.b32.xlu1 %v12800_v20, %s19315_s26  ;;  %942 = vrot.lane.b32.xlu0 %v12790_v18, %s19315_s26  ;;  %s12588_s26 = smov 55  }
  0xc2   : > { %v12982_v47 = vpop.permute.xlu1 %626  ;;  %v12984_v48 = vpop.permute.xlu0 %624 }
  0xc3   : > { %19446 = vst [vmem:[#allocation37_spill] sm:$0xff] %v12982_v47  ;;  %19447 = vst [vmem:[#allocation38_spill] sm:$0xff] %v12984_v48 }
  0xc4   : > { %1051 = vrot.lane.b32.xlu1 %v12713_v3, %s19362_s27  ;;  %1049 = vrot.lane.b32.xlu0 %v12703_v1, %s19362_s27 }
  0xc6   : > { %v12990_v49 = vpop.permute.xlu1 %630  ;;  %v12992_v50 = vpop.permute.xlu0 %628 }
  0xc7   : > { %19448 = vst [vmem:[#allocation39_spill] sm:$0xff] %v12990_v49  ;;  %19449 = vst [vmem:[#allocation40_spill] sm:$0xff] %v12992_v50 }
  0xc8   : > { %1055 = vrot.lane.b32.xlu1 %v12710_v2, %s19362_s27  ;;  %1053 = vrot.lane.b32.xlu0 %v12700_v0, %s19362_s27 }
  0xca   : > { %v12998_v51 = vpop.permute.xlu1 %634  ;;  %v13000_v52 = vpop.permute.xlu0 %632 }
  0xcb   : > { %19450 = vst [vmem:[#allocation41_spill] sm:$0xff] %v12998_v51  ;;  %19451 = vst [vmem:[#allocation42_spill] sm:$0xff] %v13000_v52 }
  0xcc   : > { %1059 = vrot.lane.b32.xlu1 %v12720_v4, %s19362_s27  ;;  %1057 = vrot.lane.b32.xlu0 %v12723_v5, %s19362_s27 }
  0xce   : > { %v13006_v53 = vpop.permute.xlu1 %638  ;;  %v13008_v54 = vpop.permute.xlu0 %636 }
  0xcf   : > { %19452 = vst [vmem:[#allocation43_spill] sm:$0xff] %v13006_v53  ;;  %19453 = vst [vmem:[#allocation44_spill] sm:$0xff] %v13008_v54 }
  0xd0   : > { %1063 = vrot.lane.b32.xlu1 %v12730_v6, %s19362_s27  ;;  %1061 = vrot.lane.b32.xlu0 %v12733_v7, %s19362_s27 }
  0xd2   : > { %v13014_v55 = vpop.permute.xlu1 %642  ;;  %v13016_v56 = vpop.permute.xlu0 %640 }
  0xd3   : > { %19454 = vst [vmem:[#allocation45_spill] sm:$0xff] %v13014_v55  ;;  %19455 = vst [vmem:[#allocation46_spill] sm:$0xff] %v13016_v56 }
  0xd4   : > { %1067 = vrot.lane.b32.xlu1 %v12740_v8, %s19362_s27  ;;  %1065 = vrot.lane.b32.xlu0 %v12743_v9, %s19362_s27 }
  0xd6   : > { %v13022_v57 = vpop.permute.xlu1 %646  ;;  %v13024_v58 = vpop.permute.xlu0 %644 }
  0xd7   : > { %19456 = vst [vmem:[#allocation47_spill] sm:$0xff] %v13022_v57  ;;  %19457 = vst [vmem:[#allocation48_spill] sm:$0xff] %v13024_v58 }
  0xd8   : > { %1071 = vrot.lane.b32.xlu1 %v12750_v10, %s19362_s27  ;;  %1069 = vrot.lane.b32.xlu0 %v12753_v11, %s19362_s27 }
  0xda   : > { %v13030_v59 = vpop.permute.xlu1 %650  ;;  %v13032_v60 = vpop.permute.xlu0 %648 }
  0xdb   : > { %19458 = vst [vmem:[#allocation49_spill] sm:$0xff] %v13030_v59  ;;  %19459 = vst [vmem:[#allocation50_spill] sm:$0xff] %v13032_v60 }
  0xdc   : > { %1075 = vrot.lane.b32.xlu1 %v12760_v12, %s19362_s27  ;;  %1073 = vrot.lane.b32.xlu0 %v12763_v13, %s19362_s27 }
  0xde   : > { %v13038_v61 = vpop.permute.xlu1 %654  ;;  %v13040_v62 = vpop.permute.xlu0 %652 }
  0xdf   : > { %19460 = vst [vmem:[#allocation51_spill] sm:$0xff] %v13038_v61  ;;  %19461 = vst [vmem:[#allocation52_spill] sm:$0xff] %v13040_v62 }
  0xe0   : > { %1079 = vrot.lane.b32.xlu1 %v12770_v14, %s19362_s27  ;;  %1077 = vrot.lane.b32.xlu0 %v12773_v15, %s19362_s27 }
  0xe2   : > { %v13046_v63 = vpop.permute.xlu1 %761  ;;  %v13048_v39 = vpop.permute.xlu0 %759 }
  0xe3   : > { %19462 = vst [vmem:[#allocation53_spill] sm:$0xff] %v13048_v39 }
  0xe4   : > { %1083 = vrot.lane.b32.xlu1 %v12780_v16, %s19362_s27  ;;  %1081 = vrot.lane.b32.xlu0 %v12783_v17, %s19362_s27 }
  0xe6   : > { %v13054_v42 = vpop.permute.xlu1 %765  ;;  %v13056_v61 = vpop.permute.xlu0 %763 }
  0xe7   : > { %19463 = vst [vmem:[#allocation54_spill] sm:$0xff] %v13054_v42 }
  0xe8   : > { %1087 = vrot.lane.b32.xlu1 %v12790_v18, %s19362_s27  ;;  %1085 = vrot.lane.b32.xlu0 %v12793_v19, %s19362_s27 }
  0xea   : > { %v13062_v62 = vpop.permute.xlu1 %769  ;;  %v13064_v37 = vpop.permute.xlu0 %767 }
  0xeb   : > { %19464 = vst [vmem:[#allocation55_spill] sm:$0xff] %v13062_v62  ;;  %19465 = vst [vmem:[#allocation56_spill] sm:$0xff] %v13064_v37 }
  0xec   : > { %1194 = vrot.lane.b32.xlu1 %v12703_v1, %s12570_s28  ;;  %1089 = vrot.lane.b32.xlu0 %v12800_v20, %s19362_s27 }
  0xee   : > { %v13070_v40 = vpop.permute.xlu1 %773  ;;  %v13072_v60 = vpop.permute.xlu0 %771 }
  0xef   : > { %19466 = vst [vmem:[#allocation57_spill] sm:$0xff] %v13070_v40  ;;  %19467 = vst [vmem:[#allocation58_spill] sm:$0xff] %v13072_v60 }
  0xf0   : > { %1198 = vrot.lane.b32.xlu1 %v12700_v0, %s12570_s28  ;;  %1196 = vrot.lane.b32.xlu0 %v12713_v3, %s12570_s28 }
  0xf2   : > { %v13078_v59 = vpop.permute.xlu1 %777  ;;  %v13080_v35 = vpop.permute.xlu0 %775 }
  0xf3   : > { %19468 = vst [vmem:[#allocation59_spill] sm:$0xff] %v13078_v59  ;;  %19469 = vst [vmem:[#allocation60_spill] sm:$0xff] %v13080_v35 }
  0xf4   : > { %1202 = vrot.lane.b32.xlu1 %v12723_v5, %s12570_s28  ;;  %1200 = vrot.lane.b32.xlu0 %v12710_v2, %s12570_s28 }
  0xf6   : > { %v13086_v38 = vpop.permute.xlu1 %781  ;;  %v13088_v58 = vpop.permute.xlu0 %779 }
  0xf7   : > { %19470 = vst [vmem:[#allocation61_spill] sm:$0xff] %v13086_v38  ;;  %19471 = vst [vmem:[#allocation62_spill] sm:$0xff] %v13088_v58 }
  0xf8   : > { %1206 = vrot.lane.b32.xlu1 %v12733_v7, %s12570_s28  ;;  %1204 = vrot.lane.b32.xlu0 %v12720_v4, %s12570_s28 }
  0xfa   : > { %v13094_v57 = vpop.permute.xlu1 %785  ;;  %v13096_v33 = vpop.permute.xlu0 %783 }
  0xfb   : > { %19472 = vst [vmem:[#allocation63_spill] sm:$0xff] %v13094_v57  ;;  %19473 = vst [vmem:[#allocation64_spill] sm:$0xff] %v13096_v33 }
  0xfc   : > { %1210 = vrot.lane.b32.xlu1 %v12743_v9, %s12570_s28  ;;  %1208 = vrot.lane.b32.xlu0 %v12730_v6, %s12570_s28 }
  0xfe   : > { %v13102_v36 = vpop.permute.xlu1 %789  ;;  %v13104_v56 = vpop.permute.xlu0 %787 }
  0xff   : > { %19474 = vst [vmem:[#allocation65_spill] sm:$0xff] %v13102_v36  ;;  %19475 = vst [vmem:[#allocation66_spill] sm:$0xff] %v13104_v56 }
 0x100   : > { %1214 = vrot.lane.b32.xlu1 %v12753_v11, %s12570_s28  ;;  %1212 = vrot.lane.b32.xlu0 %v12740_v8, %s12570_s28 }
 0x102   : > { %v13110_v55 = vpop.permute.xlu1 %793  ;;  %v13112_v57 = vpop.permute.xlu0 %791 }
 0x103   : > { %19476 = vst [vmem:[#allocation67_spill] sm:$0xff] %v13110_v55  ;;  %19477 = vst [vmem:[#allocation68_spill] sm:$0xff] %v13112_v57 }
 0x104   : > { %1218 = vrot.lane.b32.xlu1 %v12763_v13, %s12570_s28  ;;  %1216 = vrot.lane.b32.xlu0 %v12750_v10, %s12570_s28 }
 0x106   : > { %v13118_v31 = vpop.permute.xlu1 %797  ;;  %v13120_v36 = vpop.permute.xlu0 %795 }
 0x107   : > { %19478 = vst [vmem:[#allocation69_spill] sm:$0xff] %v13118_v31  ;;  %19479 = vst [vmem:[#allocation70_spill] sm:$0xff] %v13120_v36 }
 0x108   : > { %1222 = vrot.lane.b32.xlu1 %v12773_v15, %s12570_s28  ;;  %1220 = vrot.lane.b32.xlu0 %v12760_v12, %s12570_s28 }
 0x10a   : > { %v13126_v56 = vpop.permute.xlu1 %904  ;;  %v13128_v55 = vpop.permute.xlu0 %799 }
 0x10b   : > { %19480 = vst [vmem:[#allocation71_spill] sm:$0xff] %v13128_v55 }
 0x10c   : > { %1226 = vrot.lane.b32.xlu1 %v12783_v17, %s12570_s28  ;;  %1224 = vrot.lane.b32.xlu0 %v12770_v14, %s12570_s28 }
 0x10e   : > { %v13134_v57 = vpop.permute.xlu1 %908  ;;  %v13136_v31 = vpop.permute.xlu0 %906 }
 0x110   : > { %1230 = vrot.lane.b32.xlu1 %v12793_v19, %s12570_s28  ;;  %1228 = vrot.lane.b32.xlu0 %v12780_v16, %s12570_s28 }
 0x112   : > { %v13142_v36 = vpop.permute.xlu1 %912  ;;  %v13144_v34 = vpop.permute.xlu0 %910 }
 0x113   : > { %19481 = vst [vmem:[#allocation72_spill] sm:$0xff] %v13142_v36  ;;  %19482 = vst [vmem:[#allocation73_spill] sm:$0xff] %v13144_v34 }
 0x114   : > { %1234 = vrot.lane.b32.xlu1 %v12800_v20, %s12570_s28  ;;  %1232 = vrot.lane.b32.xlu0 %v12790_v18, %s12570_s28  ;;  %s19346_s28 = smov 29  }
 0x116   : > { %v13150_v55 = vpop.permute.xlu1 %916  ;;  %v13152_v54 = vpop.permute.xlu0 %914 }
 0x117   : > { %19483 = vst [vmem:[#allocation74_spill] sm:$0xff] %v13150_v55  ;;  %19484 = vst [vmem:[#allocation75_spill] sm:$0xff] %v13152_v54 }
 0x118   : > { %1341 = vrot.lane.b32.xlu1 %v12713_v3, %s12571_s29  ;;  %1339 = vrot.lane.b32.xlu0 %v12703_v1, %s12571_s29 }
 0x11a   : > { %v13158_v53 = vpop.permute.xlu1 %920  ;;  %v13160_v38 = vpop.permute.xlu0 %918 }
 0x11b   : > { %19485 = vst [vmem:[#allocation76_spill] sm:$0xff] %v13158_v53  ;;  %19486 = vst [vmem:[#allocation77_spill] sm:$0xff] %v13160_v38 }
 0x11c   : > { %1345 = vrot.lane.b32.xlu1 %v12710_v2, %s12571_s29  ;;  %1343 = vrot.lane.b32.xlu0 %v12700_v0, %s12571_s29 }
 0x11e   : > { %v13166_v33 = vpop.permute.xlu1 %924  ;;  %v13168_v29 = vpop.permute.xlu0 %922 }
 0x11f   : > { %19487 = vst [vmem:[#allocation78_spill] sm:$0xff] %v13166_v33  ;;  %19488 = vst [vmem:[#allocation79_spill] sm:$0xff] %v13168_v29 }
 0x120   : > { %1349 = vrot.lane.b32.xlu1 %v12720_v4, %s12571_s29  ;;  %1347 = vrot.lane.b32.xlu0 %v12723_v5, %s12571_s29 }
 0x122   : > { %v13174_v32 = vpop.permute.xlu1 %928  ;;  %v13176_v52 = vpop.permute.xlu0 %926 }
 0x123   : > { %19489 = vst [vmem:[#allocation80_spill] sm:$0xff] %v13174_v32  ;;  %19490 = vst [vmem:[#allocation81_spill] sm:$0xff] %v13176_v52 }
 0x124   : > { %1353 = vrot.lane.b32.xlu1 %v12730_v6, %s12571_s29  ;;  %1351 = vrot.lane.b32.xlu0 %v12733_v7, %s12571_s29 }
 0x126   : > { %v13182_v51 = vpop.permute.xlu1 %932  ;;  %v13184_v59 = vpop.permute.xlu0 %930 }
 0x127   : > { %19491 = vst [vmem:[#allocation82_spill] sm:$0xff] %v13182_v51  ;;  %19492 = vst [vmem:[#allocation83_spill] sm:$0xff] %v13184_v59 }
 0x128   : > { %1357 = vrot.lane.b32.xlu1 %v12740_v8, %s12571_s29  ;;  %1355 = vrot.lane.b32.xlu0 %v12743_v9, %s12571_s29 }
 0x12a   : > { %v13190_v58 = vpop.permute.xlu1 %936  ;;  %v13192_v32 = vpop.permute.xlu0 %934 }
 0x12b   : > { %19493 = vst [vmem:[#allocation84_spill] sm:$0xff] %v13190_v58  ;;  %19494 = vst [vmem:[#allocation85_spill] sm:$0xff] %v13192_v32 }
 0x12c   : > { %1361 = vrot.lane.b32.xlu1 %v12750_v10, %s12571_s29  ;;  %1359 = vrot.lane.b32.xlu0 %v12753_v11, %s12571_s29 }
 0x12e   : > { %v13198_v52 = vpop.permute.xlu1 %940  ;;  %v13200_v51 = vpop.permute.xlu0 %938 }
 0x12f   : > { %19495 = vst [vmem:[#allocation86_spill] sm:$0xff] %v13198_v52  ;;  %19496 = vst [vmem:[#allocation87_spill] sm:$0xff] %v13200_v51 }
 0x130   : > { %1365 = vrot.lane.b32.xlu1 %v12760_v12, %s12571_s29  ;;  %1363 = vrot.lane.b32.xlu0 %v12763_v13, %s12571_s29 }
 0x132   : > { %v13206_v59 = vpop.permute.xlu1 %944  ;;  %v13208_v58 = vpop.permute.xlu0 %942 }
 0x133   : > { %19497 = vst [vmem:[#allocation88_spill] sm:$0xff] %v13206_v59  ;;  %19498 = vst [vmem:[#allocation89_spill] sm:$0xff] %v13208_v58 }
 0x134   : > { %1369 = vrot.lane.b32.xlu1 %v12770_v14, %s12571_s29  ;;  %1367 = vrot.lane.b32.xlu0 %v12773_v15, %s12571_s29 }
 0x136   : > { %v13214_v32 = vpop.permute.xlu1 %1051  ;;  %v13216_v52 = vpop.permute.xlu0 %1049 }
 0x138   : > { %1373 = vrot.lane.b32.xlu1 %v12780_v16, %s12571_s29  ;;  %1371 = vrot.lane.b32.xlu0 %v12783_v17, %s12571_s29 }
 0x13a   : > { %v13222_v51 = vpop.permute.xlu1 %1055  ;;  %v13224_v59 = vpop.permute.xlu0 %1053 }
 0x13b   : > { %19499 = vst [vmem:[#allocation90_spill] sm:$0xff] %v13222_v51 }
 0x13c   : > { %1377 = vrot.lane.b32.xlu1 %v12790_v18, %s12571_s29  ;;  %1375 = vrot.lane.b32.xlu0 %v12793_v19, %s12571_s29 }
 0x13e   : > { %v13230_v58 = vpop.permute.xlu1 %1059  ;;  %v13232_v29 = vpop.permute.xlu0 %1057 }
 0x13f   : > { %19500 = vst [vmem:[#allocation91_spill] sm:$0xff] %v13230_v58  ;;  %19501 = vst [vmem:[#allocation92_spill] sm:$0xff] %v13232_v29  ;;  %v13539_v58 = vld [vmem:[%s12697_s22 + $0x98] sm:$0xff] }
 0x140   : > { %1484 = vrot.lane.b32.xlu1 %v12703_v1, %s12572_s30  ;;  %1379 = vrot.lane.b32.xlu0 %v12800_v20, %s12571_s29  ;;  %s19384_s29 = smov 30  }
 0x142   : > { %v13238_v33 = vpop.permute.xlu1 %1063  ;;  %v13240_v27 = vpop.permute.xlu0 %1061 }
 0x143   : > { %19502 = vst [vmem:[#allocation93_spill] sm:$0xff] %v13238_v33  ;;  %19503 = vst [vmem:[#allocation94_spill] sm:$0xff] %v13240_v27 }
 0x144   : > { %1488 = vrot.lane.b32.xlu1 %v12700_v0, %s12572_s30  ;;  %1486 = vrot.lane.b32.xlu0 %v12713_v3, %s12572_s30 }
 0x146   : > { %v13246_v30 = vpop.permute.xlu1 %1067  ;;  %v13248_v50 = vpop.permute.xlu0 %1065 }
 0x147   : > { %19504 = vst [vmem:[#allocation95_spill] sm:$0xff] %v13246_v30  ;;  %19505 = vst [vmem:[#allocation96_spill] sm:$0xff] %v13248_v50 }
 0x148   : > { %1492 = vrot.lane.b32.xlu1 %v12723_v5, %s12572_s30  ;;  %1490 = vrot.lane.b32.xlu0 %v12710_v2, %s12572_s30 }
 0x14a   : > { %v13254_v49 = vpop.permute.xlu1 %1071  ;;  %v13256_v40 = vpop.permute.xlu0 %1069 }
 0x14b   : > { %19506 = vst [vmem:[#allocation97_spill] sm:$0xff] %v13254_v49  ;;  %19507 = vst [vmem:[#allocation98_spill] sm:$0xff] %v13256_v40 }
 0x14c   : > { %1496 = vrot.lane.b32.xlu1 %v12733_v7, %s12572_s30  ;;  %1494 = vrot.lane.b32.xlu0 %v12720_v4, %s12572_s30 }
 0x14e   : > { %v13262_v35 = vpop.permute.xlu1 %1075  ;;  %v13264_v30 = vpop.permute.xlu0 %1073 }
 0x14f   : > { %19508 = vst [vmem:[#allocation99_spill] sm:$0xff] %v13262_v35  ;;  %19509 = vst [vmem:[#allocation100_spill] sm:$0xff] %v13264_v30 }
 0x150   : > { %1500 = vrot.lane.b32.xlu1 %v12743_v9, %s12572_s30  ;;  %1498 = vrot.lane.b32.xlu0 %v12730_v6, %s12572_s30 }
 0x152   : > { %v13270_v38 = vpop.permute.xlu1 %1079  ;;  %v13272_v49 = vpop.permute.xlu0 %1077 }
 0x153   : > { %19510 = vst [vmem:[#allocation101_spill] sm:$0xff] %v13270_v38  ;;  %19511 = vst [vmem:[#allocation102_spill] sm:$0xff] %v13272_v49 }
 0x154   : > { %1504 = vrot.lane.b32.xlu1 %v12753_v11, %s12572_s30  ;;  %1502 = vrot.lane.b32.xlu0 %v12740_v8, %s12572_s30 }
 0x156   : > { %v13278_v40 = vpop.permute.xlu1 %1083  ;;  %v13280_v35 = vpop.permute.xlu0 %1081 }
 0x157   : > { %19512 = vst [vmem:[#allocation103_spill] sm:$0xff] %v13278_v40  ;;  %19513 = vst [vmem:[#allocation104_spill] sm:$0xff] %v13280_v35 }
 0x158   : > { %1508 = vrot.lane.b32.xlu1 %v12763_v13, %s12572_s30  ;;  %1506 = vrot.lane.b32.xlu0 %v12750_v10, %s12572_s30 }
 0x15a   : > { %v13286_v30 = vpop.permute.xlu1 %1087  ;;  %v13288_v38 = vpop.permute.xlu0 %1085 }
 0x15b   : > { %19514 = vst [vmem:[#allocation105_spill] sm:$0xff] %v13286_v30  ;;  %19515 = vst [vmem:[#allocation106_spill] sm:$0xff] %v13288_v38 }
 0x15c   : > { %1512 = vrot.lane.b32.xlu1 %v12773_v15, %s12572_s30  ;;  %1510 = vrot.lane.b32.xlu0 %v12760_v12, %s12572_s30 }
 0x15e   : > { %v13294_v49 = vpop.permute.xlu1 %1194  ;;  %v13296_v40 = vpop.permute.xlu0 %1089 }
 0x15f   : > { %19516 = vst [vmem:[#allocation107_spill] sm:$0xff] %v13296_v40 }
 0x160   : > { %1516 = vrot.lane.b32.xlu1 %v12783_v17, %s12572_s30  ;;  %1514 = vrot.lane.b32.xlu0 %v12770_v14, %s12572_s30 }
 0x162   : > { %v13302_v35 = vpop.permute.xlu1 %1198  ;;  %v13304_v30 = vpop.permute.xlu0 %1196 }
 0x164   : > { %1520 = vrot.lane.b32.xlu1 %v12793_v19, %s12572_s30  ;;  %1518 = vrot.lane.b32.xlu0 %v12780_v16, %s12572_s30 }
 0x166   : > { %v13310_v38 = vpop.permute.xlu1 %1202  ;;  %v13312_v53 = vpop.permute.xlu0 %1200 }
 0x168   : > { %1524 = vrot.lane.b32.xlu1 %v12800_v20, %s12572_s30  ;;  %1522 = vrot.lane.b32.xlu0 %v12790_v18, %s12572_s30  ;;  %s19344_s30 = smov 31  }
 0x16a   : > { %v13318_v40 = vpop.permute.xlu1 %1206  ;;  %v13320_v33 = vpop.permute.xlu0 %1204 }
 0x16b   : > { %19517 = vst [vmem:[#allocation108_spill] sm:$0xff] %v13318_v40  ;;  %19518 = vst [vmem:[#allocation109_spill] sm:$0xff] %v13320_v33 }
 0x16c   : > { %1631 = vrot.lane.b32.xlu1 %v12713_v3, %s12573_s12  ;;  %1629 = vrot.lane.b32.xlu0 %v12703_v1, %s12573_s12 }
 0x16e   : > { %v13326_v50 = vpop.permute.xlu1 %1210  ;;  %v13328_v25 = vpop.permute.xlu0 %1208 }
 0x16f   : > { %19519 = vst [vmem:[#allocation110_spill] sm:$0xff] %v13326_v50  ;;  %19520 = vst [vmem:[#allocation111_spill] sm:$0xff] %v13328_v25 }
 0x170   : > { %1635 = vrot.lane.b32.xlu1 %v12710_v2, %s12573_s12  ;;  %1633 = vrot.lane.b32.xlu0 %v12700_v0, %s12573_s12 }
 0x172   : > { %v13334_v28 = vpop.permute.xlu1 %1214  ;;  %v13336_v48 = vpop.permute.xlu0 %1212 }
 0x173   : > { %19521 = vst [vmem:[#allocation112_spill] sm:$0xff] %v13334_v28  ;;  %19522 = vst [vmem:[#allocation113_spill] sm:$0xff] %v13336_v48 }
 0x174   : > { %1639 = vrot.lane.b32.xlu1 %v12720_v4, %s12573_s12  ;;  %1637 = vrot.lane.b32.xlu0 %v12723_v5, %s12573_s12 }
 0x176   : > { %v13342_v1 = vpop.permute.xlu1 %1218  ;;  %v13344_v3 = vpop.permute.xlu0 %1216 }
 0x177   : > { %19523 = vst [vmem:[#allocation114_spill] sm:$0xff] %v13342_v1  ;;  %19524 = vst [vmem:[#allocation115_spill] sm:$0xff] %v13344_v3  ;;  %v13452_v3 = vld [vmem:[%s12697_s22 + $0x40] sm:$0xff]  ;;  %v13455_v1 = vld [vmem:[%s12697_s22 + $0x38] sm:$0xff] }
 0x178   : > { %1643 = vrot.lane.b32.xlu1 %v12730_v6, %s12573_s12  ;;  %1641 = vrot.lane.b32.xlu0 %v12733_v7, %s12573_s12 }
 0x17a   : > { %v13350_v0 = vpop.permute.xlu1 %1222  ;;  %v13352_v2 = vpop.permute.xlu0 %1220 }
 0x17b   : > { %19525 = vst [vmem:[#allocation116_spill] sm:$0xff] %v13350_v0  ;;  %19526 = vst [vmem:[#allocation117_spill] sm:$0xff] %v13352_v2 }
 0x17c   : > { %1647 = vrot.lane.b32.xlu1 %v12740_v8, %s12573_s12  ;;  %1645 = vrot.lane.b32.xlu0 %v12743_v9, %s12573_s12 }
 0x17e   : > { %v13358_v4 = vpop.permute.xlu1 %1226  ;;  %v13360_v5 = vpop.permute.xlu0 %1224 }
 0x17f   : > { %19527 = vst [vmem:[#allocation118_spill] sm:$0xff] %v13358_v4  ;;  %19528 = vst [vmem:[#allocation119_spill] sm:$0xff] %v13360_v5  ;;  %v13438_v5 = vld [vmem:[%s12697_s22 + $0x30] sm:$0xff]  ;;  %v13441_v4 = vld [vmem:[%s12697_s22 + $0x28] sm:$0xff] }
 0x180   : > { %1651 = vrot.lane.b32.xlu1 %v12750_v10, %s12573_s12  ;;  %1649 = vrot.lane.b32.xlu0 %v12753_v11, %s12573_s12 }
 0x182   : > { %v13366_v6 = vpop.permute.xlu1 %1230  ;;  %v13368_v7 = vpop.permute.xlu0 %1228 }
 0x183   : > { %19529 = vst [vmem:[#allocation120_spill] sm:$0xff] %v13366_v6  ;;  %19530 = vst [vmem:[#allocation121_spill] sm:$0xff] %v13368_v7  ;;  %v13427_v7 = vld [vmem:[%s12697_s22 + $0x18] sm:$0xff] }
 0x184   : > { %1655 = vrot.lane.b32.xlu1 %v12760_v12, %s12573_s12  ;;  %1653 = vrot.lane.b32.xlu0 %v12763_v13, %s12573_s12 }
 0x186   : > { %v13374_v8 = vpop.permute.xlu1 %1234  ;;  %v13376_v9 = vpop.permute.xlu0 %1232 }
 0x187   : > { %19531 = vst [vmem:[#allocation122_spill] sm:$0xff] %v13374_v8  ;;  %19532 = vst [vmem:[#allocation123_spill] sm:$0xff] %v13376_v9  ;;  %v13424_v8 = vld [vmem:[%s12697_s22 + $0x20] sm:$0xff] }
 0x188   : > { %1659 = vrot.lane.b32.xlu1 %v12770_v14, %s12573_s12  ;;  %1657 = vrot.lane.b32.xlu0 %v12773_v15, %s12573_s12  ;;  %v13399_v14 = vld [vmem:[%s12697_s22] sm:$0xff] }
 0x18a   : > { %v13382_v10 = vpop.permute.xlu1 %1341  ;;  %v13384_v11 = vpop.permute.xlu0 %1339 }
 0x18c   : > { %1663 = vrot.lane.b32.xlu1 %v12780_v16, %s12573_s12  ;;  %1661 = vrot.lane.b32.xlu0 %v12783_v17, %s12573_s12  ;;  %v13410_v17 = vld [vmem:[%s12697_s22 + $0x10] sm:$0xff] }
 0x18e   : > { %v13390_v12 = vpop.permute.xlu1 %1345  ;;  %v13392_v13 = vpop.permute.xlu0 %1343 }
 0x190   : > { %1667 = vrot.lane.b32.xlu1 %v12790_v18, %s12573_s12  ;;  %1665 = vrot.lane.b32.xlu0 %v12793_v19, %s12573_s12  ;;  %v13413_v18 = vld [vmem:[%s12697_s22 + $0x8] sm:$0xff] }
 0x192   : > { %v13401_v15 = vpop.permute.xlu1 %1349  ;;  %v13403_v16 = vpop.permute.xlu0 %1347 }
 0x193   : > { %19533 = vst [vmem:[#allocation124_spill] sm:$0xff] %v13401_v15 }
 0x194   : > { %1774 = vrot.lane.b32.xlu1 %v13399_v14, %s19318_s13  ;;  %1669 = vrot.lane.b32.xlu0 %v12800_v20, %s12573_s12  ;;  %s19380_s12 = smov 32  }
 0x196   : > { %v13415_v19 = vpop.permute.xlu1 %1353  ;;  %v13417_v9 = vpop.permute.xlu0 %1351 }
 0x197   : > { %19534 = vst [vmem:[#allocation125_spill] sm:$0xff] %v13415_v19  ;;  %19535 = vst [vmem:[#allocation126_spill] sm:$0xff] %v13417_v9 }
 0x198   : > { %1778 = vrot.lane.b32.xlu1 %v13410_v17, %s19318_s13  ;;  %1776 = vrot.lane.b32.xlu0 %v13413_v18, %s19318_s13 }
 0x19a   : > { %v13429_v20 = vpop.permute.xlu1 %1357  ;;  %v13431_v6 = vpop.permute.xlu0 %1355 }
 0x19b   : > { %19536 = vst [vmem:[#allocation127_spill] sm:$0xff] %v13429_v20  ;;  %19537 = vst [vmem:[#allocation128_spill] sm:$0xff] %v13431_v6  ;;  %v13469_v20 = vld [vmem:[%s12697_s22 + $0x48] sm:$0xff] }
 0x19c   : > { %1782 = vrot.lane.b32.xlu1 %v13424_v8, %s19318_s13  ;;  %1780 = vrot.lane.b32.xlu0 %v13427_v7, %s19318_s13 }
 0x19e   : > { %v13443_v2 = vpop.permute.xlu1 %1361  ;;  %v13445_v0 = vpop.permute.xlu0 %1359 }
 0x19f   : > { %19538 = vst [vmem:[#allocation129_spill] sm:$0xff] %v13443_v2  ;;  %19539 = vst [vmem:[#allocation130_spill] sm:$0xff] %v13445_v0  ;;  %v13466_v2 = vld [vmem:[%s12697_s22 + $0x50] sm:$0xff] }
 0x1a0   : > { %1786 = vrot.lane.b32.xlu1 %v13438_v5, %s19318_s13  ;;  %1784 = vrot.lane.b32.xlu0 %v13441_v4, %s19318_s13 }
 0x1a2   : > { %v13457_v48 = vpop.permute.xlu1 %1365  ;;  %v13459_v28 = vpop.permute.xlu0 %1363 }
 0x1a3   : > { %19540 = vst [vmem:[#allocation131_spill] sm:$0xff] %v13457_v48  ;;  %19541 = vst [vmem:[#allocation132_spill] sm:$0xff] %v13459_v28  ;;  %v13480_v48 = vld [vmem:[%s12697_s22 + $0x60] sm:$0xff]  ;;  %v13483_v28 = vld [vmem:[%s12697_s22 + $0x58] sm:$0xff] }
 0x1a4   : > { %1790 = vrot.lane.b32.xlu1 %v13452_v3, %s19318_s13  ;;  %1788 = vrot.lane.b32.xlu0 %v13455_v1, %s19318_s13 }
 0x1a6   : > { %v13471_v0 = vpop.permute.xlu1 %1369  ;;  %v13473_v25 = vpop.permute.xlu0 %1367 }
 0x1a7   : > { %19542 = vst [vmem:[#allocation133_spill] sm:$0xff] %v13471_v0  ;;  %19543 = vst [vmem:[#allocation134_spill] sm:$0xff] %v13473_v25  ;;  %v13494_v0 = vld [vmem:[%s12697_s22 + $0x70] sm:$0xff]  ;;  %v13497_v25 = vld [vmem:[%s12697_s22 + $0x68] sm:$0xff] }
 0x1a8   : > { %1794 = vrot.lane.b32.xlu1 %v13466_v2, %s19318_s13  ;;  %1792 = vrot.lane.b32.xlu0 %v13469_v20, %s19318_s13 }
 0x1aa   : > { %v13485_v50 = vpop.permute.xlu1 %1373  ;;  %v13487_v47 = vpop.permute.xlu0 %1371 }
 0x1ab   : > { %19544 = vst [vmem:[#allocation135_spill] sm:$0xff] %v13485_v50  ;;  %19545 = vst [vmem:[#allocation136_spill] sm:$0xff] %v13487_v47  ;;  %v13508_v50 = vld [vmem:[%s12697_s22 + $0x80] sm:$0xff]  ;;  %v13511_v47 = vld [vmem:[%s12697_s22 + $0x78] sm:$0xff] }
 0x1ac   : > { %1798 = vrot.lane.b32.xlu1 %v13480_v48, %s19318_s13  ;;  %1796 = vrot.lane.b32.xlu0 %v13483_v28, %s19318_s13 }
 0x1ae   : > { %v13499_v19 = vpop.permute.xlu1 %1377  ;;  %v13501_v6 = vpop.permute.xlu0 %1375 }
 0x1af   : > { %19546 = vst [vmem:[#allocation137_spill] sm:$0xff] %v13499_v19  ;;  %19547 = vst [vmem:[#allocation138_spill] sm:$0xff] %v13501_v6  ;;  %v13522_v19 = vld [vmem:[%s12697_s22 + $0x90] sm:$0xff]  ;;  %v13525_v6 = vld [vmem:[%s12697_s22 + $0x88] sm:$0xff] }
 0x1b0   : > { %1802 = vrot.lane.b32.xlu1 %v13494_v0, %s19318_s13  ;;  %1800 = vrot.lane.b32.xlu0 %v13497_v25, %s19318_s13 }
 0x1b2   : > { %v13513_v62 = vpop.permute.xlu1 %1484  ;;  %v13515_v60 = vpop.permute.xlu0 %1379 }
 0x1b3   : > { %19548 = vst [vmem:[#allocation139_spill] sm:$0xff] %v13515_v60  ;;  %v13536_v60 = vld [vmem:[%s12697_s22 + $0xa0] sm:$0xff] }
 0x1b4   : > { %1806 = vrot.lane.b32.xlu1 %v13508_v50, %s19318_s13  ;;  %1804 = vrot.lane.b32.xlu0 %v13511_v47, %s19318_s13 }
 0x1b6   : > { %v13527_v54 = vpop.permute.xlu1 %1488  ;;  %v13529_v55 = vpop.permute.xlu0 %1486 }
 0x1b8   : > { %1810 = vrot.lane.b32.xlu1 %v13522_v19, %s19318_s13  ;;  %1808 = vrot.lane.b32.xlu0 %v13525_v6, %s19318_s13 }
 0x1ba   : > { %v13541_v27 = vpop.permute.xlu1 %1492  ;;  %v13543_v33 = vpop.permute.xlu0 %1490 }
 0x1bc   : > { %1814 = vrot.lane.b32.xlu1 %v13536_v60, %s19318_s13  ;;  %1812 = vrot.lane.b32.xlu0 %v13539_v58, %s19318_s13  ;;  %s19393_s13 = smov 112  }
 0x1be   : > { %v13549_v40 = vpop.permute.xlu1 %1496  ;;  %v13551_v15 = vpop.permute.xlu0 %1494 }
 0x1bf   : > { %19549 = vst [vmem:[#allocation140_spill] sm:$0xff] %v13549_v40  ;;  %19550 = vst [vmem:[#allocation141_spill] sm:$0xff] %v13551_v15 }
 0x1c0   : > { %1921 = vrot.lane.b32.xlu1 %v13413_v18, %s12575_s14  ;;  %1919 = vrot.lane.b32.xlu0 %v13399_v14, %s12575_s14 }
 0x1c2   : > { %v13557_v9 = vpop.permute.xlu1 %1500  ;;  %v13559_v23 = vpop.permute.xlu0 %1498 }
 0x1c3   : > { %19551 = vst [vmem:[#allocation142_spill] sm:$0xff] %v13557_v9  ;;  %19552 = vst [vmem:[#allocation143_spill] sm:$0xff] %v13559_v23 }
 0x1c4   : > { %1925 = vrot.lane.b32.xlu1 %v13427_v7, %s12575_s14  ;;  %1923 = vrot.lane.b32.xlu0 %v13410_v17, %s12575_s14 }
 0x1c6   : > { %v13565_v40 = vpop.permute.xlu1 %1504  ;;  %v13567_v15 = vpop.permute.xlu0 %1502 }
 0x1c7   : > { %19553 = vst [vmem:[#allocation144_spill] sm:$0xff] %v13565_v40  ;;  %19554 = vst [vmem:[#allocation145_spill] sm:$0xff] %v13567_v15 }
 0x1c8   : > { %1929 = vrot.lane.b32.xlu1 %v13441_v4, %s12575_s14  ;;  %1927 = vrot.lane.b32.xlu0 %v13424_v8, %s12575_s14 }
 0x1ca   : > { %v13573_v26 = vpop.permute.xlu1 %1508  ;;  %v13575_v9 = vpop.permute.xlu0 %1506 }
 0x1cb   : > { %19555 = vst [vmem:[#allocation146_spill] sm:$0xff] %v13573_v26  ;;  %19556 = vst [vmem:[#allocation147_spill] sm:$0xff] %v13575_v9 }
 0x1cc   : > { %1933 = vrot.lane.b32.xlu1 %v13455_v1, %s12575_s14  ;;  %1931 = vrot.lane.b32.xlu0 %v13438_v5, %s12575_s14 }
 0x1ce   : > { %v13581_v23 = vpop.permute.xlu1 %1512  ;;  %v13583_v40 = vpop.permute.xlu0 %1510 }
 0x1cf   : > { %19557 = vst [vmem:[#allocation148_spill] sm:$0xff] %v13581_v23  ;;  %19558 = vst [vmem:[#allocation149_spill] sm:$0xff] %v13583_v40 }
 0x1d0   : > { %1937 = vrot.lane.b32.xlu1 %v13469_v20, %s12575_s14  ;;  %1935 = vrot.lane.b32.xlu0 %v13452_v3, %s12575_s14 }
 0x1d2   : > { %v13589_v15 = vpop.permute.xlu1 %1516  ;;  %v13591_v26 = vpop.permute.xlu0 %1514 }
 0x1d3   : > { %19559 = vst [vmem:[#allocation150_spill] sm:$0xff] %v13589_v15  ;;  %19560 = vst [vmem:[#allocation151_spill] sm:$0xff] %v13591_v26 }
 0x1d4   : > { %1941 = vrot.lane.b32.xlu1 %v13483_v28, %s12575_s14  ;;  %1939 = vrot.lane.b32.xlu0 %v13466_v2, %s12575_s14 }
 0x1d6   : > { %v13597_v9 = vpop.permute.xlu1 %1520  ;;  %v13599_v23 = vpop.permute.xlu0 %1518 }
 0x1d7   : > { %19561 = vst [vmem:[#allocation152_spill] sm:$0xff] %v13597_v9  ;;  %19562 = vst [vmem:[#allocation153_spill] sm:$0xff] %v13599_v23 }
 0x1d8   : > { %1945 = vrot.lane.b32.xlu1 %v13497_v25, %s12575_s14  ;;  %1943 = vrot.lane.b32.xlu0 %v13480_v48, %s12575_s14 }
 0x1da   : > { %v13605_v40 = vpop.permute.xlu1 %1524  ;;  %v13607_v15 = vpop.permute.xlu0 %1522 }
 0x1db   : > { %19563 = vst [vmem:[#allocation154_spill] sm:$0xff] %v13605_v40  ;;  %19564 = vst [vmem:[#allocation155_spill] sm:$0xff] %v13607_v15 }
 0x1dc   : > { %1949 = vrot.lane.b32.xlu1 %v13511_v47, %s12575_s14  ;;  %1947 = vrot.lane.b32.xlu0 %v13494_v0, %s12575_s14 }
 0x1de   : > { %v13613_v26 = vpop.permute.xlu1 %1631  ;;  %v13615_v9 = vpop.permute.xlu0 %1629 }
 0x1e0   : > { %1953 = vrot.lane.b32.xlu1 %v13525_v6, %s12575_s14  ;;  %1951 = vrot.lane.b32.xlu0 %v13508_v50, %s12575_s14 }
 0x1e2   : > { %v13621_v23 = vpop.permute.xlu1 %1635  ;;  %v13623_v40 = vpop.permute.xlu0 %1633 }
 0x1e4   : > { %1957 = vrot.lane.b32.xlu1 %v13539_v58, %s12575_s14  ;;  %1955 = vrot.lane.b32.xlu0 %v13522_v19, %s12575_s14 }
 0x1e6   : > { %v13629_v15 = vpop.permute.xlu1 %1639  ;;  %v13631_v46 = vpop.permute.xlu0 %1637 }
 0x1e7   : > { %19565 = vst [vmem:[#allocation156_spill] sm:$0xff] %v13629_v15 }
 0x1e8   : > { %2064 = vrot.lane.b32.xlu1 %v13399_v14, %s19320_s15  ;;  %1959 = vrot.lane.b32.xlu0 %v13536_v60, %s12575_s14  ;;  %s12585_s14 = smov 52  }
 0x1ea   : > { %v13637_v45 = vpop.permute.xlu1 %1643  ;;  %v13639_v42 = vpop.permute.xlu0 %1641 }
 0x1eb   : > { %19566 = vst [vmem:[#allocation157_spill] sm:$0xff] %v13637_v45  ;;  %19567 = vst [vmem:[#allocation158_spill] sm:$0xff] %v13639_v42 }
 0x1ec   : > { %2068 = vrot.lane.b32.xlu1 %v13410_v17, %s19320_s15  ;;  %2066 = vrot.lane.b32.xlu0 %v13413_v18, %s19320_s15 }
 0x1ee   : > { %v13645_v15 = vpop.permute.xlu1 %1647  ;;  %v13647_v37 = vpop.permute.xlu0 %1645 }
 0x1ef   : > { %19568 = vst [vmem:[#allocation159_spill] sm:$0xff] %v13645_v15  ;;  %19569 = vst [vmem:[#allocation160_spill] sm:$0xff] %v13647_v37 }
 0x1f0   : > { %2072 = vrot.lane.b32.xlu1 %v13424_v8, %s19320_s15  ;;  %2070 = vrot.lane.b32.xlu0 %v13427_v7, %s19320_s15 }
 0x1f2   : > { %v13653_v22 = vpop.permute.xlu1 %1651  ;;  %v13655_v45 = vpop.permute.xlu0 %1649 }
 0x1f3   : > { %19570 = vst [vmem:[#allocation161_spill] sm:$0xff] %v13653_v22  ;;  %19571 = vst [vmem:[#allocation162_spill] sm:$0xff] %v13655_v45 }
 0x1f4   : > { %2076 = vrot.lane.b32.xlu1 %v13438_v5, %s19320_s15  ;;  %2074 = vrot.lane.b32.xlu0 %v13441_v4, %s19320_s15 }
 0x1f6   : > { %v13661_v42 = vpop.permute.xlu1 %1655  ;;  %v13663_v15 = vpop.permute.xlu0 %1653 }
 0x1f7   : > { %19572 = vst [vmem:[#allocation163_spill] sm:$0xff] %v13661_v42  ;;  %19573 = vst [vmem:[#allocation164_spill] sm:$0xff] %v13663_v15 }
 0x1f8   : > { %2080 = vrot.lane.b32.xlu1 %v13452_v3, %s19320_s15  ;;  %2078 = vrot.lane.b32.xlu0 %v13455_v1, %s19320_s15 }
 0x1fa   : > { %v13669_v37 = vpop.permute.xlu1 %1659  ;;  %v13671_v22 = vpop.permute.xlu0 %1657 }
 0x1fb   : > { %19574 = vst [vmem:[#allocation165_spill] sm:$0xff] %v13669_v37  ;;  %19575 = vst [vmem:[#allocation166_spill] sm:$0xff] %v13671_v22 }
 0x1fc   : > { %2084 = vrot.lane.b32.xlu1 %v13466_v2, %s19320_s15  ;;  %2082 = vrot.lane.b32.xlu0 %v13469_v20, %s19320_s15 }
 0x1fe   : > { %v13677_v45 = vpop.permute.xlu1 %1663  ;;  %v13679_v42 = vpop.permute.xlu0 %1661 }
 0x1ff   : > { %19576 = vst [vmem:[#allocation167_spill] sm:$0xff] %v13677_v45  ;;  %19577 = vst [vmem:[#allocation168_spill] sm:$0xff] %v13679_v42 }
 0x200   : > { %2088 = vrot.lane.b32.xlu1 %v13480_v48, %s19320_s15  ;;  %2086 = vrot.lane.b32.xlu0 %v13483_v28, %s19320_s15 }
 0x202   : > { %v13685_v15 = vpop.permute.xlu1 %1667  ;;  %v13687_v37 = vpop.permute.xlu0 %1665 }
 0x203   : > { %19578 = vst [vmem:[#allocation169_spill] sm:$0xff] %v13685_v15  ;;  %19579 = vst [vmem:[#allocation170_spill] sm:$0xff] %v13687_v37 }
 0x204   : > { %2092 = vrot.lane.b32.xlu1 %v13494_v0, %s19320_s15  ;;  %2090 = vrot.lane.b32.xlu0 %v13497_v25, %s19320_s15 }
 0x206   : > { %v13693_v22 = vpop.permute.xlu1 %1774  ;;  %v13695_v45 = vpop.permute.xlu0 %1669 }
 0x207   : > { %19580 = vst [vmem:[#allocation171_spill] sm:$0xff] %v13695_v45 }
 0x208   : > { %2096 = vrot.lane.b32.xlu1 %v13508_v50, %s19320_s15  ;;  %2094 = vrot.lane.b32.xlu0 %v13511_v47, %s19320_s15 }
 0x20a   : > { %v13701_v42 = vpop.permute.xlu1 %1778  ;;  %v13703_v15 = vpop.permute.xlu0 %1776 }
 0x20c   : > { %2100 = vrot.lane.b32.xlu1 %v13522_v19, %s19320_s15  ;;  %2098 = vrot.lane.b32.xlu0 %v13525_v6, %s19320_s15 }
 0x20e   : > { %v13709_v0 = vpop.permute.xlu1 %1782  ;;  %v13711_v37 = vpop.permute.xlu0 %1780 }
 0x210   : > { %2104 = vrot.lane.b32.xlu1 %v13536_v60, %s19320_s15  ;;  %2102 = vrot.lane.b32.xlu0 %v13539_v58, %s19320_s15  ;;  %s19391_s15 = smov 24  }
 0x212   : > { %v13717_v47 = vpop.permute.xlu1 %1786  ;;  %v13719_v50 = vpop.permute.xlu0 %1784 }
 0x213   : > { %19581 = vst [vmem:[#allocation172_spill] sm:$0xff] %v13717_v47  ;;  %19582 = vst [vmem:[#allocation173_spill] sm:$0xff] %v13719_v50 }
 0x214   : > { %2211 = vrot.lane.b32.xlu1 %v13413_v18, %s12577_s16  ;;  %2209 = vrot.lane.b32.xlu0 %v13399_v14, %s12577_s16 }
 0x216   : > { %v13725_v6 = vpop.permute.xlu1 %1790  ;;  %v13727_v19 = vpop.permute.xlu0 %1788 }
 0x217   : > { %19583 = vst [vmem:[#allocation174_spill] sm:$0xff] %v13725_v6  ;;  %19584 = vst [vmem:[#allocation175_spill] sm:$0xff] %v13727_v19 }
 0x218   : > { %2215 = vrot.lane.b32.xlu1 %v13427_v7, %s12577_s16  ;;  %2213 = vrot.lane.b32.xlu0 %v13410_v17, %s12577_s16 }
 0x21a   : > { %v13733_v58 = vpop.permute.xlu1 %1794  ;;  %v13735_v60 = vpop.permute.xlu0 %1792 }
 0x21b   : > { %19585 = vst [vmem:[#allocation176_spill] sm:$0xff] %v13733_v58  ;;  %19586 = vst [vmem:[#allocation177_spill] sm:$0xff] %v13735_v60 }
 0x21c   : > { %2219 = vrot.lane.b32.xlu1 %v13441_v4, %s12577_s16  ;;  %2217 = vrot.lane.b32.xlu0 %v13424_v8, %s12577_s16 }
 0x21e   : > { %v13741_v45 = vpop.permute.xlu1 %1798  ;;  %v13743_v6 = vpop.permute.xlu0 %1796 }
 0x21f   : > { %19587 = vst [vmem:[#allocation178_spill] sm:$0xff] %v13741_v45  ;;  %19588 = vst [vmem:[#allocation179_spill] sm:$0xff] %v13743_v6 }
 0x220   : > { %2223 = vrot.lane.b32.xlu1 %v13455_v1, %s12577_s16  ;;  %2221 = vrot.lane.b32.xlu0 %v13438_v5, %s12577_s16 }
 0x222   : > { %v13749_v19 = vpop.permute.xlu1 %1802  ;;  %v13751_v58 = vpop.permute.xlu0 %1800 }
 0x223   : > { %19589 = vst [vmem:[#allocation180_spill] sm:$0xff] %v13749_v19  ;;  %19590 = vst [vmem:[#allocation181_spill] sm:$0xff] %v13751_v58 }
 0x224   : > { %2503 = vrot.lane.b32.xlu1 %v13410_v17, %s19354_s19  ;;  %2501 = vrot.lane.b32.xlu0 %v13413_v18, %s19354_s19 }
 0x226   : > { %v13757_v45 = vpop.permute.xlu1 %1806  ;;  %v13759_v6 = vpop.permute.xlu0 %1804 }
 0x227   : > { %19591 = vst [vmem:[#allocation182_spill] sm:$0xff] %v13757_v45  ;;  %19592 = vst [vmem:[#allocation183_spill] sm:$0xff] %v13759_v6 }
 0x228   : > { %2356 = vrot.lane.b32.xlu1 %v13413_v18, %s19372_s20  ;;  %2499 = vrot.lane.b32.xlu0 %v13399_v14, %s19354_s19 }
 0x22a   : > { %v13765_v19 = vpop.permute.xlu1 %1810  ;;  %v13767_v58 = vpop.permute.xlu0 %1808 }
 0x22b   : > { %19593 = vst [vmem:[#allocation184_spill] sm:$0xff] %v13765_v19  ;;  %19594 = vst [vmem:[#allocation185_spill] sm:$0xff] %v13767_v58 }
 0x22c   : > { %2505 = vrot.lane.b32.xlu1 %v13427_v7, %s19354_s19  ;;  %2358 = vrot.lane.b32.xlu0 %v13410_v17, %s19372_s20 }
 0x22e   : > { %v13773_v45 = vpop.permute.xlu1 %1814  ;;  %v13775_v6 = vpop.permute.xlu0 %1812 }
 0x22f   : > { %19595 = vst [vmem:[#allocation186_spill] sm:$0xff] %v13773_v45  ;;  %19596 = vst [vmem:[#allocation187_spill] sm:$0xff] %v13775_v6 }
 0x230   : > { %2354 = vrot.lane.b32.xlu1 %v13399_v14, %s19372_s20  ;;  %2507 = vrot.lane.b32.xlu0 %v13424_v8, %s19354_s19 }
 0x232   : > { %v13781_v60 = vpop.permute.xlu1 %1921  ;;  %v13783_v19 = vpop.permute.xlu0 %1919 }
 0x234   : > { %2362 = vrot.lane.b32.xlu1 %v13424_v8, %s19372_s20  ;;  %2360 = vrot.lane.b32.xlu0 %v13427_v7, %s19372_s20 }
 0x236   : > { %v13789_v58 = vpop.permute.xlu1 %1925  ;;  %v13791_v45 = vpop.permute.xlu0 %1923 }
 0x238   : > { %2227 = vrot.lane.b32.xlu1 %v13469_v20, %s12577_s16  ;;  %2225 = vrot.lane.b32.xlu0 %v13452_v3, %s12577_s16 }
 0x23a   : > { %v13797_v6 = vpop.permute.xlu1 %1929  ;;  %v13799_v50 = vpop.permute.xlu0 %1927 }
 0x23b   : > { %19597 = vst [vmem:[#allocation188_spill] sm:$0xff] %v13797_v6 }
 0x23c   : > { %2231 = vrot.lane.b32.xlu1 %v13483_v28, %s12577_s16  ;;  %2229 = vrot.lane.b32.xlu0 %v13466_v2, %s12577_s16 }
 0x23e   : > { %v13805_v47 = vpop.permute.xlu1 %1933  ;;  %v13807_v24 = vpop.permute.xlu0 %1931 }
 0x23f   : > { %19598 = vst [vmem:[#allocation189_spill] sm:$0xff] %v13805_v47  ;;  %19599 = vst [vmem:[#allocation190_spill] sm:$0xff] %v13807_v24 }
 0x240   : > { %2235 = vrot.lane.b32.xlu1 %v13497_v25, %s12577_s16  ;;  %2233 = vrot.lane.b32.xlu0 %v13480_v48, %s12577_s16 }
 0x242   : > { %v13813_v20 = vpop.permute.xlu1 %1937  ;;  %v13815_v6 = vpop.permute.xlu0 %1935 }
 0x243   : > { %19600 = vst [vmem:[#allocation191_spill] sm:$0xff] %v13813_v20  ;;  %19601 = vst [vmem:[#allocation192_spill] sm:$0xff] %v13815_v6 }
 0x244   : > { %3808 = vrot.lane.b32.xlu1 %v13410_v17, %s19386_s21  ;;  %3806 = vrot.lane.b32.xlu0 %v13413_v18, %s19386_s21 }
 0x246   : > { %v13821_v28 = vpop.permute.xlu1 %1941  ;;  %v13823_v2 = vpop.permute.xlu0 %1939 }
 0x247   : > { %19602 = vst [vmem:[#allocation193_spill] sm:$0xff] %v13821_v28  ;;  %19603 = vst [vmem:[#allocation194_spill] sm:$0xff] %v13823_v2 }
 0x248   : > { %3661 = vrot.lane.b32.xlu1 %v13413_v18, %s19346_s28  ;;  %3804 = vrot.lane.b32.xlu0 %v13399_v14, %s19386_s21 }
 0x24a   : > { %v13829_v25 = vpop.permute.xlu1 %1945  ;;  %v13831_v48 = vpop.permute.xlu0 %1943 }
 0x24b   : > { %19604 = vst [vmem:[#allocation195_spill] sm:$0xff] %v13829_v25  ;;  %19605 = vst [vmem:[#allocation196_spill] sm:$0xff] %v13831_v48 }
 0x24c   : > { %3810 = vrot.lane.b32.xlu1 %v13427_v7, %s19386_s21  ;;  %3663 = vrot.lane.b32.xlu0 %v13410_v17, %s19346_s28 }
 0x24e   : > { %v13837_v28 = vpop.permute.xlu1 %1949  ;;  %v13839_v20 = vpop.permute.xlu0 %1947 }
 0x24f   : > { %19606 = vst [vmem:[#allocation197_spill] sm:$0xff] %v13837_v28  ;;  %19607 = vst [vmem:[#allocation198_spill] sm:$0xff] %v13839_v20 }
 0x250   : > { %3659 = vrot.lane.b32.xlu1 %v13399_v14, %s19346_s28  ;;  %3812 = vrot.lane.b32.xlu0 %v13424_v8, %s19386_s21 }
 0x252   : > { %v13845_v2 = vpop.permute.xlu1 %1953  ;;  %v13847_v25 = vpop.permute.xlu0 %1951 }
 0x253   : > { %19608 = vst [vmem:[#allocation199_spill] sm:$0xff] %v13845_v2  ;;  %19609 = vst [vmem:[#allocation200_spill] sm:$0xff] %v13847_v25 }
 0x254   : > { %3518 = vrot.lane.b32.xlu1 %v13410_v17, %s19384_s29  ;;  %3516 = vrot.lane.b32.xlu0 %v13413_v18, %s19384_s29 }
 0x256   : > { %v13853_v28 = vpop.permute.xlu1 %1957  ;;  %v13855_v20 = vpop.permute.xlu0 %1955 }
 0x257   : > { %19610 = vst [vmem:[#allocation201_spill] sm:$0xff] %v13853_v28  ;;  %19611 = vst [vmem:[#allocation202_spill] sm:$0xff] %v13855_v20 }
 0x258   : > { %3667 = vrot.lane.b32.xlu1 %v13424_v8, %s19346_s28  ;;  %3665 = vrot.lane.b32.xlu0 %v13427_v7, %s19346_s28 }
 0x25a   : > { %v13861_v2 = vpop.permute.xlu1 %2064  ;;  %v13863_v25 = vpop.permute.xlu0 %1959 }
 0x25b   : > { %19612 = vst [vmem:[#allocation203_spill] sm:$0xff] %v13863_v25 }
 0x25c   : > { %3371 = vrot.lane.b32.xlu1 %v13413_v18, %s19344_s30  ;;  %3514 = vrot.lane.b32.xlu0 %v13399_v14, %s19384_s29 }
 0x25e   : > { %v13869_v28 = vpop.permute.xlu1 %2068  ;;  %v13871_v20 = vpop.permute.xlu0 %2066 }
 0x260   : > { %3520 = vrot.lane.b32.xlu1 %v13427_v7, %s19384_s29  ;;  %3373 = vrot.lane.b32.xlu0 %v13410_v17, %s19344_s30 }
 0x262   : > { %v13877_v48 = vpop.permute.xlu1 %2072  ;;  %v13879_v25 = vpop.permute.xlu0 %2070 }
 0x264   : > { %3369 = vrot.lane.b32.xlu1 %v13399_v14, %s19344_s30  ;;  %3522 = vrot.lane.b32.xlu0 %v13424_v8, %s19384_s29 }
 0x266   : > { %v13885_v47 = vpop.permute.xlu1 %2076  ;;  %v13887_v6 = vpop.permute.xlu0 %2074 }
 0x267   : > { %19613 = vst [vmem:[#allocation204_spill] sm:$0xff] %v13885_v47  ;;  %19614 = vst [vmem:[#allocation205_spill] sm:$0xff] %v13887_v6 }
 0x268   : > { %3228 = vrot.lane.b32.xlu1 %v13410_v17, %s19380_s12  ;;  %3226 = vrot.lane.b32.xlu0 %v13413_v18, %s19380_s12 }
 0x26a   : > { %v13893_v24 = vpop.permute.xlu1 %2080  ;;  %v13895_v21 = vpop.permute.xlu0 %2078 }
 0x26b   : > { %19615 = vst [vmem:[#allocation206_spill] sm:$0xff] %v13893_v24  ;;  %19616 = vst [vmem:[#allocation207_spill] sm:$0xff] %v13895_v21 }
 0x26c   : > { %3377 = vrot.lane.b32.xlu1 %v13424_v8, %s19344_s30  ;;  %3375 = vrot.lane.b32.xlu0 %v13427_v7, %s19344_s30 }
 0x26e   : > { %v13901_v47 = vpop.permute.xlu1 %2084  ;;  %v13903_v6 = vpop.permute.xlu0 %2082 }
 0x26f   : > { %19617 = vst [vmem:[#allocation208_spill] sm:$0xff] %v13901_v47  ;;  %19618 = vst [vmem:[#allocation209_spill] sm:$0xff] %v13903_v6 }
 0x270   : > { %3081 = vrot.lane.b32.xlu1 %v13413_v18, %s12585_s14  ;;  %3224 = vrot.lane.b32.xlu0 %v13399_v14, %s19380_s12 }
 0x272   : > { %v13909_v24 = vpop.permute.xlu1 %2088  ;;  %v13911_v21 = vpop.permute.xlu0 %2086 }
 0x273   : > { %19619 = vst [vmem:[#allocation210_spill] sm:$0xff] %v13909_v24  ;;  %19620 = vst [vmem:[#allocation211_spill] sm:$0xff] %v13911_v21 }
 0x274   : > { %3230 = vrot.lane.b32.xlu1 %v13427_v7, %s19380_s12  ;;  %3083 = vrot.lane.b32.xlu0 %v13410_v17, %s12585_s14 }
 0x276   : > { %v13917_v47 = vpop.permute.xlu1 %2092  ;;  %v13919_v6 = vpop.permute.xlu0 %2090 }
 0x277   : > { %19621 = vst [vmem:[#allocation212_spill] sm:$0xff] %v13917_v47  ;;  %19622 = vst [vmem:[#allocation213_spill] sm:$0xff] %v13919_v6 }
 0x278   : > { %3079 = vrot.lane.b32.xlu1 %v13399_v14, %s12585_s14  ;;  %3232 = vrot.lane.b32.xlu0 %v13424_v8, %s19380_s12 }
 0x27a   : > { %v13925_v34 = vpop.permute.xlu1 %2096  ;;  %v13927_v24 = vpop.permute.xlu0 %2094 }
 0x27b   : > { %19623 = vst [vmem:[#allocation214_spill] sm:$0xff] %v13925_v34  ;;  %19624 = vst [vmem:[#allocation215_spill] sm:$0xff] %v13927_v24 }
 0x27c   : > { %2938 = vrot.lane.b32.xlu1 %v13410_v17, %s12586_s25  ;;  %2936 = vrot.lane.b32.xlu0 %v13413_v18, %s12586_s25 }
 0x27e   : > { %v13933_v47 = vpop.permute.xlu1 %2100  ;;  %v13935_v6 = vpop.permute.xlu0 %2098 }
 0x27f   : > { %19625 = vst [vmem:[#allocation216_spill] sm:$0xff] %v13933_v47  ;;  %19626 = vst [vmem:[#allocation217_spill] sm:$0xff] %v13935_v6 }
 0x280   : > { %3087 = vrot.lane.b32.xlu1 %v13424_v8, %s12585_s14  ;;  %3085 = vrot.lane.b32.xlu0 %v13427_v7, %s12585_s14 }
 0x282   : > { %v13941_v34 = vpop.permute.xlu1 %2104  ;;  %v13943_v24 = vpop.permute.xlu0 %2102 }
 0x283   : > { %19627 = vst [vmem:[#allocation218_spill] sm:$0xff] %v13941_v34  ;;  %19628 = vst [vmem:[#allocation219_spill] sm:$0xff] %v13943_v24 }
 0x284   : > { %2791 = vrot.lane.b32.xlu1 %v13413_v18, %s12587_s24  ;;  %2934 = vrot.lane.b32.xlu0 %v13399_v14, %s12586_s25 }
 0x286   : > { %v2212_v47 = vpop.permute.xlu1 %2211  ;;  %v2210_v21 = vpop.permute.xlu0 %2209 }
 0x288   : > { %2940 = vrot.lane.b32.xlu1 %v13427_v7, %s12586_s25  ;;  %2793 = vrot.lane.b32.xlu0 %v13410_v17, %s12587_s24 }
 0x28a   : > { %v13953_v6 = vpop.permute.xlu1 %2215  ;;  %v13955_v34 = vpop.permute.xlu0 %2213 }
 0x28c   : > { %2789 = vrot.lane.b32.xlu1 %v13399_v14, %s12587_s24  ;;  %2942 = vrot.lane.b32.xlu0 %v13424_v8, %s12586_s25 }
 0x28e   : > { %v13961_v24 = vpop.permute.xlu1 %2219  ;;  %v13963_v36 = vpop.permute.xlu0 %2217 }
 0x28f   : > { %19629 = vst [vmem:[#allocation220_spill] sm:$0xff] %v13961_v24  ;;  %v13980_v24 = vld [vmem:[%s19632_s1 + $0x8] sm:$0xff] }
 0x290   : > { %2648 = vrot.lane.b32.xlu1 %v13410_v17, %s12588_s26  ;;  %2646 = vrot.lane.b32.xlu0 %v13413_v18, %s12588_s26  ;;  %19633 = vst [vmem:[#allocation223_spill] sm:$0xff] %v13980_v24 }
 0x291   : > { %12167 = vmatprep.mubr.msk.f32.mxu0 %vm4415_vm1, %v13980_v24  ;;  %12168 = vmatprep.mubr.msk.f32.mxu1 %vm4415_vm1, %v13980_v24 }
 0x292   : > { %v13969_v41 = vpop.permute.xlu1 %2223  ;;  %v13971_v44 = vpop.permute.xlu0 %2221 }
 0x293   : > { %19630 = vst [vmem:[#allocation221_spill] sm:$0xff] %v13969_v41  ;;  %19631 = vst [vmem:[#allocation222_spill] sm:$0xff] %v13971_v44 }
 0x294   : > { %2797 = vrot.lane.b32.xlu1 %v13424_v8, %s12587_s24  ;;  %2795 = vrot.lane.b32.xlu0 %v13427_v7, %s12587_s24 }
 0x296   : > { %v2504_v17 = vpop.permute.xlu1 %2503  ;;  %v2502_v18 = vpop.permute.xlu0 %2501 }
 0x297   : > { %v2543_v41 = vsel %vm2541_vm0, %v2502_v18, %v2504_v17 }
 0x298   : > { %2509 = vrot.lane.b32.xlu1 %v13441_v4, %s19354_s19  ;;  %2644 = vrot.lane.b32.xlu0 %v13399_v14, %s12588_s26 }
 0x299   : > { %4419 = vmatprep.subr.mxu0 %v2543_v41 }
 0x29a   : > { %v2357_v44 = vpop.permute.xlu1 %2356  ;;  %v2500_v43 = vpop.permute.xlu0 %2499 }
 0x29b   : > { %v2542_v51 = vsel %vm2541_vm0, %v2500_v43, %v2502_v18 }
 0x29c   : > { %2650 = vrot.lane.b32.xlu1 %v13427_v7, %s12588_s26  ;;  %2511 = vrot.lane.b32.xlu0 %v13438_v5, %s19354_s19 }
 0x29d   : > { %4420 = vmatpush1.msra.mxu0 %v2542_v51 }
 0x29e   : > { %v2506_v24 = vpop.permute.xlu1 %2505  ;;  %v2359_v29 = vpop.permute.xlu0 %2358 }
 0x29f   : > { %v2398_v39 = vsel %vm2396_vm2, %v2357_v44, %v2359_v29  ;;  %v2544_v51 = vsel %vm2541_vm0, %v2504_v17, %v2506_v24 }
 0x2a0   : > { %2364 = vrot.lane.b32.xlu1 %v13441_v4, %s19372_s20  ;;  %2652 = vrot.lane.b32.xlu0 %v13424_v8, %s12588_s26  ;;  %v2252_v8 = vsel %vm2251_vm3, %v2210_v21, %v2212_v47 }
 0x2a1   : > { %4421 = vmatprep.subr.mxu0 %v2398_v39  ;;  %v2253_v39 = vsel %vm2251_vm3, %v2212_v47, %v13955_v34  ;;  %v1963_v47 = vsel %vm19339_vm5, %v13781_v60, %v13791_v45 }
 0x2a2   : > { %v2355_v41 = vpop.permute.xlu1 %2354  ;;  %v14001_v43 = vpop.permute.xlu0 %2507 }
 0x2a3   : > { %v2397_v7 = vsel %vm2396_vm2, %v2355_v41, %v2357_v44  ;;  %v2545_v14 = vsel %vm2541_vm0, %v2506_v24, %v14001_v43  ;;  %v2108_v24 = vsel %vm19340_vm4, %v13871_v20, %v13869_v28  ;;  %v2107_v41 = vsel %vm19340_vm4, %v13861_v2, %v13871_v20 }
 0x2a4   : > { %2513 = vrot.lane.b32.xlu1 %v13455_v1, %s19354_s19  ;;  %2366 = vrot.lane.b32.xlu0 %v13438_v5, %s19372_s20  ;;  %v1818_v2 = vsel %vm1816_vm6, %v13703_v15, %v13701_v42 }
 0x2a5   : > { %4422 = vmatpush1.msra.mxu0 %v2397_v7  ;;  %4490 = vmatprep.subr.mxu1 %v2545_v14  ;;  %v1962_v14 = vsel %vm19339_vm5, %v13783_v19, %v13781_v60  ;;  %v1817_v19 = vsel %vm1816_vm6, %v13693_v22, %v13703_v15  ;;  %v2110_v60 = vsel %vm19340_vm4, %v13879_v25, %v13877_v48 }
 0x2a6   : > { %4423 = vmatprep.subr.mxu0 %v2253_v39  ;;  %v14013_v44 = vpop.permute.xlu1 %2362  ;;  %v2361_v18 = vpop.permute.xlu0 %2360  ;;  %4491 = vmatpush1.msra.mxu1 %v2544_v51  ;;  %v2254_v51 = vsel %vm2251_vm3, %v13955_v34, %v13953_v6  ;;  %v1673_v34 = vsel %vm19341_vm7, %v13613_v26, %v13623_v40  ;;  %v2109_v22 = vsel %vm19340_vm4, %v13869_v28, %v13879_v25 }
 0x2a7   : > { %4424 = vmatpush1.msra.mxu0 %v2252_v8  ;;  %v2400_v17 = vsel %vm2396_vm2, %v2361_v18, %v14013_v44  ;;  %v2399_v21 = vsel %vm2396_vm2, %v2359_v29, %v2361_v18  ;;  %v2255_v29 = vsel %vm2251_vm3, %v13953_v6, %v13963_v36  ;;  %v1965_v15 = vsel %vm19339_vm5, %v13789_v58, %v13799_v50 }
 0x2a8   : > { %4425 = vmatprep.subr.mxu0 %v2108_v24  ;;  %2368 = vrot.lane.b32.xlu1 %v13455_v1, %s19372_s20  ;;  %v1528_v8 = vsel %vm1526_vm8, %v13529_v55, %v13527_v54  ;;  %v1964_v28 = vsel %vm19339_vm5, %v13791_v45, %v13789_v58  ;;  %v1820_v45 = vsel %vm1816_vm6, %v13711_v37, %v13709_v0 }
 0x2a9   : > { %2515 = vrot.lane.b32.xlu0 %v13452_v3, %s19354_s19  ;;  %4426 = vmatpush1.msra.mxu0 %v2107_v41  ;;  %v1675_v58 = vsel %vm19341_vm7, %v13621_v23, %v13631_v46  ;;  %v1238_v18 = vsel %vm19342_vm10, %v13304_v30, %v13302_v35  ;;  %v948_v24 = vsel %vm19331_vm12, %v13136_v31, %v13134_v57 }
 0x2aa   : > { %4492 = vmatprep.subr.mxu1 %v2400_v17  ;;  %4427 = vmatprep.subr.mxu0 %v1963_v47  ;;  %v14032_v7 = vpop.permute.xlu1 %2227  ;;  %v14037_v20 = vpop.permute.xlu0 %2225  ;;  %v14145_v17 = vld [vmem:[%s12697_s22 + $0x40] sm:$0xff] }
 0x2ab   : > { %4493 = vmatpush1.msra.mxu1 %v2399_v21  ;;  %4428 = vmatpush1.msra.mxu0 %v1962_v14  ;;  %v14174_v21 = vld [vmem:[%s12697_s22 + $0x38] sm:$0xff] }
 0x2ac   : > { %4494 = vmatprep.subr.mxu1 %v2255_v29  ;;  %4429 = vmatprep.subr.mxu0 %v1818_v2  ;;  %v19635_v29 = vld [vmem:[#allocation92_spill] sm:$0xff]  ;;  %v19636_v2 = vld [vmem:[#allocation90_spill] sm:$0xff] }
 0x2ad   : > { %4495 = vmatpush1.msra.mxu1 %v2254_v51  ;;  %3814 = vrot.lane.b32.xlu1 %v13441_v4, %s19386_s21  ;;  %v1095_v51 = vsel %vm19330_vm11, %v19636_v2, %v19635_v29 }
 0x2ae   : > { %2370 = vrot.lane.b32.xlu0 %v13452_v3, %s19372_s20  ;;  %4430 = vmatpush1.msra.mxu0 %v1817_v19  ;;  %v14061_v6 = vpop.permute.xlu1 %2231  ;;  %v14063_v39 = vpop.permute.xlu0 %2229  ;;  %v1672_v3 = vsel %vm19341_vm7, %v13615_v9, %v13613_v26  ;;  %v1527_v26 = vsel %vm1526_vm8, %v13513_v62, %v13529_v55  ;;  %v1819_v55 = vsel %vm1816_vm6, %v13701_v42, %v13711_v37  ;;  %v19637_v19 = vld [vmem:[#allocation33_spill] sm:$0xff] }
 0x2af   : > { %4496 = vmatprep.subr.mxu1 %v2110_v60  ;;  %4431 = vmatprep.subr.mxu0 %v1673_v34  ;;  %v1382_v62 = vsel %vm1381_vm9, %v13384_v11, %v13382_v10  ;;  %v1674_v37 = vsel %vm19341_vm7, %v13623_v40, %v13621_v23  ;;  %v1237_v11 = vsel %vm19342_vm10, %v13294_v49, %v13304_v30  ;;  %v14136_v49 = vld [vmem:[%s12697_s22 + $0x28] sm:$0xff]  ;;  %v19639_v34 = vld [vmem:[#allocation31_spill] sm:$0xff] }
 0x2b0   : > { %4497 = vmatpush1.msra.mxu1 %v2109_v22  ;;  %4432 = vmatpush1.msra.mxu0 %v1672_v3  ;;  %v1530_v23 = vsel %vm1526_vm8, %v13543_v33, %v13541_v27  ;;  %v1093_v40 = vsel %vm19330_vm11, %v13214_v32, %v13224_v59  ;;  %v1092_v30 = vsel %vm19330_vm11, %v13216_v52, %v13214_v32  ;;  %v19638_v60 = vld [vmem:[#allocation34_spill] sm:$0xff]  ;;  %v19640_v3 = vld [vmem:[#allocation72_spill] sm:$0xff] }
 0x2b1   : > { %4498 = vmatprep.subr.mxu1 %v1965_v15  ;;  %4433 = vmatprep.subr.mxu0 %v1528_v8  ;;  %v1384_v32 = vsel %vm1381_vm9, %v13392_v13, %v13390_v12  ;;  %v947_v52 = vsel %vm19331_vm12, %v13126_v56, %v13136_v31  ;;  %v1239_v31 = vsel %vm19342_vm10, %v13302_v35, %v13312_v53  ;;  %v19634_v56 = vld [vmem:[#allocation53_spill] sm:$0xff] }
 0x2b2   : > { %4499 = vmatpush1.msra.mxu1 %v1964_v28  ;;  %3669 = vrot.lane.b32.xlu1 %v13441_v4, %s19346_s28  ;;  %v14085_v9 = vpop.permute.xlu1 %2235  ;;  %v14087_v25 = vpop.permute.xlu0 %2233  ;;  %v1383_v4 = vsel %vm1381_vm9, %v13382_v10, %v13392_v13  ;;  %v802_v13 = vsel %vm19332_vm13, %v19634_v56, %v13046_v63  ;;  %v658_v35 = vsel %vm656_vm14, %v19638_v60, %v19637_v19  ;;  %v19641_v15 = vld [vmem:[#allocation73_spill] sm:$0xff]  ;;  %v19642_v28 = vld [vmem:[#allocation11_spill] sm:$0xff] }
 0x2b3   : > { %3816 = vrot.lane.b32.xlu0 %v13438_v5, %s19386_s21  ;;  %4434 = vmatpush1.msra.mxu0 %v1527_v26  ;;  %v657_v22 = vsel %vm656_vm14, %v19639_v34, %v19638_v60  ;;  %v950_v8 = vsel %vm19331_vm12, %v19641_v15, %v19640_v3  ;;  %v19643_v26 = vld [vmem:[#allocation14_spill] sm:$0xff] }
 0x2b4   : > { %4500 = vmatprep.subr.mxu1 %v1820_v45  ;;  %4435 = vmatprep.subr.mxu0 %v1383_v4  ;;  %v388_v45 = vld [vmem:[%s12697_s22 + $0x8] sm:$0xff] }
 0x2b5   : > { %4501 = vmatpush1.msra.mxu1 %v1819_v55  ;;  %4436 = vmatpush1.msra.mxu0 %v1382_v62  ;;  %v949_v62 = vsel %vm19331_vm12, %v13134_v57, %v19641_v15  ;;  %vm19334_vm12 = vcmask 236544  }
 0x2b6   : > { %4502 = vmatprep.subr.mxu1 %v1675_v58  ;;  %4437 = vmatprep.subr.mxu0 %v1238_v18  ;;  %v14112_v42 = vpop.permute.xlu1 %3808  ;;  %v14114_v10 = vpop.permute.xlu0 %3806  ;;  %v19644_v58 = vld [vmem:[#allocation12_spill] sm:$0xff] }
 0x2b7   : > { %4503 = vmatpush1.msra.mxu1 %v1674_v37  ;;  %3818 = vrot.lane.b32.xlu1 %v13455_v1, %s19386_s21  ;;  %v1529_v1 = vsel %vm1526_vm8, %v13527_v54, %v13543_v33  ;;  %v1240_v54 = vsel %vm19342_vm10, %v13312_v53, %v13310_v38  ;;  %v14187_v53 = vld [vmem:[%s12697_s22 + $0x30] sm:$0xff]  ;;  %v512_v18 = vsel %vm19343_vm15, %v19644_v58, %v19643_v26  ;;  %v19645_v37 = vld [vmem:[#allocation56_spill] sm:$0xff] }
 0x2b8   : > { %3671 = vrot.lane.b32.xlu0 %v13438_v5, %s19346_s28  ;;  %4438 = vmatpush1.msra.mxu0 %v1237_v11  ;;  %v1385_v5 = vsel %vm1381_vm9, %v13390_v12, %v13403_v16  ;;  %v803_v12 = vsel %vm19332_vm13, %v13046_v63, %v13056_v61  ;;  %v1094_v63 = vsel %vm19330_vm11, %v13224_v59, %v19636_v2  ;;  %v19646_v11 = vld [vmem:[#allocation54_spill] sm:$0xff]  ;;  %vm19333_vm11 = vcmask 228352   ;;  %v390_v2 = vld [vmem:[%s12697_s22 + $0x18] sm:$0xff] }
 0x2b9   : > { %4504 = vmatprep.subr.mxu1 %v1530_v23  ;;  %4439 = vmatprep.subr.mxu0 %v1093_v40  ;;  %v513_v59 = vsel %vm19343_vm15, %v19643_v26, %v19642_v28  ;;  %v805_v23 = vsel %vm19332_vm13, %v19646_v11, %v19645_v37  ;;  %v387_v40 = vld [vmem:[%s12697_s22] sm:$0xff] }
 0x2ba   : > { %4505 = vmatpush1.msra.mxu1 %v1529_v1  ;;  %4440 = vmatpush1.msra.mxu0 %v1092_v30  ;;  %v14147_v41 = vpop.permute.xlu1 %3661  ;;  %v14149_v33 = vpop.permute.xlu0 %3804  ;;  %v804_v1 = vsel %vm19332_vm13, %v13056_v61, %v19646_v11  ;;  %v3848_v61 = vsel %vm19333_vm11, %v14114_v10, %v14112_v42  ;;  %vm19335_vm13 = vcmask 244736  }
 0x2bb   : > { %4506 = vmatprep.subr.mxu1 %v1385_v5  ;;  %4441 = vmatprep.subr.mxu0 %v948_v24  ;;  %v19647_v5 = vld [vmem:[#allocation35_spill] sm:$0xff]  ;;  %v19648_v24 = vld [vmem:[#allocation36_spill] sm:$0xff] }
 0x2bc   : > { %4507 = vmatpush1.msra.mxu1 %v1384_v32  ;;  %3524 = vrot.lane.b32.xlu1 %v14136_v49, %s19384_s29  ;;  %v660_v32 = vsel %vm656_vm14, %v19648_v24, %v19647_v5 }
 0x2bd   : > { %3820 = vrot.lane.b32.xlu0 %v14145_v17, %s19386_s21  ;;  %4442 = vmatpush1.msra.mxu0 %v947_v52  ;;  %v659_v52 = vsel %vm656_vm14, %v19637_v19, %v19648_v24  ;;  %v389_v19 = vld [vmem:[%s12697_s22 + $0x10] sm:$0xff] }
 0x2be   : > { %4508 = vmatprep.subr.mxu1 %v1240_v54  ;;  %4443 = vmatprep.subr.mxu0 %v803_v12  ;;  %v14176_v47 = vpop.permute.xlu1 %3810  ;;  %v14178_v14 = vpop.permute.xlu0 %3663  ;;  %v3847_v54 = vsel %vm19333_vm11, %v14149_v33, %v14114_v10  ;;  %v19649_v12 = vld [vmem:[#allocation16_spill] sm:$0xff] }
 0x2bf   : > { %4509 = vmatpush1.msra.mxu1 %v1239_v31  ;;  %4444 = vmatpush1.msra.mxu0 %v802_v13  ;;  %v19650_v31 = vld [vmem:[#allocation13_spill] sm:$0xff]  ;;  %v3703_v13 = vsel %vm19334_vm12, %v14147_v41, %v14178_v14 }
 0x2c0   : > { %4510 = vmatprep.subr.mxu1 %v1095_v51  ;;  %4445 = vmatprep.subr.mxu0 %v658_v35  ;;  %v515_v56 = vsel %vm19343_vm15, %v19650_v31, %v19649_v12  ;;  %v514_v51 = vsel %vm19343_vm15, %v19642_v28, %v19650_v31 }
 0x2c1   : > { %4511 = vmatpush1.msra.mxu1 %v1094_v63  ;;  %3673 = vrot.lane.b32.xlu1 %v14174_v21, %s19346_s28  ;;  %v3849_v63 = vsel %vm19333_vm11, %v14112_v42, %v14176_v47 }
 0x2c2   : > { %3526 = vrot.lane.b32.xlu0 %v14187_v53, %s19384_s29  ;;  %4446 = vmatpush1.msra.mxu0 %v657_v22  ;;  %v3660_v4 = vpop.permute.xlu1 %3659  ;;  %v14206_v55 = vpop.permute.xlu0 %3812 }
 0x2c3   : > { %4512 = vmatprep.subr.mxu1 %v950_v8  ;;  %4447 = vmatprep.subr.mxu0 %v513_v59  ;;  %v3702_v10 = vsel %vm19334_vm12, %v3660_v4, %v14147_v41  ;;  %v3850_v41 = vsel %vm19333_vm11, %v14176_v47, %v14206_v55  ;;  %vm19336_vm11 = vcmask 252928  }
 0x2c4   : > { %4513 = vmatpush1.msra.mxu1 %v949_v62  ;;  %4448 = vmatpush1.msra.mxu0 %v512_v18 }
 0x2c5   : > { %4514 = vmatprep.subr.mxu1 %v805_v23  ;;  %4449 = vmatprep.subr.mxu0 %v388_v45 }
 0x2c6   : > { %4515 = vmatpush1.msra.mxu1 %v804_v1  ;;  %3379 = vrot.lane.b32.xlu1 %v14136_v49, %s19344_s30  ;;  %v3519_v57 = vpop.permute.xlu1 %3518  ;;  %v3517_v30 = vpop.permute.xlu0 %3516 }
 0x2c7   : > { %3675 = vrot.lane.b32.xlu0 %v14145_v17, %s19346_s28  ;;  %4450 = vmatpush1.msra.mxu0 %v387_v40  ;;  %v3558_v35 = vsel %vm19335_vm13, %v3517_v30, %v3519_v57 }
 0x2c8   : > { %4516 = vmatprep.subr.mxu1 %v660_v32  ;;  %4465 = vmatprep.subr.mxu0 %v3848_v61 }
 0x2c9   : > { %4517 = vmatpush1.msra.mxu1 %v659_v52  ;;  %4466 = vmatpush2.msra.mxu0 %v3847_v54 }
 0x2ca   : > { %4518 = vmatprep.subr.mxu1 %v515_v56  ;;  %4467 = vmatprep.subr.mxu0 %v3703_v13  ;;  %v14250_v33 = vpop.permute.xlu1 %3667  ;;  %v3666_v60 = vpop.permute.xlu0 %3665 }
 0x2cb   : > { %4519 = vmatpush1.msra.mxu1 %v514_v51  ;;  %3528 = vrot.lane.b32.xlu1 %v14174_v21, %s19384_s29  ;;  %v3705_v34 = vsel %vm19334_vm12, %v3666_v60, %v14250_v33  ;;  %v3704_v22 = vsel %vm19334_vm12, %v14178_v14, %v3666_v60  ;;  %vm19338_vm12 = vcmask 261120  }
 0x2cc   : > { %3381 = vrot.lane.b32.xlu0 %v14187_v53, %s19344_s30  ;;  %4520 = vmatprep.subr.mxu1 %v390_v2 }
 0x2cd   : > { %4521 = vmatpush1.msra.mxu1 %v389_v19  ;;  %4468 = vmatpush2.msra.mxu0 %v3702_v10 }
 0x2ce   : > { %4536 = vmatprep.subr.mxu1 %v3850_v41  ;;  %4469 = vmatprep.subr.mxu0 %v3558_v35  ;;  %v3372_v15 = vpop.permute.xlu1 %3371  ;;  %v3515_v8 = vpop.permute.xlu0 %3514 }
 0x2cf   : > { %3234 = vrot.lane.b32.xlu1 %v14136_v49, %s19380_s12  ;;  %4537 = vmatpush2.msra.mxu1 %v3849_v63  ;;  %v3557_v42 = vsel %vm19335_vm13, %v3515_v8, %v3517_v30 }
 0x2d0   : > { %3530 = vrot.lane.b32.xlu0 %v14145_v17, %s19384_s29  ;;  %4538 = vmatprep.subr.mxu1 %v3705_v34 }
 0x2d1   : > { %4539 = vmatpush2.msra.mxu1 %v3704_v22  ;;  %4470 = vmatpush2.msra.mxu0 %v3557_v42  ;;  %v14336_v22 = vld [vmem:[%s12697_s22 + $0x48] sm:$0xff] }
 0x2d2   : > { %v3521_v47 = vpop.permute.xlu1 %3520  ;;  %v3374_v28 = vpop.permute.xlu0 %3373 }
 0x2d3   : > { %3383 = vrot.lane.b32.xlu1 %v14174_v21, %s19344_s30  ;;  %v3413_v14 = vsel %vm19336_vm11, %v3372_v15, %v3374_v28  ;;  %v3559_v45 = vsel %vm19335_vm13, %v3519_v57, %v3521_v47 }
 0x2d4   : > { %3236 = vrot.lane.b32.xlu0 %v14187_v53, %s19380_s12  ;;  %4471 = vmatprep.subr.mxu0 %v3413_v14 }
 0x2d6   : > { %v3370_v26 = vpop.permute.xlu1 %3369  ;;  %v14277_v59 = vpop.permute.xlu0 %3522 }
 0x2d7   : > { %3089 = vrot.lane.b32.xlu1 %v14136_v49, %s12585_s14  ;;  %v3560_v4 = vsel %vm19335_vm13, %v3521_v47, %v14277_v59  ;;  %v3412_v62 = vsel %vm19336_vm11, %v3370_v26, %v3372_v15  ;;  %vm19337_vm13 = vcmask 424960   ;;  %v14344_v47 = vld [vmem:[%s12697_s22 + $0x50] sm:$0xff] }
 0x2d8   : > { %3385 = vrot.lane.b32.xlu0 %v14145_v17, %s19344_s30  ;;  %4540 = vmatprep.subr.mxu1 %v3560_v4 }
 0x2d9   : > { %4472 = vmatpush2.msra.mxu0 %v3412_v62  ;;  %4541 = vmatpush2.msra.mxu1 %v3559_v45 }
 0x2da   : > { %v3229_v58 = vpop.permute.xlu1 %3228  ;;  %v3227_v18 = vpop.permute.xlu0 %3226 }
 0x2db   : > { %3238 = vrot.lane.b32.xlu1 %v14174_v21, %s19380_s12  ;;  %v3268_v11 = vsel %vm19338_vm12, %v3227_v18, %v3229_v58 }
 0x2dc   : > { %3091 = vrot.lane.b32.xlu0 %v14187_v53, %s12585_s14  ;;  %4473 = vmatprep.subr.mxu0 %v3268_v11  ;;  %v14362_v11 = vld [vmem:[%s12697_s22 + $0x58] sm:$0xff] }
 0x2de   : > { %v14292_v23 = vpop.permute.xlu1 %3377  ;;  %v3376_v40 = vpop.permute.xlu0 %3375 }
 0x2df   : > { %2944 = vrot.lane.b32.xlu1 %v14136_v49, %s12586_s25  ;;  %v3415_v1 = vsel %vm19336_vm11, %v3376_v40, %v14292_v23  ;;  %v3414_v57 = vsel %vm19336_vm11, %v3374_v28, %v3376_v40  ;;  %vm2976_vm11 = vcmask 433152  }
 0x2e0   : > { %3240 = vrot.lane.b32.xlu0 %v14145_v17, %s19380_s12  ;;  %4542 = vmatprep.subr.mxu1 %v3415_v1 }
 0x2e1   : > { %4543 = vmatpush2.msra.mxu1 %v3414_v57 }
 0x2e2   : > { %v3082_v30 = vpop.permute.xlu1 %3081  ;;  %v3225_v24 = vpop.permute.xlu0 %3224 }
 0x2e3   : > { %3093 = vrot.lane.b32.xlu1 %v14174_v21, %s12585_s14  ;;  %v3267_v32 = vsel %vm19338_vm12, %v3225_v24, %v3227_v18 }
 0x2e4   : > { %2946 = vrot.lane.b32.xlu0 %v14187_v53, %s12586_s25  ;;  %4474 = vmatpush2.msra.mxu0 %v3267_v32 }
 0x2e6   : > { %v3231_v61 = vpop.permute.xlu1 %3230  ;;  %v3084_v52 = vpop.permute.xlu0 %3083 }
 0x2e7   : > { %2799 = vrot.lane.b32.xlu1 %v14136_v49, %s12587_s24  ;;  %v3123_v54 = vsel %vm19337_vm13, %v3082_v30, %v3084_v52  ;;  %v3269_v13 = vsel %vm19338_vm12, %v3229_v58, %v3231_v61 }
 0x2e8   : > { %3095 = vrot.lane.b32.xlu0 %v14145_v17, %s12585_s14  ;;  %4475 = vmatprep.subr.mxu0 %v3123_v54 }
 0x2ea   : > { %v3080_v31 = vpop.permute.xlu1 %3079  ;;  %v14311_v56 = vpop.permute.xlu0 %3232 }
 0x2eb   : > { %2948 = vrot.lane.b32.xlu1 %v14174_v21, %s12586_s25  ;;  %v3270_v2 = vsel %vm19338_vm12, %v3231_v61, %v14311_v56  ;;  %v3122_v51 = vsel %vm19337_vm13, %v3080_v31, %v3082_v30  ;;  %vm2686_vm12 = vcmask 449536   ;;  %v14370_v30 = vld [vmem:[%s12697_s22 + $0x60] sm:$0xff] }
 0x2ec   : > { %2801 = vrot.lane.b32.xlu0 %v14187_v53, %s12587_s24  ;;  %4544 = vmatprep.subr.mxu1 %v3270_v2  ;;  %v14384_v31 = vld [vmem:[%s19632_s1] sm:$0xff] }
 0x2ed   : > { %4476 = vmatpush2.msra.mxu0 %v3122_v51  ;;  %4545 = vmatpush2.msra.mxu1 %v3269_v13 }
 0x2ee   : > { %v2939_v19 = vpop.permute.xlu1 %2938  ;;  %v2937_v10 = vpop.permute.xlu0 %2936 }
 0x2ef   : > { %2654 = vrot.lane.b32.xlu1 %v14136_v49, %s12588_s26  ;;  %v2978_v60 = vsel %vm2976_vm11, %v2937_v10, %v2939_v19 }
 0x2f0   : > { %2950 = vrot.lane.b32.xlu0 %v14145_v17, %s12586_s25  ;;  %4477 = vmatprep.subr.mxu0 %v2978_v60 }
 0x2f2   : > { %v14326_v35 = vpop.permute.xlu1 %3087  ;;  %v3086_v63 = vpop.permute.xlu0 %3085 }
 0x2f3   : > { %2803 = vrot.lane.b32.xlu1 %v14174_v21, %s12587_s24  ;;  %v3125_v41 = vsel %vm19337_vm13, %v3086_v63, %v14326_v35  ;;  %v3124_v34 = vsel %vm19337_vm13, %v3084_v52, %v3086_v63  ;;  %vm2831_vm13 = vcmask 441344  }
 0x2f4   : > { %2656 = vrot.lane.b32.xlu0 %v14187_v53, %s12588_s26  ;;  %4546 = vmatprep.subr.mxu1 %v3125_v41 }
 0x2f5   : > { %4547 = vmatpush2.msra.mxu1 %v3124_v34 }
 0x2f6   : > { %v2792_v15 = vpop.permute.xlu1 %2791  ;;  %v2935_v8 = vpop.permute.xlu0 %2934 }
 0x2f7   : > { %2517 = vrot.lane.b32.xlu1 %v14336_v22, %s19354_s19  ;;  %v2977_v42 = vsel %vm2976_vm11, %v2935_v8, %v2937_v10 }
 0x2f8   : > { %2805 = vrot.lane.b32.xlu0 %v14145_v17, %s12587_s24  ;;  %4478 = vmatpush2.msra.mxu0 %v2977_v42 }
 0x2fa   : > { %v2941_v28 = vpop.permute.xlu1 %2940  ;;  %v2794_v14 = vpop.permute.xlu0 %2793 }
 0x2fb   : > { %2658 = vrot.lane.b32.xlu1 %v14174_v21, %s12588_s26  ;;  %v2833_v26 = vsel %vm2831_vm13, %v2792_v15, %v2794_v14  ;;  %v2979_v62 = vsel %vm2976_vm11, %v2939_v19, %v2941_v28  ;;  %v19651_v19 = vld [vmem:[#allocation223_spill] sm:$0xff] }
 0x2fc   : > { %2519 = vrot.lane.b32.xlu0 %v14344_v47, %s19354_s19  ;;  %4479 = vmatprep.subr.mxu0 %v2833_v26  ;;  %v19653_v26 = vld [vmem:[#allocation220_spill] sm:$0xff] }
 0x2fe   : > { %v2790_v45 = vpop.permute.xlu1 %2789  ;;  %v14351_v4 = vpop.permute.xlu0 %2942 }
 0x2ff   : > { %2372 = vrot.lane.b32.xlu1 %v14336_v22, %s19372_s20  ;;  %v2980_v58 = vsel %vm2976_vm11, %v2941_v28, %v14351_v4  ;;  %v2832_v18 = vsel %vm2831_vm13, %v2790_v45, %v2792_v15 }
 0x300   : > { %2660 = vrot.lane.b32.xlu0 %v14145_v17, %s12588_s26  ;;  %4548 = vmatprep.subr.mxu1 %v2980_v58  ;;  %v2256_v58 = vsel %vm2251_vm3, %v13963_v36, %v19653_v26 }
 0x301   : > { %4480 = vmatpush2.msra.mxu0 %v2832_v18  ;;  %4549 = vmatpush2.msra.mxu1 %v2979_v62 }
 0x302   : > { %v2649_v40 = vpop.permute.xlu1 %2648  ;;  %v2647_v1 = vpop.permute.xlu0 %2646 }
 0x303   : > { %2521 = vrot.lane.b32.xlu1 %v14362_v11, %s19354_s19  ;;  %v2688_v57 = vsel %vm2686_vm12, %v2647_v1, %v2649_v40 }
 0x304   : > { %2374 = vrot.lane.b32.xlu0 %v14344_v47, %s19372_s20  ;;  %4481 = vmatprep.subr.mxu0 %v2688_v57 }
 0x306   : > { %v14372_v17 = vpop.permute.xlu1 %2797  ;;  %v2796_v24 = vpop.permute.xlu0 %2795 }
 0x307   : > { %2376 = vrot.lane.b32.xlu1 %v14362_v11, %s19372_s20  ;;  %v2835_v32 = vsel %vm2831_vm13, %v2796_v24, %v14372_v17  ;;  %v2834_v61 = vsel %vm2831_vm13, %v2794_v14, %v2796_v24  ;;  %v19652_v14 = vld [vmem:[#allocation222_spill] sm:$0xff] }
 0x308   : > { %2523 = vrot.lane.b32.xlu0 %v14370_v30, %s19354_s19  ;;  %4550 = vmatprep.subr.mxu1 %v2835_v32  ;;  %v2257_v45 = vsel %vm2251_vm3, %v19653_v26, %v19652_v14  ;;  %v19656_v32 = vld [vmem:[#allocation190_spill] sm:$0xff] }
 0x309   : > { %4551 = vmatpush2.msra.mxu1 %v2834_v61  ;;  %v19657_v61 = vld [vmem:[#allocation188_spill] sm:$0xff] }
 0x30a   : > { %v2510_v52 = vpop.permute.xlu1 %2509  ;;  %v2645_v54 = vpop.permute.xlu0 %2644 }
 0x30b   : > { %3822 = vrot.lane.b32.xlu1 %v14336_v22, %s19386_s21  ;;  %v2687_v13 = vsel %vm2686_vm12, %v2645_v54, %v2647_v1  ;;  %v2546_v60 = vsel %vm2541_vm0, %v14001_v43, %v2510_v52  ;;  %v19655_v1 = vld [vmem:[#allocation205_spill] sm:$0xff]  ;;  %v1966_v54 = vsel %vm19339_vm5, %v13799_v50, %v19657_v61 }
 0x30c   : > { %2378 = vrot.lane.b32.xlu0 %v14370_v30, %s19372_s20  ;;  %4482 = vmatpush2.msra.mxu0 %v2687_v13  ;;  %v2111_v36 = vsel %vm19340_vm4, %v13877_v48, %v19655_v1  ;;  %v19658_v48 = vld [vmem:[#allocation172_spill] sm:$0xff] }
 0x30d   : > { %4484 = vmatmul.mubr.f32.vlgmr.msra.gmra.mxu0 %v14384_v31 }
 0x30e   : > { %v2651_v2 = vpop.permute.xlu1 %2650  ;;  %v2512_v51 = vpop.permute.xlu0 %2511  ;;  %12169 = vmatprep.mubr.msk.f32.mxu0 %vm4415_vm1, %v19651_v19 }
 0x30f   : > { %3677 = vrot.lane.b32.xlu1 %v14336_v22, %s19346_s28  ;;  %v2547_v10 = vsel %vm2541_vm0, %v2510_v52, %v2512_v51  ;;  %v2689_v34 = vsel %vm2686_vm12, %v2649_v40, %v2651_v2  ;;  %v19654_v40 = vld [vmem:[#allocation204_spill] sm:$0xff]  ;;  %v1967_v52 = vsel %vm19339_vm5, %v19657_v61, %v19656_v32 }
 0x310   : > { %3824 = vrot.lane.b32.xlu0 %v14344_v47, %s19386_s21  ;;  %4561 = vmatprep.subr.mxu0 %v2547_v10 }
 0x311   : > { %4562 = vmatpush1.msra.mxu0 %v2546_v60  ;;  %v19660_v60 = vld [vmem:[#allocation158_spill] sm:$0xff] }
 0x312   : > { %v2365_v63 = vpop.permute.xlu1 %2364  ;;  %v14401_v41 = vpop.permute.xlu0 %2652 }
 0x313   : > { %3826 = vrot.lane.b32.xlu1 %v14362_v11, %s19386_s21  ;;  %v2690_v15 = vsel %vm2686_vm12, %v2651_v2, %v14401_v41  ;;  %v2401_v28 = vsel %vm2396_vm2, %v14013_v44, %v2365_v63  ;;  %v2112_v44 = vsel %vm19340_vm4, %v19655_v1, %v19654_v40  ;;  %v19659_v2 = vld [vmem:[#allocation173_spill] sm:$0xff]  ;;  %v19665_v1 = vld [vmem:[#allocation206_spill] sm:$0xff] }
 0x314   : > { %3679 = vrot.lane.b32.xlu0 %v14344_v47, %s19346_s28  ;;  %4552 = vmatprep.subr.mxu1 %v2690_v15  ;;  %v1821_v50 = vsel %vm1816_vm6, %v13709_v0, %v19659_v2 }
 0x315   : > { %4553 = vmatpush2.msra.mxu1 %v2689_v34 }
 0x316   : > { %v2514_v8 = vpop.permute.xlu1 %2513  ;;  %v2367_v42 = vpop.permute.xlu0 %2366  ;;  %4555 = vmatmul.mubr.f32.vlgmr.msra.gmra.mxu1 %v14384_v31 }
 0x317   : > { %3532 = vrot.lane.b32.xlu1 %v14336_v22, %s19384_s29  ;;  %v2402_v43 = vsel %vm2396_vm2, %v2365_v63, %v2367_v42  ;;  %12170 = vmatprep.mubr.msk.f32.mxu1 %vm4415_vm1, %v19651_v19  ;;  %v2548_v24 = vsel %vm2541_vm0, %v2512_v51, %v2514_v8  ;;  %v1822_v51 = vsel %vm1816_vm6, %v19659_v2, %v19658_v48  ;;  %v19661_v63 = vld [vmem:[#allocation156_spill] sm:$0xff] }
 0x318   : > { %3828 = vrot.lane.b32.xlu0 %v14370_v30, %s19386_s21  ;;  %4563 = vmatprep.subr.mxu0 %v2402_v43  ;;  %v1677_v34 = vsel %vm19341_vm7, %v19661_v63, %v19660_v60 }
 0x319   : > { %4564 = vmatpush1.msra.mxu0 %v2401_v28  ;;  %v1676_v28 = vsel %vm19341_vm7, %v13631_v46, %v19661_v63  ;;  %v19672_v63 = vld [vmem:[#allocation109_spill] sm:$0xff] }
 0x31a   : > { %v2369_v62 = vpop.permute.xlu1 %2368  ;;  %4565 = vmatprep.subr.mxu0 %v2257_v45  ;;  %v19663_v45 = vld [vmem:[#allocation140_spill] sm:$0xff] }
 0x31b   : > { %3681 = vrot.lane.b32.xlu1 %v14362_v11, %s19346_s28  ;;  %v14428_v18 = vpop.permute.xlu0 %2515  ;;  %4566 = vmatpush1.msra.mxu0 %v2256_v58  ;;  %v2403_v15 = vsel %vm2396_vm2, %v2367_v42, %v2369_v62 }
 0x31c   : > { %3534 = vrot.lane.b32.xlu0 %v14344_v47, %s19384_s29  ;;  %4567 = vmatprep.subr.mxu0 %v2112_v44  ;;  %v2549_v57 = vsel %vm2541_vm0, %v2514_v8, %v14428_v18  ;;  %v19662_v8 = vld [vmem:[#allocation221_spill] sm:$0xff]  ;;  %v19666_v44 = vld [vmem:[#allocation207_spill] sm:$0xff] }
 0x31d   : > { %4632 = vmatprep.subr.mxu1 %v2549_v57  ;;  %4568 = vmatpush1.msra.mxu0 %v2111_v36  ;;  %v2259_v0 = vsel %vm2251_vm3, %v19662_v8, %v14037_v20  ;;  %v2258_v42 = vsel %vm2251_vm3, %v19652_v14, %v19662_v8  ;;  %v2114_v57 = vsel %vm19340_vm4, %v19666_v44, %v19665_v1  ;;  %v19667_v36 = vld [vmem:[#allocation126_spill] sm:$0xff]  ;;  %v19674_v8 = vld [vmem:[#allocation175_spill] sm:$0xff] }
 0x31e   : > { %4633 = vmatpush1.msra.mxu1 %v2548_v24  ;;  %4569 = vmatprep.subr.mxu0 %v1967_v52  ;;  %v2113_v14 = vsel %vm19340_vm4, %v19654_v40, %v19666_v44  ;;  %v19668_v24 = vld [vmem:[#allocation124_spill] sm:$0xff]  ;;  %v19679_v44 = vld [vmem:[#allocation157_spill] sm:$0xff] }
 0x31f   : > { %3387 = vrot.lane.b32.xlu1 %v14336_v22, %s19344_s30  ;;  %v14449_v13 = vpop.permute.xlu1 %3814  ;;  %4570 = vmatpush1.msra.mxu0 %v1966_v54  ;;  %v1387_v61 = vsel %vm1381_vm9, %v19668_v24, %v19667_v36  ;;  %v19669_v52 = vld [vmem:[#allocation192_spill] sm:$0xff]  ;;  %v19670_v54 = vld [vmem:[#allocation189_spill] sm:$0xff]  ;;  %v1386_v40 = vsel %vm1381_vm9, %v13403_v16, %v19668_v24  ;;  %v19681_v24 = vld [vmem:[#allocation74_spill] sm:$0xff] }
 0x320   : > { %3683 = vrot.lane.b32.xlu0 %v14370_v30, %s19346_s28  ;;  %v14456_v19 = vpop.permute.xlu0 %2370  ;;  %4571 = vmatprep.subr.mxu0 %v1822_v51  ;;  %v1968_v51 = vsel %vm19339_vm5, %v19656_v32, %v19670_v54  ;;  %v1241_v32 = vsel %vm19342_vm10, %v13310_v38, %v19672_v63 }
 0x321   : > { %v2404_v10 = vsel %vm2396_vm2, %v2369_v62, %v14456_v19  ;;  %4572 = vmatpush1.msra.mxu0 %v1821_v50  ;;  %v19664_v62 = vld [vmem:[#allocation141_spill] sm:$0xff] }
 0x322   : > { %4634 = vmatprep.subr.mxu1 %v2404_v10  ;;  %4573 = vmatprep.subr.mxu0 %v1677_v34  ;;  %v1532_v58 = vsel %vm1526_vm8, %v19664_v62, %v19663_v45  ;;  %v1531_v46 = vsel %vm1526_vm8, %v13541_v27, %v19664_v62  ;;  %v1969_v27 = vsel %vm19339_vm5, %v19670_v54, %v19669_v52  ;;  %v19671_v10 = vld [vmem:[#allocation108_spill] sm:$0xff]  ;;  %vm19677_vm5 = vcmask 850944  }
 0x323   : > { %3536 = vrot.lane.b32.xlu1 %v14362_v11, %s19384_s29  ;;  %4635 = vmatpush1.msra.mxu1 %v2403_v15  ;;  %v1242_v34 = vsel %vm19342_vm10, %v19672_v63, %v19671_v10  ;;  %v19673_v15 = vld [vmem:[#allocation174_spill] sm:$0xff]  ;;  %vm19680_vm4 = vmmov %vm19677_vm5 }
 0x324   : > { %3389 = vrot.lane.b32.xlu0 %v14344_v47, %s19344_s30  ;;  %v14474_v43 = vpop.permute.xlu1 %3669  ;;  %4636 = vmatprep.subr.mxu1 %v2259_v0  ;;  %v1824_v16 = vsel %vm1816_vm6, %v19674_v8, %v19673_v15  ;;  %v1823_v0 = vsel %vm1816_vm6, %v19658_v48, %v19674_v8  ;;  %v19687_v63 = vld [vmem:[#allocation58_spill] sm:$0xff] }
 0x325   : > { %v14482_v26 = vpop.permute.xlu0 %3816  ;;  %4574 = vmatpush1.msra.mxu0 %v1676_v28  ;;  %4637 = vmatpush1.msra.mxu1 %v2258_v42  ;;  %v19675_v28 = vld [vmem:[#allocation94_spill] sm:$0xff]  ;;  %v19676_v42 = vld [vmem:[#allocation91_spill] sm:$0xff] }
 0x326   : > { %4575 = vmatprep.subr.mxu0 %v1532_v58  ;;  %4638 = vmatprep.subr.mxu1 %v2114_v57  ;;  %v1097_v62 = vsel %vm19677_vm5, %v19676_v42, %v19675_v28  ;;  %v19678_v58 = vld [vmem:[#allocation160_spill] sm:$0xff]  ;;  %v1096_v38 = vsel %vm19680_vm4, %v19635_v29, %v19676_v42  ;;  %vm19683_vm5 = vcmask 1014784   ;;  %v19685_v29 = vld [vmem:[#allocation143_spill] sm:$0xff] }
 0x327   : > { %3242 = vrot.lane.b32.xlu1 %v14336_v22, %s19380_s12  ;;  %4576 = vmatpush1.msra.mxu0 %v1531_v46  ;;  %v1679_v57 = vsel %vm19341_vm7, %v19679_v44, %v19678_v58  ;;  %vm19686_vm4 = vmmov %vm19683_vm5 }
 0x328   : > { %3538 = vrot.lane.b32.xlu0 %v14370_v30, %s19384_s29  ;;  %4639 = vmatpush1.msra.mxu1 %v2113_v14  ;;  %v1678_v14 = vsel %vm19341_vm7, %v19660_v60, %v19679_v44  ;;  %v1533_v60 = vsel %vm1526_vm8, %v19663_v45, %v19685_v29  ;;  %vm19689_vm7 = vcmask 1022976   ;;  %v19693_v44 = vld [vmem:[#allocation37_spill] sm:$0xff] }
 0x329   : > { %v14506_v2 = vpop.permute.xlu1 %3818  ;;  %4577 = vmatprep.subr.mxu0 %v1387_v61  ;;  %4640 = vmatprep.subr.mxu1 %v1969_v27  ;;  %v19682_v61 = vld [vmem:[#allocation75_spill] sm:$0xff]  ;;  %v19684_v27 = vld [vmem:[#allocation142_spill] sm:$0xff] }
 0x32a   : > { %v14514_v50 = vpop.permute.xlu0 %3671  ;;  %4578 = vmatpush1.msra.mxu0 %v1386_v40  ;;  %4641 = vmatpush1.msra.mxu1 %v1968_v51  ;;  %v952_v54 = vsel %vm19683_vm5, %v19682_v61, %v19681_v24  ;;  %v1534_v40 = vsel %vm1526_vm8, %v19685_v29, %v19684_v27  ;;  %v951_v51 = vsel %vm19686_vm4, %v19640_v3, %v19682_v61  ;;  %vm19692_vm5 = vmmov %vm19689_vm7  ;;  %v19696_v61 = vld [vmem:[#allocation111_spill] sm:$0xff] }
 0x32b   : > { %3391 = vrot.lane.b32.xlu1 %v14362_v11, %s19344_s30  ;;  %4579 = vmatprep.subr.mxu0 %v1242_v34  ;;  %v19688_v34 = vld [vmem:[#allocation55_spill] sm:$0xff] }
 0x32c   : > { %3244 = vrot.lane.b32.xlu0 %v14344_v47, %s19380_s12  ;;  %4642 = vmatprep.subr.mxu1 %v1824_v16  ;;  %v807_v8 = vsel %vm19689_vm7, %v19688_v34, %v19687_v63  ;;  %v806_v42 = vsel %vm19692_vm5, %v19645_v37, %v19688_v34  ;;  %v19699_v34 = vld [vmem:[#allocation96_spill] sm:$0xff]  ;;  %vm19701_vm7 = vcmask 850944   ;;  %vm19705_vm5 = vcmask 1014784  }
 0x32d   : > { %4580 = vmatpush1.msra.mxu0 %v1241_v32  ;;  %4643 = vmatpush1.msra.mxu1 %v1823_v0  ;;  %v19690_v32 = vld [vmem:[#allocation128_spill] sm:$0xff]  ;;  %v19691_v0 = vld [vmem:[#allocation125_spill] sm:$0xff]  ;;  %vm19702_vm4 = vmmov %vm19701_vm7 }
 0x32e   : > { %v14538_v46 = vpop.permute.xlu1 %3524  ;;  %4581 = vmatprep.subr.mxu0 %v1097_v62  ;;  %4644 = vmatprep.subr.mxu1 %v1679_v57  ;;  %v1389_v3 = vsel %vm1381_vm9, %v19691_v0, %v19690_v32  ;;  %v1388_v62 = vsel %vm1381_vm9, %v19667_v36, %v19691_v0  ;;  %v19694_v57 = vld [vmem:[#allocation38_spill] sm:$0xff]  ;;  %v1243_v36 = vsel %vm19342_vm10, %v19671_v10, %v19696_v61 }
 0x32f   : > { %3097 = vrot.lane.b32.xlu1 %v14336_v22, %s12585_s14  ;;  %v14545_v48 = vpop.permute.xlu0 %3820  ;;  %4582 = vmatpush1.msra.mxu0 %v1096_v38  ;;  %v662_v38 = vsel %vm656_vm14, %v19694_v57, %v19693_v44  ;;  %v661_v37 = vsel %vm656_vm14, %v19647_v5, %v19694_v57  ;;  %v19700_v5 = vld [vmem:[#allocation93_spill] sm:$0xff] }
 0x330   : > { %3393 = vrot.lane.b32.xlu0 %v14370_v30, %s19344_s30  ;;  %4645 = vmatpush1.msra.mxu1 %v1678_v14  ;;  %v19695_v14 = vld [vmem:[#allocation110_spill] sm:$0xff]  ;;  %v19704_v57 = vld [vmem:[#allocation77_spill] sm:$0xff] }
 0x331   : > { %4583 = vmatprep.subr.mxu0 %v952_v54  ;;  %4646 = vmatprep.subr.mxu1 %v1534_v40  ;;  %v1244_v54 = vsel %vm19342_vm10, %v19696_v61, %v19695_v14  ;;  %v19697_v40 = vld [vmem:[#allocation18_spill] sm:$0xff]  ;;  %vm19710_vm10 = vcmask 1022976  }
 0x332   : > { %4584 = vmatpush1.msra.mxu0 %v951_v51  ;;  %4647 = vmatpush1.msra.mxu1 %v1533_v60  ;;  %v19698_v51 = vld [vmem:[#allocation15_spill] sm:$0xff] }
 0x333   : > { %3246 = vrot.lane.b32.xlu1 %v14362_v11, %s19380_s12  ;;  %v14569_v16 = vpop.permute.xlu1 %3673  ;;  %4585 = vmatprep.subr.mxu0 %v807_v8  ;;  %v517_v60 = vsel %vm19343_vm15, %v19698_v51, %v19697_v40  ;;  %v1099_v8 = vsel %vm19701_vm7, %v19700_v5, %v19699_v34  ;;  %v516_v10 = vsel %vm19343_vm15, %v19649_v12, %v19698_v51  ;;  %vm19706_vm7 = vmmov %vm19705_vm5 }
 0x334   : > { %3099 = vrot.lane.b32.xlu0 %v14344_v47, %s12585_s14  ;;  %v14576_v45 = vpop.permute.xlu0 %3526  ;;  %4648 = vmatprep.subr.mxu1 %v1389_v3  ;;  %v1098_v3 = vsel %vm19702_vm4, %v19675_v28, %v19700_v5  ;;  %v953_v12 = vsel %vm19706_vm7, %v19681_v24, %v19704_v57  ;;  %vm19707_vm4 = vcmask 228352   ;;  %vm19712_vm7 = vmmov %vm19710_vm10  ;;  %v19714_v5 = vld [vmem:[#allocation39_spill] sm:$0xff] }
 0x335   : > { %4586 = vmatpush1.msra.mxu0 %v806_v42  ;;  %4649 = vmatpush1.msra.mxu1 %v1388_v62  ;;  %v391_v42 = vld [vmem:[%s12697_s22 + $0x20] sm:$0xff]  ;;  %v19703_v62 = vld [vmem:[#allocation76_spill] sm:$0xff]  ;;  %v3852_v61 = vsel %vm19707_vm4, %v14449_v13, %v14482_v26 }
 0x336   : > { %4587 = vmatprep.subr.mxu0 %v662_v38  ;;  %4650 = vmatprep.subr.mxu1 %v1244_v54  ;;  %v954_v38 = vsel %vm19705_vm5, %v19704_v57, %v19703_v62  ;;  %v19709_v54 = vld [vmem:[#allocation57_spill] sm:$0xff]  ;;  %vm19711_vm5 = vmmov %vm19707_vm4  ;;  %v19718_v57 = vld [vmem:[#allocation20_spill] sm:$0xff] }
 0x337   : > { %2952 = vrot.lane.b32.xlu1 %v14336_v22, %s12586_s25  ;;  %4588 = vmatpush1.msra.mxu0 %v661_v37  ;;  %v3851_v51 = vsel %vm19711_vm5, %v14206_v55, %v14449_v13  ;;  %v808_v24 = vsel %vm19712_vm7, %v19687_v63, %v19709_v54  ;;  %vm19717_vm5 = vcmask 244736  }
 0x338   : > { %3248 = vrot.lane.b32.xlu0 %v14370_v30, %s19380_s12  ;;  %4651 = vmatpush1.msra.mxu1 %v1243_v36  ;;  %v3380_v29 = vpop.permute.xlu1 %3379  ;;  %vm19720_vm7 = vmmov %vm19717_vm5 }
 0x339   : > { %v14606_v0 = vpop.permute.xlu0 %3675  ;;  %4589 = vmatprep.subr.mxu0 %v517_v60  ;;  %4652 = vmatprep.subr.mxu1 %v1099_v8  ;;  %v19715_v8 = vld [vmem:[#allocation40_spill] sm:$0xff] }
 0x33a   : > { %4590 = vmatpush1.msra.mxu0 %v516_v10  ;;  %4653 = vmatpush1.msra.mxu1 %v1098_v3  ;;  %v664_v55 = vsel %vm656_vm14, %v19715_v8, %v19714_v5  ;;  %v663_v63 = vsel %vm656_vm14, %v19693_v44, %v19715_v8 }
 0x33b   : > { %3101 = vrot.lane.b32.xlu1 %v14362_v11, %s12585_s14  ;;  %4591 = vmatprep.subr.mxu0 %v14136_v49  ;;  %v19708_v49 = vld [vmem:[#allocation60_spill] sm:$0xff] }
 0x33c   : > { %2954 = vrot.lane.b32.xlu0 %v14344_v47, %s12586_s25  ;;  %4654 = vmatprep.subr.mxu1 %v954_v38  ;;  %v809_v37 = vsel %vm19710_vm10, %v19709_v54, %v19708_v49  ;;  %vm19713_vm10 = vcmask 236544   ;;  %v19719_v38 = vld [vmem:[#allocation17_spill] sm:$0xff] }
 0x33d   : > { %4592 = vmatpush1.msra.mxu0 %v391_v42  ;;  %4655 = vmatpush1.msra.mxu1 %v953_v12  ;;  %v3529_v28 = vpop.permute.xlu1 %3528  ;;  %v3707_v60 = vsel %vm19713_vm10, %v14474_v43, %v14514_v50  ;;  %vm19716_vm4 = vmmov %vm19713_vm10  ;;  %v3562_v42 = vsel %vm19717_vm5, %v14538_v46, %v14576_v45  ;;  %v519_v12 = vsel %vm19343_vm15, %v19719_v38, %v19718_v57  ;;  %vm19721_vm10 = vcmask 252928  }
 0x33e   : > { %v14632_v36 = vpop.permute.xlu0 %3381  ;;  %4607 = vmatprep.subr.mxu0 %v3852_v61  ;;  %4656 = vmatprep.subr.mxu1 %v809_v37  ;;  %v3706_v13 = vsel %vm19716_vm4, %v14250_v33, %v14474_v43  ;;  %v3561_v33 = vsel %vm19720_vm7, %v14277_v59, %v14538_v46  ;;  %v518_v43 = vsel %vm19343_vm15, %v19697_v40, %v19719_v38  ;;  %vm19722_vm4 = vmmov %vm19721_vm10  ;;  %vm19723_vm5 = vcmask 228352   ;;  %v14745_v38 = vld [vmem:[%s12697_s22 + $0x78] sm:$0xff] }
 0x33f   : > { %4608 = vmatpush2.msra.mxu0 %v3851_v51  ;;  %4657 = vmatpush1.msra.mxu1 %v808_v24  ;;  %v3416_v44 = vsel %vm19721_vm10, %v14292_v23, %v3380_v29  ;;  %v3417_v61 = vsel %vm19722_vm4, %v3380_v29, %v14632_v36  ;;  %v3854_v23 = vsel %vm19723_vm5, %v14506_v2, %v14545_v48  ;;  %vm19724_vm7 = vcmask 261120   ;;  %vm19725_vm10 = vmmov %vm19723_vm5  ;;  %v14714_v24 = vld [vmem:[%s12697_s22 + $0x68] sm:$0xff] }
 0x340   : > { %2807 = vrot.lane.b32.xlu1 %v14336_v22, %s12587_s24  ;;  %3103 = vrot.lane.b32.xlu0 %v14370_v30, %s12585_s14  ;;  %v3853_v40 = vsel %vm19725_vm10, %v14482_v26, %v14506_v2  ;;  %vm19726_vm4 = vcmask 236544   ;;  %vm19727_vm5 = vmmov %vm19724_vm7  ;;  %vm19729_vm10 = vcmask 244736  }
 0x341   : > { %4609 = vmatprep.subr.mxu0 %v3707_v60  ;;  %4658 = vmatprep.subr.mxu1 %v664_v55  ;;  %v3235_v10 = vpop.permute.xlu1 %3234  ;;  %vm19731_vm15 = vmmov %vm19729_vm10 }
 0x342   : > { %4610 = vmatpush2.msra.mxu0 %v3706_v13  ;;  %4659 = vmatpush1.msra.mxu1 %v663_v63  ;;  %v14656_v3 = vpop.permute.xlu0 %3530  ;;  %v3271_v29 = vsel %vm19727_vm5, %v14311_v56, %v3235_v10  ;;  %v3563_v51 = vsel %vm19731_vm15, %v14576_v45, %v3529_v28 }
 0x343   : > { %4611 = vmatprep.subr.mxu0 %v3562_v42  ;;  %4660 = vmatprep.subr.mxu1 %v519_v12 }
 0x344   : > { %4612 = vmatpush2.msra.mxu0 %v3561_v33  ;;  %4661 = vmatpush1.msra.mxu1 %v518_v43 }
 0x345   : > { %2956 = vrot.lane.b32.xlu1 %v14362_v11, %s12586_s25  ;;  %2809 = vrot.lane.b32.xlu0 %v14344_v47, %s12587_s24  ;;  %v3384_v54 = vpop.permute.xlu1 %3383 }
 0x346   : > { %4613 = vmatprep.subr.mxu0 %v3417_v61  ;;  %4662 = vmatprep.subr.mxu1 %v14174_v21  ;;  %v3237_v59 = vpop.permute.xlu0 %3236  ;;  %v3709_v21 = vsel %vm19726_vm4, %v14569_v16, %v14606_v0 }
 0x347   : > { %4663 = vmatpush1.msra.mxu1 %v14187_v53  ;;  %4614 = vmatpush2.msra.mxu0 %v3416_v44  ;;  %v3272_v46 = vsel %vm19724_vm7, %v3235_v10, %v3237_v59  ;;  %vm19728_vm7 = vmmov %vm19726_vm4  ;;  %vm19730_vm4 = vcmask 252928   ;;  %v14757_v44 = vld [vmem:[%s12697_s22 + $0x80] sm:$0xff] }
 0x348   : > { %4678 = vmatprep.subr.mxu1 %v3854_v23  ;;  %4615 = vmatprep.subr.mxu0 %v3272_v46  ;;  %v3708_v26 = vsel %vm19728_vm7, %v14514_v50, %v14569_v16  ;;  %vm19732_vm5 = vmmov %vm19730_vm4  ;;  %vm19733_vm7 = vcmask 424960  }
 0x349   : > { %4679 = vmatpush2.msra.mxu1 %v3853_v40  ;;  %2662 = vrot.lane.b32.xlu1 %v14336_v22, %s12588_s26  ;;  %v3090_v53 = vpop.permute.xlu1 %3089  ;;  %v3564_v22 = vsel %vm19729_vm10, %v3529_v28, %v14656_v3  ;;  %v3418_v50 = vsel %vm19732_vm5, %v14632_v36, %v3384_v54  ;;  %vm19734_vm15 = vmmov %vm19733_vm7  ;;  %v14726_v36 = vld [vmem:[%s12697_s22 + $0x70] sm:$0xff]  ;;  %vm19735_vm10 = vcmask 261120  }
 0x34a   : > { %2958 = vrot.lane.b32.xlu0 %v14370_v30, %s12586_s25  ;;  %4680 = vmatprep.subr.mxu1 %v3709_v21  ;;  %v14699_v2 = vpop.permute.xlu0 %3385  ;;  %v3126_v60 = vsel %vm19733_vm7, %v14326_v35, %v3090_v53  ;;  %vm19737_vm5 = vmmov %vm19733_vm7 }
 0x34b   : > { %4616 = vmatpush2.msra.mxu0 %v3271_v29  ;;  %4681 = vmatpush2.msra.mxu1 %v3708_v26  ;;  %v3419_v37 = vsel %vm19730_vm4, %v3384_v54, %v14699_v2  ;;  %vm19736_vm4 = vmmov %vm19735_vm10 }
 0x34c   : > { %4682 = vmatprep.subr.mxu1 %v3564_v22  ;;  %vm19738_vm7 = vmmov %vm19737_vm5 }
 0x34d   : > { %4683 = vmatpush2.msra.mxu1 %v3563_v51  ;;  %2811 = vrot.lane.b32.xlu1 %v14362_v11, %s12587_s24  ;;  %v3239_v56 = vpop.permute.xlu1 %3238 }
 0x34e   : > { %2664 = vrot.lane.b32.xlu0 %v14344_v47, %s12588_s26  ;;  %4684 = vmatprep.subr.mxu1 %v3419_v37  ;;  %v3092_v16 = vpop.permute.xlu0 %3091  ;;  %v3273_v35 = vsel %vm19736_vm4, %v3237_v59, %v3239_v56  ;;  %v14788_v37 = vld [vmem:[%s19632_s1 + $0x8] sm:$0xff]  ;;  %vm19745_vm4 = vcmask 646144  }
 0x34f   : > { %4685 = vmatpush2.msra.mxu1 %v3418_v50  ;;  %v3127_v45 = vsel %vm19734_vm15, %v3090_v53, %v3092_v16  ;;  %vm19741_vm15 = vcmask 637952  }
 0x350   : > { %4617 = vmatprep.subr.mxu0 %v3127_v45 }
 0x351   : > { %2525 = vrot.lane.b32.xlu1 %v14714_v24, %s19354_s19  ;;  %v2945_v28 = vpop.permute.xlu1 %2944  ;;  %4618 = vmatpush2.msra.mxu0 %v3126_v60 }
 0x352   : > { %2813 = vrot.lane.b32.xlu0 %v14370_v30, %s12587_s24  ;;  %v14723_v47 = vpop.permute.xlu0 %3240  ;;  %v2981_v10 = vsel %vm2976_vm11, %v14351_v4, %v2945_v28 }
 0x353   : > { %v3274_v8 = vsel %vm19735_vm10, %v3239_v56, %v14723_v47  ;;  %vm19742_vm10 = vmmov %vm19741_vm15 }
 0x354   : > { %4686 = vmatprep.subr.mxu1 %v3274_v8 }
 0x355   : > { %2666 = vrot.lane.b32.xlu1 %v14362_v11, %s12588_s26  ;;  %4687 = vmatpush2.msra.mxu1 %v3273_v35  ;;  %v3094_v55 = vpop.permute.xlu1 %3093 }
 0x356   : > { %2527 = vrot.lane.b32.xlu0 %v14726_v36, %s19354_s19  ;;  %v2947_v13 = vpop.permute.xlu0 %2946  ;;  %v3128_v33 = vsel %vm19738_vm7, %v3092_v16, %v3094_v55  ;;  %vm19751_vm7 = vcmask 818176  }
 0x357   : > { %v2982_v63 = vsel %vm2976_vm11, %v2945_v28, %v2947_v13 }
 0x358   : > { %4619 = vmatprep.subr.mxu0 %v2982_v63 }
 0x359   : > { %2380 = vrot.lane.b32.xlu1 %v14714_v24, %s19372_s20  ;;  %4620 = vmatpush2.msra.mxu0 %v2981_v10  ;;  %v2800_v42 = vpop.permute.xlu1 %2799  ;;  %v2261_v10 = vsel %vm2251_vm3, %v14032_v7, %v14063_v39 }
 0x35a   : > { %2668 = vrot.lane.b32.xlu0 %v14370_v30, %s12588_s26  ;;  %v14742_v11 = vpop.permute.xlu0 %3095  ;;  %v2836_v30 = vsel %vm2831_vm13, %v14372_v17, %v2800_v42 }
 0x35b   : > { %v3129_v12 = vsel %vm19737_vm5, %v3094_v55, %v14742_v11  ;;  %vm19746_vm5 = vmmov %vm19745_vm4 }
 0x35c   : > { %4688 = vmatprep.subr.mxu1 %v3129_v12  ;;  %v19740_v12 = vld [vmem:[#allocation209_spill] sm:$0xff] }
 0x35d   : > { %2529 = vrot.lane.b32.xlu1 %v14745_v38, %s19354_s19  ;;  %4689 = vmatpush2.msra.mxu1 %v3128_v33  ;;  %v2949_v4 = vpop.permute.xlu1 %2948 }
 0x35e   : > { %2382 = vrot.lane.b32.xlu0 %v14726_v36, %s19372_s20  ;;  %v2802_v43 = vpop.permute.xlu0 %2801  ;;  %v2983_v17 = vsel %vm2976_vm11, %v2947_v13, %v2949_v4 }
 0x35f   : > { %v2837_v61 = vsel %vm2831_vm13, %v2800_v42, %v2802_v43  ;;  %v2260_v42 = vsel %vm2251_vm3, %v14037_v20, %v14032_v7 }
 0x360   : > { %4621 = vmatprep.subr.mxu0 %v2837_v61  ;;  %v19743_v61 = vld [vmem:[#allocation194_spill] sm:$0xff] }
 0x361   : > { %2237 = vrot.lane.b32.xlu1 %v14726_v36, %s12577_s16  ;;  %v2655_v54 = vpop.permute.xlu1 %2654  ;;  %4622 = vmatpush2.msra.mxu0 %v2836_v30 }
 0x362   : > { %2531 = vrot.lane.b32.xlu0 %v14757_v44, %s19354_s19  ;;  %v14764_v59 = vpop.permute.xlu0 %2950  ;;  %v2691_v53 = vsel %vm2686_vm12, %v14401_v41, %v2655_v54 }
 0x363   : > { %v2984_v23 = vsel %vm2976_vm11, %v2949_v4, %v14764_v59 }
 0x364   : > { %4690 = vmatprep.subr.mxu1 %v2984_v23 }
 0x365   : > { %2386 = vrot.lane.b32.xlu1 %v14757_v44, %s19372_s20  ;;  %4691 = vmatpush2.msra.mxu1 %v2983_v17  ;;  %v2804_v46 = vpop.permute.xlu1 %2803 }
 0x366   : > { %2384 = vrot.lane.b32.xlu0 %v14745_v38, %s19372_s20  ;;  %v2657_v40 = vpop.permute.xlu0 %2656  ;;  %v2838_v41 = vsel %vm2831_vm13, %v2802_v43, %v2804_v46  ;;  %v2115_v43 = vsel %vm19742_vm10, %v19665_v1, %v19740_v12 }
 0x367   : > { %v2692_v21 = vsel %vm2686_vm12, %v2655_v54, %v2657_v40  ;;  %v19744_v54 = vld [vmem:[#allocation191_spill] sm:$0xff] }
 0x368   : > { %4623 = vmatprep.subr.mxu0 %v2692_v21  ;;  %v1971_v23 = vsel %vm19745_vm4, %v19744_v54, %v19743_v61  ;;  %v1970_v1 = vsel %vm19746_vm5, %v19669_v52, %v19744_v54  ;;  %vm19757_vm4 = vmmov %vm19742_vm10  ;;  %v19764_v54 = vld [vmem:[#allocation113_spill] sm:$0xff] }
 0x369   : > { %2241 = vrot.lane.b32.xlu1 %v14757_v44, %s12577_s16  ;;  %4624 = vmatpush2.msra.mxu0 %v2691_v53  ;;  %v2518_v29 = vpop.permute.xlu1 %2517 }
 0x36a   : > { %2239 = vrot.lane.b32.xlu0 %v14745_v38, %s12577_s16  ;;  %v14780_v26 = vpop.permute.xlu0 %2805  ;;  %4626 = vmatmul.mubr.f32.vlgmr.msra.gmra.mxu0 %v14384_v31  ;;  %v2550_v16 = vsel %vm2541_vm0, %v14428_v18, %v2518_v29 }
 0x36b   : > { %v2839_v22 = vsel %vm2831_vm13, %v2804_v46, %v14780_v26  ;;  %12171 = vmatprep.mubr.msk.f32.mxu0 %vm4415_vm1, %v14788_v37  ;;  %v19747_v46 = vld [vmem:[#allocation176_spill] sm:$0xff] }
 0x36c   : > { %4692 = vmatprep.subr.mxu1 %v2839_v22 }
 0x36d   : > { %3832 = vrot.lane.b32.xlu1 %v14726_v36, %s19386_s21  ;;  %4693 = vmatpush2.msra.mxu1 %v2838_v41  ;;  %v2659_v51 = vpop.permute.xlu1 %2658  ;;  %v19749_v41 = vld [vmem:[#allocation162_spill] sm:$0xff] }
 0x36e   : > { %3830 = vrot.lane.b32.xlu0 %v14714_v24, %s19386_s21  ;;  %v2520_v56 = vpop.permute.xlu0 %2519  ;;  %v2693_v8 = vsel %vm2686_vm12, %v2657_v40, %v2659_v51  ;;  %v19748_v40 = vld [vmem:[#allocation177_spill] sm:$0xff] }
 0x36f   : > { %v2551_v50 = vsel %vm2541_vm0, %v2518_v29, %v2520_v56  ;;  %v1826_v21 = vsel %vm1816_vm6, %v19748_v40, %v19747_v46  ;;  %v1825_v53 = vsel %vm1816_vm6, %v19673_v15, %v19748_v40  ;;  %v2263_v15 = vsel %vm2251_vm3, %v14061_v6, %v14087_v25 }
 0x370   : > { %4703 = vmatprep.subr.mxu0 %v2551_v50 }
 0x371   : > { %3687 = vrot.lane.b32.xlu1 %v14726_v36, %s19346_s28  ;;  %4704 = vmatpush1.msra.mxu0 %v2550_v16  ;;  %v2373_v60 = vpop.permute.xlu1 %2372  ;;  %v2262_v16 = vsel %vm2251_vm3, %v14063_v39, %v14061_v6 }
 0x372   : > { %3685 = vrot.lane.b32.xlu0 %v14714_v24, %s19346_s28  ;;  %v14804_v45 = vpop.permute.xlu0 %2660  ;;  %v2405_v13 = vsel %vm2396_vm2, %v14456_v19, %v2373_v60  ;;  %v19739_v19 = vld [vmem:[#allocation208_spill] sm:$0xff] }
 0x373   : > { %v2694_v28 = vsel %vm2686_vm12, %v2659_v51, %v14804_v45  ;;  %v2116_v33 = vsel %vm19741_vm15, %v19740_v12, %v19739_v19  ;;  %v19750_v51 = vld [vmem:[#allocation159_spill] sm:$0xff]  ;;  %vm19752_vm15 = vmmov %vm19751_vm7  ;;  %v19760_v12 = vld [vmem:[#allocation196_spill] sm:$0xff] }
 0x374   : > { %4694 = vmatprep.subr.mxu1 %v2694_v28  ;;  %v1680_v50 = vsel %vm19752_vm15, %v19678_v58, %v19750_v51  ;;  %v19754_v28 = vld [vmem:[#allocation145_spill] sm:$0xff]  ;;  %v19755_v58 = vld [vmem:[#allocation210_spill] sm:$0xff]  ;;  %vm19765_vm15 = vcmask 842752  }
 0x375   : > { %3836 = vrot.lane.b32.xlu1 %v14757_v44, %s19386_s21  ;;  %4695 = vmatpush2.msra.mxu1 %v2693_v8  ;;  %v2522_v18 = vpop.permute.xlu1 %2521  ;;  %v1535_v6 = vsel %vm1526_vm8, %v19684_v27, %v19754_v28 }
 0x376   : > { %3834 = vrot.lane.b32.xlu0 %v14745_v38, %s19386_s21  ;;  %v2375_v35 = vpop.permute.xlu0 %2374  ;;  %4697 = vmatmul.mubr.f32.vlgmr.msra.gmra.mxu1 %v14384_v31  ;;  %v2552_v7 = vsel %vm2541_vm0, %v2520_v56, %v2522_v18  ;;  %v1681_v56 = vsel %vm19751_vm7, %v19750_v51, %v19749_v41  ;;  %vm19762_vm7 = vmmov %vm19746_vm5 }
 0x377   : > { %v2406_v55 = vsel %vm2396_vm2, %v2373_v60, %v2375_v35  ;;  %12172 = vmatprep.mubr.msk.f32.mxu1 %vm4415_vm1, %v14788_v37  ;;  %v19753_v60 = vld [vmem:[#allocation144_spill] sm:$0xff] }
 0x378   : > { %4705 = vmatprep.subr.mxu0 %v2406_v55  ;;  %v1536_v8 = vsel %vm1526_vm8, %v19754_v28, %v19753_v60 }
 0x379   : > { %3542 = vrot.lane.b32.xlu1 %v14726_v36, %s19384_s29  ;;  %4706 = vmatpush1.msra.mxu0 %v2405_v13  ;;  %v2377_v63 = vpop.permute.xlu1 %2376 }
 0x37a   : > { %3540 = vrot.lane.b32.xlu0 %v14714_v24, %s19384_s29  ;;  %v14826_v31 = vpop.permute.xlu0 %2523  ;;  %4707 = vmatprep.subr.mxu0 %v2261_v10  ;;  %v2407_v52 = vsel %vm2396_vm2, %v2375_v35, %v2377_v63  ;;  %v19756_v35 = vld [vmem:[#allocation211_spill] sm:$0xff] }
 0x37b   : > { %4708 = vmatpush1.msra.mxu0 %v2260_v42  ;;  %v2553_v4 = vsel %vm2541_vm0, %v2522_v18, %v14826_v31  ;;  %v2118_v55 = vsel %vm19742_vm10, %v19756_v35, %v19755_v58  ;;  %v2117_v13 = vsel %vm19757_vm4, %v19739_v19, %v19756_v35  ;;  %v19759_v10 = vld [vmem:[#allocation127_spill] sm:$0xff]  ;;  %vm19768_vm10 = vmmov %vm19765_vm15  ;;  %vm19771_vm4 = vcmask 850944  }
 0x37c   : > { %4709 = vmatprep.subr.mxu0 %v2116_v33  ;;  %4774 = vmatprep.subr.mxu1 %v2553_v4  ;;  %v19761_v33 = vld [vmem:[#allocation193_spill] sm:$0xff]  ;;  %v1390_v27 = vsel %vm1381_vm9, %v19690_v32, %v19759_v10  ;;  %v19766_v32 = vld [vmem:[#allocation178_spill] sm:$0xff]  ;;  %v1245_v40 = vsel %vm19768_vm10, %v19695_v14, %v19764_v54  ;;  %v19778_v35 = vld [vmem:[#allocation79_spill] sm:$0xff]  ;;  %vm19779_vm10 = vcmask 1014784  }
 0x37d   : > { %3691 = vrot.lane.b32.xlu1 %v14757_v44, %s19346_s28  ;;  %4710 = vmatpush1.msra.mxu0 %v2115_v43  ;;  %v14842_v20 = vpop.permute.xlu1 %3822  ;;  %v1973_v4 = vsel %vm19746_vm5, %v19761_v33, %v19760_v12  ;;  %v1972_v19 = vsel %vm19762_vm7, %v19743_v61, %v19761_v33  ;;  %vm19774_vm5 = vcmask 818176   ;;  %vm19775_vm7 = vmmov %vm19771_vm4  ;;  %v19784_v33 = vld [vmem:[#allocation59_spill] sm:$0xff] }
 0x37e   : > { %3689 = vrot.lane.b32.xlu0 %v14745_v38, %s19346_s28  ;;  %4775 = vmatpush1.msra.mxu1 %v2552_v7  ;;  %v14846_v30 = vpop.permute.xlu0 %2378  ;;  %v19763_v7 = vld [vmem:[#allocation112_spill] sm:$0xff] }
 0x37f   : > { %4711 = vmatprep.subr.mxu0 %v1971_v23  ;;  %v2408_v17 = vsel %vm2396_vm2, %v2377_v63, %v14846_v30  ;;  %v19758_v63 = vld [vmem:[#allocation130_spill] sm:$0xff]  ;;  %v1246_v23 = vsel %vm19765_vm15, %v19764_v54, %v19763_v7  ;;  %vm19776_vm15 = vmmov %vm19774_vm5  ;;  %v19787_v54 = vld [vmem:[#allocation129_spill] sm:$0xff] }
 0x380   : > { %4712 = vmatpush1.msra.mxu0 %v1970_v1  ;;  %4776 = vmatprep.subr.mxu1 %v2408_v17  ;;  %v1391_v42 = vsel %vm1381_vm9, %v19759_v10, %v19758_v63  ;;  %v19767_v17 = vld [vmem:[#allocation179_spill] sm:$0xff] }
 0x381   : > { %3397 = vrot.lane.b32.xlu1 %v14726_v36, %s19344_s30  ;;  %4713 = vmatprep.subr.mxu0 %v1826_v21  ;;  %v14864_v29 = vpop.permute.xlu1 %3677  ;;  %v1828_v61 = vsel %vm1816_vm6, %v19767_v17, %v19766_v32  ;;  %v1827_v21 = vsel %vm1816_vm6, %v19747_v46, %v19767_v17 }
 0x382   : > { %3395 = vrot.lane.b32.xlu0 %v14714_v24, %s19344_s30  ;;  %4714 = vmatpush1.msra.mxu0 %v1825_v53  ;;  %v14869_v22 = vpop.permute.xlu0 %3824  ;;  %v19769_v53 = vld [vmem:[#allocation98_spill] sm:$0xff] }
 0x383   : > { %4777 = vmatpush1.msra.mxu1 %v2407_v52  ;;  %4715 = vmatprep.subr.mxu0 %v1681_v56  ;;  %v19770_v52 = vld [vmem:[#allocation95_spill] sm:$0xff]  ;;  %v19772_v56 = vld [vmem:[#allocation164_spill] sm:$0xff] }
 0x384   : > { %4778 = vmatprep.subr.mxu1 %v2263_v15  ;;  %4716 = vmatpush1.msra.mxu0 %v1680_v50  ;;  %v1101_v51 = vsel %vm19771_vm4, %v19770_v52, %v19769_v53  ;;  %v19773_v15 = vld [vmem:[#allocation161_spill] sm:$0xff]  ;;  %v1100_v14 = vsel %vm19775_vm7, %v19699_v34, %v19770_v52  ;;  %v19780_v34 = vld [vmem:[#allocation146_spill] sm:$0xff]  ;;  %vm19782_vm4 = vmmov %vm19779_vm10 }
 0x385   : > { %4779 = vmatpush1.msra.mxu1 %v2262_v16  ;;  %3546 = vrot.lane.b32.xlu1 %v14757_v44, %s19384_s29  ;;  %v14888_v18 = vpop.permute.xlu1 %3826  ;;  %v1683_v50 = vsel %vm19774_vm5, %v19773_v15, %v19772_v56  ;;  %v1682_v46 = vsel %vm19776_vm15, %v19749_v41, %v19773_v15  ;;  %v955_v41 = vsel %vm19782_vm4, %v19703_v62, %v19778_v35  ;;  %vm19785_vm5 = vcmask 1022976   ;;  %v19792_v52 = vld [vmem:[#allocation115_spill] sm:$0xff] }
 0x386   : > { %3544 = vrot.lane.b32.xlu0 %v14745_v38, %s19384_s29  ;;  %4717 = vmatprep.subr.mxu0 %v1536_v8  ;;  %v14898_v39 = vpop.permute.xlu0 %3679  ;;  %v19777_v8 = vld [vmem:[#allocation78_spill] sm:$0xff]  ;;  %vm19788_vm7 = vmmov %vm19785_vm5  ;;  %vm19793_vm15 = vcmask 842752   ;;  %vm19797_vm4 = vcmask 1039360  }
 0x387   : > { %4780 = vmatprep.subr.mxu1 %v2118_v55  ;;  %4718 = vmatpush1.msra.mxu0 %v1535_v6  ;;  %v956_v55 = vsel %vm19779_vm10, %v19778_v35, %v19777_v8  ;;  %v19781_v6 = vld [vmem:[#allocation147_spill] sm:$0xff]  ;;  %v810_v62 = vsel %vm19788_vm7, %v19708_v49, %v19784_v33  ;;  %v19791_v49 = vld [vmem:[#allocation114_spill] sm:$0xff]  ;;  %vm19794_vm10 = vmmov %vm19793_vm15 }
 0x388   : > { %4781 = vmatpush1.msra.mxu1 %v2117_v13  ;;  %4719 = vmatprep.subr.mxu0 %v1391_v42  ;;  %v1538_v13 = vsel %vm1526_vm8, %v19781_v6, %v19780_v34  ;;  %v1537_v10 = vsel %vm1526_vm8, %v19753_v60, %v19781_v6  ;;  %v19783_v42 = vld [vmem:[#allocation62_spill] sm:$0xff]  ;;  %v1392_v60 = vsel %vm1381_vm9, %v19758_v63, %v19787_v54  ;;  %v19798_v6 = vld [vmem:[#allocation100_spill] sm:$0xff]  ;;  %vm19801_vm7 = vmmov %vm19797_vm4 }
 0x389   : > { %4782 = vmatprep.subr.mxu1 %v1973_v4  ;;  %4720 = vmatpush1.msra.mxu0 %v1390_v27  ;;  %v14915_v43 = vpop.permute.xlu1 %3532  ;;  %v811_v4 = vsel %vm19785_vm5, %v19784_v33, %v19783_v42  ;;  %vm19800_vm5 = vcmask 850944   ;;  %v395_v33 = vld [vmem:[%s12697_s22 + $0x40] sm:$0xff] }
 0x38a   : > { %4783 = vmatpush1.msra.mxu1 %v1972_v19  ;;  %3252 = vrot.lane.b32.xlu1 %v14726_v36, %s19380_s12  ;;  %v14922_v1 = vpop.permute.xlu0 %3828  ;;  %v19786_v19 = vld [vmem:[#allocation132_spill] sm:$0xff] }
 0x38b   : > { %3250 = vrot.lane.b32.xlu0 %v14714_v24, %s19380_s12  ;;  %4721 = vmatprep.subr.mxu0 %v1246_v23  ;;  %v1393_v23 = vsel %vm1381_vm9, %v19787_v54, %v19786_v19  ;;  %v19803_v54 = vld [vmem:[#allocation80_spill] sm:$0xff] }
 0x38c   : > { %4784 = vmatprep.subr.mxu1 %v1828_v61  ;;  %4722 = vmatpush1.msra.mxu0 %v1245_v40  ;;  %v19789_v61 = vld [vmem:[#allocation41_spill] sm:$0xff]  ;;  %v19790_v40 = vld [vmem:[#allocation42_spill] sm:$0xff] }
 0x38d   : > { %4785 = vmatpush1.msra.mxu1 %v1827_v21  ;;  %4723 = vmatprep.subr.mxu0 %v1101_v51  ;;  %v14944_v16 = vpop.permute.xlu1 %3681  ;;  %v666_v21 = vsel %vm656_vm14, %v19790_v40, %v19789_v61  ;;  %v1248_v51 = vsel %vm19793_vm15, %v19792_v52, %v19791_v49  ;;  %v665_v63 = vsel %vm656_vm14, %v19714_v5, %v19790_v40  ;;  %vm19802_vm15 = vmmov %vm19800_vm5  ;;  %v19808_v40 = vld [vmem:[#allocation64_spill] sm:$0xff] }
 0x38e   : > { %4786 = vmatprep.subr.mxu1 %v1683_v50  ;;  %4724 = vmatpush1.msra.mxu0 %v1100_v14  ;;  %v14949_v28 = vpop.permute.xlu0 %3534  ;;  %v1247_v50 = vsel %vm19794_vm10, %v19763_v7, %v19792_v52  ;;  %v19795_v14 = vld [vmem:[#allocation22_spill] sm:$0xff]  ;;  %vm19805_vm10 = vcmask 1014784  }
 0x38f   : > { %4787 = vmatpush1.msra.mxu1 %v1682_v46  ;;  %3401 = vrot.lane.b32.xlu1 %v14757_v44, %s19344_s30  ;;  %v19796_v46 = vld [vmem:[#allocation19_spill] sm:$0xff] }
 0x390   : > { %3399 = vrot.lane.b32.xlu0 %v14745_v38, %s19344_s30  ;;  %4725 = vmatprep.subr.mxu0 %v956_v55  ;;  %v521_v35 = vsel %vm19797_vm4, %v19796_v46, %v19795_v14  ;;  %vm19806_vm4 = vmmov %vm19805_vm10 }
 0x391   : > { %4788 = vmatprep.subr.mxu1 %v1538_v13  ;;  %4726 = vmatpush1.msra.mxu0 %v955_v41  ;;  %v14970_v27 = vpop.permute.xlu1 %3387  ;;  %v19799_v13 = vld [vmem:[#allocation97_spill] sm:$0xff]  ;;  %v520_v41 = vsel %vm19801_vm7, %v19718_v57, %v19796_v46  ;;  %vm19810_vm7 = vcmask 1022976  }
 0x392   : > { %4789 = vmatpush1.msra.mxu1 %v1537_v10  ;;  %4727 = vmatprep.subr.mxu0 %v811_v4  ;;  %v14978_v17 = vpop.permute.xlu0 %3683  ;;  %v1103_v5 = vsel %vm19800_vm5, %v19799_v13, %v19798_v6  ;;  %v396_v10 = vld [vmem:[%s12697_s22 + $0x48] sm:$0xff]  ;;  %v1102_v7 = vsel %vm19802_vm15, %v19769_v53, %v19799_v13  ;;  %vm19807_vm5 = vcmask 228352  }
 0x393   : > { %4790 = vmatprep.subr.mxu1 %v1393_v23  ;;  %4728 = vmatpush1.msra.mxu0 %v810_v62  ;;  %v19804_v23 = vld [vmem:[#allocation81_spill] sm:$0xff]  ;;  %vm19811_vm15 = vmmov %vm19807_vm5 }
 0x394   : > { %4791 = vmatpush1.msra.mxu1 %v1392_v60  ;;  %3107 = vrot.lane.b32.xlu1 %v14726_v36, %s12585_s14  ;;  %v958_v57 = vsel %vm19805_vm10, %v19804_v23, %v19803_v54  ;;  %v957_v53 = vsel %vm19806_vm4, %v19777_v8, %v19804_v23  ;;  %v3856_v60 = vsel %vm19807_vm5, %v14842_v20, %v14869_v22  ;;  %vm19812_vm10 = vmmov %vm19810_vm7  ;;  %vm19813_vm4 = vcmask 236544  }
 0x395   : > { %3105 = vrot.lane.b32.xlu0 %v14714_v24, %s12585_s14  ;;  %4729 = vmatprep.subr.mxu0 %v666_v21  ;;  %v14996_v15 = vpop.permute.xlu1 %3536  ;;  %v19809_v21 = vld [vmem:[#allocation61_spill] sm:$0xff]  ;;  %vm19816_vm5 = vmmov %vm19813_vm4 }
 0x396   : > { %4792 = vmatprep.subr.mxu1 %v1248_v51  ;;  %4730 = vmatpush1.msra.mxu0 %v665_v63  ;;  %v15004_v55 = vpop.permute.xlu0 %3389  ;;  %v813_v52 = vsel %vm19810_vm7, %v19809_v21, %v19808_v40  ;;  %v3855_v51 = vsel %vm19811_vm15, %v14545_v48, %v14842_v20  ;;  %v812_v8 = vsel %vm19812_vm10, %v19783_v42, %v19809_v21  ;;  %v19814_v48 = vld [vmem:[#allocation43_spill] sm:$0xff]  ;;  %v19815_v20 = vld [vmem:[#allocation44_spill] sm:$0xff]  ;;  %vm19817_vm7 = vcmask 244736  }
 0x397   : > { %4793 = vmatpush1.msra.mxu1 %v1247_v50  ;;  %4731 = vmatprep.subr.mxu0 %v521_v35  ;;  %v3711_v50 = vsel %vm19813_vm4, %v14864_v29, %v14898_v39  ;;  %v668_v42 = vsel %vm656_vm14, %v19815_v20, %v19814_v48  ;;  %v3710_v35 = vsel %vm19816_vm5, %v14606_v0, %v14864_v29  ;;  %vm19820_vm15 = vcmask 1039360   ;;  %vm19821_vm10 = vmmov %vm19817_vm7 }
 0x398   : > { %4794 = vmatprep.subr.mxu1 %v1103_v5  ;;  %4732 = vmatpush1.msra.mxu0 %v520_v41  ;;  %v667_v13 = vsel %vm656_vm14, %v19789_v61, %v19815_v20  ;;  %v3566_v5 = vsel %vm19817_vm7, %v14915_v43, %v14949_v28  ;;  %v19818_v41 = vld [vmem:[#allocation24_spill] sm:$0xff]  ;;  %v3565_v0 = vsel %vm19821_vm10, %v14656_v3, %v14915_v43  ;;  %vm19822_vm4 = vmmov %vm19820_vm15  ;;  %vm19823_vm5 = vcmask 252928  }
 0x399   : > { %4795 = vmatpush1.msra.mxu1 %v1102_v7  ;;  %3256 = vrot.lane.b32.xlu1 %v14757_v44, %s19380_s12  ;;  %v3243_v4 = vpop.permute.xlu1 %3242  ;;  %vm19824_vm7 = vcmask 261120   ;;  %vm19826_vm10 = vcmask 228352  }
 0x39a   : > { %3254 = vrot.lane.b32.xlu0 %v14745_v38, %s19380_s12  ;;  %4733 = vmatprep.subr.mxu0 %v396_v10  ;;  %v15024_v62 = vpop.permute.xlu0 %3538  ;;  %v19819_v10 = vld [vmem:[#allocation21_spill] sm:$0xff] }
 0x39b   : > { %4796 = vmatprep.subr.mxu1 %v958_v57  ;;  %4734 = vmatpush1.msra.mxu0 %v395_v33  ;;  %v523_v7 = vsel %vm19820_vm15, %v19819_v10, %v19818_v41  ;;  %v522_v61 = vsel %vm19822_vm4, %v19795_v14, %v19819_v10  ;;  %v398_v33 = vld [vmem:[%s12697_s22 + $0x58] sm:$0xff]  ;;  %v3421_v57 = vsel %vm19823_vm5, %v14970_v27, %v15004_v55  ;;  %vm19825_vm15 = vmmov %vm19823_vm5  ;;  %vm19828_vm5 = vcmask 424960  }
 0x39c   : > { %4797 = vmatpush1.msra.mxu1 %v957_v53  ;;  %4749 = vmatprep.subr.mxu0 %v3856_v60  ;;  %v397_v53 = vld [vmem:[%s12697_s22 + $0x50] sm:$0xff]  ;;  %v3420_v43 = vsel %vm19825_vm15, %v14699_v2, %v14970_v27  ;;  %v3858_v60 = vsel %vm19826_vm10, %v14888_v18, %v14922_v1  ;;  %vm19827_vm4 = vmmov %vm19826_vm10  ;;  %vm19830_vm15 = vcmask 261120  }
 0x39d   : > { %4798 = vmatprep.subr.mxu1 %v813_v52  ;;  %4750 = vmatpush2.msra.mxu0 %v3855_v51  ;;  %v15041_v63 = vpop.permute.xlu1 %3391  ;;  %v3857_v52 = vsel %vm19827_vm4, %v14869_v22, %v14888_v18  ;;  %v3275_v51 = vsel %vm19830_vm15, %v14723_v47, %v3243_v4  ;;  %vm19832_vm4 = vcmask 244736   ;;  %vm19835_vm15 = vcmask 424960  }
 0x39e   : > { %4799 = vmatpush1.msra.mxu1 %v812_v8  ;;  %2962 = vrot.lane.b32.xlu1 %v14726_v36, %s12586_s25  ;;  %v15048_v46 = vpop.permute.xlu0 %3244  ;;  %v3568_v8 = vsel %vm19832_vm4, %v14996_v15, %v15024_v62 }
 0x39f   : > { %2960 = vrot.lane.b32.xlu0 %v14714_v24, %s12586_s25  ;;  %4751 = vmatprep.subr.mxu0 %v3711_v50  ;;  %v3276_v3 = vsel %vm19824_vm7, %v3243_v4, %v15048_v46  ;;  %vm19829_vm7 = vcmask 236544  }
 0x3a0   : > { %4800 = vmatprep.subr.mxu1 %v668_v42  ;;  %4752 = vmatpush2.msra.mxu0 %v3710_v35  ;;  %v3713_v27 = vsel %vm19829_vm7, %v14944_v16, %v14978_v17  ;;  %vm19831_vm10 = vmmov %vm19829_vm7  ;;  %v12589_v42 = vmov 0  }
 0x3a1   : > { %4801 = vmatpush1.msra.mxu1 %v667_v13  ;;  %4753 = vmatprep.subr.mxu0 %v3566_v5  ;;  %v3098_v29 = vpop.permute.xlu1 %3097  ;;  %v3712_v22 = vsel %vm19831_vm10, %v14898_v39, %v14944_v16  ;;  %vm19834_vm7 = vmmov %vm19832_vm4  ;;  %vm19836_vm10 = vcmask 261120  }
 0x3a2   : > { %4802 = vmatprep.subr.mxu1 %v523_v7  ;;  %4754 = vmatpush2.msra.mxu0 %v3565_v0  ;;  %v15074_v23 = vpop.permute.xlu0 %3393  ;;  %v3567_v47 = vsel %vm19834_vm7, %v14949_v28, %v14996_v15  ;;  %v3130_v39 = vsel %vm19835_vm15, %v14742_v11, %v3098_v29  ;;  %vm19839_vm7 = vmmov %vm19835_vm15 }
 0x3a3   : > { %4803 = vmatpush1.msra.mxu1 %v522_v61  ;;  %3111 = vrot.lane.b32.xlu1 %v14757_v44, %s12585_s14  ;;  %vm19840_vm15 = vmmov %vm19839_vm7 }
 0x3a4   : > { %3109 = vrot.lane.b32.xlu0 %v14745_v38, %s12585_s14  ;;  %4755 = vmatprep.subr.mxu0 %v3421_v57 }
 0x3a5   : > { %4804 = vmatprep.subr.mxu1 %v398_v33  ;;  %4756 = vmatpush2.msra.mxu0 %v3420_v43  ;;  %v3247_v14 = vpop.permute.xlu1 %3246 }
 0x3a6   : > { %4805 = vmatpush1.msra.mxu1 %v397_v53  ;;  %4757 = vmatprep.subr.mxu0 %v3276_v3  ;;  %v3100_v21 = vpop.permute.xlu0 %3099 }
 0x3a7   : > { %4820 = vmatprep.subr.mxu1 %v3858_v60  ;;  %2817 = vrot.lane.b32.xlu1 %v14726_v36, %s12587_s24  ;;  %v3131_v2 = vsel %vm19828_vm5, %v3098_v29, %v3100_v21  ;;  %vm19833_vm5 = vcmask 252928  }
 0x3a8   : > { %4821 = vmatpush2.msra.mxu1 %v3857_v52  ;;  %2815 = vrot.lane.b32.xlu0 %v14714_v24, %s12587_s24  ;;  %v3423_v50 = vsel %vm19833_vm5, %v15041_v63, %v15074_v23  ;;  %vm19837_vm4 = vmmov %vm19833_vm5 }
 0x3a9   : > { %4822 = vmatprep.subr.mxu1 %v3713_v27  ;;  %4758 = vmatpush2.msra.mxu0 %v3275_v51  ;;  %v2953_v18 = vpop.permute.xlu1 %2952  ;;  %v3422_v4 = vsel %vm19837_vm4, %v15004_v55, %v15041_v63  ;;  %vm19838_vm5 = vmmov %vm19836_vm10 }
 0x3aa   : > { %4823 = vmatpush2.msra.mxu1 %v3712_v22  ;;  %4759 = vmatprep.subr.mxu0 %v3131_v2  ;;  %v15114_v20 = vpop.permute.xlu0 %3248  ;;  %v3277_v11 = vsel %vm19838_vm5, %v15048_v46, %v3247_v14  ;;  %v2985_v55 = vsel %vm2976_vm11, %v14764_v59, %v2953_v18  ;;  %v15152_v59 = vld [vmem:[%s12697_s22 + $0x88] sm:$0xff]  ;;  %vm19847_vm5 = vcmask 646144  }
 0x3ab   : > { %4824 = vmatprep.subr.mxu1 %v3568_v8  ;;  %2966 = vrot.lane.b32.xlu1 %v14757_v44, %s12586_s25  ;;  %v3278_v16 = vsel %vm19836_vm10, %v3247_v14, %v15114_v20  ;;  %vm19843_vm10 = vcmask 637952  }
 0x3ac   : > { %4825 = vmatpush2.msra.mxu1 %v3567_v47  ;;  %2964 = vrot.lane.b32.xlu0 %v14745_v38, %s12586_s25  ;;  %vm19844_vm4 = vmmov %vm19843_vm10 }
 0x3ad   : > { %4826 = vmatprep.subr.mxu1 %v3423_v50  ;;  %4760 = vmatpush2.msra.mxu0 %v3130_v39  ;;  %v3102_v28 = vpop.permute.xlu1 %3101 }
 0x3ae   : > { %4827 = vmatpush2.msra.mxu1 %v3422_v4  ;;  %v2955_v15 = vpop.permute.xlu0 %2954  ;;  %12423 = vset.pattern.permute.xlu0 %v12589_v42  ;;  %v3132_v46 = vsel %vm19840_vm15, %v3100_v21, %v3102_v28  ;;  %v15192_v21 = vld [vmem:[%s19632_s1] sm:$0xff]  ;;  %vm19853_vm15 = vcmask 818176  }
 0x3af   : > { %2672 = vrot.lane.b32.xlu1 %v14726_v36, %s12588_s26  ;;  %4828 = vmatprep.subr.mxu1 %v3278_v16  ;;  %v2986_v35 = vsel %vm2976_vm11, %v2953_v18, %v2955_v15 }
 0x3b0   : > { %2670 = vrot.lane.b32.xlu0 %v14714_v24, %s12588_s26  ;;  %4829 = vmatpush2.msra.mxu1 %v3277_v11  ;;  %v15148_v24 = vld [vmem:[%s12697_s22 + $0x90] sm:$0xff] }
 0x3b1   : > { %4761 = vmatprep.subr.mxu0 %v2986_v35  ;;  %12544 = vset.pattern.permute.xlu1 %v12589_v42 }
 0x3b2   : > { %4762 = vmatpush2.msra.mxu0 %v2985_v55  ;;  %v2808_v63 = vpop.permute.xlu1 %2807  ;;  %v15139_v13 = vpop.permute.xlu0 %3103  ;;  %v19841_v55 = vld [vmem:[#allocation212_spill] sm:$0xff] }
 0x3b3   : > { %2821 = vrot.lane.b32.xlu1 %v14757_v44, %s12587_s24  ;;  %v3133_v36 = vsel %vm19839_vm7, %v3102_v28, %v15139_v13  ;;  %v2840_v0 = vsel %vm2831_vm13, %v14780_v26, %v2808_v63  ;;  %vm19848_vm7 = vmmov %vm19847_vm5 }
 0x3b4   : > { %2819 = vrot.lane.b32.xlu0 %v14745_v38, %s12587_s24  ;;  %4830 = vmatprep.subr.mxu1 %v3133_v36 }
 0x3b5   : > { %4831 = vmatpush2.msra.mxu1 %v3132_v46 }
 0x3b7   : > { %2535 = vrot.lane.b32.xlu1 %v15148_v24, %s19354_s19  ;;  %v2957_v5 = vpop.permute.xlu1 %2956  ;;  %v2810_v10 = vpop.permute.xlu0 %2809 }
 0x3b8   : > { %2533 = vrot.lane.b32.xlu0 %v15152_v59, %s19354_s19  ;;  %v2841_v7 = vsel %vm2831_vm13, %v2808_v63, %v2810_v10  ;;  %v2987_v57 = vsel %vm2976_vm11, %v2955_v15, %v2957_v5  ;;  %v19842_v63 = vld [vmem:[#allocation213_spill] sm:$0xff] }
 0x3b9   : > { %4763 = vmatprep.subr.mxu0 %v2841_v7  ;;  %v2120_v36 = vsel %vm19843_vm10, %v19842_v63, %v19841_v55  ;;  %vm19854_vm10 = vmmov %vm19853_vm15 }
 0x3ba   : > { %4764 = vmatpush2.msra.mxu0 %v2840_v0 }
 0x3bb   : > { %2676 = vrot.lane.b32.xlu1 %v14757_v44, %s12588_s26  ;;  %v2663_v29 = vpop.permute.xlu1 %2662  ;;  %v15175_v44 = vld [vmem:[%s12697_s22 + $0xa0] sm:$0xff] }
 0x3bc   : > { %2674 = vrot.lane.b32.xlu0 %v14745_v38, %s12588_s26  ;;  %v15165_v61 = vpop.permute.xlu0 %2958  ;;  %v15178_v38 = vld [vmem:[%s12697_s22 + $0x98] sm:$0xff]  ;;  %v2695_v43 = vsel %vm2686_vm12, %v14804_v45, %v2663_v29 }
 0x3bd   : > { %v2988_v33 = vsel %vm2976_vm11, %v2957_v5, %v15165_v61  ;;  %v19846_v5 = vld [vmem:[#allocation195_spill] sm:$0xff] }
 0x3be   : > { %4832 = vmatprep.subr.mxu1 %v2988_v33 }
 0x3bf   : > { %2390 = vrot.lane.b32.xlu1 %v15148_v24, %s19372_s20  ;;  %4833 = vmatpush2.msra.mxu1 %v2987_v57  ;;  %v2812_v26 = vpop.permute.xlu1 %2811  ;;  %v19849_v57 = vld [vmem:[#allocation180_spill] sm:$0xff] }
 0x3c0   : > { %2388 = vrot.lane.b32.xlu0 %v15152_v59, %s19372_s20  ;;  %v2665_v53 = vpop.permute.xlu0 %2664  ;;  %v2842_v52 = vsel %vm2831_vm13, %v2810_v10, %v2812_v26 }
 0x3c1   : > { %v2696_v3 = vsel %vm2686_vm12, %v2663_v29, %v2665_v53  ;;  %v1974_v29 = vsel %vm19848_vm7, %v19760_v12, %v19846_v5 }
 0x3c2   : > { %4765 = vmatprep.subr.mxu0 %v2696_v3 }
 0x3c3   : > { %2539 = vrot.lane.b32.xlu1 %v15175_v44, %s19354_s19  ;;  %4766 = vmatpush2.msra.mxu0 %v2695_v43  ;;  %v2526_v14 = vpop.permute.xlu1 %2525  ;;  %v19851_v43 = vld [vmem:[#allocation166_spill] sm:$0xff] }
 0x3c4   : > { %2537 = vrot.lane.b32.xlu0 %v15178_v38, %s19354_s19  ;;  %v15187_v60 = vpop.permute.xlu0 %2813  ;;  %4768 = vmatmul.mubr.f32.vlgmr.msra.gmra.mxu0 %v15192_v21  ;;  %v2554_v22 = vsel %vm2541_vm0, %v14826_v31, %v2526_v14 }
 0x3c5   : > { %v2843_v45 = vsel %vm2831_vm13, %v2812_v26, %v15187_v60  ;;  %12173 = vmatprep.mubr.msk.f32.mxu0 %vm4415_vm1, %v14788_v37  ;;  %v19850_v26 = vld [vmem:[#allocation181_spill] sm:$0xff] }
 0x3c6   : > { %4834 = vmatprep.subr.mxu1 %v2843_v45  ;;  %v1829_v12 = vsel %vm1816_vm6, %v19766_v32, %v19850_v26 }
 0x3c7   : > { %2245 = vrot.lane.b32.xlu1 %v15148_v24, %s12577_s16  ;;  %4835 = vmatpush2.msra.mxu1 %v2842_v52  ;;  %v2667_v2 = vpop.permute.xlu1 %2666 }
 0x3c8   : > { %2243 = vrot.lane.b32.xlu0 %v15152_v59, %s12577_s16  ;;  %v2528_v27 = vpop.permute.xlu0 %2527  ;;  %v2697_v47 = vsel %vm2686_vm12, %v2665_v53, %v2667_v2  ;;  %v1830_v53 = vsel %vm1816_vm6, %v19850_v26, %v19849_v57 }
 0x3c9   : > { %v2555_v51 = vsel %vm2541_vm0, %v2526_v14, %v2528_v27  ;;  %v19852_v14 = vld [vmem:[#allocation163_spill] sm:$0xff] }
 0x3ca   : > { %4845 = vmatprep.subr.mxu0 %v2555_v51  ;;  %v1685_v45 = vsel %vm19853_vm15, %v19852_v14, %v19851_v43  ;;  %v19855_v51 = vld [vmem:[#allocation148_spill] sm:$0xff]  ;;  %vm19864_vm15 = vmmov %vm19848_vm7 }
 0x3cb   : > { %2394 = vrot.lane.b32.xlu1 %v15175_v44, %s19372_s20  ;;  %4846 = vmatpush1.msra.mxu0 %v2554_v22  ;;  %v2381_v18 = vpop.permute.xlu1 %2380  ;;  %v19856_v22 = vld [vmem:[#allocation149_spill] sm:$0xff] }
 0x3cc   : > { %2392 = vrot.lane.b32.xlu0 %v15178_v38, %s19372_s20  ;;  %v15211_v8 = vpop.permute.xlu0 %2668  ;;  %v2409_v4 = vsel %vm2396_vm2, %v14846_v30, %v2381_v18  ;;  %v2264_v30 = vsel %vm2251_vm3, %v14087_v25, %v14085_v9  ;;  %v19845_v25 = vld [vmem:[#allocation198_spill] sm:$0xff] }
 0x3cd   : > { %v2698_v50 = vsel %vm2686_vm12, %v2667_v2, %v15211_v8  ;;  %v1975_v10 = vsel %vm19847_vm5, %v19846_v5, %v19845_v25  ;;  %v1684_v2 = vsel %vm19854_vm10, %v19772_v56, %v19852_v14  ;;  %v1539_v56 = vsel %vm1526_vm8, %v19780_v34, %v19856_v22  ;;  %vm19859_vm5 = vmmov %vm19844_vm4  ;;  %v19862_v34 = vld [vmem:[#allocation200_spill] sm:$0xff]  ;;  %v19868_v5 = vld [vmem:[#allocation182_spill] sm:$0xff] }
 0x3ce   : > { %4836 = vmatprep.subr.mxu1 %v2698_v50  ;;  %v19857_v50 = vld [vmem:[#allocation214_spill] sm:$0xff]  ;;  %vm19867_vm10 = vcmask 842752  }
 0x3cf   : > { %2249 = vrot.lane.b32.xlu1 %v15175_v44, %s12577_s16  ;;  %4837 = vmatpush2.msra.mxu1 %v2697_v47  ;;  %v2530_v31 = vpop.permute.xlu1 %2529  ;;  %v19858_v47 = vld [vmem:[#allocation215_spill] sm:$0xff] }
 0x3d0   : > { %2247 = vrot.lane.b32.xlu0 %v15178_v38, %s12577_s16  ;;  %v2383_v39 = vpop.permute.xlu0 %2382  ;;  %4839 = vmatmul.mubr.f32.vlgmr.msra.gmra.mxu1 %v15192_v21  ;;  %v2556_v11 = vsel %vm2541_vm0, %v2528_v27, %v2530_v31  ;;  %s20063_s16 = smov 78  }
 0x3d1   : > { %v2410_v16 = vsel %vm2396_vm2, %v2381_v18, %v2383_v39  ;;  %12174 = vmatprep.mubr.msk.f32.mxu1 %vm4415_vm1, %v14788_v37  ;;  %v1540_v18 = vsel %vm1526_vm8, %v19856_v22, %v19855_v51 }
 0x3d2   : > { %4847 = vmatprep.subr.mxu0 %v2410_v16  ;;  %v19860_v16 = vld [vmem:[#allocation134_spill] sm:$0xff] }
 0x3d3   : > { %3840 = vrot.lane.b32.xlu1 %v15148_v24, %s19386_s21  ;;  %4848 = vmatpush1.msra.mxu0 %v2409_v4  ;;  %v2238_v28 = vpop.permute.xlu1 %2237  ;;  %v19861_v4 = vld [vmem:[#allocation131_spill] sm:$0xff] }
 0x3d4   : > { %3838 = vrot.lane.b32.xlu0 %v15152_v59, %s19386_s21  ;;  %v15230_v15 = vpop.permute.xlu0 %2531  ;;  %v2265_v42 = vsel %vm2251_vm3, %v14085_v9, %v2238_v28  ;;  %v2119_v9 = vsel %vm19844_vm4, %v19755_v58, %v19842_v63 }
 0x3d5   : > { %4849 = vmatprep.subr.mxu0 %v2265_v42  ;;  %v2557_v37 = vsel %vm2541_vm0, %v2530_v31, %v15230_v15  ;;  %v2122_v31 = vsel %vm19844_vm4, %v19858_v47, %v19857_v50  ;;  %vm19870_vm4 = vmmov %vm19867_vm10 }
 0x3d6   : > { %4916 = vmatprep.subr.mxu1 %v2557_v37  ;;  %4850 = vmatpush1.msra.mxu0 %v2264_v30  ;;  %v19863_v37 = vld [vmem:[#allocation197_spill] sm:$0xff] }
 0x3d7   : > { %3695 = vrot.lane.b32.xlu1 %v15148_v24, %s19346_s28  ;;  %4917 = vmatpush1.msra.mxu1 %v2556_v11  ;;  %v15242_v35 = vpop.permute.xlu1 %2386  ;;  %v1977_v30 = vsel %vm19848_vm7, %v19863_v37, %v19862_v34  ;;  %v1394_v11 = vsel %vm1381_vm9, %v19786_v19, %v19861_v4  ;;  %v1976_v63 = vsel %vm19864_vm15, %v19845_v25, %v19863_v37  ;;  %vm19876_vm7 = vcmask 818176   ;;  %v19888_v37 = vld [vmem:[#allocation136_spill] sm:$0xff] }
 0x3d8   : > { %3693 = vrot.lane.b32.xlu0 %v15152_v59, %s19346_s28  ;;  %v2385_v46 = vpop.permute.xlu0 %2384  ;;  %4851 = vmatprep.subr.mxu0 %v2120_v36  ;;  %v19865_v36 = vld [vmem:[#allocation116_spill] sm:$0xff] }
 0x3d9   : > { %4852 = vmatpush1.msra.mxu0 %v2119_v9  ;;  %v2412_v7 = vsel %vm2396_vm2, %v2385_v46, %v15242_v35  ;;  %v2411_v0 = vsel %vm2396_vm2, %v2383_v39, %v2385_v46  ;;  %v2121_v39 = vsel %vm19859_vm5, %v19841_v55, %v19858_v47  ;;  %v19866_v46 = vld [vmem:[#allocation117_spill] sm:$0xff]  ;;  %vm19873_vm5 = vcmask 850944  }
 0x3da   : > { %4853 = vmatprep.subr.mxu0 %v1975_v10  ;;  %4918 = vmatprep.subr.mxu1 %v2412_v7  ;;  %v1250_v9 = vsel %vm19867_vm10, %v19866_v46, %v19865_v36  ;;  %v19869_v10 = vld [vmem:[#allocation183_spill] sm:$0xff]  ;;  %v1249_v19 = vsel %vm19870_vm4, %v19791_v49, %v19866_v46  ;;  %v19875_v49 = vld [vmem:[#allocation165_spill] sm:$0xff]  ;;  %vm19877_vm15 = vmmov %vm19873_vm5  ;;  %vm19881_vm4 = vcmask 1014784  }
 0x3db   : > { %3844 = vrot.lane.b32.xlu1 %v15175_v44, %s19386_s21  ;;  %4854 = vmatpush1.msra.mxu0 %v1974_v29  ;;  %v15263_v58 = vpop.permute.xlu1 %2241  ;;  %v1832_v7 = vsel %vm1816_vm6, %v19869_v10, %v19868_v5  ;;  %v1831_v25 = vsel %vm1816_vm6, %v19849_v57, %v19869_v10  ;;  %v19871_v29 = vld [vmem:[#allocation102_spill] sm:$0xff]  ;;  %vm19878_vm10 = vmmov %vm19876_vm7  ;;  %v19891_v46 = vld [vmem:[#allocation45_spill] sm:$0xff] }
 0x3dc   : > { %3842 = vrot.lane.b32.xlu0 %v15178_v38, %s19386_s21  ;;  %4919 = vmatpush1.msra.mxu1 %v2411_v0  ;;  %v2240_v33 = vpop.permute.xlu0 %2239  ;;  %v1686_v57 = vsel %vm19878_vm10, %v19851_v43, %v19875_v49  ;;  %vm19895_vm10 = vcmask 842752  }
 0x3dd   : > { %4855 = vmatprep.subr.mxu0 %v1830_v53  ;;  %v2267_v3 = vsel %vm2251_vm3, %v2240_v33, %v15263_v58  ;;  %v2266_v52 = vsel %vm2251_vm3, %v2238_v28, %v2240_v33  ;;  %v1395_v28 = vsel %vm1381_vm9, %v19861_v4, %v19860_v16  ;;  %v19872_v33 = vld [vmem:[#allocation99_spill] sm:$0xff] }
 0x3de   : > { %4856 = vmatpush1.msra.mxu0 %v1829_v12  ;;  %4920 = vmatprep.subr.mxu1 %v2267_v3  ;;  %v1105_v26 = vsel %vm19873_vm5, %v19872_v33, %v19871_v29  ;;  %v19874_v12 = vld [vmem:[#allocation168_spill] sm:$0xff]  ;;  %v1104_v14 = vsel %vm19877_vm15, %v19798_v6, %v19872_v33  ;;  %v19882_v6 = vld [vmem:[#allocation150_spill] sm:$0xff]  ;;  %vm19884_vm5 = vmmov %vm19881_vm4 }
 0x3df   : > { %3550 = vrot.lane.b32.xlu1 %v15148_v24, %s19384_s29  ;;  %4857 = vmatprep.subr.mxu0 %v1685_v45  ;;  %v15284_v32 = vpop.permute.xlu1 %3832  ;;  %v1687_v3 = vsel %vm19876_vm7, %v19875_v49, %v19874_v12  ;;  %v19879_v45 = vld [vmem:[#allocation82_spill] sm:$0xff]  ;;  %v19886_v4 = vld [vmem:[#allocation63_spill] sm:$0xff]  ;;  %vm19887_vm7 = vcmask 1022976  }
 0x3e0   : > { %3548 = vrot.lane.b32.xlu0 %v15152_v59, %s19384_s29  ;;  %4858 = vmatpush1.msra.mxu0 %v1684_v2  ;;  %v15288_v27 = vpop.permute.xlu0 %3830  ;;  %vm19890_vm15 = vmmov %vm19887_vm7  ;;  %v19898_v49 = vld [vmem:[#allocation23_spill] sm:$0xff] }
 0x3e1   : > { %4921 = vmatpush1.msra.mxu1 %v2266_v52  ;;  %4859 = vmatprep.subr.mxu0 %v1540_v18  ;;  %v19880_v52 = vld [vmem:[#allocation83_spill] sm:$0xff] }
 0x3e2   : > { %4922 = vmatprep.subr.mxu1 %v2122_v31  ;;  %4860 = vmatpush1.msra.mxu0 %v1539_v56  ;;  %v960_v2 = vsel %vm19881_vm4, %v19880_v52, %v19879_v45  ;;  %v19883_v18 = vld [vmem:[#allocation151_spill] sm:$0xff]  ;;  %v959_v43 = vsel %vm19884_vm5, %v19803_v54, %v19880_v52  ;;  %v814_v54 = vsel %vm19890_vm15, %v19808_v40, %v19886_v4  ;;  %v19893_v40 = vld [vmem:[#allocation118_spill] sm:$0xff]  ;;  %vm19896_vm4 = vmmov %vm19895_vm10  ;;  %vm19899_vm5 = vcmask 1039360  }
 0x3e3   : > { %3699 = vrot.lane.b32.xlu1 %v15175_v44, %s19346_s28  ;;  %4923 = vmatpush1.msra.mxu1 %v2121_v39  ;;  %v15307_v42 = vpop.permute.xlu1 %3687  ;;  %v1542_v47 = vsel %vm1526_vm8, %v19883_v18, %v19882_v6  ;;  %v1541_v56 = vsel %vm1526_vm8, %v19855_v51, %v19883_v18  ;;  %v19885_v39 = vld [vmem:[#allocation66_spill] sm:$0xff]  ;;  %v19901_v52 = vld [vmem:[#allocation101_spill] sm:$0xff]  ;;  %vm19903_vm15 = vmmov %vm19899_vm5 }
 0x3e4   : > { %3697 = vrot.lane.b32.xlu0 %v15178_v38, %s19346_s28  ;;  %4861 = vmatprep.subr.mxu0 %v1395_v28  ;;  %v15317_v55 = vpop.permute.xlu0 %3685  ;;  %v815_v28 = vsel %vm19887_vm7, %v19886_v4, %v19885_v39  ;;  %vm19902_vm7 = vcmask 850944   ;;  %v399_v18 = vld [vmem:[%s12697_s22 + $0x60] sm:$0xff]  ;;  %s20065_s28 = smov 124  }
 0x3e5   : > { %4924 = vmatprep.subr.mxu1 %v1977_v30  ;;  %4862 = vmatpush1.msra.mxu0 %v1394_v11  ;;  %v19889_v30 = vld [vmem:[#allocation133_spill] sm:$0xff] }
 0x3e6   : > { %4925 = vmatpush1.msra.mxu1 %v1976_v63  ;;  %4863 = vmatprep.subr.mxu0 %v1250_v9  ;;  %v1397_v11 = vsel %vm1381_vm9, %v19889_v30, %v19888_v37  ;;  %v1396_v51 = vsel %vm1381_vm9, %v19860_v16, %v19889_v30  ;;  %v19892_v9 = vld [vmem:[#allocation46_spill] sm:$0xff]  ;;  %v19906_v4 = vld [vmem:[#allocation85_spill] sm:$0xff] }
 0x3e7   : > { %3405 = vrot.lane.b32.xlu1 %v15148_v24, %s19344_s30  ;;  %4926 = vmatprep.subr.mxu1 %v1832_v7  ;;  %v15333_v0 = vpop.permute.xlu1 %3836  ;;  %v670_v10 = vsel %vm656_vm14, %v19892_v9, %v19891_v46  ;;  %v669_v33 = vsel %vm656_vm14, %v19814_v48, %v19892_v9  ;;  %v19900_v48 = vld [vmem:[#allocation104_spill] sm:$0xff] }
 0x3e8   : > { %3403 = vrot.lane.b32.xlu0 %v15152_v59, %s19344_s30  ;;  %4864 = vmatpush1.msra.mxu0 %v1249_v19  ;;  %v15343_v53 = vpop.permute.xlu0 %3834  ;;  %v19894_v19 = vld [vmem:[#allocation119_spill] sm:$0xff] }
 0x3e9   : > { %4927 = vmatpush1.msra.mxu1 %v1831_v25  ;;  %4865 = vmatprep.subr.mxu0 %v1105_v26  ;;  %v1252_v25 = vsel %vm19895_vm10, %v19894_v19, %v19893_v40  ;;  %v1251_v16 = vsel %vm19896_vm4, %v19865_v36, %v19894_v19  ;;  %v19897_v26 = vld [vmem:[#allocation26_spill] sm:$0xff]  ;;  %v524_v36 = vsel %vm19903_vm15, %v19818_v41, %v19898_v49  ;;  %vm19904_vm10 = vmmov %vm19902_vm7  ;;  %vm19907_vm4 = vcmask 1014784  }
 0x3ea   : > { %4928 = vmatprep.subr.mxu1 %v1687_v3  ;;  %4866 = vmatpush1.msra.mxu0 %v1104_v14  ;;  %v525_v3 = vsel %vm19899_vm5, %v19898_v49, %v19897_v26  ;;  %v400_v14 = vld [vmem:[%s12697_s22 + $0x68] sm:$0xff]  ;;  %vm19908_vm5 = vmmov %vm19907_vm4  ;;  %vm19912_vm15 = vcmask 1022976  }
 0x3eb   : > { %3554 = vrot.lane.b32.xlu1 %v15175_v44, %s19384_s29  ;;  %4929 = vmatpush1.msra.mxu1 %v1686_v57  ;;  %v15359_v22 = vpop.permute.xlu1 %3542  ;;  %v961_v41 = vsel %vm19908_vm5, %v19879_v45, %v19906_v4  ;;  %vm19915_vm5 = vcmask 236544  }
 0x3ec   : > { %3552 = vrot.lane.b32.xlu0 %v15178_v38, %s19384_s29  ;;  %4867 = vmatprep.subr.mxu0 %v960_v2  ;;  %v15369_v31 = vpop.permute.xlu0 %3540  ;;  %v1107_v2 = vsel %vm19902_vm7, %v19901_v52, %v19900_v48  ;;  %vm19909_vm7 = vcmask 228352   ;;  %v3715_v19 = vsel %vm19915_vm5, %v15317_v55, %v15307_v42 }
 0x3ed   : > { %4930 = vmatprep.subr.mxu1 %v1542_v47  ;;  %4868 = vmatpush1.msra.mxu0 %v959_v43  ;;  %v1106_v43 = vsel %vm19904_vm10, %v19871_v29, %v19901_v52  ;;  %v3860_v29 = vsel %vm19909_vm7, %v15288_v27, %v15284_v32  ;;  %vm19913_vm10 = vmmov %vm19909_vm7  ;;  %v402_v52 = vld [vmem:[%s12697_s22 + $0x78] sm:$0xff] }
 0x3ee   : > { %4931 = vmatpush1.msra.mxu1 %v1541_v56  ;;  %4869 = vmatprep.subr.mxu0 %v815_v28  ;;  %v19905_v56 = vld [vmem:[#allocation84_spill] sm:$0xff]  ;;  %v3859_v45 = vsel %vm19913_vm10, %v14922_v1, %v15288_v27  ;;  %vm19918_vm7 = vmmov %vm19915_vm5  ;;  %vm19922_vm10 = vcmask 1039360  }
 0x3ef   : > { %3260 = vrot.lane.b32.xlu1 %v15148_v24, %s19380_s12  ;;  %4932 = vmatprep.subr.mxu1 %v1397_v11  ;;  %v15385_v63 = vpop.permute.xlu1 %3691  ;;  %v962_v28 = vsel %vm19907_vm4, %v19906_v4, %v19905_v56  ;;  %vm19914_vm4 = vmmov %vm19912_vm15  ;;  %v3714_v1 = vsel %vm19918_vm7, %v14978_v17, %v15317_v55  ;;  %v19920_v17 = vld [vmem:[#allocation28_spill] sm:$0xff]  ;;  %v19921_v55 = vld [vmem:[#allocation25_spill] sm:$0xff]  ;;  %vm19925_vm7 = vcmask 252928  }
 0x3f0   : > { %3258 = vrot.lane.b32.xlu0 %v15152_v59, %s19380_s12  ;;  %4870 = vmatpush1.msra.mxu0 %v814_v54  ;;  %v15395_v7 = vpop.permute.xlu0 %3689  ;;  %v19910_v54 = vld [vmem:[#allocation68_spill] sm:$0xff]  ;;  %vm19924_vm5 = vmmov %vm19922_vm10 }
 0x3f1   : > { %4933 = vmatpush1.msra.mxu1 %v1396_v51  ;;  %4871 = vmatprep.subr.mxu0 %v670_v10  ;;  %v19911_v51 = vld [vmem:[#allocation65_spill] sm:$0xff] }
 0x3f2   : > { %4934 = vmatprep.subr.mxu1 %v1252_v25  ;;  %4872 = vmatpush1.msra.mxu0 %v669_v33  ;;  %v817_v9 = vsel %vm19912_vm15, %v19911_v51, %v19910_v54  ;;  %v816_v10 = vsel %vm19914_vm4, %v19885_v39, %v19911_v51  ;;  %v19916_v25 = vld [vmem:[#allocation47_spill] sm:$0xff]  ;;  %v19917_v33 = vld [vmem:[#allocation48_spill] sm:$0xff]  ;;  %vm19919_vm15 = vcmask 244736  }
 0x3f3   : > { %4935 = vmatpush1.msra.mxu1 %v1251_v16  ;;  %3409 = vrot.lane.b32.xlu1 %v15175_v44, %s19344_s30  ;;  %v15412_v57 = vpop.permute.xlu1 %3397  ;;  %v672_v16 = vsel %vm656_vm14, %v19917_v33, %v19916_v25  ;;  %v671_v27 = vsel %vm656_vm14, %v19891_v46, %v19917_v33  ;;  %v3570_v49 = vsel %vm19919_vm15, %v15369_v31, %v15359_v22  ;;  %vm19923_vm4 = vmmov %vm19919_vm15 }
 0x3f4   : > { %3407 = vrot.lane.b32.xlu0 %v15178_v38, %s19344_s30  ;;  %4873 = vmatprep.subr.mxu0 %v525_v3  ;;  %v3396_v47 = vpop.permute.xlu0 %3395  ;;  %v3569_v46 = vsel %vm19923_vm4, %v15024_v62, %v15369_v31  ;;  %vm19926_vm15 = vmmov %vm19925_vm7  ;;  %vm19928_vm4 = vcmask 228352   ;;  %s19348_s30 = smov 122  }
 0x3f5   : > { %4936 = vmatprep.subr.mxu1 %v1107_v2  ;;  %4874 = vmatpush1.msra.mxu0 %v524_v36  ;;  %v526_v2 = vsel %vm19924_vm5, %v19897_v26, %v19921_v55  ;;  %v3425_v36 = vsel %vm19925_vm7, %v3396_v47, %v15412_v57  ;;  %v3862_v26 = vsel %vm19928_vm4, %v15343_v53, %v15333_v0  ;;  %vm19930_vm7 = vmmov %vm19928_vm4  ;;  %vm19933_vm4 = vcmask 244736  }
 0x3f6   : > { %4937 = vmatpush1.msra.mxu1 %v1106_v43  ;;  %4875 = vmatprep.subr.mxu0 %v400_v14  ;;  %v527_v14 = vsel %vm19922_vm10, %v19921_v55, %v19920_v17  ;;  %v3424_v43 = vsel %vm19926_vm15, %v15074_v23, %v3396_v47  ;;  %vm19927_vm10 = vcmask 261120   ;;  %v3861_v23 = vsel %vm19930_vm7, %v15284_v32, %v15343_v53  ;;  %vm19935_vm7 = vmmov %vm19933_vm4 }
 0x3f7   : > { %4938 = vmatprep.subr.mxu1 %v962_v28  ;;  %4876 = vmatpush1.msra.mxu0 %v399_v18  ;;  %v15432_v30 = vpop.permute.xlu1 %3546  ;;  %v401_v18 = vld [vmem:[%s12697_s22 + $0x70] sm:$0xff]  ;;  %vm19929_vm5 = vmmov %vm19927_vm10  ;;  %vm19931_vm15 = vcmask 236544  }
 0x3f8   : > { %4939 = vmatpush1.msra.mxu1 %v961_v41  ;;  %3115 = vrot.lane.b32.xlu1 %v15148_v24, %s12585_s14  ;;  %v3545_v11 = vpop.permute.xlu0 %3544  ;;  %v3717_v47 = vsel %vm19931_vm15, %v15395_v7, %v15385_v63 }
 0x3f9   : > { %3113 = vrot.lane.b32.xlu0 %v15152_v59, %s12585_s14  ;;  %4891 = vmatprep.subr.mxu0 %v3860_v29  ;;  %v3572_v41 = vsel %vm19933_vm4, %v3545_v11, %v15432_v30  ;;  %v3571_v29 = vsel %vm19935_vm7, %v15359_v22, %v3545_v11 }
 0x3fa   : > { %4940 = vmatprep.subr.mxu1 %v817_v9  ;;  %4892 = vmatpush2.msra.mxu0 %v3859_v45 }
 0x3fb   : > { %4941 = vmatpush1.msra.mxu1 %v816_v10  ;;  %4893 = vmatprep.subr.mxu0 %v3715_v19 }
 0x3fc   : > { %4942 = vmatprep.subr.mxu1 %v672_v16  ;;  %4894 = vmatpush2.msra.mxu0 %v3714_v1  ;;  %v3253_v39 = vpop.permute.xlu1 %3252 }
 0x3fd   : > { %4943 = vmatpush1.msra.mxu1 %v671_v27  ;;  %3264 = vrot.lane.b32.xlu1 %v15175_v44, %s19380_s12  ;;  %v3251_v3 = vpop.permute.xlu0 %3250 }
 0x3fe   : > { %3262 = vrot.lane.b32.xlu0 %v15178_v38, %s19380_s12  ;;  %4895 = vmatprep.subr.mxu0 %v3570_v49  ;;  %v3280_v62 = vsel %vm19927_vm10, %v3251_v3, %v3253_v39  ;;  %v3279_v4 = vsel %vm19929_vm5, %v15114_v20, %v3251_v3  ;;  %vm19932_vm10 = vmmov %vm19931_vm15  ;;  %vm19934_vm5 = vcmask 252928   ;;  %v4409_v3 = vld [vmem:[%s19943_s2] sm:$0xff]  ;;  %s20139_s2 = smov 32  }
 0x3ff   : > { %4944 = vmatprep.subr.mxu1 %v527_v14  ;;  %4896 = vmatpush2.msra.mxu0 %v3569_v46  ;;  %v3716_v20 = vsel %vm19932_vm10, %v15307_v42, %v15395_v7  ;;  %vm19936_vm15 = vmmov %vm19934_vm5  ;;  %vm19937_vm10 = vcmask 424960  }
 0x400   : > { %4945 = vmatpush1.msra.mxu1 %v526_v2  ;;  %4897 = vmatprep.subr.mxu0 %v3425_v36  ;;  %vm19938_vm4 = vmmov %vm19937_vm10 }
 0x401   : > { %4946 = vmatprep.subr.mxu1 %v402_v52  ;;  %4898 = vmatpush2.msra.mxu0 %v3424_v43  ;;  %v15485_v31 = vpop.permute.xlu1 %3401 }
 0x402   : > { %4947 = vmatpush1.msra.mxu1 %v401_v18  ;;  %2970 = vrot.lane.b32.xlu1 %v15148_v24, %s12586_s25  ;;  %v3400_v28 = vpop.permute.xlu0 %3399 }
 0x403   : > { %2968 = vrot.lane.b32.xlu0 %v15152_v59, %s12586_s25  ;;  %4962 = vmatprep.subr.mxu1 %v3862_v26  ;;  %v3427_v32 = vsel %vm19934_vm5, %v3400_v28, %v15485_v31  ;;  %v3426_v42 = vsel %vm19936_vm15, %v15412_v57, %v3400_v28  ;;  %vm19939_vm5 = vcmask 261120   ;;  %vm19941_vm15 = vmmov %vm19938_vm4  ;;  %v12547_v26 = vld [vmem:[%s19632_s1 + $0x8] sm:$0xff] }
 0x404   : > { %4963 = vmatpush2.msra.mxu1 %v3861_v23  ;;  %4899 = vmatprep.subr.mxu0 %v3280_v62  ;;  %vm19940_vm7 = vmmov %vm19939_vm5 }
 0x405   : > { %4964 = vmatprep.subr.mxu1 %v3717_v47  ;;  %4900 = vmatpush2.msra.mxu0 %v3279_v4 }
 0x406   : > { %4965 = vmatpush2.msra.mxu1 %v3716_v20  ;;  %3119 = vrot.lane.b32.xlu1 %v15175_v44, %s12585_s14  ;;  %v3108_v53 = vpop.permute.xlu1 %3107 }
 0x407   : > { %3117 = vrot.lane.b32.xlu0 %v15178_v38, %s12585_s14  ;;  %4966 = vmatprep.subr.mxu1 %v3572_v41  ;;  %v3106_v7 = vpop.permute.xlu0 %3105  ;;  %s19352_s14 = smov 120  }
 0x408   : > { %4967 = vmatpush2.msra.mxu1 %v3571_v29  ;;  %v3135_v51 = vsel %vm19937_vm10, %v3106_v7, %v3108_v53  ;;  %v3134_v9 = vsel %vm19938_vm4, %v15139_v13, %v3106_v7  ;;  %vm19942_vm10 = vmmov %vm19938_vm4  ;;  %vm19946_vm4 = vcmask 637952  }
 0x409   : > { %4968 = vmatprep.subr.mxu1 %v3427_v32  ;;  %4901 = vmatprep.subr.mxu0 %v3135_v51 }
 0x40a   : > { %2825 = vrot.lane.b32.xlu1 %v15148_v24, %s12587_s24  ;;  %4969 = vmatpush2.msra.mxu1 %v3426_v42 }
 0x40b   : > { %2823 = vrot.lane.b32.xlu0 %v15152_v59, %s12587_s24  ;;  %4902 = vmatpush2.msra.mxu0 %v3134_v9  ;;  %v15524_v22 = vpop.permute.xlu1 %3256 }
 0x40c   : > { %v3255_v57 = vpop.permute.xlu0 %3254 }
 0x40d   : > { %v3282_v11 = vsel %vm19939_vm5, %v3255_v57, %v15524_v22  ;;  %v3281_v45 = vsel %vm19940_vm7, %v3253_v39, %v3255_v57  ;;  %vm19947_vm5 = vmmov %vm19946_vm4  ;;  %vm19950_vm7 = vcmask 646144  }
 0x40e   : > { %2974 = vrot.lane.b32.xlu1 %v15175_v44, %s12586_s25  ;;  %4970 = vmatprep.subr.mxu1 %v3282_v11 }
 0x40f   : > { %2972 = vrot.lane.b32.xlu0 %v15178_v38, %s12586_s25  ;;  %4971 = vmatpush2.msra.mxu1 %v3281_v45  ;;  %s19377_s25 = smov 72  }
 0x410   : > { %v2963_v13 = vpop.permute.xlu1 %2962 }
 0x411   : > { %v2961_v10 = vpop.permute.xlu0 %2960 }
 0x412   : > { %2680 = vrot.lane.b32.xlu1 %v15148_v24, %s12588_s26  ;;  %v2990_v19 = vsel %vm2976_vm11, %v2961_v10, %v2963_v13  ;;  %v2989_v33 = vsel %vm2976_vm11, %v15165_v61, %v2961_v10  ;;  %v19944_v10 = vld [vmem:[#allocation216_spill] sm:$0xff] }
 0x413   : > { %2678 = vrot.lane.b32.xlu0 %v15152_v59, %s12588_s26  ;;  %4903 = vmatprep.subr.mxu0 %v2990_v19  ;;  %v19945_v19 = vld [vmem:[#allocation217_spill] sm:$0xff] }
 0x414   : > { %4904 = vmatpush2.msra.mxu0 %v2989_v33  ;;  %v2124_v33 = vsel %vm19946_vm4, %v19945_v19, %v19944_v10 }
 0x415   : > { %v15540_v16 = vpop.permute.xlu1 %3111 }
 0x416   : > { %2829 = vrot.lane.b32.xlu1 %v15175_v44, %s12587_s24  ;;  %v3110_v1 = vpop.permute.xlu0 %3109 }
 0x417   : > { %2827 = vrot.lane.b32.xlu0 %v15178_v38, %s12587_s24  ;;  %v3137_v24 = vsel %vm19941_vm15, %v3110_v1, %v15540_v16  ;;  %v3136_v27 = vsel %vm19942_vm10, %v3108_v53, %v3110_v1  ;;  %vm19951_vm15 = vmmov %vm19950_vm7  ;;  %vm19956_vm10 = vcmask 818176   ;;  %s19389_s24 = smov 26  }
 0x418   : > { %4972 = vmatprep.subr.mxu1 %v3137_v24  ;;  %v2123_v24 = vsel %vm19947_vm5, %v19857_v50, %v19945_v19  ;;  %v19953_v50 = vld [vmem:[#allocation185_spill] sm:$0xff]  ;;  %vm19957_vm4 = vmmov %vm19956_vm10 }
 0x419   : > { %4973 = vmatpush2.msra.mxu1 %v3136_v27  ;;  %v2818_v61 = vpop.permute.xlu1 %2817  ;;  %v19948_v27 = vld [vmem:[#allocation202_spill] sm:$0xff] }
 0x41a   : > { %2684 = vrot.lane.b32.xlu1 %v15175_v44, %s12588_s26  ;;  %v2816_v59 = vpop.permute.xlu0 %2815 }
 0x41b   : > { %2682 = vrot.lane.b32.xlu0 %v15178_v38, %s12588_s26  ;;  %v2845_v39 = vsel %vm2831_vm13, %v2816_v59, %v2818_v61  ;;  %v2844_v49 = vsel %vm2831_vm13, %v15187_v60, %v2816_v59  ;;  %s19374_s26 = smov 74  }
 0x41c   : > { %4905 = vmatprep.subr.mxu0 %v2845_v39 }
 0x41d   : > { %4906 = vmatpush2.msra.mxu0 %v2844_v49  ;;  %v15559_v55 = vpop.permute.xlu1 %2966 }
 0x41e   : > { %v2965_v14 = vpop.permute.xlu0 %2964 }
 0x41f   : > { %4412 = vperm.xlu0 %12423, %v4409_v3   ;;  %v2992_v44 = vsel %vm2976_vm11, %v2965_v14, %v15559_v55  ;;  %v2991_v38 = vsel %vm2976_vm11, %v2963_v13, %v2965_v14  ;;  %v19952_v14 = vld [vmem:[#allocation184_spill] sm:$0xff] }
 0x420   : > { %4974 = vmatprep.subr.mxu1 %v2992_v44  ;;  %v1834_v44 = vsel %vm1816_vm6, %v19953_v50, %v19952_v14 }
 0x421   : > { %4975 = vmatpush2.msra.mxu1 %v2991_v38  ;;  %v2673_v46 = vpop.permute.xlu1 %2672 }
 0x422   : > { %v2671_v52 = vpop.permute.xlu0 %2670 }
 0x423   : > { %v2700_v60 = vsel %vm2686_vm12, %v2671_v52, %v2673_v46  ;;  %v2699_v2 = vsel %vm2686_vm12, %v15211_v8, %v2671_v52  ;;  %v19954_v52 = vld [vmem:[#allocation170_spill] sm:$0xff] }
 0x424   : > { %4907 = vmatprep.subr.mxu0 %v2700_v60  ;;  %v19955_v60 = vld [vmem:[#allocation167_spill] sm:$0xff] }
 0x425   : > { %4908 = vmatpush2.msra.mxu0 %v2699_v2  ;;  %v15567_v36 = vpop.permute.xlu1 %2821  ;;  %v1689_v2 = vsel %vm19956_vm10, %v19955_v60, %v19954_v52  ;;  %vm19970_vm10 = vcmask 842752  }
 0x426   : > { %v2820_v18 = vpop.permute.xlu0 %2819  ;;  %4910 = vmatmul.mubr.f32.vlgmr.msra.gmra.mxu0 %v15192_v21 }
 0x427   : > { %v2847_v43 = vsel %vm2831_vm13, %v2820_v18, %v15567_v36  ;;  %v2846_v62 = vsel %vm2831_vm13, %v2818_v61, %v2820_v18  ;;  %12175 = vmatprep.mubr.msk.f32.mxu0 %vm4415_vm1, %v12547_v26  ;;  %v19949_v61 = vld [vmem:[#allocation199_spill] sm:$0xff] }
 0x428   : > { %4976 = vmatprep.subr.mxu1 %v2847_v43  ;;  %v1979_v59 = vsel %vm19950_vm7, %v19949_v61, %v19948_v27  ;;  %v1978_v49 = vsel %vm19951_vm15, %v19862_v34, %v19949_v61  ;;  %v1688_v43 = vsel %vm19957_vm4, %v19874_v12, %v19955_v60  ;;  %vm19967_vm15 = vmmov %vm19950_vm7  ;;  %v19978_v61 = vld [vmem:[#allocation169_spill] sm:$0xff]  ;;  %v19988_v60 = vld [vmem:[#allocation70_spill] sm:$0xff] }
 0x429   : > { %4977 = vmatpush2.msra.mxu1 %v2846_v62  ;;  %v2536_v8 = vpop.permute.xlu1 %2535  ;;  %vm19973_vm4 = vmmov %vm19970_vm10 }
 0x42a   : > { %v2534_v4 = vpop.permute.xlu0 %2533 }
 0x42b   : > { %v2559_v28 = vsel %vm2541_vm0, %v2534_v4, %v2536_v8  ;;  %v2558_v23 = vsel %vm2541_vm0, %v15230_v15, %v2534_v4  ;;  %v19960_v4 = vld [vmem:[#allocation218_spill] sm:$0xff] }
 0x42c   : > { %4987 = vmatprep.subr.mxu0 %v2559_v28  ;;  %v19961_v28 = vld [vmem:[#allocation219_spill] sm:$0xff] }
 0x42d   : > { %4988 = vmatpush1.msra.mxu0 %v2558_v23  ;;  %v15580_v47 = vpop.permute.xlu1 %2676  ;;  %v2126_v23 = vsel %vm19947_vm5, %v19961_v28, %v19960_v4  ;;  %v19994_v4 = vld [vmem:[#allocation49_spill] sm:$0xff] }
 0x42e   : > { %v2675_v20 = vpop.permute.xlu0 %2674 }
 0x42f   : > { %v2702_v41 = vsel %vm2686_vm12, %v2675_v20, %v15580_v47  ;;  %v2701_v32 = vsel %vm2686_vm12, %v2673_v46, %v2675_v20  ;;  %v1833_v46 = vsel %vm1816_vm6, %v19868_v5, %v19953_v50  ;;  %v19958_v5 = vld [vmem:[#allocation152_spill] sm:$0xff]  ;;  %v19985_v50 = vld [vmem:[#allocation154_spill] sm:$0xff] }
 0x430   : > { %4978 = vmatprep.subr.mxu1 %v2702_v41 }
 0x431   : > { %4979 = vmatpush2.msra.mxu1 %v2701_v32  ;;  %v2391_v53 = vpop.permute.xlu1 %2390  ;;  %v19963_v32 = vld [vmem:[#allocation138_spill] sm:$0xff] }
 0x432   : > { %v2389_v29 = vpop.permute.xlu0 %2388  ;;  %4981 = vmatmul.mubr.f32.vlgmr.msra.gmra.mxu1 %v15192_v21 }
 0x433   : > { %v2414_v42 = vsel %vm2396_vm2, %v2389_v29, %v2391_v53  ;;  %v2413_v15 = vsel %vm2396_vm2, %v15242_v35, %v2389_v29  ;;  %12176 = vmatprep.mubr.msk.f32.mxu1 %vm4415_vm1, %v12547_v26  ;;  %v19959_v26 = vld [vmem:[#allocation153_spill] sm:$0xff] }
 0x434   : > { %4989 = vmatprep.subr.mxu0 %v2414_v42  ;;  %v1543_v12 = vsel %vm1526_vm8, %v19882_v6, %v19959_v26  ;;  %v19965_v42 = vld [vmem:[#allocation203_spill] sm:$0xff] }
 0x435   : > { %4990 = vmatpush1.msra.mxu0 %v2413_v15  ;;  %v2540_v7 = vpop.permute.xlu1 %2539  ;;  %v19966_v15 = vld [vmem:[#allocation201_spill] sm:$0xff] }
 0x436   : > { %v2538_v51 = vpop.permute.xlu0 %2537 }
 0x437   : > { %v2561_v9 = vsel %vm2541_vm0, %v2538_v51, %v2540_v7  ;;  %v2560_v57 = vsel %vm2541_vm0, %v2536_v8, %v2538_v51  ;;  %v1544_v8 = vsel %vm1526_vm8, %v19959_v26, %v19958_v5  ;;  %v1981_v7 = vsel %vm19950_vm7, %v19966_v15, %v19965_v42  ;;  %v20000_v42 = vld [vmem:[#allocation30_spill] sm:$0xff] }
 0x438   : > { %5058 = vmatprep.subr.mxu1 %v2561_v9  ;;  %v1980_v51 = vsel %vm19967_vm15, %v19948_v27, %v19966_v15  ;;  %v19977_v27 = vld [vmem:[#allocation171_spill] sm:$0xff] }
 0x439   : > { %5059 = vmatpush1.msra.mxu1 %v2560_v57  ;;  %v2246_v11 = vpop.permute.xlu1 %2245  ;;  %v19968_v57 = vld [vmem:[#allocation120_spill] sm:$0xff]  ;;  %v20001_v15 = vld [vmem:[#allocation27_spill] sm:$0xff] }
 0x43a   : > { %v2244_v45 = vpop.permute.xlu0 %2243 }
 0x43b   : > { %v2269_v21 = vsel %vm2251_vm3, %v2244_v45, %v2246_v11  ;;  %v2268_v13 = vsel %vm2251_vm3, %v15263_v58, %v2244_v45 }
 0x43c   : > { %4991 = vmatprep.subr.mxu0 %v2269_v21  ;;  %v19971_v21 = vld [vmem:[#allocation186_spill] sm:$0xff] }
 0x43d   : > { %4992 = vmatpush1.msra.mxu0 %v2268_v13  ;;  %v2395_v35 = vpop.permute.xlu1 %2394  ;;  %v19972_v13 = vld [vmem:[#allocation187_spill] sm:$0xff] }
 0x43e   : > { %v2393_v1 = vpop.permute.xlu0 %2392  ;;  %4993 = vmatprep.subr.mxu0 %v2124_v33  ;;  %v1835_v19 = vsel %vm1816_vm6, %v19952_v14, %v19972_v13  ;;  %v19974_v33 = vld [vmem:[#allocation106_spill] sm:$0xff] }
 0x43f   : > { %4994 = vmatpush1.msra.mxu0 %v2123_v24  ;;  %v2416_v58 = vsel %vm2396_vm2, %v2393_v1, %v2395_v35  ;;  %v2415_v39 = vsel %vm2396_vm2, %v2391_v53, %v2393_v1  ;;  %v19964_v53 = vld [vmem:[#allocation135_spill] sm:$0xff]  ;;  %v1836_v35 = vsel %vm1816_vm6, %v19972_v13, %v19971_v21  ;;  %v403_v21 = vld [vmem:[%s12697_s22 + $0x80] sm:$0xff] }
 0x440   : > { %4995 = vmatprep.subr.mxu0 %v1979_v59  ;;  %5060 = vmatprep.subr.mxu1 %v2416_v58  ;;  %v1399_v29 = vsel %vm1381_vm9, %v19964_v53, %v19963_v32  ;;  %v1398_v6 = vsel %vm1381_vm9, %v19888_v37, %v19964_v53  ;;  %v19975_v1 = vld [vmem:[#allocation103_spill] sm:$0xff] }
 0x441   : > { %4996 = vmatpush1.msra.mxu0 %v1978_v49  ;;  %5061 = vmatpush1.msra.mxu1 %v2415_v39  ;;  %v2250_v3 = vpop.permute.xlu1 %2249  ;;  %v19982_v49 = vld [vmem:[#allocation86_spill] sm:$0xff] }
 0x442   : > { %v2248_v38 = vpop.permute.xlu0 %2247  ;;  %4997 = vmatprep.subr.mxu0 %v1834_v44  ;;  %v19986_v44 = vld [vmem:[#allocation155_spill] sm:$0xff] }
 0x443   : > { %4998 = vmatpush1.msra.mxu0 %v1833_v46  ;;  %v2271_v34 = vsel %vm2251_vm3, %v2248_v38, %v2250_v3  ;;  %v2270_v18 = vsel %vm2251_vm3, %v2246_v11, %v2248_v38  ;;  %vm19962_vm3 = vmmov %vm19947_vm5  ;;  %v19969_v11 = vld [vmem:[#allocation121_spill] sm:$0xff]  ;;  %vm19976_vm5 = vcmask 850944   ;;  %v19983_v3 = vld [vmem:[#allocation87_spill] sm:$0xff]  ;;  %v1546_v38 = vsel %vm1526_vm8, %v19986_v44, %v19985_v50 }
 0x444   : > { %4999 = vmatprep.subr.mxu0 %v1689_v2  ;;  %5062 = vmatprep.subr.mxu1 %v2271_v34  ;;  %v2125_v41 = vsel %vm19962_vm3, %v19944_v10, %v19961_v28  ;;  %v1254_v45 = vsel %vm19970_vm10, %v19969_v11, %v19968_v57  ;;  %v1253_v37 = vsel %vm19973_vm4, %v19893_v40, %v19969_v11  ;;  %vm19979_vm3 = vcmask 818176   ;;  %vm19980_vm7 = vmmov %vm19976_vm5  ;;  %v19989_v2 = vld [vmem:[#allocation67_spill] sm:$0xff]  ;;  %v19995_v28 = vld [vmem:[#allocation50_spill] sm:$0xff] }
 0x445   : > { %5000 = vmatpush1.msra.mxu0 %v1688_v43  ;;  %5063 = vmatpush1.msra.mxu1 %v2270_v18  ;;  %v15623_v62 = vpop.permute.xlu1 %3840  ;;  %v1109_v24 = vsel %vm19976_vm5, %v19975_v1, %v19974_v33  ;;  %v1691_v59 = vsel %vm19979_vm3, %v19978_v61, %v19977_v27  ;;  %v1108_v40 = vsel %vm19980_vm7, %v19900_v48, %v19975_v1  ;;  %vm19981_vm15 = vmmov %vm19979_vm3  ;;  %vm19984_vm10 = vcmask 1014784   ;;  %v19991_v18 = vld [vmem:[#allocation139_spill] sm:$0xff]  ;;  %v19992_v43 = vld [vmem:[#allocation137_spill] sm:$0xff] }
 0x446   : > { %v15631_v20 = vpop.permute.xlu0 %3838  ;;  %5001 = vmatprep.subr.mxu0 %v1544_v8  ;;  %5064 = vmatprep.subr.mxu1 %v2126_v23  ;;  %v1690_v58 = vsel %vm19981_vm15, %v19954_v52, %v19978_v61  ;;  %v964_v14 = vsel %vm19984_vm10, %v19983_v3, %v19982_v49  ;;  %vm19987_vm4 = vmmov %vm19984_vm10  ;;  %v1545_v52 = vsel %vm1526_vm8, %v19958_v5, %v19986_v44  ;;  %vm19990_vm5 = vcmask 1022976   ;;  %v20014_v27 = vld [vmem:[#allocation69_spill] sm:$0xff] }
 0x447   : > { %5002 = vmatpush1.msra.mxu0 %v1543_v12  ;;  %5065 = vmatpush1.msra.mxu1 %v2125_v41  ;;  %v963_v48 = vsel %vm19987_vm4, %v19905_v56, %v19983_v3  ;;  %v819_v34 = vsel %vm19990_vm5, %v19989_v2, %v19988_v60  ;;  %v1401_v26 = vsel %vm1381_vm9, %v19992_v43, %v19991_v18  ;;  %vm19993_vm3 = vmmov %vm19990_vm5  ;;  %v19996_v12 = vld [vmem:[#allocation122_spill] sm:$0xff]  ;;  %v19997_v41 = vld [vmem:[#allocation123_spill] sm:$0xff]  ;;  %vm19998_vm8 = vcmask 842752  }
 0x448   : > { %5003 = vmatprep.subr.mxu0 %v1399_v29  ;;  %5066 = vmatprep.subr.mxu1 %v1981_v7  ;;  %v818_v56 = vsel %vm19993_vm3, %v19910_v54, %v19989_v2  ;;  %v1400_v5 = vsel %vm1381_vm9, %v19963_v32, %v19992_v43  ;;  %v674_v23 = vsel %vm656_vm14, %v19995_v28, %v19994_v4  ;;  %vm19999_vm9 = vmmov %vm19998_vm8  ;;  %vm20002_vm7 = vcmask 1039360   ;;  %v20019_v3 = vld [vmem:[#allocation51_spill] sm:$0xff]  ;;  %v406_v2 = vld [vmem:[%s12697_s22 + $0x98] sm:$0xff] }
 0x449   : > { %5004 = vmatpush1.msra.mxu0 %v1398_v6  ;;  %5067 = vmatpush1.msra.mxu1 %v1980_v51  ;;  %v15651_v9 = vpop.permute.xlu1 %3695  ;;  %v1256_v53 = vsel %vm19998_vm8, %v19997_v41, %v19996_v12  ;;  %v673_v54 = vsel %vm656_vm14, %v19916_v25, %v19995_v28  ;;  %v1255_v32 = vsel %vm19999_vm9, %v19968_v57, %v19997_v41  ;;  %v20003_v6 = vld [vmem:[#allocation107_spill] sm:$0xff]  ;;  %v20004_v51 = vld [vmem:[#allocation105_spill] sm:$0xff]  ;;  %vm20005_vm15 = vcmask 850944   ;;  %vm20006_vm10 = vmmov %vm20002_vm7 }
 0x44a   : > { %v15659_v10 = vpop.permute.xlu0 %3693  ;;  %5005 = vmatprep.subr.mxu0 %v1254_v45  ;;  %5068 = vmatprep.subr.mxu1 %v1836_v35  ;;  %v529_v7 = vsel %vm20002_vm7, %v20001_v15, %v20000_v42  ;;  %v1111_v11 = vsel %vm20005_vm15, %v20004_v51, %v20003_v6  ;;  %v404_v45 = vld [vmem:[%s12697_s22 + $0x88] sm:$0xff]  ;;  %v528_v25 = vsel %vm20006_vm10, %v19920_v17, %v20001_v15  ;;  %vm20007_vm4 = vmmov %vm20005_vm15  ;;  %v20008_v35 = vld [vmem:[#allocation88_spill] sm:$0xff]  ;;  %vm20010_vm5 = vcmask 1014784  }
 0x44b   : > { %5006 = vmatpush1.msra.mxu0 %v1253_v37  ;;  %5069 = vmatpush1.msra.mxu1 %v1835_v19  ;;  %v1110_v57 = vsel %vm20007_vm4, %v19974_v33, %v20004_v51  ;;  %v20009_v37 = vld [vmem:[#allocation89_spill] sm:$0xff]  ;;  %vm20011_vm3 = vmmov %vm20010_vm5  ;;  %vm20012_vm8 = vcmask 228352   ;;  %v20013_v33 = vld [vmem:[#allocation71_spill] sm:$0xff]  ;;  %vm20015_vm9 = vcmask 1022976   ;;  %vm20018_vm10 = vcmask 236544  }
 0x44c   : > { %5007 = vmatprep.subr.mxu0 %v1109_v24  ;;  %5070 = vmatprep.subr.mxu1 %v1691_v59  ;;  %v966_v19 = vsel %vm20010_vm5, %v20009_v37, %v20008_v35  ;;  %v965_v24 = vsel %vm20011_vm3, %v19982_v49, %v20009_v37  ;;  %v3864_v17 = vsel %vm20012_vm8, %v15631_v20, %v15623_v62  ;;  %vm20016_vm7 = vmmov %vm20012_vm8  ;;  %vm20022_vm5 = vcmask 244736  }
 0x44d   : > { %5008 = vmatpush1.msra.mxu0 %v1108_v40  ;;  %5071 = vmatpush1.msra.mxu1 %v1690_v58  ;;  %v15679_v39 = vpop.permute.xlu1 %3844  ;;  %v821_v61 = vsel %vm20015_vm9, %v20014_v27, %v20013_v33  ;;  %v3863_v59 = vsel %vm20016_vm7, %v15333_v0, %v15631_v20  ;;  %vm20017_vm15 = vmmov %vm20015_vm9  ;;  %v3719_v49 = vsel %vm20018_vm10, %v15659_v10, %v15651_v9  ;;  %vm20025_vm3 = vcmask 1039360  }
 0x44e   : > { %v15687_v46 = vpop.permute.xlu0 %3842  ;;  %5009 = vmatprep.subr.mxu0 %v964_v14  ;;  %5072 = vmatprep.subr.mxu1 %v1546_v38  ;;  %v820_v40 = vsel %vm20017_vm15, %v19988_v60, %v20014_v27  ;;  %v20020_v14 = vld [vmem:[#allocation52_spill] sm:$0xff]  ;;  %vm20021_vm4 = vmmov %vm20018_vm10  ;;  %vm20028_vm7 = vcmask 252928   ;;  %vm20030_vm10 = vcmask 228352  }
 0x44f   : > { %5010 = vmatpush1.msra.mxu0 %v963_v48  ;;  %5073 = vmatpush1.msra.mxu1 %v1545_v52  ;;  %v676_v50 = vsel %vm656_vm14, %v20020_v14, %v20019_v3  ;;  %v3718_v0 = vsel %vm20021_vm4, %v15385_v63, %v15659_v10  ;;  %v675_v20 = vsel %vm656_vm14, %v19994_v4, %v20020_v14  ;;  %v20023_v48 = vld [vmem:[#allocation32_spill] sm:$0xff]  ;;  %v20024_v52 = vld [vmem:[#allocation29_spill] sm:$0xff]  ;;  %vm20026_vm8 = vmmov %vm20022_vm5 }
 0x450   : > { %5011 = vmatprep.subr.mxu0 %v819_v34  ;;  %5074 = vmatprep.subr.mxu1 %v1401_v26  ;;  %v531_v60 = vsel %vm20025_vm3, %v20024_v52, %v20023_v48  ;;  %vm20027_vm9 = vmmov %vm20025_vm3  ;;  %v405_v10 = vld [vmem:[%s12697_s22 + $0x90] sm:$0xff]  ;;  %s20064_s22 = smov 80  }
 0x451   : > { %5012 = vmatpush1.msra.mxu0 %v818_v56  ;;  %5075 = vmatpush1.msra.mxu1 %v1400_v5  ;;  %v15707_v8 = vpop.permute.xlu1 %3550  ;;  %v530_v63 = vsel %vm20027_vm9, %v20000_v42, %v20024_v52  ;;  %vm20029_vm15 = vmmov %vm20028_vm7  ;;  %vm20035_vm9 = vcmask 244736  }
 0x452   : > { %v3549_v29 = vpop.permute.xlu0 %3548  ;;  %5013 = vmatprep.subr.mxu0 %v674_v23  ;;  %5076 = vmatprep.subr.mxu1 %v1256_v53  ;;  %vm20031_vm4 = vmmov %vm20030_vm10 }
 0x453   : > { %5014 = vmatpush1.msra.mxu0 %v673_v54  ;;  %5077 = vmatpush1.msra.mxu1 %v1255_v32  ;;  %v3574_v38 = vsel %vm20022_vm5, %v3549_v29, %v15707_v8  ;;  %v3573_v34 = vsel %vm20026_vm8, %v15432_v30, %v3549_v29  ;;  %v3866_v30 = vsel %vm20030_vm10, %v15687_v46, %v15679_v39  ;;  %vm20032_vm5 = vcmask 236544  }
 0x454   : > { %5015 = vmatprep.subr.mxu0 %v529_v7  ;;  %5078 = vmatprep.subr.mxu1 %v1111_v11  ;;  %v3865_v5 = vsel %vm20031_vm4, %v15623_v62, %v15687_v46  ;;  %vm20033_vm3 = vmmov %vm20032_vm5  ;;  %vm20034_vm8 = vcmask 261120   ;;  %vm20038_vm10 = vcmask 252928  }
 0x455   : > { %5016 = vmatpush1.msra.mxu0 %v528_v25  ;;  %5079 = vmatpush1.msra.mxu1 %v1110_v57  ;;  %v3700_v13 = vpop.permute.xlu1 %3699  ;;  %vm20039_vm4 = vmmov %vm20038_vm10 }
 0x456   : > { %v3698_v1 = vpop.permute.xlu0 %3697  ;;  %5017 = vmatprep.subr.mxu0 %v404_v45  ;;  %5080 = vmatprep.subr.mxu1 %v966_v19 }
 0x457   : > { %5018 = vmatpush1.msra.mxu0 %v403_v21  ;;  %5081 = vmatpush1.msra.mxu1 %v965_v24  ;;  %v3721_v28 = vsel %vm20032_vm5, %v3698_v1, %v3700_v13  ;;  %vm20040_vm5 = vcmask 424960  }
 0x458   : > { %5033 = vmatprep.subr.mxu0 %v3864_v17  ;;  %5082 = vmatprep.subr.mxu1 %v821_v61 }
 0x459   : > { %5034 = vmatpush2.msra.mxu0 %v3863_v59  ;;  %5083 = vmatpush1.msra.mxu1 %v820_v40  ;;  %v3406_v58 = vpop.permute.xlu1 %3405 }
 0x45a   : > { %v3404_v44 = vpop.permute.xlu0 %3403  ;;  %5035 = vmatprep.subr.mxu0 %v3719_v49  ;;  %5084 = vmatprep.subr.mxu1 %v676_v50  ;;  %v12548_v49 = vld [vmem:[%s19632_s1] sm:$0xff]  ;;  %s20136_s1 = smov 30  }
 0x45b   : > { %5036 = vmatpush2.msra.mxu0 %v3718_v0  ;;  %5085 = vmatpush1.msra.mxu1 %v675_v20  ;;  %v3429_v43 = vsel %vm20028_vm7, %v3404_v44, %v3406_v58  ;;  %v3428_v56 = vsel %vm20029_vm15, %v15485_v31, %v3404_v44  ;;  %v3720_v31 = vsel %vm20033_vm3, %v15651_v9, %v3698_v1  ;;  %vm20036_vm7 = vmmov %vm20034_vm8  ;;  %v4485_v20 = vpop.f32.mrf.mxu0 }
 0x45c   : > { %5037 = vmatprep.subr.mxu0 %v3574_v38  ;;  %5086 = vmatprep.subr.mxu1 %v531_v60  ;;  %vm20037_vm15 = vmmov %vm20035_vm9  ;;  %v4556_v38 = vpop.f32.mrf.mxu1 }
 0x45d   : > { %5038 = vmatpush2.msra.mxu0 %v3573_v34  ;;  %5087 = vmatpush1.msra.mxu1 %v530_v63  ;;  %v3555_v18 = vpop.permute.xlu1 %3554  ;;  %vm20041_vm3 = vmmov %vm20040_vm5  ;;  %v4487_v48 = vpop.f32.mrf.mxu0 }
 0x45e   : > { %v3553_v26 = vpop.permute.xlu0 %3552  ;;  %5039 = vmatprep.subr.mxu0 %v3429_v43  ;;  %5088 = vmatprep.subr.mxu1 %v406_v2  ;;  %v4558_v52 = vpop.f32.mrf.mxu1 }
 0x45f   : > { %5040 = vmatpush2.msra.mxu0 %v3428_v56  ;;  %5089 = vmatpush1.msra.mxu1 %v405_v10  ;;  %v3576_v41 = vsel %vm20035_vm9, %v3553_v26, %v3555_v18  ;;  %v3575_v62 = vsel %vm20037_vm15, %v15707_v8, %v3553_v26  ;;  %vm20043_vm9 = vmmov %vm20036_vm7  ;;  %v4627_v60 = vpop.f32.mrf.mxu0 }
 0x460   : > { %5104 = vmatprep.subr.mxu1 %v3866_v30  ;;  %vm20045_vm15 = vmmov %vm20041_vm3  ;;  %v4698_v10 = vpop.f32.mrf.mxu1 }
 0x461   : > { %5105 = vmatpush2.msra.mxu1 %v3865_v5  ;;  %v3261_v4 = vpop.permute.xlu1 %3260  ;;  %v4629_v30 = vpop.f32.mrf.mxu0 }
 0x462   : > { %v3259_v23 = vpop.permute.xlu0 %3258  ;;  %5106 = vmatprep.subr.mxu1 %v3721_v28  ;;  %v4700_v5 = vpop.f32.mrf.mxu1 }
 0x463   : > { %5107 = vmatpush2.msra.mxu1 %v3720_v31  ;;  %v3284_v12 = vsel %vm20034_vm8, %v3259_v23, %v3261_v4  ;;  %v3283_v39 = vsel %vm20036_vm7, %v15524_v22, %v3259_v23  ;;  %vm20042_vm8 = vmmov %vm20036_vm7 }
 0x464   : > { %5041 = vmatprep.subr.mxu0 %v3284_v12  ;;  %5108 = vmatprep.subr.mxu1 %v3576_v41  ;;  %vm20044_vm7 = vmmov %vm20041_vm3 }
 0x465   : > { %5042 = vmatpush2.msra.mxu0 %v3283_v39  ;;  %5109 = vmatpush2.msra.mxu1 %v3575_v62  ;;  %v3410_v46 = vpop.permute.xlu1 %3409 }
 0x466   : > { %v3408_v53 = vpop.permute.xlu0 %3407 }
 0x467   : > { %v3431_v29 = vsel %vm20038_vm10, %v3408_v53, %v3410_v46  ;;  %v3430_v9 = vsel %vm20039_vm4, %v3406_v58, %v3408_v53 }
 0x468   : > { %5110 = vmatprep.subr.mxu1 %v3431_v29 }
 0x469   : > { %5111 = vmatpush2.msra.mxu1 %v3430_v9 }
 0x46a   : > { %v3116_v54 = vpop.permute.xlu1 %3115 }
 0x46b   : > { %v3114_v32 = vpop.permute.xlu0 %3113 }
 0x46c   : > { %v3139_v42 = vsel %vm20040_vm5, %v3114_v32, %v3116_v54  ;;  %v3138_v22 = vsel %vm20041_vm3, %v15540_v16, %v3114_v32 }
 0x46d   : > { %5043 = vmatprep.subr.mxu0 %v3139_v42 }
 0x46e   : > { %5044 = vmatpush2.msra.mxu0 %v3138_v22 }
 0x46f   : > { %v3265_v8 = vpop.permute.xlu1 %3264 }
 0x470   : > { %v3263_v15 = vpop.permute.xlu0 %3262 }
 0x471   : > { %v3286_v7 = vsel %vm20042_vm8, %v3263_v15, %v3265_v8  ;;  %v3285_v6 = vsel %vm20043_vm9, %v3261_v4, %v3263_v15 }
 0x472   : > { %5112 = vmatprep.subr.mxu1 %v3286_v7 }
 0x473   : > { %5113 = vmatpush2.msra.mxu1 %v3285_v6 }
 0x474   : > { %v2971_v51 = vpop.permute.xlu1 %2970 }
 0x475   : > { %v2969_v11 = vpop.permute.xlu0 %2968 }
 0x476   : > { %v2994_v45 = vsel %vm2976_vm11, %v2969_v11, %v2971_v51  ;;  %v2993_v25 = vsel %vm2976_vm11, %v15559_v55, %v2969_v11 }
 0x477   : > { %5045 = vmatprep.subr.mxu0 %v2994_v45 }
 0x478   : > { %5046 = vmatpush2.msra.mxu0 %v2993_v25  ;;  %v3120_v16 = vpop.permute.xlu1 %3119 }
 0x479   : > { %v3118_v57 = vpop.permute.xlu0 %3117 }
 0x47a   : > { %v3141_v21 = vsel %vm20044_vm7, %v3118_v57, %v3120_v16  ;;  %v3140_v13 = vsel %vm20045_vm15, %v3116_v54, %v3118_v57 }
 0x47b   : > { %5114 = vmatprep.subr.mxu1 %v3141_v21 }
 0x47c   : > { %5115 = vmatpush2.msra.mxu1 %v3140_v13  ;;  %v2826_v35 = vpop.permute.xlu1 %2825 }
 0x47d   : > { %v2824_v37 = vpop.permute.xlu0 %2823 }
 0x47e   : > { %v2849_v19 = vsel %vm2831_vm13, %v2824_v37, %v2826_v35  ;;  %v2848_v1 = vsel %vm2831_vm13, %v15567_v36, %v2824_v37 }
 0x47f   : > { %5047 = vmatprep.subr.mxu0 %v2849_v19 }
 0x480   : > { %5048 = vmatpush2.msra.mxu0 %v2848_v1  ;;  %v2975_v55 = vpop.permute.xlu1 %2974 }
 0x481   : > { %v2973_v24 = vpop.permute.xlu0 %2972 }
 0x482   : > { %v2996_v17 = vsel %vm2976_vm11, %v2973_v24, %v2975_v55  ;;  %v2995_v33 = vsel %vm2976_vm11, %v2971_v51, %v2973_v24  ;;  %vm20046_vm11 = vcmask 1039360  }
 0x483   : > { %5116 = vmatprep.subr.mxu1 %v2996_v17  ;;  %vm20049_vm10 = vmmov %vm20046_vm11 }
 0x484   : > { %5117 = vmatpush2.msra.mxu1 %v2995_v33  ;;  %v2681_v27 = vpop.permute.xlu1 %2680  ;;  %v4769_v12 = vpop.f32.mrf.mxu0  ;;  %vm20050_vm4 = vmmov %vm20049_vm10 }
 0x485   : > { %v2679_v61 = vpop.permute.xlu0 %2678  ;;  %vm20051_vm5 = vmmov %vm20050_vm4 }
 0x486   : > { %v2704_v59 = vsel %vm2686_vm12, %v2679_v61, %v2681_v27  ;;  %v2703_v40 = vsel %vm2686_vm12, %v15580_v47, %v2679_v61  ;;  %v4771_v42 = vpop.f32.mrf.mxu0  ;;  %vm20052_vm3 = vmmov %vm20050_vm4 }
 0x487   : > { %5049 = vmatprep.subr.mxu0 %v2704_v59  ;;  %vm20053_vm8 = vmmov %vm20052_vm3 }
 0x488   : > { %5050 = vmatpush2.msra.mxu0 %v2703_v40  ;;  %v2830_v36 = vpop.permute.xlu1 %2829  ;;  %vm20054_vm9 = vmmov %vm20052_vm3 }
 0x489   : > { %v2828_v58 = vpop.permute.xlu0 %2827  ;;  %5052 = vmatmul.mubr.f32.vlgmr.msra.gmra.mxu0 %v12548_v49  ;;  %vm20055_vm7 = vmmov %vm20052_vm3 }
 0x48a   : > { %v2851_v3 = vsel %vm2831_vm13, %v2828_v58, %v2830_v36  ;;  %v2850_v14 = vsel %vm2831_vm13, %v2826_v35, %v2828_v58  ;;  %vm20048_vm13 = vmmov %vm20046_vm11 }
 0x48b   : > { %5118 = vmatprep.subr.mxu1 %v2851_v3  ;;  %vm20056_vm15 = vmmov %vm20052_vm3 }
 0x48c   : > { %5119 = vmatpush2.msra.mxu1 %v2850_v14  ;;  %v2685_v50 = vpop.permute.xlu1 %2684 }
 0x48d   : > { %v2683_v44 = vpop.permute.xlu0 %2682 }
 0x48e   : > { %v2706_v0 = vsel %vm2686_vm12, %v2683_v44, %v2685_v50  ;;  %v2705_v47 = vsel %vm2686_vm12, %v2681_v27, %v2683_v44  ;;  %vm20047_vm12 = vmmov %vm20046_vm11 }
 0x48f   : > { %5120 = vmatprep.subr.mxu1 %v2706_v0 }
 0x490   : > { %5121 = vmatpush2.msra.mxu1 %v2705_v47  ;;  %v4840_v53 = vpop.f32.mrf.mxu1 }
 0x491   : > { %5123 = vmatmul.mubr.f32.vlgmr.msra.gmra.mxu1 %v12548_v49 }
 0x492   : > { %v4842_v7 = vpop.f32.mrf.mxu1 }
 0x49a   : > { %v15822_v2 = vpop.permute.xlu0 %4412 }
 0x49b   : > { %v4557_v34 = vadd.f32 %v4556_v38, %v15822_v2  ;;  %v4628_v63 = vadd.f32 %v4627_v60, %v15822_v2  ;;  %v4559_v26 = vadd.f32 %v4558_v52, %v15822_v2  ;;  %v4488_v56 = vadd.f32 %v4487_v48, %v15822_v2 }
 0x49c   : > { %v4630_v23 = vadd.f32 %v4629_v30, %v15822_v2  ;;  %v15832_v31 = vadd.f32 %v4700_v5, %v15822_v2  ;;  %v4699_v62 = vadd.f32 %v4698_v10, %v15822_v2  ;;  %v15839_v46 = vadd.f32 %v4769_v12, %v15822_v2 }
 0x49d   : > { %v5131_v18 = vmax.f32 %v4557_v34, 0.0  ;;  %v5133_v43 = vmax.f32 %v4628_v63, 0.0  ;;  %v5132_v4 = vmax.f32 %v4559_v26, 0.0  ;;  %v5130_v28 = vmax.f32 %v4488_v56, 0.0 }
 0x49e   : > { %v5134_v41 = vmax.f32 %v4630_v23, 0.0  ;;  %v5136_v39 = vmax.f32 %v15832_v31, 0.0  ;;  %v5135_v29 = vmax.f32 %v4699_v62, 0.0  ;;  %v5137_v9 = vmax.f32 %v15839_v46, 0.0 }
 0x49f   : > { %5232 = vrot.lane.b32.xlu1 %v5131_v18, %s19350_s23  ;;  %5236 = vrot.lane.b32.xlu0 %v5133_v43, %s19350_s23  ;;  %v15847_v54 = vadd.f32 %v4840_v53, %v15822_v2  ;;  %v4486_v32 = vadd.f32 %v4485_v20, %v15822_v2  ;;  %v15855_v22 = vadd.f32 %v4771_v42, %v15822_v2 }
 0x4a0   : > { %v15864_v51 = vadd.f32 %v4842_v7, %v15822_v2 }
 0x4a1   : > { %v5139_v8 = vmax.f32 %v15847_v54, 0.0  ;;  %v5129_v15 = vmax.f32 %v4486_v32, 0.0  ;;  %v5138_v6 = vmax.f32 %v15855_v22, 0.0 }
 0x4a2   : > { %v5140_v11 = vmax.f32 %v15864_v51, 0.0 }
 0x4a3   : > { %5234 = vrot.lane.b32.xlu1 %v5132_v4, %s19350_s23  ;;  %5230 = vrot.lane.b32.xlu0 %v5130_v28, %s19350_s23 }
 0x4a7   : > { %5238 = vrot.lane.b32.xlu1 %v5134_v41, %s19350_s23  ;;  %5242 = vrot.lane.b32.xlu0 %v5136_v39, %s19350_s23 }
 0x4ab   : > { %5240 = vrot.lane.b32.xlu1 %v5135_v29, %s19350_s23  ;;  %5244 = vrot.lane.b32.xlu0 %v5137_v9, %s19350_s23 }
 0x4af   : > { %5248 = vrot.lane.b32.xlu0 %v5139_v8, %s19350_s23  ;;  %5228 = vrot.lane.b32.xlu1 %v5129_v15, %s19350_s23 }
 0x4b3   : > { %5246 = vrot.lane.b32.xlu1 %v5138_v6, %s19350_s23 }
 0x4b7   : > { %5250 = vrot.lane.b32.xlu1 %v5140_v11, %s19350_s23 }
 0x4e6   : > { %v4911_v33 = vpop.f32.mrf.mxu0 }
 0x4e7   : > { %v15888_v36 = vadd.f32 %v4911_v33, %v15822_v2 }
 0x4e8   : > { %v4913_v3 = vpop.f32.mrf.mxu0 }
 0x4e9   : > { %v5141_v0 = vmax.f32 %v15888_v36, 0.0  ;;  %v15898_v47 = vadd.f32 %v4913_v3, %v15822_v2 }
 0x4eb   : > { %v5142_v60 = vmax.f32 %v15898_v47, 0.0 }
 0x4f2   : > { %v4982_v14 = vpop.f32.mrf.mxu1 }
 0x4f3   : > { %v15901_v20 = vadd.f32 %v4982_v14, %v15822_v2 }
 0x4f4   : > { %v4984_v48 = vpop.f32.mrf.mxu1 }
 0x4f5   : > { %v5143_v34 = vmax.f32 %v15901_v20, 0.0  ;;  %v15910_v63 = vadd.f32 %v4984_v48, %v15822_v2 }
 0x511   : > { %v5233_v45 = vpop.permute.xlu1 %5232  ;;  %v5237_v25 = vpop.permute.xlu0 %5236 }
 0x515   : > { %v5235_v16 = vpop.permute.xlu1 %5234  ;;  %v5231_v57 = vpop.permute.xlu0 %5230 }
 0x516   : > { %v5270_v21 = vsel %vm20046_vm11, %v5233_v45, %v5235_v16  ;;  %v5271_v13 = vsel %vm20047_vm12, %v5235_v16, %v5237_v25  ;;  %v5269_v19 = vsel %vm20048_vm13, %v5231_v57, %v5233_v45  ;;  %vm20057_vm11 = vcmask 850944  }
 0x517   : > { %v5308_v35 = vmax.f32 %v5131_v18, %v5270_v21  ;;  %v15873_v37 = vmax.f32 %v5132_v4, %v5271_v13  ;;  %v5307_v24 = vmax.f32 %v5130_v28, %v5269_v19  ;;  %vm20058_vm12 = vmmov %vm20057_vm11 }
 0x518   : > { %vm20059_vm13 = vmmov %vm20057_vm11 }
 0x519   : > { %v5239_v1 = vpop.permute.xlu1 %5238  ;;  %5370 = vrot.lane.b32.xlu0 %v5308_v35, %s19362_s27  ;;  %5372 = vrot.lane.b32.xlu1 %v15873_v37, %s19362_s27  ;;  %v5243_v27 = vpop.permute.xlu0 %5242 }
 0x51a   : > { %v5272_v55 = vsel %vm20049_vm10, %v5237_v25, %v5239_v1  ;;  %vm20060_vm10 = vmmov %vm20057_vm11 }
 0x51b   : > { %v15880_v17 = vmax.f32 %v5133_v43, %v5272_v55  ;;  %v5144_v43 = vmax.f32 %v15910_v63, 0.0 }
 0x51d   : > { %v5241_v61 = vpop.permute.xlu1 %5240  ;;  %5374 = vrot.lane.b32.xlu0 %v15880_v17, %s19362_s27  ;;  %5368 = vrot.lane.b32.xlu1 %v5307_v24, %s19362_s27  ;;  %v5245_v52 = vpop.permute.xlu0 %5244 }
 0x51e   : > { %v5273_v59 = vsel %vm20050_vm4, %v5239_v1, %v5241_v61  ;;  %v5274_v40 = vsel %vm20051_vm5, %v5241_v61, %v5243_v27  ;;  %v5275_v18 = vsel %vm20053_vm8, %v5243_v27, %v5245_v52  ;;  %vm20061_vm4 = vmmov %vm20060_vm10  ;;  %vm19388_vm8 = vcmask 195584  }
 0x51f   : > { %v5311_v58 = vmax.f32 %v5134_v41, %v5273_v59  ;;  %v15890_v49 = vmax.f32 %v5135_v29, %v5274_v40  ;;  %v15922_v26 = vmax.f32 %v5136_v39, %v5275_v18  ;;  %vm20062_vm5 = vmmov %vm20061_vm4 }
 0x521   : > { %5376 = vrot.lane.b32.xlu0 %v5311_v58, %s19362_s27  ;;  %5378 = vrot.lane.b32.xlu1 %v15890_v49, %s19362_s27  ;;  %v5229_v50 = vpop.permute.xlu1 %5228  ;;  %v5249_v56 = vpop.permute.xlu0 %5248 }
 0x522   : > { %v5268_v44 = vsel %vm20052_vm3, %v5229_v50, %v5231_v57  ;;  %vm19379_vm3 = vcmask 916480  }
 0x523   : > { %v5306_v38 = vmax.f32 %v5129_v15, %v5268_v44 }
 0x525   : > { %5252 = vrot.lane.b32.xlu1 %v5141_v0, %s19350_s23  ;;  %5366 = vrot.lane.b32.xlu0 %v5306_v38, %s19362_s27  ;;  %v5247_v10 = vpop.permute.xlu1 %5246 }
 0x526   : > { %v5276_v30 = vsel %vm20054_vm9, %v5245_v52, %v5247_v10  ;;  %v5277_v5 = vsel %vm20055_vm7, %v5247_v10, %v5249_v56  ;;  %vm19383_vm9 = vcmask 211968   ;;  %vm20067_vm7 = vcmask 228352  }
 0x527   : > { %v15935_v28 = vmax.f32 %v5137_v9, %v5276_v30  ;;  %v15937_v23 = vmax.f32 %v5138_v6, %v5277_v5 }
 0x529   : > { %5256 = vrot.lane.b32.xlu1 %v5143_v34, %s19350_s23  ;;  %5254 = vrot.lane.b32.xlu0 %v5142_v60, %s19350_s23  ;;  %v15926_v4 = vpop.permute.xlu1 %5250 }
 0x52a   : > { %v5278_v31 = vsel %vm20056_vm15, %v5249_v56, %v15926_v4  ;;  %vm20068_vm15 = vmmov %vm20067_vm7 }
 0x52b   : > { %v15947_v12 = vmax.f32 %v5139_v8, %v5278_v31 }
 0x52d   : > { %5380 = vrot.lane.b32.xlu1 %v15922_v26, %s19362_s27  ;;  %5258 = vrot.lane.b32.xlu0 %v5144_v43, %s19350_s23 }
 0x531   : > { %5384 = vrot.lane.b32.xlu1 %v15937_v23, %s19362_s27  ;;  %5382 = vrot.lane.b32.xlu0 %v15935_v28, %s19362_s27 }
 0x535   : > { %5386 = vrot.lane.b32.xlu0 %v15947_v12, %s19362_s27 }
 0x549   : > { %v5053_v44 = vpop.f32.mrf.mxu0 }
 0x54a   : > { %v16129_v52 = vadd.f32 %v5053_v44, %v15822_v2 }
 0x54b   : > { %v5055_v56 = vpop.f32.mrf.mxu0 }
 0x54c   : > { %v5145_v5 = vmax.f32 %v16129_v52, 0.0  ;;  %v16138_v31 = vadd.f32 %v5055_v56, %v15822_v2 }
 0x58b   : > { %v5371_v41 = vpop.permute.xlu0 %5370  ;;  %v5373_v39 = vpop.permute.xlu1 %5372 }
 0x58c   : > { %v5408_v62 = vsel %vm20057_vm11, %v5371_v41, %v5373_v39  ;;  %vm20069_vm11 = vcmask 244736  }
 0x58d   : > { %v15952_v46 = vmax.f32 %v5308_v35, %v5408_v62 }
 0x58f   : > { %v5375_v53 = vpop.permute.xlu0 %5374  ;;  %7590 = vrot.lane.b32.xlu1 %v15952_v46, %s19393_s13  ;;  %v5369_v29 = vpop.permute.xlu1 %5368 }
 0x590   : > { %v5409_v9 = vsel %vm20058_vm12, %v5373_v39, %v5375_v53  ;;  %v5407_v54 = vsel %vm20059_vm13, %v5369_v29, %v5371_v41  ;;  %vm20070_vm12 = vmmov %vm20069_vm11 }
 0x591   : > { %v15959_v32 = vmax.f32 %v15873_v37, %v5409_v9  ;;  %v15961_v42 = vmax.f32 %v5307_v24, %v5407_v54  ;;  %v5124_v54 = vpop.f32.mrf.mxu1  ;;  %vm20071_vm13 = vmmov %vm20067_vm7 }
 0x593   : > { %v5377_v22 = vpop.permute.xlu0 %5376  ;;  %7592 = vrot.lane.b32.xlu0 %v15959_v32, %s19393_s13  ;;  %7588 = vrot.lane.b32.xlu1 %v15961_v42, %s19393_s13  ;;  %v15967_v8 = vpop.permute.xlu1 %5378 }
 0x594   : > { %v5410_v15 = vsel %vm20060_vm10, %v5375_v53, %v5377_v22  ;;  %v5411_v7 = vsel %vm20061_vm4, %v5377_v22, %v15967_v8  ;;  %v19382_v53 = vmax.f32 %v16138_v31, 0.0  ;;  %vm20072_vm10 = vmmov %vm20067_vm7  ;;  %vm20073_vm4 = vcmask 261120  }
 0x595   : > { %v15977_v45 = vmax.f32 %v15880_v17, %v5410_v15  ;;  %v15979_v25 = vmax.f32 %v5311_v58, %v5411_v7 }
 0x597   : > { %v5367_v6 = vpop.permute.xlu0 %5366  ;;  %7445 = vrot.lane.b32.xlu0 %v15961_v42, %s19391_s15  ;;  %7447 = vrot.lane.b32.xlu1 %v15952_v46, %s19391_s15  ;;  %v16064_v21 = vpop.permute.xlu1 %5252 }
 0x598   : > { %v5406_v16 = vsel %vm20062_vm5, %v5367_v6, %v5369_v29  ;;  %vm20074_vm5 = vmmov %vm20069_vm11 }
 0x599   : > { %v15986_v57 = vmax.f32 %v5306_v38, %v5406_v16 }
 0x59b   : > { %7594 = vrot.lane.b32.xlu0 %v15977_v45, %s19393_s13  ;;  %7596 = vrot.lane.b32.xlu1 %v15979_v25, %s19393_s13  ;;  %v16070_v13 = vpop.permute.xlu0 %5254  ;;  %v16076_v35 = vpop.permute.xlu1 %5256 }
 0x59f   : > { %7443 = vrot.lane.b32.xlu0 %v15986_v57, %s19391_s15  ;;  %7300 = vrot.lane.b32.xlu1 %v15961_v42, %s19389_s24  ;;  %v16082_v37 = vpop.permute.xlu0 %5258  ;;  %v16084_v19 = vpop.permute.xlu1 %5380 }
 0x5a3   : > { %7302 = vrot.lane.b32.xlu0 %v15952_v46, %s19389_s24  ;;  %7449 = vrot.lane.b32.xlu1 %v15959_v32, %s19391_s15  ;;  %v16090_v1 = vpop.permute.xlu0 %5382  ;;  %v16096_v55 = vpop.permute.xlu1 %5384 }
 0x5a7   : > { %7451 = vrot.lane.b32.xlu0 %v15977_v45, %s19391_s15  ;;  %7298 = vrot.lane.b32.xlu1 %v15986_v57, %s19389_s24  ;;  %v16102_v24 = vpop.permute.xlu0 %5386 }
 0x5ab   : > { %7156 = vrot.lane.b32.xlu0 %v15961_v42, %s19386_s21  ;;  %7158 = vrot.lane.b32.xlu1 %v15952_v46, %s19386_s21 }
 0x5af   : > { %7304 = vrot.lane.b32.xlu0 %v15959_v32, %s19389_s24  ;;  %7306 = vrot.lane.b32.xlu1 %v15977_v45, %s19389_s24 }
 0x5b3   : > { %7154 = vrot.lane.b32.xlu0 %v15986_v57, %s19386_s21  ;;  %7012 = vrot.lane.b32.xlu1 %v15961_v42, %s19384_s29 }
 0x5b7   : > { %7014 = vrot.lane.b32.xlu0 %v15952_v46, %s19384_s29  ;;  %7160 = vrot.lane.b32.xlu1 %v15959_v32, %s19386_s21 }
 0x5bb   : > { %7162 = vrot.lane.b32.xlu0 %v15977_v45, %s19386_s21  ;;  %7010 = vrot.lane.b32.xlu1 %v15986_v57, %s19384_s29 }
 0x5bf   : > { %6868 = vrot.lane.b32.xlu0 %v15961_v42, %s19380_s12  ;;  %6870 = vrot.lane.b32.xlu1 %v15952_v46, %s19380_s12 }
 0x5c3   : > { %7016 = vrot.lane.b32.xlu0 %v15959_v32, %s19384_s29  ;;  %7018 = vrot.lane.b32.xlu1 %v15977_v45, %s19384_s29 }
 0x5c7   : > { %6866 = vrot.lane.b32.xlu0 %v15986_v57, %s19380_s12  ;;  %6724 = vrot.lane.b32.xlu1 %v15961_v42, %s19377_s25 }
 0x5cb   : > { %6726 = vrot.lane.b32.xlu0 %v15952_v46, %s19377_s25  ;;  %6872 = vrot.lane.b32.xlu1 %v15959_v32, %s19380_s12 }
 0x5cf   : > { %6874 = vrot.lane.b32.xlu0 %v15977_v45, %s19380_s12  ;;  %6722 = vrot.lane.b32.xlu1 %v15986_v57, %s19377_s25 }
 0x5d3   : > { %6579 = vrot.lane.b32.xlu0 %v15961_v42, %s19374_s26  ;;  %6581 = vrot.lane.b32.xlu1 %v15952_v46, %s19374_s26 }
 0x5d7   : > { %6728 = vrot.lane.b32.xlu0 %v15959_v32, %s19377_s25  ;;  %6730 = vrot.lane.b32.xlu1 %v15977_v45, %s19377_s25 }
 0x5db   : > { %6577 = vrot.lane.b32.xlu0 %v15986_v57, %s19374_s26  ;;  %6435 = vrot.lane.b32.xlu1 %v15961_v42, %s19372_s20 }
 0x5df   : > { %6437 = vrot.lane.b32.xlu0 %v15952_v46, %s19372_s20  ;;  %6583 = vrot.lane.b32.xlu1 %v15959_v32, %s19374_s26 }
 0x5e3   : > { %6585 = vrot.lane.b32.xlu0 %v15977_v45, %s19374_s26  ;;  %6433 = vrot.lane.b32.xlu1 %v15986_v57, %s19372_s20 }
 0x5e7   : > { %6291 = vrot.lane.b32.xlu0 %v15961_v42, %s20063_s16  ;;  %6293 = vrot.lane.b32.xlu1 %v15952_v46, %s20063_s16 }
 0x5eb   : > { %6439 = vrot.lane.b32.xlu0 %v15959_v32, %s19372_s20  ;;  %6441 = vrot.lane.b32.xlu1 %v15977_v45, %s19372_s20 }
 0x5ef   : > { %6289 = vrot.lane.b32.xlu0 %v15986_v57, %s20063_s16  ;;  %6147 = vrot.lane.b32.xlu1 %v15961_v42, %s20064_s22 }
 0x5f3   : > { %6149 = vrot.lane.b32.xlu0 %v15952_v46, %s20064_s22  ;;  %6295 = vrot.lane.b32.xlu1 %v15959_v32, %s20063_s16 }
 0x5f7   : > { %6297 = vrot.lane.b32.xlu0 %v15977_v45, %s20063_s16  ;;  %6145 = vrot.lane.b32.xlu1 %v15986_v57, %s20064_s22 }
 0x5fb   : > { %6002 = vrot.lane.b32.xlu0 %v15961_v42, %s19352_s14  ;;  %6004 = vrot.lane.b32.xlu1 %v15952_v46, %s19352_s14 }
 0x5ff   : > { %6151 = vrot.lane.b32.xlu0 %v15959_v32, %s20064_s22  ;;  %6153 = vrot.lane.b32.xlu1 %v15977_v45, %s20064_s22 }
 0x601   : > { %v7591_v17 = vpop.permute.xlu1 %7590 }
 0x603   : > { %6000 = vrot.lane.b32.xlu0 %v15986_v57, %s19352_s14  ;;  %5857 = vrot.lane.b32.xlu1 %v15961_v42, %s19348_s30 }
 0x605   : > { %v7593_v33 = vpop.permute.xlu0 %7592  ;;  %v7589_v27 = vpop.permute.xlu1 %7588 }
 0x606   : > { %v7631_v61 = vsel %vm19379_vm3, %v7589_v27, %v7591_v17  ;;  %v7632_v59 = vsel %vm19379_vm3, %v7591_v17, %v7593_v33  ;;  %v5126_v17 = vpop.f32.mrf.mxu1  ;;  %v16164_v27 = vadd.f32 %v5124_v54, %v15822_v2 }
 0x607   : > { %5859 = vrot.lane.b32.xlu0 %v15952_v46, %s19348_s30  ;;  %6006 = vrot.lane.b32.xlu1 %v15959_v32, %s19352_s14 }
 0x608   : > { %9516 = vmatprep.subr.mxu0 %v7632_v59 }
 0x609   : > { %9517 = vmatpush1.msra.mxu0 %v7631_v61  ;;  %v7446_v40 = vpop.permute.xlu0 %7445  ;;  %v7448_v58 = vpop.permute.xlu1 %7447  ;;  %v16167_v61 = vadd.f32 %v5126_v17, %v15822_v2 }
 0x60a   : > { %v7487_v3 = vsel %vm19388_vm8, %v7446_v40, %v7448_v58 }
 0x60b   : > { %6008 = vrot.lane.b32.xlu0 %v15977_v45, %s19352_s14  ;;  %5855 = vrot.lane.b32.xlu1 %v15986_v57, %s19348_s30  ;;  %v19371_v2 = vmax.f32 %v16167_v61, 0.0  ;;  %s19356_s14 = smov 60  }
 0x60c   : > { %9518 = vmatprep.subr.mxu0 %v7487_v3 }
 0x60d   : > { %v7595_v14 = vpop.permute.xlu0 %7594  ;;  %v16119_v50 = vpop.permute.xlu1 %7596 }
 0x60e   : > { %v7634_v38 = vsel %vm19379_vm3, %v7595_v14, %v16119_v50  ;;  %v7633_v48 = vsel %vm19379_vm3, %v7593_v33, %v7595_v14  ;;  %v19376_v14 = vmax.f32 %v16164_v27, 0.0 }
 0x60f   : > { %5713 = vrot.lane.b32.xlu0 %v15961_v42, %s20065_s28  ;;  %5715 = vrot.lane.b32.xlu1 %v15952_v46, %s20065_s28 }
 0x610   : > { %9593 = vmatprep.subr.mxu1 %v7634_v38 }
 0x611   : > { %9594 = vmatpush1.msra.mxu1 %v7633_v48  ;;  %v7444_v10 = vpop.permute.xlu0 %7443  ;;  %v7301_v18 = vpop.permute.xlu1 %7300 }
 0x612   : > { %v7486_v30 = vsel %vm19388_vm8, %v7444_v10, %v7446_v40 }
 0x613   : > { %5861 = vrot.lane.b32.xlu0 %v15959_v32, %s19348_s30  ;;  %5863 = vrot.lane.b32.xlu1 %v15977_v45, %s19348_s30  ;;  %s20066_s30 = smov 126  }
 0x614   : > { %9519 = vmatpush1.msra.mxu0 %v7486_v30 }
 0x615   : > { %v7303_v41 = vpop.permute.xlu0 %7302  ;;  %v7450_v39 = vpop.permute.xlu1 %7449 }
 0x616   : > { %v7342_v62 = vsel %vm19383_vm9, %v7301_v18, %v7303_v41  ;;  %v7488_v7 = vsel %vm19388_vm8, %v7448_v58, %v7450_v39 }
 0x617   : > { %5711 = vrot.lane.b32.xlu0 %v15986_v57, %s20065_s28  ;;  %5260 = vrot.lane.b32.xlu1 %v5145_v5, %s19350_s23 }
 0x618   : > { %9520 = vmatprep.subr.mxu0 %v7342_v62 }
 0x619   : > { %v16147_v29 = vpop.permute.xlu0 %7451  ;;  %v7299_v9 = vpop.permute.xlu1 %7298 }
 0x61a   : > { %v7341_v22 = vsel %vm19383_vm9, %v7299_v9, %v7301_v18  ;;  %v7489_v15 = vsel %vm19388_vm8, %v7450_v39, %v16147_v29 }
 0x61b   : > { %5262 = vrot.lane.b32.xlu0 %v19382_v53, %s19350_s23  ;;  %5569 = vrot.lane.b32.xlu1 %v15961_v42, %s20066_s30 }
 0x61c   : > { %9521 = vmatpush1.msra.mxu0 %v7341_v22  ;;  %9595 = vmatprep.subr.mxu1 %v7489_v15 }
 0x61d   : > { %9596 = vmatpush1.msra.mxu1 %v7488_v7  ;;  %v7157_v6 = vpop.permute.xlu0 %7156  ;;  %v7159_v16 = vpop.permute.xlu1 %7158 }
 0x61e   : > { %v7197_v33 = vsel %vm20067_vm7, %v7157_v6, %v7159_v16  ;;  %vm20075_vm7 = vmmov %vm20074_vm5 }
 0x61f   : > { %5571 = vrot.lane.b32.xlu0 %v15952_v46, %s20066_s30  ;;  %5717 = vrot.lane.b32.xlu1 %v15959_v32, %s20065_s28 }
 0x620   : > { %9522 = vmatprep.subr.mxu0 %v7197_v33 }
 0x621   : > { %v7305_v59 = vpop.permute.xlu0 %7304  ;;  %v16169_v40 = vpop.permute.xlu1 %7306 }
 0x622   : > { %v7344_v58 = vsel %vm19383_vm9, %v7305_v59, %v16169_v40  ;;  %v7343_v3 = vsel %vm19383_vm9, %v7303_v41, %v7305_v59 }
 0x623   : > { %5719 = vrot.lane.b32.xlu0 %v15977_v45, %s20065_s28  ;;  %5567 = vrot.lane.b32.xlu1 %v15986_v57, %s20066_s30 }
 0x624   : > { %9597 = vmatprep.subr.mxu1 %v7344_v58 }
 0x625   : > { %9598 = vmatpush1.msra.mxu1 %v7343_v3  ;;  %v7155_v44 = vpop.permute.xlu0 %7154  ;;  %v7013_v38 = vpop.permute.xlu1 %7012 }
 0x626   : > { %v7196_v48 = vsel %vm20068_vm15, %v7155_v44, %v7157_v6  ;;  %vm20076_vm15 = vmmov %vm20073_vm4 }
 0x627   : > { %5264 = vrot.lane.b32.xlu0 %v19376_v14, %s19350_s23  ;;  %5266 = vrot.lane.b32.xlu1 %v19371_v2, %s19350_s23  ;;  %s19364_s23 = smov 58  }
 0x628   : > { %9523 = vmatpush1.msra.mxu0 %v7196_v48 }
 0x629   : > { %v7015_v10 = vpop.permute.xlu0 %7014  ;;  %v7161_v18 = vpop.permute.xlu1 %7160 }
 0x62a   : > { %v7053_v56 = vsel %vm20069_vm11, %v7013_v38, %v7015_v10  ;;  %v7198_v9 = vsel %vm20072_vm10, %v7159_v16, %v7161_v18  ;;  %vm20077_vm11 = vmmov %vm20073_vm4  ;;  %vm20079_vm10 = vcmask 1039360  }
 0x62b   : > { %5573 = vrot.lane.b32.xlu0 %v15959_v32, %s20066_s30  ;;  %5575 = vrot.lane.b32.xlu1 %v15977_v45, %s20066_s30 }
 0x62c   : > { %9524 = vmatprep.subr.mxu0 %v7053_v56 }
 0x62d   : > { %v16192_v30 = vpop.permute.xlu0 %7162  ;;  %v7011_v41 = vpop.permute.xlu1 %7010 }
 0x62e   : > { %v7052_v39 = vsel %vm20070_vm12, %v7011_v41, %v7013_v38  ;;  %v7199_v62 = vsel %vm20071_vm13, %v7161_v18, %v16192_v30  ;;  %vm6619_vm12 = vcmask 605184   ;;  %vm20078_vm13 = vmmov %vm20073_vm4 }
 0x62f   : > { %8894 = vrot.lane.b32.xlu0 %v15952_v46, %s19354_s19  ;;  %8896 = vrot.lane.b32.xlu1 %v15959_v32, %s19354_s19 }
 0x630   : > { %9525 = vmatpush1.msra.mxu0 %v7052_v39  ;;  %9599 = vmatprep.subr.mxu1 %v7199_v62 }
 0x631   : > { %9600 = vmatpush1.msra.mxu1 %v7198_v9  ;;  %v6869_v54 = vpop.permute.xlu0 %6868  ;;  %v6871_v22 = vpop.permute.xlu1 %6870 }
 0x632   : > { %v6909_v15 = vsel %vm20073_vm4, %v6869_v54, %v6871_v22  ;;  %vm20080_vm4 = vmmov %vm20079_vm10 }
 0x633   : > { %8892 = vrot.lane.b32.xlu0 %v15961_v42, %s19354_s19  ;;  %8749 = vrot.lane.b32.xlu1 %v15952_v46, %s19364_s23 }
 0x634   : > { %9526 = vmatprep.subr.mxu0 %v6909_v15 }
 0x635   : > { %v7017_v7 = vpop.permute.xlu0 %7016  ;;  %v16207_v6 = vpop.permute.xlu1 %7018 }
 0x636   : > { %v7055_v17 = vsel %vm20074_vm5, %v7017_v7, %v16207_v6  ;;  %v7054_v16 = vsel %vm20075_vm7, %v7015_v10, %v7017_v7  ;;  %vm20081_vm5 = vmmov %vm20080_vm4 }
 0x637   : > { %8751 = vrot.lane.b32.xlu0 %v15959_v32, %s19364_s23  ;;  %8898 = vrot.lane.b32.xlu1 %v15977_v45, %s19354_s19  ;;  %vm20082_vm7 = vmmov %vm20080_vm4 }
 0x638   : > { %9601 = vmatprep.subr.mxu1 %v7055_v17 }
 0x639   : > { %9602 = vmatpush1.msra.mxu1 %v7054_v16  ;;  %v6867_v33 = vpop.permute.xlu0 %6866  ;;  %v6725_v59 = vpop.permute.xlu1 %6724 }
 0x63a   : > { %v6908_v58 = vsel %vm20076_vm15, %v6867_v33, %v6869_v54  ;;  %vm20083_vm15 = vcmask 637952  }
 0x63b   : > { %8900 = vrot.lane.b32.xlu0 %v15979_v25, %s19354_s19  ;;  %8747 = vrot.lane.b32.xlu1 %v15961_v42, %s19364_s23  ;;  %s19358_s19 = smov 62  }
 0x63c   : > { %9527 = vmatpush1.msra.mxu0 %v6908_v58 }
 0x63d   : > { %v6727_v3 = vpop.permute.xlu0 %6726  ;;  %v6873_v44 = vpop.permute.xlu1 %6872 }
 0x63e   : > { %v6765_v38 = vsel %vm4415_vm1, %v6725_v59, %v6727_v3  ;;  %v6910_v41 = vsel %vm20078_vm13, %v6871_v22, %v6873_v44  ;;  %v5279_v22 = vsel %vm20079_vm10, %v15926_v4, %v16064_v21  ;;  %v5280_v4 = vsel %vm20080_vm4, %v16064_v21, %v16070_v13 }
 0x63f   : > { %8604 = vrot.lane.b32.xlu0 %v15952_v46, %s19356_s14  ;;  %8606 = vrot.lane.b32.xlu1 %v15959_v32, %s19356_s14  ;;  %v16255_v16 = vmax.f32 %v5140_v11, %v5279_v22  ;;  %v16267_v51 = vmax.f32 %v5141_v0, %v5280_v4  ;;  %vm6042_vm10 = vcmask 982016  }
 0x640   : > { %9528 = vmatprep.subr.mxu0 %v6765_v38 }
 0x641   : > { %v16226_v48 = vpop.permute.xlu0 %6874  ;;  %v6723_v10 = vpop.permute.xlu1 %6722 }
 0x642   : > { %v6764_v18 = vsel %vm4415_vm1, %v6723_v10, %v6725_v59  ;;  %v6911_v56 = vsel %vm20077_vm11, %v6873_v44, %v16226_v48  ;;  %vm20084_vm11 = vmmov %vm20083_vm15 }
 0x643   : > { %8753 = vrot.lane.b32.xlu0 %v15977_v45, %s19364_s23  ;;  %8755 = vrot.lane.b32.xlu1 %v15979_v25, %s19364_s23  ;;  %vm20085_vm13 = vmmov %vm20084_vm11  ;;  %s20097_s23 = smov 120  }
 0x644   : > { %9529 = vmatpush1.msra.mxu0 %v6764_v18  ;;  %9603 = vmatprep.subr.mxu1 %v6911_v56  ;;  %vm20086_vm4 = vmmov %vm20084_vm11 }
 0x645   : > { %9604 = vmatpush1.msra.mxu1 %v6910_v41  ;;  %v6580_v39 = vpop.permute.xlu0 %6579  ;;  %v6582_v62 = vpop.permute.xlu1 %6581  ;;  %v5281_v41 = vsel %vm20081_vm5, %v16070_v13, %v16076_v35  ;;  %vm5897_vm5 = vcmask 998400  }
 0x646   : > { %v6621_v9 = vsel %vm6619_vm12, %v6580_v39, %v6582_v62 }
 0x647   : > { %8602 = vrot.lane.b32.xlu0 %v15961_v42, %s19356_s14  ;;  %8459 = vrot.lane.b32.xlu1 %v15952_v46, %s19358_s19 }
 0x648   : > { %9530 = vmatprep.subr.mxu0 %v6621_v9 }
 0x649   : > { %v6729_v54 = vpop.permute.xlu0 %6728  ;;  %v16241_v15 = vpop.permute.xlu1 %6730 }
 0x64a   : > { %v6767_v7 = vsel %vm4415_vm1, %v6729_v54, %v16241_v15  ;;  %v6766_v17 = vsel %vm4415_vm1, %v6727_v3, %v6729_v54 }
 0x64b   : > { %8461 = vrot.lane.b32.xlu0 %v15959_v32, %s19358_s19  ;;  %8608 = vrot.lane.b32.xlu1 %v15977_v45, %s19356_s14 }
 0x64c   : > { %9605 = vmatprep.subr.mxu1 %v6767_v7 }
 0x64d   : > { %9606 = vmatpush1.msra.mxu1 %v6766_v17  ;;  %v6578_v33 = vpop.permute.xlu0 %6577  ;;  %v6436_v59 = vpop.permute.xlu1 %6435 }
 0x64e   : > { %v6620_v58 = vsel %vm6619_vm12, %v6578_v33, %v6580_v39  ;;  %v5282_v39 = vsel %vm20082_vm7, %v16076_v35, %v16082_v37  ;;  %vm20087_vm7 = vcmask 1014784  }
 0x64f   : > { %8610 = vrot.lane.b32.xlu0 %v15979_v25, %s19356_s14  ;;  %5388 = vrot.lane.b32.xlu1 %v16255_v16, %s19362_s27  ;;  %s19360_s14 = smov 64   ;;  %v16301_v13 = vmax.f32 %v5143_v34, %v5282_v39 }
 0x650   : > { %9531 = vmatpush1.msra.mxu0 %v6620_v58 }
 0x651   : > { %v6438_v11 = vpop.permute.xlu0 %6437  ;;  %v6584_v3 = vpop.permute.xlu1 %6583 }
 0x652   : > { %v6476_v44 = vsel %vm2396_vm2, %v6436_v59, %v6438_v11  ;;  %v6622_v0 = vsel %vm6619_vm12, %v6582_v62, %v6584_v3  ;;  %v16297_v62 = vmax.f32 %v5142_v60, %v5281_v41 }
 0x653   : > { %5390 = vrot.lane.b32.xlu0 %v16267_v51, %s19362_s27  ;;  %8457 = vrot.lane.b32.xlu1 %v15961_v42, %s19358_s19 }
 0x654   : > { %9532 = vmatprep.subr.mxu0 %v6476_v44 }
 0x655   : > { %v16274_v21 = vpop.permute.xlu0 %6585  ;;  %v6434_v38 = vpop.permute.xlu1 %6433 }
 0x656   : > { %v6475_v10 = vsel %vm2396_vm2, %v6434_v38, %v6436_v59  ;;  %v6623_v36 = vsel %vm6619_vm12, %v6584_v3, %v16274_v21 }
 0x657   : > { %8314 = vrot.lane.b32.xlu0 %v15952_v46, %s19360_s14  ;;  %8316 = vrot.lane.b32.xlu1 %v15959_v32, %s19360_s14 }
 0x658   : > { %9533 = vmatpush1.msra.mxu0 %v6475_v10  ;;  %9607 = vmatprep.subr.mxu1 %v6623_v36 }
 0x659   : > { %9608 = vmatpush1.msra.mxu1 %v6622_v0  ;;  %v6292_v18 = vpop.permute.xlu0 %6291  ;;  %v6294_v56 = vpop.permute.xlu1 %6293 }
 0x65a   : > { %v6332_v9 = vsel %vm20083_vm15, %v6292_v18, %v6294_v56  ;;  %vm20088_vm15 = vcmask 850944  }
 0x65b   : > { %8463 = vrot.lane.b32.xlu0 %v15977_v45, %s19358_s19  ;;  %8465 = vrot.lane.b32.xlu1 %v15979_v25, %s19358_s19  ;;  %s19366_s19 = smov 106  }
 0x65c   : > { %9534 = vmatprep.subr.mxu0 %v6332_v9 }
 0x65d   : > { %v6440_v54 = vpop.permute.xlu0 %6439  ;;  %v16303_v22 = vpop.permute.xlu1 %6441 }
 0x65e   : > { %v6478_v35 = vsel %vm2396_vm2, %v6440_v54, %v16303_v22  ;;  %v6477_v7 = vsel %vm2396_vm2, %v6438_v11, %v6440_v54 }
 0x65f   : > { %5392 = vrot.lane.b32.xlu0 %v16297_v62, %s19362_s27  ;;  %5394 = vrot.lane.b32.xlu1 %v16301_v13, %s19362_s27 }
 0x660   : > { %9609 = vmatprep.subr.mxu1 %v6478_v35 }
 0x661   : > { %9610 = vmatpush1.msra.mxu1 %v6477_v7  ;;  %v6290_v47 = vpop.permute.xlu0 %6289  ;;  %v6148_v20 = vpop.permute.xlu1 %6147 }
 0x662   : > { %v6331_v60 = vsel %vm20084_vm11, %v6290_v47, %v6292_v18  ;;  %vm20089_vm11 = vmmov %vm20088_vm15 }
 0x663   : > { %8312 = vrot.lane.b32.xlu0 %v15961_v42, %s19360_s14  ;;  %8170 = vrot.lane.b32.xlu1 %v15952_v46, %s19362_s27 }
 0x664   : > { %9535 = vmatpush1.msra.mxu0 %v6331_v60 }
 0x665   : > { %v6150_v34 = vpop.permute.xlu0 %6149  ;;  %v6296_v17 = vpop.permute.xlu1 %6295 }
 0x666   : > { %v6188_v33 = vsel %vm1816_vm6, %v6148_v20, %v6150_v34  ;;  %v6333_v3 = vsel %vm20086_vm4, %v6294_v56, %v6296_v17  ;;  %vm20091_vm4 = vmmov %vm20089_vm11 }
 0x667   : > { %8172 = vrot.lane.b32.xlu0 %v15959_v32, %s19362_s27  ;;  %8318 = vrot.lane.b32.xlu1 %v15977_v45, %s19360_s14 }
 0x668   : > { %9536 = vmatprep.subr.mxu0 %v6188_v33 }
 0x669   : > { %v16322_v59 = vpop.permute.xlu0 %6297  ;;  %v6146_v4 = vpop.permute.xlu1 %6145 }
 0x66a   : > { %v6187_v58 = vsel %vm1816_vm6, %v6146_v4, %v6148_v20  ;;  %v6334_v11 = vsel %vm20085_vm13, %v6296_v17, %v16322_v59  ;;  %vm20090_vm13 = vmmov %vm20087_vm7 }
 0x66b   : > { %8320 = vrot.lane.b32.xlu0 %v15979_v25, %s19360_s14  ;;  %8168 = vrot.lane.b32.xlu1 %v15961_v42, %s19362_s27  ;;  %s19397_s14 = smov 108  }
 0x66c   : > { %9537 = vmatpush1.msra.mxu0 %v6187_v58  ;;  %9611 = vmatprep.subr.mxu1 %v6334_v11  ;;  %v16369_v58 = vld [vmem:[%s19112_s3 + $0x8] sm:$0xff] }
 0x66d   : > { %9612 = vmatpush1.msra.mxu1 %v6333_v3  ;;  %v6003_v44 = vpop.permute.xlu0 %6002  ;;  %v6005_v38 = vpop.permute.xlu1 %6004  ;;  %12177 = vmatprep.mubr.msk.f32.mxu0 %vm4415_vm1, %v16369_v58 }
 0x66e   : > { %v6044_v10 = vsel %vm6042_vm10, %v6003_v44, %v6005_v38  ;;  %12179 = vmatprep.mubr.msk.f32.mxu1 %vm4415_vm1, %v16369_v58 }
 0x66f   : > { %8025 = vrot.lane.b32.xlu0 %v15952_v46, %s19366_s19  ;;  %8027 = vrot.lane.b32.xlu1 %v15959_v32, %s19366_s19 }
 0x670   : > { %9538 = vmatprep.subr.mxu0 %v6044_v10 }
 0x671   : > { %v6152_v36 = vpop.permute.xlu0 %6151  ;;  %v16337_v0 = vpop.permute.xlu1 %6153 }
 0x672   : > { %v6190_v18 = vsel %vm1816_vm6, %v6152_v36, %v16337_v0  ;;  %v6189_v56 = vsel %vm1816_vm6, %v6150_v34, %v6152_v36 }
 0x673   : > { %8174 = vrot.lane.b32.xlu0 %v15977_v45, %s19362_s27  ;;  %8176 = vrot.lane.b32.xlu1 %v15979_v25, %s19362_s27  ;;  %s20099_s27 = smov 122  }
 0x674   : > { %9613 = vmatprep.subr.mxu1 %v6190_v18 }
 0x675   : > { %9614 = vmatpush1.msra.mxu1 %v6189_v56  ;;  %v6001_v41 = vpop.permute.xlu0 %6000  ;;  %v5858_v39 = vpop.permute.xlu1 %5857 }
 0x676   : > { %v6043_v9 = vsel %vm6042_vm10, %v6001_v41, %v6003_v44 }
 0x677   : > { %8023 = vrot.lane.b32.xlu0 %v15961_v42, %s19366_s19  ;;  %7880 = vrot.lane.b32.xlu1 %v15952_v46, %s19397_s14 }
 0x678   : > { %9539 = vmatpush1.msra.mxu0 %v6043_v9 }
 0x679   : > { %v5860_v54 = vpop.permute.xlu0 %5859  ;;  %v6007_v35 = vpop.permute.xlu1 %6006 }
 0x67a   : > { %v5899_v7 = vsel %vm5897_vm5, %v5858_v39, %v5860_v54  ;;  %v6045_v17 = vsel %vm6042_vm10, %v6005_v38, %v6007_v35  ;;  %v5412_v38 = vsel %vm20088_vm15, %v15967_v8, %v16084_v19  ;;  %v5413_v8 = vsel %vm20089_vm11, %v16084_v19, %v16090_v1  ;;  %vm20093_vm15 = vmmov %vm20090_vm13 }
 0x67b   : > { %7882 = vrot.lane.b32.xlu0 %v15959_v32, %s19397_s14  ;;  %8029 = vrot.lane.b32.xlu1 %v15977_v45, %s19366_s19  ;;  %v16393_v18 = vmax.f32 %v15890_v49, %v5412_v38  ;;  %v16406_v49 = vmax.f32 %v15922_v26, %v5413_v8  ;;  %vm20094_vm11 = vmmov %vm20090_vm13 }
 0x67c   : > { %9540 = vmatprep.subr.mxu0 %v5899_v7  ;;  %v5414_v7 = vsel %vm20091_vm4, %v16090_v1, %v16096_v55 }
 0x67d   : > { %v16356_v47 = vpop.permute.xlu0 %6008  ;;  %v5856_v20 = vpop.permute.xlu1 %5855  ;;  %v16423_v26 = vmax.f32 %v15935_v28, %v5414_v7 }
 0x67e   : > { %v5898_v60 = vsel %vm5897_vm5, %v5856_v20, %v5858_v39  ;;  %v6046_v34 = vsel %vm6042_vm10, %v6007_v35, %v16356_v47 }
 0x67f   : > { %8031 = vrot.lane.b32.xlu0 %v15979_v25, %s19366_s19  ;;  %7878 = vrot.lane.b32.xlu1 %v15961_v42, %s19397_s14  ;;  %s19395_s19 = smov 110  }
 0x680   : > { %9541 = vmatpush1.msra.mxu0 %v5898_v60  ;;  %9615 = vmatprep.subr.mxu1 %v6046_v34 }
 0x681   : > { %9616 = vmatpush1.msra.mxu1 %v6045_v17  ;;  %v5714_v33 = vpop.permute.xlu0 %5713  ;;  %v5716_v4 = vpop.permute.xlu1 %5715 }
 0x682   : > { %v5754_v11 = vsel %vm20087_vm7, %v5714_v33, %v5716_v4  ;;  %vm20092_vm7 = vmmov %vm20091_vm4  ;;  %vm19369_vm4 = vcmask 490496  }
 0x683   : > { %7735 = vrot.lane.b32.xlu0 %v15952_v46, %s19395_s19  ;;  %7737 = vrot.lane.b32.xlu1 %v15959_v32, %s19395_s19  ;;  %v5415_v17 = vsel %vm20092_vm7, %v16096_v55, %v16102_v24  ;;  %vm19368_vm7 = vcmask 506880  }
 0x684   : > { %9542 = vmatprep.subr.mxu0 %v5754_v11  ;;  %v16439_v11 = vmax.f32 %v15937_v23, %v5415_v17 }
 0x685   : > { %v5862_v3 = vpop.permute.xlu0 %5861  ;;  %v16380_v44 = vpop.permute.xlu1 %5863 }
 0x686   : > { %v5901_v10 = vsel %vm5897_vm5, %v5862_v3, %v16380_v44  ;;  %v5900_v36 = vsel %vm5897_vm5, %v5860_v54, %v5862_v3 }
 0x687   : > { %7884 = vrot.lane.b32.xlu0 %v15977_v45, %s19397_s14  ;;  %7886 = vrot.lane.b32.xlu1 %v15979_v25, %s19397_s14 }
 0x688   : > { %9617 = vmatprep.subr.mxu1 %v5901_v10 }
 0x689   : > { %9618 = vmatpush1.msra.mxu1 %v5900_v36  ;;  %v5712_v56 = vpop.permute.xlu0 %5711  ;;  %v16395_v41 = vpop.permute.xlu1 %5260 }
 0x68a   : > { %v5753_v39 = vsel %vm20090_vm13, %v5712_v56, %v5714_v33  ;;  %vm8789_vm13 = vcmask 474112  }
 0x68b   : > { %7733 = vrot.lane.b32.xlu0 %v15961_v42, %s19395_s19  ;;  %7598 = vrot.lane.b32.xlu1 %v16393_v18, %s19393_s13 }
 0x68c   : > { %9543 = vmatpush1.msra.mxu0 %v5753_v39 }
 0x68d   : > { %v16408_v9 = vpop.permute.xlu0 %5262  ;;  %v5570_v54 = vpop.permute.xlu1 %5569 }
 0x68f   : > { %7600 = vrot.lane.b32.xlu0 %v16406_v49, %s19393_s13  ;;  %7739 = vrot.lane.b32.xlu1 %v15977_v45, %s19395_s19 }
 0x691   : > { %v5572_v19 = vpop.permute.xlu0 %5571  ;;  %v5718_v35 = vpop.permute.xlu1 %5717 }
 0x692   : > { %v5610_v20 = vsel %vm656_vm14, %v5570_v54, %v5572_v19  ;;  %v5755_v28 = vsel %vm20094_vm11, %v5716_v4, %v5718_v35  ;;  %vm20095_vm11 = vcmask 850944  }
 0x693   : > { %7741 = vrot.lane.b32.xlu0 %v15979_v25, %s19395_s19  ;;  %7453 = vrot.lane.b32.xlu1 %v15979_v25, %s19391_s15  ;;  %s20128_s19 = smov 112  }
 0x694   : > { %9544 = vmatprep.subr.mxu0 %v5610_v20 }
 0x695   : > { %v16425_v60 = vpop.permute.xlu0 %5719  ;;  %v5568_v34 = vpop.permute.xlu1 %5567 }
 0x696   : > { %v5609_v1 = vsel %vm656_vm14, %v5568_v34, %v5570_v54  ;;  %v5756_v33 = vsel %vm20093_vm15, %v5718_v35, %v16425_v60  ;;  %vm19370_vm15 = vcmask 523264  }
 0x697   : > { %7455 = vrot.lane.b32.xlu0 %v16393_v18, %s19391_s15  ;;  %7602 = vrot.lane.b32.xlu1 %v16423_v26, %s19393_s13 }
 0x698   : > { %9545 = vmatpush1.msra.mxu0 %v5609_v1  ;;  %9619 = vmatprep.subr.mxu1 %v5756_v33 }
 0x699   : > { %9546 = vmatprep.subr.mxu0 %v15961_v42  ;;  %9620 = vmatpush1.msra.mxu1 %v5755_v28  ;;  %v16442_v55 = vpop.permute.xlu0 %5264  ;;  %v16444_v3 = vpop.permute.xlu1 %5266 }
 0x69a   : > { %9547 = vmatpush1.msra.mxu0 %v15986_v57 }
 0x69b   : > { %7604 = vrot.lane.b32.xlu0 %v16439_v11, %s19393_s13  ;;  %7308 = vrot.lane.b32.xlu1 %v15979_v25, %s19389_s24  ;;  %s20130_s13 = smov 24  }
 0x69d   : > { %v5574_v38 = vpop.permute.xlu0 %5573  ;;  %v16451_v4 = vpop.permute.xlu1 %5575 }
 0x69e   : > { %v5612_v23 = vsel %vm656_vm14, %v5574_v38, %v16451_v4  ;;  %v5611_v42 = vsel %vm656_vm14, %v5572_v19, %v5574_v38 }
 0x69f   : > { %7310 = vrot.lane.b32.xlu0 %v16393_v18, %s19389_s24  ;;  %7457 = vrot.lane.b32.xlu1 %v16406_v49, %s19391_s15 }
 0x6a0   : > { %9621 = vmatprep.subr.mxu1 %v5612_v23 }
 0x6a1   : > { %9622 = vmatpush1.msra.mxu1 %v5611_v42  ;;  %v8895_v57 = vpop.permute.xlu0 %8894  ;;  %v8897_v10 = vpop.permute.xlu1 %8896 }
 0x6a2   : > { %9623 = vmatprep.subr.mxu1 %v15959_v32  ;;  %v8935_v36 = vsel %vm2541_vm0, %v8895_v57, %v8897_v10 }
 0x6a3   : > { %9624 = vmatpush1.msra.mxu1 %v15952_v46  ;;  %7459 = vrot.lane.b32.xlu0 %v16423_v26, %s19391_s15  ;;  %s20132_s15 = smov 26  }
 0x6a4   : > { %7164 = vrot.lane.b32.xlu1 %v15979_v25, %s19386_s21  ;;  %9562 = vmatprep.subr.mxu0 %v8935_v36 }
 0x6a5   : > { %v8893_v56 = vpop.permute.xlu0 %8892  ;;  %v8750_v8 = vpop.permute.xlu1 %8749 }
 0x6a6   : > { %v8934_v39 = vsel %vm2541_vm0, %v8893_v56, %v8895_v57 }
 0x6a7   : > { %7166 = vrot.lane.b32.xlu0 %v16393_v18, %s19386_s21  ;;  %9563 = vmatpush2.msra.mxu0 %v8934_v39 }
 0x6a8   : > { %7312 = vrot.lane.b32.xlu1 %v16406_v49, %s19389_s24 }
 0x6a9   : > { %v8752_v46 = vpop.permute.xlu0 %8751  ;;  %v8899_v32 = vpop.permute.xlu1 %8898 }
 0x6aa   : > { %v8791_v54 = vsel %vm8789_vm13, %v8750_v8, %v8752_v46  ;;  %v8936_v34 = vsel %vm2541_vm0, %v8897_v10, %v8899_v32 }
 0x6ab   : > { %7314 = vrot.lane.b32.xlu0 %v16423_v26, %s19389_s24  ;;  %9564 = vmatprep.subr.mxu0 %v8791_v54  ;;  %s20122_s24 = smov 106  }
 0x6ac   : > { %7020 = vrot.lane.b32.xlu1 %v15979_v25, %s19384_s29 }
 0x6ad   : > { %v16477_v19 = vpop.permute.xlu0 %8900  ;;  %v8748_v35 = vpop.permute.xlu1 %8747 }
 0x6ae   : > { %v8790_v7 = vsel %vm8789_vm13, %v8748_v35, %v8750_v8  ;;  %v8937_v20 = vsel %vm2541_vm0, %v8899_v32, %v16477_v19 }
 0x6af   : > { %7022 = vrot.lane.b32.xlu0 %v16393_v18, %s19384_s29  ;;  %9565 = vmatpush2.msra.mxu0 %v8790_v7 }
 0x6b0   : > { %7168 = vrot.lane.b32.xlu1 %v16406_v49, %s19386_s21  ;;  %9639 = vmatprep.subr.mxu1 %v8937_v20 }
 0x6b1   : > { %9640 = vmatpush2.msra.mxu1 %v8936_v34  ;;  %v8605_v17 = vpop.permute.xlu0 %8604  ;;  %v8607_v1 = vpop.permute.xlu1 %8606 }
 0x6b2   : > { %v8646_v33 = vsel %vm19369_vm4, %v8605_v17, %v8607_v1 }
 0x6b3   : > { %7170 = vrot.lane.b32.xlu0 %v16423_v26, %s19386_s21  ;;  %9566 = vmatprep.subr.mxu0 %v8646_v33  ;;  %s20113_s21 = smov 64  }
 0x6b4   : > { %6876 = vrot.lane.b32.xlu1 %v15979_v25, %s19380_s12 }
 0x6b5   : > { %v8754_v28 = vpop.permute.xlu0 %8753  ;;  %v16492_v38 = vpop.permute.xlu1 %8755 }
 0x6b6   : > { %v8793_v23 = vsel %vm8789_vm13, %v8754_v28, %v16492_v38  ;;  %v8792_v42 = vsel %vm8789_vm13, %v8752_v46, %v8754_v28 }
 0x6b7   : > { %6878 = vrot.lane.b32.xlu0 %v16393_v18, %s19380_s12  ;;  %9641 = vmatprep.subr.mxu1 %v8793_v23 }
 0x6b8   : > { %7024 = vrot.lane.b32.xlu1 %v16406_v49, %s19384_s29  ;;  %9642 = vmatpush2.msra.mxu1 %v8792_v42 }
 0x6b9   : > { %v8603_v57 = vpop.permute.xlu0 %8602  ;;  %v8460_v10 = vpop.permute.xlu1 %8459 }
 0x6ba   : > { %v8645_v36 = vsel %vm19369_vm4, %v8603_v57, %v8605_v17 }
 0x6bb   : > { %7026 = vrot.lane.b32.xlu0 %v16423_v26, %s19384_s29  ;;  %9567 = vmatpush2.msra.mxu0 %v8645_v36  ;;  %s20110_s29 = smov 104  }
 0x6bc   : > { %6732 = vrot.lane.b32.xlu1 %v15979_v25, %s19377_s25 }
 0x6bd   : > { %v8462_v56 = vpop.permute.xlu0 %8461  ;;  %v8609_v8 = vpop.permute.xlu1 %8608 }
 0x6be   : > { %v8501_v39 = vsel %vm19368_vm7, %v8460_v10, %v8462_v56  ;;  %v8647_v35 = vsel %vm19369_vm4, %v8607_v1, %v8609_v8 }
 0x6bf   : > { %6734 = vrot.lane.b32.xlu0 %v16393_v18, %s19377_s25  ;;  %9568 = vmatprep.subr.mxu0 %v8501_v39 }
 0x6c0   : > { %6880 = vrot.lane.b32.xlu1 %v16406_v49, %s19380_s12 }
 0x6c1   : > { %v16511_v46 = vpop.permute.xlu0 %8610  ;;  %v16513_v32 = vpop.permute.xlu1 %5388 }
 0x6c2   : > { %v8648_v54 = vsel %vm19369_vm4, %v8609_v8, %v16511_v46 }
 0x6c3   : > { %6882 = vrot.lane.b32.xlu0 %v16423_v26, %s19380_s12  ;;  %9643 = vmatprep.subr.mxu1 %v8648_v54  ;;  %s20105_s12 = smov 62  }
 0x6c4   : > { %6587 = vrot.lane.b32.xlu1 %v15979_v25, %s19374_s26  ;;  %9644 = vmatpush2.msra.mxu1 %v8647_v35 }
 0x6c5   : > { %v16522_v7 = vpop.permute.xlu0 %5390  ;;  %v8458_v20 = vpop.permute.xlu1 %8457 }
 0x6c6   : > { %v8500_v34 = vsel %vm19368_vm7, %v8458_v20, %v8460_v10 }
 0x6c7   : > { %6589 = vrot.lane.b32.xlu0 %v16393_v18, %s19374_s26  ;;  %9569 = vmatpush2.msra.mxu0 %v8500_v34 }
 0x6c8   : > { %6736 = vrot.lane.b32.xlu1 %v16406_v49, %s19377_s25 }
 0x6c9   : > { %v8315_v17 = vpop.permute.xlu0 %8314  ;;  %v8317_v33 = vpop.permute.xlu1 %8316 }
 0x6ca   : > { %v8356_v1 = vsel %vm19370_vm15, %v8315_v17, %v8317_v33 }
 0x6cb   : > { %6738 = vrot.lane.b32.xlu0 %v16423_v26, %s19377_s25  ;;  %9570 = vmatprep.subr.mxu0 %v8356_v1  ;;  %s20102_s25 = smov 60  }
 0x6cc   : > { %6443 = vrot.lane.b32.xlu1 %v15979_v25, %s19372_s20 }
 0x6cd   : > { %v8464_v28 = vpop.permute.xlu0 %8463  ;;  %v16534_v23 = vpop.permute.xlu1 %8465 }
 0x6ce   : > { %v8503_v42 = vsel %vm19368_vm7, %v8464_v28, %v16534_v23  ;;  %v8502_v57 = vsel %vm19368_vm7, %v8462_v56, %v8464_v28  ;;  %vm20096_vm7 = vmmov %vm20095_vm11 }
 0x6cf   : > { %6445 = vrot.lane.b32.xlu0 %v16393_v18, %s19372_s20  ;;  %9645 = vmatprep.subr.mxu1 %v8503_v42  ;;  %vm20098_vm4 = vmmov %vm20096_vm7 }
 0x6d0   : > { %6591 = vrot.lane.b32.xlu1 %v16406_v49, %s19374_s26  ;;  %9646 = vmatpush2.msra.mxu1 %v8502_v57 }
 0x6d1   : > { %v16543_v10 = vpop.permute.xlu0 %5392  ;;  %v16545_v36 = vpop.permute.xlu1 %5394 }
 0x6d3   : > { %6593 = vrot.lane.b32.xlu0 %v16423_v26, %s19374_s26  ;;  %s20101_s26 = smov 58  }
 0x6d4   : > { %6299 = vrot.lane.b32.xlu1 %v15979_v25, %s20063_s16 }
 0x6d5   : > { %v8313_v8 = vpop.permute.xlu0 %8312  ;;  %v8171_v56 = vpop.permute.xlu1 %8170 }
 0x6d6   : > { %v8355_v39 = vsel %vm19370_vm15, %v8313_v8, %v8315_v17 }
 0x6d7   : > { %6301 = vrot.lane.b32.xlu0 %v16393_v18, %s20063_s16  ;;  %9571 = vmatpush2.msra.mxu0 %v8355_v39 }
 0x6d8   : > { %6447 = vrot.lane.b32.xlu1 %v16406_v49, %s19372_s20 }
 0x6d9   : > { %v8173_v54 = vpop.permute.xlu0 %8172  ;;  %v8319_v35 = vpop.permute.xlu1 %8318 }
 0x6da   : > { %v8211_v20 = vsel %vm20095_vm11, %v8171_v56, %v8173_v54  ;;  %vm8065_vm11 = vcmask 867328   ;;  %v8357_v42 = vsel %vm19370_vm15, %v8317_v33, %v8319_v35 }
 0x6db   : > { %6449 = vrot.lane.b32.xlu0 %v16423_v26, %s19372_s20  ;;  %9572 = vmatprep.subr.mxu0 %v8211_v20  ;;  %s20100_s20 = smov 56  }
 0x6dc   : > { %6155 = vrot.lane.b32.xlu1 %v15979_v25, %s20064_s22 }
 0x6dd   : > { %v16561_v34 = vpop.permute.xlu0 %8320  ;;  %v8169_v17 = vpop.permute.xlu1 %8168 }
 0x6de   : > { %v8210_v1 = vsel %vm20096_vm7, %v8169_v17, %v8171_v56  ;;  %v8358_v28 = vsel %vm19370_vm15, %v8319_v35, %v16561_v34  ;;  %vm7920_vm15 = vcmask 883712  }
 0x6df   : > { %6157 = vrot.lane.b32.xlu0 %v16393_v18, %s20064_s22  ;;  %9573 = vmatpush2.msra.mxu0 %v8210_v1 }
 0x6e0   : > { %6303 = vrot.lane.b32.xlu1 %v16406_v49, %s20063_s16  ;;  %9647 = vmatprep.subr.mxu1 %v8358_v28 }
 0x6e1   : > { %9648 = vmatpush2.msra.mxu1 %v8357_v42  ;;  %v8026_v57 = vpop.permute.xlu0 %8025  ;;  %v8028_v8 = vpop.permute.xlu1 %8027 }
 0x6e2   : > { %v8067_v39 = vsel %vm8065_vm11, %v8026_v57, %v8028_v8 }
 0x6e3   : > { %6305 = vrot.lane.b32.xlu0 %v16423_v26, %s20063_s16  ;;  %9574 = vmatprep.subr.mxu0 %v8067_v39 }
 0x6e4   : > { %6010 = vrot.lane.b32.xlu1 %v15979_v25, %s20097_s23 }
 0x6e5   : > { %v8175_v56 = vpop.permute.xlu0 %8174  ;;  %v16576_v20 = vpop.permute.xlu1 %8176 }
 0x6e6   : > { %v8213_v17 = vsel %vm20096_vm7, %v8175_v56, %v16576_v20  ;;  %v8212_v33 = vsel %vm20098_vm4, %v8173_v54, %v8175_v56  ;;  %vm7775_vm4 = vcmask 900096   ;;  %vm20103_vm7 = vcmask 228352  }
 0x6e7   : > { %6012 = vrot.lane.b32.xlu0 %v16393_v18, %s20097_s23  ;;  %9649 = vmatprep.subr.mxu1 %v8213_v17 }
 0x6e8   : > { %6159 = vrot.lane.b32.xlu1 %v16406_v49, %s20064_s22  ;;  %9650 = vmatpush2.msra.mxu1 %v8212_v33 }
 0x6e9   : > { %v8024_v35 = vpop.permute.xlu0 %8023  ;;  %v7881_v1 = vpop.permute.xlu1 %7880 }
 0x6ea   : > { %v8066_v28 = vsel %vm8065_vm11, %v8024_v35, %v8026_v57 }
 0x6eb   : > { %6161 = vrot.lane.b32.xlu0 %v16423_v26, %s20064_s22  ;;  %9575 = vmatpush2.msra.mxu0 %v8066_v28 }
 0x6ec   : > { %5865 = vrot.lane.b32.xlu1 %v15979_v25, %s20099_s27 }
 0x6ed   : > { %v7883_v54 = vpop.permute.xlu0 %7882  ;;  %v8030_v42 = vpop.permute.xlu1 %8029 }
 0x6ee   : > { %v7922_v39 = vsel %vm7920_vm15, %v7881_v1, %v7883_v54  ;;  %v8068_v35 = vsel %vm8065_vm11, %v8028_v8, %v8030_v42 }
 0x6ef   : > { %5867 = vrot.lane.b32.xlu0 %v16393_v18, %s20099_s27  ;;  %9576 = vmatprep.subr.mxu0 %v7922_v39 }
 0x6f0   : > { %6014 = vrot.lane.b32.xlu1 %v16406_v49, %s20097_s23 }
 0x6f1   : > { %v16595_v57 = vpop.permute.xlu0 %8031  ;;  %v7879_v56 = vpop.permute.xlu1 %7878 }
 0x6f2   : > { %v7921_v17 = vsel %vm7920_vm15, %v7879_v56, %v7881_v1  ;;  %v8069_v33 = vsel %vm8065_vm11, %v8030_v42, %v16595_v57 }
 0x6f3   : > { %6016 = vrot.lane.b32.xlu0 %v16423_v26, %s20097_s23  ;;  %9577 = vmatpush2.msra.mxu0 %v7921_v17 }
 0x6f4   : > { %5721 = vrot.lane.b32.xlu1 %v15979_v25, %s20065_s28  ;;  %9651 = vmatprep.subr.mxu1 %v8069_v33  ;;  %v16622_v33 = vld [vmem:[%s19112_s3] sm:$0xff] }
 0x6f5   : > { %9652 = vmatpush2.msra.mxu1 %v8068_v35  ;;  %v7736_v28 = vpop.permute.xlu0 %7735  ;;  %v7738_v39 = vpop.permute.xlu1 %7737 }
 0x6f6   : > { %v7777_v2 = vsel %vm7775_vm4, %v7736_v28, %v7738_v39 }
 0x6f7   : > { %5723 = vrot.lane.b32.xlu0 %v16393_v18, %s20065_s28  ;;  %9578 = vmatprep.subr.mxu0 %v7777_v2 }
 0x6f8   : > { %5869 = vrot.lane.b32.xlu1 %v16406_v49, %s20099_s27 }
 0x6f9   : > { %v7885_v1 = vpop.permute.xlu0 %7884  ;;  %v16610_v56 = vpop.permute.xlu1 %7886 }
 0x6fa   : > { %v7924_v17 = vsel %vm7920_vm15, %v7885_v1, %v16610_v56  ;;  %v7923_v8 = vsel %vm7920_vm15, %v7883_v54, %v7885_v1 }
 0x6fb   : > { %5871 = vrot.lane.b32.xlu0 %v16423_v26, %s20099_s27  ;;  %9653 = vmatprep.subr.mxu1 %v7924_v17 }
 0x6fc   : > { %5577 = vrot.lane.b32.xlu1 %v15979_v25, %s20066_s30  ;;  %9654 = vmatpush2.msra.mxu1 %v7923_v8 }
 0x6fd   : > { %v7734_v2 = vpop.permute.xlu0 %7733  ;;  %v7599_v42 = vpop.permute.xlu1 %7598 }
 0x6fe   : > { %v7776_v35 = vsel %vm7775_vm4, %v7734_v2, %v7736_v28  ;;  %v7635_v28 = vsel %vm19379_vm3, %v16119_v50, %v7599_v42 }
 0x6ff   : > { %5579 = vrot.lane.b32.xlu0 %v16393_v18, %s20066_s30  ;;  %9579 = vmatpush2.msra.mxu0 %v7776_v35 }
 0x700   : > { %5725 = vrot.lane.b32.xlu1 %v16406_v49, %s20065_s28  ;;  %9581 = vmatmul.mubr.f32.vlgmr.msra.gmra.mxu0 %v16622_v33 }
 0x701   : > { %v7601_v54 = vpop.permute.xlu0 %7600  ;;  %v7740_v1 = vpop.permute.xlu1 %7739 }
 0x702   : > { %v7636_v17 = vsel %vm19379_vm3, %v7599_v42, %v7601_v54  ;;  %v7778_v14 = vsel %vm7775_vm4, %v7738_v39, %v7740_v1 }
 0x703   : > { %5727 = vrot.lane.b32.xlu0 %v16423_v26, %s20065_s28  ;;  %9670 = vmatprep.subr.mxu0 %v7636_v17 }
 0x704   : > { %5581 = vrot.lane.b32.xlu1 %v16406_v49, %s20066_s30  ;;  %9671 = vmatpush1.msra.mxu0 %v7635_v28 }
 0x705   : > { %v16637_v8 = vpop.permute.xlu0 %7741  ;;  %v7454_v2 = vpop.permute.xlu1 %7453 }
 0x706   : > { %v7779_v35 = vsel %vm7775_vm4, %v7740_v1, %v16637_v8  ;;  %v7490_v28 = vsel %vm19388_vm8, %v16147_v29, %v7454_v2 }
 0x707   : > { %5583 = vrot.lane.b32.xlu0 %v16423_v26, %s20066_s30  ;;  %9655 = vmatprep.subr.mxu1 %v7779_v35 }
 0x708   : > { %8902 = vrot.lane.b32.xlu1 %v16393_v18, %s20100_s20  ;;  %9656 = vmatpush2.msra.mxu1 %v7778_v14 }
 0x709   : > { %v7456_v50 = vpop.permute.xlu0 %7455  ;;  %v7603_v42 = vpop.permute.xlu1 %7602  ;;  %9658 = vmatmul.mubr.f32.vlgmr.msra.gmra.mxu1 %v16622_v33 }
 0x70a   : > { %v7491_v17 = vsel %vm19388_vm8, %v7454_v2, %v7456_v50  ;;  %v7637_v35 = vsel %vm19379_vm3, %v7601_v54, %v7603_v42 }
 0x70b   : > { %8904 = vrot.lane.b32.xlu0 %v16406_v49, %s20100_s20  ;;  %9672 = vmatprep.subr.mxu0 %v7491_v17 }
 0x70c   : > { %8757 = vrot.lane.b32.xlu1 %v16393_v18, %s20101_s26  ;;  %9673 = vmatpush1.msra.mxu0 %v7490_v28 }
 0x70d   : > { %v16654_v39 = vpop.permute.xlu0 %7604  ;;  %v7309_v14 = vpop.permute.xlu1 %7308 }
 0x70e   : > { %v7638_v1 = vsel %vm19379_vm3, %v7603_v42, %v16654_v39  ;;  %v7345_v28 = vsel %vm19383_vm9, %v16169_v40, %v7309_v14  ;;  %vm20104_vm3 = vmmov %vm20103_vm7 }
 0x70f   : > { %8759 = vrot.lane.b32.xlu0 %v16406_v49, %s20101_s26  ;;  %9747 = vmatprep.subr.mxu1 %v7638_v1 }
 0x710   : > { %8906 = vrot.lane.b32.xlu1 %v16423_v26, %s20100_s20  ;;  %9748 = vmatpush1.msra.mxu1 %v7637_v35 }
 0x711   : > { %v7311_v29 = vpop.permute.xlu0 %7310  ;;  %v7458_v2 = vpop.permute.xlu1 %7457 }
 0x712   : > { %v7346_v17 = vsel %vm19383_vm9, %v7309_v14, %v7311_v29  ;;  %v7492_v35 = vsel %vm19388_vm8, %v7456_v50, %v7458_v2 }
 0x713   : > { %8908 = vrot.lane.b32.xlu0 %v16439_v11, %s20100_s20  ;;  %9674 = vmatprep.subr.mxu0 %v7346_v17 }
 0x714   : > { %8612 = vrot.lane.b32.xlu1 %v16393_v18, %s20102_s25  ;;  %9675 = vmatpush1.msra.mxu0 %v7345_v28 }
 0x715   : > { %v16670_v54 = vpop.permute.xlu0 %7459 }
 0x716   : > { %v7165_v42 = vpop.permute.xlu1 %7164  ;;  %v7493_v1 = vsel %vm19388_vm8, %v7458_v2, %v16670_v54  ;;  %vm20115_vm8 = vcmask 1039360  }
 0x717   : > { %8614 = vrot.lane.b32.xlu0 %v16406_v49, %s20102_s25  ;;  %9749 = vmatprep.subr.mxu1 %v7493_v1  ;;  %v7200_v28 = vsel %vm20104_vm3, %v16192_v30, %v7165_v42 }
 0x718   : > { %8761 = vrot.lane.b32.xlu1 %v16423_v26, %s20101_s26  ;;  %9750 = vmatpush1.msra.mxu1 %v7492_v35 }
 0x719   : > { %v7167_v40 = vpop.permute.xlu0 %7166 }
 0x71a   : > { %v7313_v14 = vpop.permute.xlu1 %7312  ;;  %v7201_v17 = vsel %vm20103_vm7, %v7165_v42, %v7167_v40  ;;  %vm20106_vm7 = vcmask 1039360  }
 0x71b   : > { %8763 = vrot.lane.b32.xlu0 %v16439_v11, %s20101_s26  ;;  %9676 = vmatprep.subr.mxu0 %v7201_v17  ;;  %v5283_v35 = vsel %vm20106_vm7, %v16082_v37, %v16395_v41  ;;  %v7347_v30 = vsel %vm19383_vm9, %v7311_v29, %v7313_v14  ;;  %vm20107_vm3 = vmmov %vm20106_vm7  ;;  %vm20108_vm7 = vcmask 244736  }
 0x71c   : > { %8467 = vrot.lane.b32.xlu1 %v16393_v18, %s20105_s12  ;;  %9677 = vmatpush1.msra.mxu0 %v7200_v28  ;;  %v16700_v17 = vmax.f32 %v5144_v43, %v5283_v35  ;;  %v5284_v28 = vsel %vm20107_vm3, %v16395_v41, %v16408_v9  ;;  %vm20111_vm3 = vcmask 228352   ;;  %v20117_v35 = vmax.f32 %v16138_v31, 0.0 }
 0x71d   : > { %v16686_v50 = vpop.permute.xlu0 %7314  ;;  %v16714_v63 = vmax.f32 %v5145_v5, %v5284_v28  ;;  %v20120_v31 = vmax.f32 %v16164_v27, 0.0 }
 0x71e   : > { %v7021_v2 = vpop.permute.xlu1 %7020  ;;  %v7348_v1 = vsel %vm19383_vm9, %v7313_v14, %v16686_v50  ;;  %vm20109_vm9 = vmmov %vm20108_vm7 }
 0x71f   : > { %8469 = vrot.lane.b32.xlu0 %v16406_v49, %s20105_s12  ;;  %9751 = vmatprep.subr.mxu1 %v7348_v1  ;;  %v7056_v29 = vsel %vm20109_vm9, %v16207_v6, %v7021_v2  ;;  %vm20114_vm9 = vcmask 261120  }
 0x720   : > { %8616 = vrot.lane.b32.xlu1 %v16423_v26, %s20102_s25  ;;  %9752 = vmatpush1.msra.mxu1 %v7347_v30 }
 0x721   : > { %v7023_v42 = vpop.permute.xlu0 %7022 }
 0x722   : > { %v7169_v37 = vpop.permute.xlu1 %7168  ;;  %v7057_v53 = vsel %vm20108_vm7, %v7021_v2, %v7023_v42  ;;  %vm20112_vm7 = vmmov %vm20111_vm3  ;;  %v5285_v2 = vsel %vm20115_vm8, %v16408_v9, %v16442_v55  ;;  %v5286_v9 = vsel %vm20115_vm8, %v16442_v55, %v16444_v3 }
 0x723   : > { %8618 = vrot.lane.b32.xlu0 %v16439_v11, %s20102_s25  ;;  %9678 = vmatprep.subr.mxu0 %v7057_v53  ;;  %v7202_v53 = vsel %vm20112_vm7, %v7167_v40, %v7169_v37  ;;  %v16739_v30 = vmax.f32 %v20117_v35, %v5285_v2  ;;  %vm20118_vm7 = vcmask 244736  }
 0x724   : > { %5396 = vrot.lane.b32.xlu1 %v16700_v17, %s20110_s29  ;;  %9679 = vmatpush1.msra.mxu0 %v7056_v29  ;;  %v16753_v29 = vmax.f32 %v20120_v31, %v5286_v9 }
 0x725   : > { %v16716_v43 = vpop.permute.xlu0 %7170 }
 0x726   : > { %v6877_v41 = vpop.permute.xlu1 %6876  ;;  %v7203_v14 = vsel %vm20111_vm3, %v7169_v37, %v16716_v43  ;;  %vm20116_vm3 = vmmov %vm20114_vm9 }
 0x727   : > { %5398 = vrot.lane.b32.xlu0 %v16714_v63, %s20110_s29  ;;  %9753 = vmatprep.subr.mxu1 %v7203_v14  ;;  %v6912_v1 = vsel %vm20116_vm3, %v16226_v48, %v6877_v41  ;;  %vm20121_vm8 = vmmov %vm20116_vm3 }
 0x728   : > { %8322 = vrot.lane.b32.xlu1 %v16393_v18, %s20113_s21  ;;  %9754 = vmatpush1.msra.mxu1 %v7202_v53 }
 0x729   : > { %v6879_v6 = vpop.permute.xlu0 %6878 }
 0x72a   : > { %v7025_v52 = vpop.permute.xlu1 %7024  ;;  %v6913_v5 = vsel %vm20114_vm9, %v6877_v41, %v6879_v6  ;;  %vm20119_vm9 = vmmov %vm20118_vm7 }
 0x72b   : > { %8324 = vrot.lane.b32.xlu0 %v16406_v49, %s20113_s21  ;;  %9680 = vmatprep.subr.mxu0 %v6913_v5  ;;  %v7058_v48 = vsel %vm20119_vm9, %v7023_v42, %v7025_v52 }
 0x72c   : > { %8471 = vrot.lane.b32.xlu1 %v16423_v26, %s20105_s12  ;;  %9681 = vmatpush1.msra.mxu0 %v6912_v1 }
 0x72d   : > { %v16735_v40 = vpop.permute.xlu0 %7026 }
 0x72e   : > { %v6733_v28 = vpop.permute.xlu1 %6732  ;;  %v7059_v37 = vsel %vm20118_vm7, %v7025_v52, %v16735_v40  ;;  %vm20123_vm7 = vcmask 637952  }
 0x72f   : > { %8473 = vrot.lane.b32.xlu0 %v16439_v11, %s20105_s12  ;;  %9755 = vmatprep.subr.mxu1 %v7059_v37  ;;  %v6768_v53 = vsel %vm4415_vm1, %v16241_v15, %v6733_v28  ;;  %vm20124_vm9 = vmmov %vm20123_vm7 }
 0x730   : > { %5400 = vrot.lane.b32.xlu1 %v16739_v30, %s20110_s29  ;;  %9756 = vmatpush1.msra.mxu1 %v7058_v48 }
 0x731   : > { %v6735_v41 = vpop.permute.xlu0 %6734 }
 0x732   : > { %v6881_v55 = vpop.permute.xlu1 %6880  ;;  %v6769_v14 = vsel %vm4415_vm1, %v6733_v28, %v6735_v41 }
 0x733   : > { %5402 = vrot.lane.b32.xlu0 %v16753_v29, %s20110_s29  ;;  %9682 = vmatprep.subr.mxu0 %v6769_v14  ;;  %v6914_v5 = vsel %vm20121_vm8, %v6879_v6, %v6881_v55 }
 0x734   : > { %8178 = vrot.lane.b32.xlu1 %v16393_v18, %s20110_s29  ;;  %9683 = vmatpush1.msra.mxu0 %v6768_v53 }
 0x735   : > { %v16762_v42 = vpop.permute.xlu0 %6882 }
 0x736   : > { %v6588_v27 = vpop.permute.xlu1 %6587  ;;  %v6915_v52 = vsel %vm20116_vm3, %v6881_v55, %v16762_v42  ;;  %vm20126_vm3 = vcmask 850944  }
 0x737   : > { %8180 = vrot.lane.b32.xlu0 %v16406_v49, %s20110_s29  ;;  %9757 = vmatprep.subr.mxu1 %v6915_v52  ;;  %v6624_v35 = vsel %vm6619_vm12, %v16274_v21, %v6588_v27  ;;  %v16811_v52 = vld [vmem:[%s19112_s3 + $0x10] sm:$0xff]  ;;  %vm20127_vm8 = vmmov %vm20126_vm3 }
 0x738   : > { %8326 = vrot.lane.b32.xlu1 %v16423_v26, %s20113_s21  ;;  %9758 = vmatpush1.msra.mxu1 %v6914_v5 }
 0x739   : > { %v6590_v15 = vpop.permute.xlu0 %6589 }
 0x73a   : > { %v6737_v2 = vpop.permute.xlu1 %6736  ;;  %v6625_v1 = vsel %vm6619_vm12, %v6588_v27, %v6590_v15 }
 0x73b   : > { %8328 = vrot.lane.b32.xlu0 %v16439_v11, %s20113_s21  ;;  %9684 = vmatprep.subr.mxu0 %v6625_v1  ;;  %v6770_v37 = vsel %vm4415_vm1, %v6735_v41, %v6737_v2 }
 0x73c   : > { %8033 = vrot.lane.b32.xlu1 %v16393_v18, %s20122_s24  ;;  %9685 = vmatpush1.msra.mxu0 %v6624_v35 }
 0x73d   : > { %v16778_v6 = vpop.permute.xlu0 %6738 }
 0x73e   : > { %v6444_v9 = vpop.permute.xlu1 %6443  ;;  %v6771_v28 = vsel %vm4415_vm1, %v6737_v2, %v16778_v6 }
 0x73f   : > { %8035 = vrot.lane.b32.xlu0 %v16406_v49, %s20122_s24  ;;  %9759 = vmatprep.subr.mxu1 %v6771_v28  ;;  %v6479_v55 = vsel %vm2396_vm2, %v16303_v22, %v6444_v9  ;;  %v16804_v22 = vld [vmem:[%s19112_s3 + $0x18] sm:$0xff] }
 0x740   : > { %8182 = vrot.lane.b32.xlu1 %v16423_v26, %s20110_s29  ;;  %9760 = vmatpush1.msra.mxu1 %v6770_v37 }
 0x741   : > { %v6446_v21 = vpop.permute.xlu0 %6445  ;;  %12178 = vmatprep.mubr.msk.f32.mxu0 %vm4415_vm1, %v16804_v22  ;;  %12180 = vmatprep.mubr.msk.f32.mxu1 %vm4415_vm1, %v16804_v22 }
 0x742   : > { %v6592_v48 = vpop.permute.xlu1 %6591  ;;  %v6480_v31 = vsel %vm2396_vm2, %v6444_v9, %v6446_v21  ;;  %9587 = vmatmul.mubr.f32.gmra.mxu0 %v16811_v52  ;;  %9664 = vmatmul.mubr.f32.gmra.mxu1 %v16811_v52 }
 0x743   : > { %8184 = vrot.lane.b32.xlu0 %v16439_v11, %s20110_s29  ;;  %9686 = vmatprep.subr.mxu0 %v6480_v31  ;;  %v6626_v27 = vsel %vm6619_vm12, %v6590_v15, %v6592_v48  ;;  %v5417_v31 = vsel %vm20127_vm8, %v16513_v32, %v16522_v7  ;;  %vm20131_vm8 = vmmov %vm20126_vm3 }
 0x744   : > { %7888 = vrot.lane.b32.xlu1 %v16393_v18, %s19397_s14  ;;  %9687 = vmatpush1.msra.mxu0 %v6479_v55 }
 0x745   : > { %v16794_v41 = vpop.permute.xlu0 %6593  ;;  %12181 = vmatprep.mubr.msk.f32.mxu0 %vm4415_vm1, %v16369_v58  ;;  %12183 = vmatprep.mubr.msk.f32.mxu1 %vm4415_vm1, %v16369_v58 }
 0x746   : > { %v6300_v14 = vpop.permute.xlu1 %6299  ;;  %v6627_v53 = vsel %vm6619_vm12, %v6592_v48, %v16794_v41 }
 0x747   : > { %7890 = vrot.lane.b32.xlu0 %v16406_v49, %s19397_s14  ;;  %9761 = vmatprep.subr.mxu1 %v6627_v53  ;;  %v6335_v1 = vsel %vm20124_vm9, %v16322_v59, %v6300_v14  ;;  %v5416_v59 = vsel %vm20126_vm3, %v16102_v24, %v16513_v32  ;;  %vm20129_vm9 = vmmov %vm20123_vm7 }
 0x748   : > { %8037 = vrot.lane.b32.xlu1 %v16423_v26, %s20122_s24  ;;  %9762 = vmatpush1.msra.mxu1 %v6626_v27  ;;  %v16843_v58 = vmax.f32 %v15947_v12, %v5416_v59  ;;  %v16856_v12 = vmax.f32 %v16255_v16, %v5417_v31 }
 0x749   : > { %v6302_v5 = vpop.permute.xlu0 %6301 }
 0x74a   : > { %v6448_v15 = vpop.permute.xlu1 %6447  ;;  %v6336_v2 = vsel %vm20123_vm7, %v6300_v14, %v6302_v5 }
 0x74b   : > { %8039 = vrot.lane.b32.xlu0 %v16439_v11, %s20122_s24  ;;  %9688 = vmatprep.subr.mxu0 %v6336_v2  ;;  %v6481_v37 = vsel %vm2396_vm2, %v6446_v21, %v6448_v15  ;;  %v5418_v2 = vsel %vm20126_vm3, %v16522_v7, %v16543_v10  ;;  %v5419_v7 = vsel %vm20131_vm8, %v16543_v10, %v16545_v36 }
 0x74c   : > { %7743 = vrot.lane.b32.xlu1 %v16393_v18, %s20125_s0  ;;  %9689 = vmatpush1.msra.mxu0 %v6335_v1 }
 0x74d   : > { %v16826_v35 = vpop.permute.xlu0 %6449 }
 0x74e   : > { %v6156_v9 = vpop.permute.xlu1 %6155  ;;  %v6482_v28 = vsel %vm2396_vm2, %v6448_v15, %v16826_v35 }
 0x74f   : > { %7745 = vrot.lane.b32.xlu0 %v16406_v49, %s20125_s0  ;;  %9763 = vmatprep.subr.mxu1 %v6482_v28  ;;  %v6191_v21 = vsel %vm1816_vm6, %v16337_v0, %v6156_v9 }
 0x750   : > { %7892 = vrot.lane.b32.xlu1 %v16423_v26, %s19397_s14  ;;  %9764 = vmatpush1.msra.mxu1 %v6481_v37 }
 0x751   : > { %v6158_v48 = vpop.permute.xlu0 %6157 }
 0x752   : > { %v6304_v55 = vpop.permute.xlu1 %6303  ;;  %v6192_v24 = vsel %vm1816_vm6, %v6156_v9, %v6158_v48  ;;  %v16880_v9 = vmax.f32 %v16267_v51, %v5418_v2  ;;  %v16893_v51 = vmax.f32 %v16297_v62, %v5419_v7 }
 0x753   : > { %7894 = vrot.lane.b32.xlu0 %v16439_v11, %s19397_s14  ;;  %9690 = vmatprep.subr.mxu0 %v6192_v24  ;;  %v6337_v27 = vsel %vm20129_vm9, %v6302_v5, %v6304_v55  ;;  %s20135_s14 = smov 28  }
 0x754   : > { %7606 = vrot.lane.b32.xlu1 %v16843_v58, %s20128_s19  ;;  %9691 = vmatpush1.msra.mxu0 %v6191_v21 }
 0x755   : > { %v16858_v14 = vpop.permute.xlu0 %6305 }
 0x756   : > { %v6011_v32 = vpop.permute.xlu1 %6010  ;;  %v6338_v53 = vsel %vm20123_vm7, %v6304_v55, %v16858_v14  ;;  %vm20133_vm7 = vcmask 1014784  }
 0x757   : > { %7608 = vrot.lane.b32.xlu0 %v16856_v12, %s20128_s19  ;;  %9765 = vmatprep.subr.mxu1 %v6338_v53  ;;  %v6047_v1 = vsel %vm6042_vm10, %v16356_v47, %v6011_v32  ;;  %vm20134_vm9 = vmmov %vm20133_vm7 }
 0x758   : > { %7747 = vrot.lane.b32.xlu1 %v16423_v26, %s20125_s0  ;;  %9766 = vmatpush1.msra.mxu1 %v6337_v27  ;;  %vm20137_vm3 = vmmov %vm20133_vm7 }
 0x759   : > { %v6013_v0 = vpop.permute.xlu0 %6012  ;;  %vm20138_vm8 = vmmov %vm20137_vm3 }
 0x75a   : > { %v6160_v15 = vpop.permute.xlu1 %6159  ;;  %v6048_v16 = vsel %vm6042_vm10, %v6011_v32, %v6013_v0 }
 0x75b   : > { %7749 = vrot.lane.b32.xlu0 %v16439_v11, %s20125_s0  ;;  %9692 = vmatprep.subr.mxu0 %v6048_v16  ;;  %v6193_v47 = vsel %vm1816_vm6, %v6158_v48, %v6160_v15 }
 0x75c   : > { %7461 = vrot.lane.b32.xlu1 %v16439_v11, %s20130_s13  ;;  %9693 = vmatpush1.msra.mxu0 %v6047_v1 }
 0x75d   : > { %v16877_v5 = vpop.permute.xlu0 %6161 }
 0x75e   : > { %v5866_v28 = vpop.permute.xlu1 %5865  ;;  %v6194_v59 = vsel %vm1816_vm6, %v6160_v15, %v16877_v5 }
 0x75f   : > { %7463 = vrot.lane.b32.xlu0 %v16843_v58, %s20130_s13  ;;  %9767 = vmatprep.subr.mxu1 %v6194_v59  ;;  %v5902_v55 = vsel %vm5897_vm5, %v16380_v44, %v5866_v28 }
 0x760   : > { %7610 = vrot.lane.b32.xlu1 %v16880_v9, %s20128_s19  ;;  %9768 = vmatpush1.msra.mxu1 %v6193_v47 }
 0x761   : > { %v5868_v37 = vpop.permute.xlu0 %5867 }
 0x762   : > { %v6015_v31 = vpop.permute.xlu1 %6014  ;;  %v5903_v10 = vsel %vm5897_vm5, %v5866_v28, %v5868_v37 }
 0x763   : > { %7612 = vrot.lane.b32.xlu0 %v16893_v51, %s20128_s19  ;;  %9694 = vmatprep.subr.mxu0 %v5903_v10  ;;  %v6049_v21 = vsel %vm6042_vm10, %v6013_v0, %v6015_v31 }
 0x764   : > { %7316 = vrot.lane.b32.xlu1 %v16439_v11, %s20132_s15  ;;  %9695 = vmatpush1.msra.mxu0 %v5902_v55 }
 0x765   : > { %v16902_v48 = vpop.permute.xlu0 %6016 }
 0x766   : > { %v5722_v24 = vpop.permute.xlu1 %5721  ;;  %v6050_v62 = vsel %vm6042_vm10, %v6015_v31, %v16902_v48 }
 0x767   : > { %7318 = vrot.lane.b32.xlu0 %v16843_v58, %s20132_s15  ;;  %9769 = vmatprep.subr.mxu1 %v6050_v62  ;;  %v5757_v27 = vsel %vm20134_vm9, %v16425_v60, %v5722_v24 }
 0x768   : > { %7465 = vrot.lane.b32.xlu1 %v16856_v12, %s20130_s13  ;;  %9770 = vmatpush1.msra.mxu1 %v6049_v21 }
 0x769   : > { %v5724_v44 = vpop.permute.xlu0 %5723 }
 0x76a   : > { %v5870_v32 = vpop.permute.xlu1 %5869  ;;  %v5758_v53 = vsel %vm20133_vm7, %v5722_v24, %v5724_v44  ;;  %vm20141_vm7 = vcmask 490496  }
 0x76b   : > { %7467 = vrot.lane.b32.xlu0 %v16880_v9, %s20130_s13  ;;  %9696 = vmatprep.subr.mxu0 %v5758_v53  ;;  %v5904_v2 = vsel %vm5897_vm5, %v5868_v37, %v5870_v32  ;;  %vm20142_vm9 = vmmov %vm20141_vm7 }
 0x76c   : > { %7172 = vrot.lane.b32.xlu1 %v16439_v11, %s20135_s14  ;;  %9697 = vmatpush1.msra.mxu0 %v5757_v27 }
 0x76d   : > { %v16918_v0 = vpop.permute.xlu0 %5871 }
 0x76e   : > { %v5578_v15 = vpop.permute.xlu1 %5577  ;;  %v5905_v16 = vsel %vm5897_vm5, %v5870_v32, %v16918_v0 }
 0x76f   : > { %7174 = vrot.lane.b32.xlu0 %v16843_v58, %s20135_s14  ;;  %9771 = vmatprep.subr.mxu1 %v5905_v16  ;;  %v5613_v28 = vsel %vm656_vm14, %v16451_v4, %v5578_v15 }
 0x770   : > { %7320 = vrot.lane.b32.xlu1 %v16856_v12, %s20132_s15  ;;  %9772 = vmatpush1.msra.mxu1 %v5904_v2 }
 0x771   : > { %v5580_v60 = vpop.permute.xlu0 %5579 }
 0x772   : > { %v5726_v1 = vpop.permute.xlu1 %5725  ;;  %v5614_v7 = vsel %vm656_vm14, %v5578_v15, %v5580_v60 }
 0x773   : > { %7322 = vrot.lane.b32.xlu0 %v16880_v9, %s20132_s15  ;;  %9698 = vmatprep.subr.mxu0 %v5614_v7  ;;  %v5759_v4 = vsel %vm20138_vm8, %v5724_v44, %v5726_v1 }
 0x774   : > { %7028 = vrot.lane.b32.xlu1 %v16439_v11, %s20136_s1  ;;  %9699 = vmatpush1.msra.mxu0 %v5613_v28 }
 0x775   : > { %v16934_v59 = vpop.permute.xlu0 %5727  ;;  %9700 = vmatprep.subr.mxu0 %v15979_v25 }
 0x776   : > { %v5582_v47 = vpop.permute.xlu1 %5581  ;;  %9701 = vmatpush1.msra.mxu0 %v15977_v45  ;;  %v5760_v37 = vsel %vm20137_vm3, %v5726_v1, %v16934_v59  ;;  %vm20144_vm3 = vcmask 506880  }
 0x777   : > { %7030 = vrot.lane.b32.xlu0 %v16843_v58, %s20136_s1  ;;  %9773 = vmatprep.subr.mxu1 %v5760_v37  ;;  %v5615_v45 = vsel %vm656_vm14, %v5580_v60, %v5582_v47  ;;  %vm20145_vm8 = vmmov %vm20144_vm3 }
 0x778   : > { %7176 = vrot.lane.b32.xlu1 %v16856_v12, %s20135_s14  ;;  %9774 = vmatpush1.msra.mxu1 %v5759_v4 }
 0x779   : > { %v16945_v31 = vpop.permute.xlu0 %5583 }
 0x77a   : > { %v8903_v10 = vpop.permute.xlu1 %8902  ;;  %v5616_v25 = vsel %vm656_vm14, %v5582_v47, %v16945_v31 }
 0x77b   : > { %7178 = vrot.lane.b32.xlu0 %v16880_v9, %s20135_s14  ;;  %9775 = vmatprep.subr.mxu1 %v5616_v25  ;;  %v8938_v21 = vsel %vm2541_vm0, %v16477_v19, %v8903_v10 }
 0x77c   : > { %6884 = vrot.lane.b32.xlu1 %v16439_v11, %s20139_s2  ;;  %9776 = vmatpush1.msra.mxu1 %v5615_v45 }
 0x77d   : > { %v8905_v55 = vpop.permute.xlu0 %8904  ;;  %9777 = vmatprep.subr.mxu1 %v16406_v49 }
 0x77e   : > { %v8758_v24 = vpop.permute.xlu1 %8757  ;;  %9778 = vmatpush1.msra.mxu1 %v16393_v18  ;;  %v8939_v62 = vsel %vm2541_vm0, %v8903_v10, %v8905_v55 }
 0x77f   : > { %6886 = vrot.lane.b32.xlu0 %v16843_v58, %s20139_s2  ;;  %9716 = vmatprep.subr.mxu0 %v8939_v62  ;;  %v8794_v18 = vsel %vm8789_vm13, %v16492_v38, %v8758_v24 }
 0x780   : > { %7032 = vrot.lane.b32.xlu1 %v16856_v12, %s20136_s1  ;;  %9717 = vmatpush2.msra.mxu0 %v8938_v21 }
 0x781   : > { %v8760_v44 = vpop.permute.xlu0 %8759 }
 0x782   : > { %v8907_v32 = vpop.permute.xlu1 %8906  ;;  %v8795_v49 = vsel %vm8789_vm13, %v8758_v24, %v8760_v44 }
 0x783   : > { %7034 = vrot.lane.b32.xlu0 %v16880_v9, %s20136_s1  ;;  %9718 = vmatprep.subr.mxu0 %v8795_v49  ;;  %v8940_v15 = vsel %vm2541_vm0, %v8905_v55, %v8907_v32 }
 0x784   : > { %6740 = vrot.lane.b32.xlu1 %v16439_v11, %s20140_s17  ;;  %9719 = vmatpush2.msra.mxu0 %v8794_v18 }
 0x785   : > { %v16970_v19 = vpop.permute.xlu0 %8908 }
 0x786   : > { %v8613_v53 = vpop.permute.xlu1 %8612  ;;  %v8941_v27 = vsel %vm2541_vm0, %v8907_v32, %v16970_v19 }
 0x787   : > { %6742 = vrot.lane.b32.xlu0 %v16843_v58, %s20140_s17  ;;  %9793 = vmatprep.subr.mxu1 %v8941_v27  ;;  %v8649_v60 = vsel %vm20142_vm9, %v16511_v46, %v8613_v53  ;;  %vm20147_vm9 = vmmov %vm20141_vm7 }
 0x788   : > { %6888 = vrot.lane.b32.xlu1 %v16856_v12, %s20139_s2  ;;  %9794 = vmatpush2.msra.mxu1 %v8940_v15 }
 0x789   : > { %v8615_v38 = vpop.permute.xlu0 %8614 }
 0x78a   : > { %v8762_v16 = vpop.permute.xlu1 %8761  ;;  %v8650_v2 = vsel %vm20141_vm7, %v8613_v53, %v8615_v38 }
 0x78b   : > { %6890 = vrot.lane.b32.xlu0 %v16880_v9, %s20139_s2  ;;  %9720 = vmatprep.subr.mxu0 %v8650_v2  ;;  %v8796_v47 = vsel %vm8789_vm13, %v8760_v44, %v8762_v16 }
 0x78c   : > { %6595 = vrot.lane.b32.xlu1 %v16439_v11, %s20143_s11  ;;  %9721 = vmatpush2.msra.mxu0 %v8649_v60 }
 0x78d   : > { %v16986_v1 = vpop.permute.xlu0 %8763 }
 0x78e   : > { %v8468_v7 = vpop.permute.xlu1 %8467  ;;  %v8797_v28 = vsel %vm8789_vm13, %v8762_v16, %v16986_v1 }
 0x78f   : > { %6597 = vrot.lane.b32.xlu0 %v16843_v58, %s20143_s11  ;;  %9795 = vmatprep.subr.mxu1 %v8797_v28  ;;  %v8504_v10 = vsel %vm20145_vm8, %v16534_v23, %v8468_v7 }
 0x790   : > { %6744 = vrot.lane.b32.xlu1 %v16856_v12, %s20140_s17  ;;  %9796 = vmatpush2.msra.mxu1 %v8796_v47 }
 0x791   : > { %v8470_v46 = vpop.permute.xlu0 %8469 }
 0x792   : > { %v8617_v37 = vpop.permute.xlu1 %8616  ;;  %v8505_v4 = vsel %vm20144_vm3, %v8468_v7, %v8470_v46  ;;  %vm20148_vm3 = vcmask 523264  }
 0x793   : > { %6746 = vrot.lane.b32.xlu0 %v16880_v9, %s20140_s17  ;;  %9722 = vmatprep.subr.mxu0 %v8505_v4  ;;  %v8651_v24 = vsel %vm20147_vm9, %v8615_v38, %v8617_v37  ;;  %vm20149_vm8 = vmmov %vm20148_vm3 }
 0x794   : > { %6451 = vrot.lane.b32.xlu1 %v16439_v11, %s20146_s18  ;;  %9723 = vmatpush2.msra.mxu0 %v8504_v10 }
 0x795   : > { %v17002_v25 = vpop.permute.xlu0 %8618 }
 0x796   : > { %v17004_v45 = vpop.permute.xlu1 %5396  ;;  %v8652_v55 = vsel %vm20141_vm7, %v8617_v37, %v17002_v25  ;;  %vm20150_vm7 = vcmask 506880  }
 0x797   : > { %6453 = vrot.lane.b32.xlu0 %v16843_v58, %s20146_s18  ;;  %9797 = vmatprep.subr.mxu1 %v8652_v55  ;;  %vm20151_vm9 = vmmov %vm20150_vm7 }
 0x798   : > { %6599 = vrot.lane.b32.xlu1 %v16856_v12, %s20143_s11  ;;  %9798 = vmatpush2.msra.mxu1 %v8651_v24 }
 0x799   : > { %v17013_v23 = vpop.permute.xlu0 %5398 }
 0x79a   : > { %v8323_v62 = vpop.permute.xlu1 %8322 }
 0x79b   : > { %6601 = vrot.lane.b32.xlu0 %v16880_v9, %s20143_s11  ;;  %v8359_v49 = vsel %vm20149_vm8, %v16561_v34, %v8323_v62 }
 0x79c   : > { %6307 = vrot.lane.b32.xlu1 %v16439_v11, %s20063_s16 }
 0x79d   : > { %v8325_v21 = vpop.permute.xlu0 %8324 }
 0x79e   : > { %v8472_v44 = vpop.permute.xlu1 %8471  ;;  %v8360_v32 = vsel %vm20148_vm3, %v8323_v62, %v8325_v21  ;;  %vm20152_vm3 = vcmask 850944  }
 0x79f   : > { %6309 = vrot.lane.b32.xlu0 %v16843_v58, %s20063_s16  ;;  %9724 = vmatprep.subr.mxu0 %v8360_v32  ;;  %v8506_v15 = vsel %vm20151_vm9, %v8470_v46, %v8472_v44  ;;  %vm20153_vm8 = vmmov %vm20152_vm3 }
 0x7a0   : > { %6455 = vrot.lane.b32.xlu1 %v16856_v12, %s20146_s18  ;;  %9725 = vmatpush2.msra.mxu0 %v8359_v49 }
 0x7a1   : > { %v17026_v18 = vpop.permute.xlu0 %8473 }
 0x7a2   : > { %v17028_v53 = vpop.permute.xlu1 %5400  ;;  %v8507_v27 = vsel %vm20150_vm7, %v8472_v44, %v17026_v18  ;;  %vm20154_vm7 = vcmask 523264  }
 0x7a3   : > { %6457 = vrot.lane.b32.xlu0 %v16880_v9, %s20146_s18  ;;  %9799 = vmatprep.subr.mxu1 %v8507_v27  ;;  %vm20155_vm9 = vmmov %vm20154_vm7 }
 0x7a4   : > { %6163 = vrot.lane.b32.xlu1 %v16439_v11, %s20064_s22  ;;  %9800 = vmatpush2.msra.mxu1 %v8506_v15 }
 0x7a5   : > { %v17037_v34 = vpop.permute.xlu0 %5402 }
 0x7a6   : > { %v8179_v38 = vpop.permute.xlu1 %8178 }
 0x7a7   : > { %6165 = vrot.lane.b32.xlu0 %v16843_v58, %s20064_s22  ;;  %v8214_v7 = vsel %vm20153_vm8, %v16576_v20, %v8179_v38  ;;  %vm20156_vm8 = vmmov %vm20152_vm3 }
 0x7a8   : > { %6311 = vrot.lane.b32.xlu1 %v16856_v12, %s20063_s16 }
 0x7a9   : > { %v8181_v16 = vpop.permute.xlu0 %8180 }
 0x7aa   : > { %v8327_v2 = vpop.permute.xlu1 %8326  ;;  %v8215_v60 = vsel %vm20152_vm3, %v8179_v38, %v8181_v16 }
 0x7ab   : > { %6313 = vrot.lane.b32.xlu0 %v16880_v9, %s20063_s16  ;;  %9726 = vmatprep.subr.mxu0 %v8215_v60  ;;  %v8361_v37 = vsel %vm20155_vm9, %v8325_v21, %v8327_v2 }
 0x7ac   : > { %6018 = vrot.lane.b32.xlu1 %v16439_v11, %s20097_s23  ;;  %9727 = vmatpush2.msra.mxu0 %v8214_v7 }
 0x7ad   : > { %v17050_v28 = vpop.permute.xlu0 %8328 }
 0x7ae   : > { %v8034_v47 = vpop.permute.xlu1 %8033  ;;  %v8362_v46 = vsel %vm20154_vm7, %v8327_v2, %v17050_v28  ;;  %vm20157_vm7 = vcmask 916480  }
 0x7af   : > { %6020 = vrot.lane.b32.xlu0 %v16843_v58, %s20097_s23  ;;  %9801 = vmatprep.subr.mxu1 %v8362_v46  ;;  %v8070_v55 = vsel %vm8065_vm11, %v16595_v57, %v8034_v47  ;;  %vm20158_vm9 = vmmov %vm20157_vm7 }
 0x7b0   : > { %6167 = vrot.lane.b32.xlu1 %v16856_v12, %s20064_s22  ;;  %9802 = vmatpush2.msra.mxu1 %v8361_v37 }
 0x7b1   : > { %v8036_v20 = vpop.permute.xlu0 %8035 }
 0x7b2   : > { %v8183_v4 = vpop.permute.xlu1 %8182  ;;  %v8071_v10 = vsel %vm8065_vm11, %v8034_v47, %v8036_v20 }
 0x7b3   : > { %6169 = vrot.lane.b32.xlu0 %v16880_v9, %s20064_s22  ;;  %9728 = vmatprep.subr.mxu0 %v8071_v10  ;;  %v8216_v44 = vsel %vm20156_vm8, %v8181_v16, %v8183_v4 }
 0x7b4   : > { %5873 = vrot.lane.b32.xlu1 %v16439_v11, %s20099_s27  ;;  %9729 = vmatpush2.msra.mxu0 %v8070_v55 }
 0x7b5   : > { %v17066_v24 = vpop.permute.xlu0 %8184 }
 0x7b6   : > { %v7889_v62 = vpop.permute.xlu1 %7888  ;;  %v8217_v21 = vsel %vm20152_vm3, %v8183_v4, %v17066_v24  ;;  %vm20159_vm3 = vcmask 195584  }
 0x7b7   : > { %5875 = vrot.lane.b32.xlu0 %v16843_v58, %s20099_s27  ;;  %9803 = vmatprep.subr.mxu1 %v8217_v21  ;;  %v7925_v27 = vsel %vm7920_vm15, %v16610_v56, %v7889_v62  ;;  %vm20160_vm8 = vmmov %vm20159_vm3 }
 0x7b8   : > { %6022 = vrot.lane.b32.xlu1 %v16856_v12, %s20097_s23  ;;  %9804 = vmatpush2.msra.mxu1 %v8216_v44 }
 0x7b9   : > { %v7891_v57 = vpop.permute.xlu0 %7890 }
 0x7ba   : > { %v8038_v32 = vpop.permute.xlu1 %8037  ;;  %v7926_v49 = vsel %vm7920_vm15, %v7889_v62, %v7891_v57  ;;  %v17115_v62 = vld [vmem:[%s19112_s3 + $0x8] sm:$0xff] }
 0x7bb   : > { %6024 = vrot.lane.b32.xlu0 %v16880_v9, %s20097_s23  ;;  %9730 = vmatprep.subr.mxu0 %v7926_v49  ;;  %v8072_v2 = vsel %vm8065_vm11, %v8036_v20, %v8038_v32 }
 0x7bc   : > { %5729 = vrot.lane.b32.xlu1 %v16439_v11, %s20065_s28  ;;  %9731 = vmatpush2.msra.mxu0 %v7925_v27 }
 0x7bd   : > { %v17082_v15 = vpop.permute.xlu0 %8039 }
 0x7be   : > { %v7744_v38 = vpop.permute.xlu1 %7743  ;;  %v8073_v16 = vsel %vm8065_vm11, %v8038_v32, %v17082_v15 }
 0x7bf   : > { %5731 = vrot.lane.b32.xlu0 %v16843_v58, %s20065_s28  ;;  %9805 = vmatprep.subr.mxu1 %v8073_v16  ;;  %v7780_v47 = vsel %vm7775_vm4, %v16637_v8, %v7744_v38 }
 0x7c0   : > { %5877 = vrot.lane.b32.xlu1 %v16856_v12, %s20099_s27  ;;  %9806 = vmatpush2.msra.mxu1 %v8072_v2 }
 0x7c1   : > { %v7746_v56 = vpop.permute.xlu0 %7745 }
 0x7c2   : > { %v7893_v60 = vpop.permute.xlu1 %7892  ;;  %v7781_v7 = vsel %vm7775_vm4, %v7744_v38, %v7746_v56 }
 0x7c3   : > { %5879 = vrot.lane.b32.xlu0 %v16880_v9, %s20099_s27  ;;  %9732 = vmatprep.subr.mxu0 %v7781_v7  ;;  %v7927_v8 = vsel %vm7920_vm15, %v7891_v57, %v7893_v60 }
 0x7c4   : > { %5585 = vrot.lane.b32.xlu1 %v16439_v11, %s20066_s30  ;;  %9733 = vmatpush2.msra.mxu0 %v7780_v47 }
 0x7c5   : > { %v17098_v46 = vpop.permute.xlu0 %7894  ;;  %9735 = vmatmul.mubr.f32.vlgmr.msra.gmra.mxu0 %v16622_v33 }
 0x7c6   : > { %v7607_v37 = vpop.permute.xlu1 %7606  ;;  %v7928_v20 = vsel %vm7920_vm15, %v7893_v60, %v17098_v46  ;;  %12182 = vmatprep.mubr.msk.f32.mxu0 %vm4415_vm1, %v16804_v22 }
 0x7c7   : > { %5587 = vrot.lane.b32.xlu0 %v16843_v58, %s20066_s30  ;;  %9807 = vmatprep.subr.mxu1 %v7928_v20  ;;  %v7639_v21 = vsel %vm20158_vm9, %v16654_v39, %v7607_v37  ;;  %vm20161_vm9 = vmmov %vm20157_vm7 }
 0x7c8   : > { %5733 = vrot.lane.b32.xlu1 %v16856_v12, %s20065_s28  ;;  %9808 = vmatpush2.msra.mxu1 %v7927_v8 }
 0x7c9   : > { %v7609_v4 = vpop.permute.xlu0 %7608  ;;  %9741 = vmatmul.mubr.f32.gmra.mxu0 %v16811_v52 }
 0x7ca   : > { %v7748_v10 = vpop.permute.xlu1 %7747  ;;  %v7640_v55 = vsel %vm20157_vm7, %v7607_v37, %v7609_v4  ;;  %12185 = vmatprep.mubr.msk.f32.mxu0 %vm4415_vm1, %v17115_v62 }
 0x7cb   : > { %5735 = vrot.lane.b32.xlu0 %v16880_v9, %s20065_s28  ;;  %9824 = vmatprep.subr.mxu0 %v7640_v55  ;;  %v7782_v49 = vsel %vm7775_vm4, %v7746_v56, %v7748_v10 }
 0x7cc   : > { %5589 = vrot.lane.b32.xlu1 %v16856_v12, %s20066_s30  ;;  %9825 = vmatpush1.msra.mxu0 %v7639_v21 }
 0x7cd   : > { %v17125_v44 = vpop.permute.xlu0 %7749 }
 0x7ce   : > { %v7462_v57 = vpop.permute.xlu1 %7461  ;;  %v7783_v32 = vsel %vm7775_vm4, %v7748_v10, %v17125_v44 }
 0x7cf   : > { %5591 = vrot.lane.b32.xlu0 %v16880_v9, %s20066_s30  ;;  %9809 = vmatprep.subr.mxu1 %v7783_v32  ;;  %v7494_v16 = vsel %vm20160_vm8, %v16670_v54, %v7462_v57 }
 0x7d0   : > { %8910 = vrot.lane.b32.xlu1 %v16843_v58, %s20100_s20  ;;  %9810 = vmatpush2.msra.mxu1 %v7782_v49 }
 0x7d1   : > { %v7464_v39 = vpop.permute.xlu0 %7463  ;;  %9812 = vmatmul.mubr.f32.vlgmr.msra.gmra.mxu1 %v16622_v33 }
 0x7d2   : > { %v7611_v27 = vpop.permute.xlu1 %7610  ;;  %v7495_v38 = vsel %vm20159_vm3, %v7462_v57, %v7464_v39  ;;  %12184 = vmatprep.mubr.msk.f32.mxu1 %vm4415_vm1, %v16804_v22  ;;  %vm20162_vm3 = vcmask 211968  }
 0x7d3   : > { %8912 = vrot.lane.b32.xlu0 %v16856_v12, %s20100_s20  ;;  %9826 = vmatprep.subr.mxu0 %v7495_v38  ;;  %v7641_v54 = vsel %vm20161_vm9, %v7609_v4, %v7611_v27  ;;  %vm20163_vm8 = vmmov %vm20162_vm3 }
 0x7d4   : > { %8765 = vrot.lane.b32.xlu1 %v16843_v58, %s20101_s26  ;;  %9827 = vmatpush1.msra.mxu0 %v7494_v16 }
 0x7d5   : > { %v17144_v2 = vpop.permute.xlu0 %7612  ;;  %9818 = vmatmul.mubr.f32.gmra.mxu1 %v16811_v52 }
 0x7d6   : > { %v7317_v33 = vpop.permute.xlu1 %7316  ;;  %v7642_v56 = vsel %vm20157_vm7, %v7611_v27, %v17144_v2  ;;  %12187 = vmatprep.mubr.msk.f32.mxu1 %vm4415_vm1, %v17115_v62  ;;  %vm20164_vm7 = vcmask 195584  }
 0x7d7   : > { %8767 = vrot.lane.b32.xlu0 %v16856_v12, %s20101_s26  ;;  %9901 = vmatprep.subr.mxu1 %v7642_v56  ;;  %v7349_v7 = vsel %vm20163_vm8, %v16686_v50, %v7317_v33  ;;  %vm20165_vm9 = vmmov %vm20164_vm7 }
 0x7d8   : > { %8914 = vrot.lane.b32.xlu1 %v16880_v9, %s20100_s20  ;;  %9902 = vmatpush1.msra.mxu1 %v7641_v54 }
 0x7d9   : > { %v7319_v22 = vpop.permute.xlu0 %7318 }
 0x7da   : > { %v7466_v60 = vpop.permute.xlu1 %7465  ;;  %v7350_v52 = vsel %vm20162_vm3, %v7317_v33, %v7319_v22  ;;  %vm20166_vm3 = vcmask 228352  }
 0x7db   : > { %8916 = vrot.lane.b32.xlu0 %v16893_v51, %s20100_s20  ;;  %9828 = vmatprep.subr.mxu0 %v7350_v52  ;;  %v7496_v8 = vsel %vm20165_vm9, %v7464_v39, %v7466_v60  ;;  %vm20167_vm8 = vmmov %vm20166_vm3  ;;  %v20170_v39 = vmax.f32 %v16167_v61, 0.0 }
 0x7dc   : > { %8620 = vrot.lane.b32.xlu1 %v16843_v58, %s20102_s25  ;;  %9829 = vmatpush1.msra.mxu0 %v7349_v7 }
 0x7dd   : > { %v17163_v47 = vpop.permute.xlu0 %7467  ;;  %v5345_v27 = vmax.f32 %v20170_v39, %v16444_v3 }
 0x7de   : > { %v7173_v37 = vpop.permute.xlu1 %7172  ;;  %v7497_v20 = vsel %vm20164_vm7, %v7466_v60, %v17163_v47  ;;  %vm20168_vm7 = vcmask 211968  }
 0x7df   : > { %8622 = vrot.lane.b32.xlu0 %v16856_v12, %s20102_s25  ;;  %9903 = vmatprep.subr.mxu1 %v7497_v20  ;;  %v7204_v55 = vsel %vm20167_vm8, %v16716_v43, %v7173_v37  ;;  %vm20169_vm9 = vmmov %vm20168_vm7 }
 0x7e0   : > { %8769 = vrot.lane.b32.xlu1 %v16880_v9, %s20101_s26  ;;  %9904 = vmatpush1.msra.mxu1 %v7496_v8 }
 0x7e1   : > { %v7175_v50 = vpop.permute.xlu0 %7174 }
 0x7e2   : > { %v7321_v4 = vpop.permute.xlu1 %7320  ;;  %v7205_v10 = vsel %vm20166_vm3, %v7173_v37, %v7175_v50  ;;  %vm20171_vm3 = vcmask 244736  }
 0x7e3   : > { %8771 = vrot.lane.b32.xlu0 %v16893_v51, %s20101_s26  ;;  %9830 = vmatprep.subr.mxu0 %v7205_v10  ;;  %v7351_v49 = vsel %vm20169_vm9, %v7319_v22, %v7321_v4  ;;  %vm20172_vm8 = vmmov %vm20171_vm3 }
 0x7e4   : > { %8475 = vrot.lane.b32.xlu1 %v16843_v58, %s20105_s12  ;;  %9831 = vmatpush1.msra.mxu0 %v7204_v55 }
 0x7e5   : > { %v17179_v21 = vpop.permute.xlu0 %7322 }
 0x7e6   : > { %v7029_v57 = vpop.permute.xlu1 %7028  ;;  %v7352_v32 = vsel %vm20168_vm7, %v7321_v4, %v17179_v21  ;;  %vm20173_vm7 = vcmask 228352  }
 0x7e7   : > { %8477 = vrot.lane.b32.xlu0 %v16856_v12, %s20105_s12  ;;  %9905 = vmatprep.subr.mxu1 %v7352_v32  ;;  %v7060_v33 = vsel %vm20172_vm8, %v16735_v40, %v7029_v57  ;;  %vm20174_vm9 = vmmov %vm20173_vm7 }
 0x7e8   : > { %8624 = vrot.lane.b32.xlu1 %v16880_v9, %s20102_s25  ;;  %9906 = vmatpush1.msra.mxu1 %v7351_v49 }
 0x7e9   : > { %v7031_v43 = vpop.permute.xlu0 %7030 }
 0x7ea   : > { %v7177_v38 = vpop.permute.xlu1 %7176  ;;  %v7061_v16 = vsel %vm20171_vm3, %v7029_v57, %v7031_v43  ;;  %vm20175_vm3 = vcmask 261120  }
 0x7eb   : > { %8626 = vrot.lane.b32.xlu0 %v16893_v51, %s20102_s25  ;;  %9832 = vmatprep.subr.mxu0 %v7061_v16  ;;  %v7206_v3 = vsel %vm20174_vm9, %v7175_v50, %v7177_v38  ;;  %vm20176_vm8 = vmmov %vm20175_vm3 }
 0x7ec   : > { %5404 = vrot.lane.b32.xlu1 %v5345_v27, %s20110_s29  ;;  %9833 = vmatpush1.msra.mxu0 %v7060_v33 }
 0x7ed   : > { %v17197_v56 = vpop.permute.xlu0 %7178 }
 0x7ee   : > { %v6885_v54 = vpop.permute.xlu1 %6884  ;;  %v7207_v61 = vsel %vm20173_vm7, %v7177_v38, %v17197_v56  ;;  %vm20177_vm7 = vcmask 244736  }
 0x7ef   : > { %8330 = vrot.lane.b32.xlu0 %v16843_v58, %s20113_s21  ;;  %9907 = vmatprep.subr.mxu1 %v7207_v61  ;;  %v6916_v52 = vsel %vm20176_vm8, %v16762_v42, %v6885_v54  ;;  %vm20178_vm9 = vmmov %vm20177_vm7 }
 0x7f0   : > { %8332 = vrot.lane.b32.xlu1 %v16856_v12, %s20113_s21  ;;  %9908 = vmatpush1.msra.mxu1 %v7206_v3  ;;  %vm20179_vm8 = vmmov %vm20175_vm3 }
 0x7f1   : > { %v6887_v40 = vpop.permute.xlu0 %6886 }
 0x7f2   : > { %v7033_v22 = vpop.permute.xlu1 %7032  ;;  %v6917_v60 = vsel %vm20175_vm3, %v6885_v54, %v6887_v40 }
 0x7f3   : > { %8479 = vrot.lane.b32.xlu0 %v16880_v9, %s20105_s12  ;;  %9834 = vmatprep.subr.mxu0 %v6917_v60  ;;  %v7062_v8 = vsel %vm20178_vm9, %v7031_v43, %v7033_v22  ;;  %vm20182_vm9 = vcmask 637952  }
 0x7f4   : > { %8481 = vrot.lane.b32.xlu1 %v16893_v51, %s20105_s12  ;;  %9835 = vmatpush1.msra.mxu0 %v6916_v52 }
 0x7f5   : > { %v17213_v7 = vpop.permute.xlu0 %7034 }
 0x7f6   : > { %v6741_v37 = vpop.permute.xlu1 %6740  ;;  %v7063_v20 = vsel %vm20177_vm7, %v7033_v22, %v17213_v7  ;;  %vm20181_vm7 = vcmask 850944  }
 0x7f7   : > { %8186 = vrot.lane.b32.xlu0 %v16843_v58, %s20110_s29  ;;  %9909 = vmatprep.subr.mxu1 %v7063_v20  ;;  %v6772_v10 = vsel %vm4415_vm1, %v16778_v6, %v6741_v37  ;;  %v5420_v20 = vsel %vm20181_vm7, %v16545_v36, %v17004_v45 }
 0x7f8   : > { %8188 = vrot.lane.b32.xlu1 %v16856_v12, %s20110_s29  ;;  %9910 = vmatpush1.msra.mxu1 %v7062_v8  ;;  %v17284_v36 = vmax.f32 %v16301_v13, %v5420_v20 }
 0x7f9   : > { %v6743_v42 = vpop.permute.xlu0 %6742 }
 0x7fa   : > { %v6889_v50 = vpop.permute.xlu1 %6888  ;;  %v6773_v4 = vsel %vm4415_vm1, %v6741_v37, %v6743_v42 }
 0x7fb   : > { %8334 = vrot.lane.b32.xlu0 %v16880_v9, %s20113_s21  ;;  %9836 = vmatprep.subr.mxu0 %v6773_v4  ;;  %v6918_v49 = vsel %vm20179_vm8, %v6887_v40, %v6889_v50  ;;  %vm20184_vm8 = vmmov %vm20182_vm9 }
 0x7fc   : > { %8336 = vrot.lane.b32.xlu1 %v16893_v51, %s20113_s21  ;;  %9837 = vmatpush1.msra.mxu0 %v6772_v10 }
 0x7fd   : > { %v17229_v55 = vpop.permute.xlu0 %6890 }
 0x7fe   : > { %v6596_v57 = vpop.permute.xlu1 %6595  ;;  %v6919_v32 = vsel %vm20175_vm3, %v6889_v50, %v17229_v55  ;;  %vm20183_vm3 = vmmov %vm20181_vm7 }
 0x7ff   : > { %8041 = vrot.lane.b32.xlu0 %v16843_v58, %s20122_s24  ;;  %9911 = vmatprep.subr.mxu1 %v6919_v32  ;;  %v6628_v27 = vsel %vm6619_vm12, %v16794_v41, %v6596_v57  ;;  %v5421_v50 = vsel %vm20183_vm3, %v17004_v45, %v17013_v23  ;;  %vm20185_vm7 = vmmov %vm20183_vm3 }
 0x800   : > { %8043 = vrot.lane.b32.xlu1 %v16856_v12, %s20122_s24  ;;  %9912 = vmatpush1.msra.mxu1 %v6918_v49 }
 0x801   : > { %v6598_v6 = vpop.permute.xlu0 %6597 }
 0x802   : > { %v6745_v43 = vpop.permute.xlu1 %6744  ;;  %v6629_v39 = vsel %vm6619_vm12, %v6596_v57, %v6598_v6  ;;  %v17289_v57 = vmax.f32 %v16700_v17, %v5421_v50 }
 0x803   : > { %8190 = vrot.lane.b32.xlu0 %v16880_v9, %s20110_s29  ;;  %9838 = vmatprep.subr.mxu0 %v6629_v39  ;;  %v6774_v54 = vsel %vm4415_vm1, %v6743_v42, %v6745_v43  ;;  %v5422_v39 = vsel %vm20185_vm7, %v17013_v23, %v17028_v53  ;;  %vm20187_vm7 = vcmask 1014784  }
 0x804   : > { %8192 = vrot.lane.b32.xlu1 %v16893_v51, %s20110_s29  ;;  %9839 = vmatpush1.msra.mxu0 %v6628_v27  ;;  %v17321_v23 = vmax.f32 %v16714_v63, %v5422_v39 }
 0x805   : > { %v17245_v38 = vpop.permute.xlu0 %6746 }
 0x806   : > { %v6452_v16 = vpop.permute.xlu1 %6451  ;;  %v6775_v33 = vsel %vm4415_vm1, %v6745_v43, %v17245_v38 }
 0x807   : > { %7896 = vrot.lane.b32.xlu0 %v16843_v58, %s20180_s7  ;;  %9913 = vmatprep.subr.mxu1 %v6775_v33  ;;  %v6483_v40 = vsel %vm2396_vm2, %v16826_v35, %v6452_v16  ;;  %v5423_v33 = vsel %vm20183_vm3, %v17028_v53, %v17037_v34  ;;  %vm20189_vm3 = vmmov %vm20187_vm7 }
 0x808   : > { %7898 = vrot.lane.b32.xlu1 %v16856_v12, %s20180_s7  ;;  %9914 = vmatpush1.msra.mxu1 %v6774_v54 }
 0x809   : > { %v6454_v41 = vpop.permute.xlu0 %6453 }
 0x80a   : > { %v6600_v61 = vpop.permute.xlu1 %6599  ;;  %v6484_v3 = vsel %vm2396_vm2, %v6452_v16, %v6454_v41 }
 0x80b   : > { %8045 = vrot.lane.b32.xlu0 %v16880_v9, %s20122_s24  ;;  %9840 = vmatprep.subr.mxu0 %v6484_v3  ;;  %v6630_v37 = vsel %vm6619_vm12, %v6598_v6, %v6600_v61 }
 0x80c   : > { %8047 = vrot.lane.b32.xlu1 %v16893_v51, %s20122_s24  ;;  %9841 = vmatpush1.msra.mxu0 %v6483_v40 }
 0x80d   : > { %v17261_v22 = vpop.permute.xlu0 %6601 }
 0x80e   : > { %v6308_v60 = vpop.permute.xlu1 %6307  ;;  %v6631_v52 = vsel %vm6619_vm12, %v6600_v61, %v17261_v22 }
 0x80f   : > { %7751 = vrot.lane.b32.xlu0 %v16843_v58, %s20125_s0  ;;  %9915 = vmatprep.subr.mxu1 %v6631_v52  ;;  %v6339_v4 = vsel %vm20184_vm8, %v16858_v14, %v6308_v60 }
 0x810   : > { %7753 = vrot.lane.b32.xlu1 %v16856_v12, %s20125_s0  ;;  %9916 = vmatpush1.msra.mxu1 %v6630_v37 }
 0x811   : > { %v6310_v35 = vpop.permute.xlu0 %6309 }
 0x812   : > { %v6456_v8 = vpop.permute.xlu1 %6455  ;;  %v6340_v42 = vsel %vm20182_vm9, %v6308_v60, %v6310_v35  ;;  %vm20186_vm9 = vmmov %vm20184_vm8 }
 0x813   : > { %7900 = vrot.lane.b32.xlu0 %v16880_v9, %s20180_s7  ;;  %9842 = vmatprep.subr.mxu0 %v6340_v42  ;;  %v6485_v14 = vsel %vm2396_vm2, %v6454_v41, %v6456_v8  ;;  %v17324_v41 = vmax.f32 %v16739_v30, %v5423_v33 }
 0x814   : > { %7902 = vrot.lane.b32.xlu1 %v16893_v51, %s20180_s7  ;;  %9843 = vmatpush1.msra.mxu0 %v6339_v4 }
 0x815   : > { %v17286_v10 = vpop.permute.xlu0 %6457 }
 0x816   : > { %v6164_v45 = vpop.permute.xlu1 %6163  ;;  %v6486_v32 = vsel %vm2396_vm2, %v6456_v8, %v17286_v10 }
 0x817   : > { %7614 = vrot.lane.b32.xlu0 %v17284_v36, %s20128_s19  ;;  %9917 = vmatprep.subr.mxu1 %v6486_v32  ;;  %v6195_v17 = vsel %vm1816_vm6, %v16877_v5, %v6164_v45 }
 0x818   : > { %7616 = vrot.lane.b32.xlu1 %v17289_v57, %s20128_s19  ;;  %9918 = vmatpush1.msra.mxu1 %v6485_v14 }
 0x819   : > { %v6166_v13 = vpop.permute.xlu0 %6165 }
 0x81a   : > { %v6312_v49 = vpop.permute.xlu1 %6311  ;;  %v6196_v6 = vsel %vm1816_vm6, %v6164_v45, %v6166_v13 }
 0x81b   : > { %7755 = vrot.lane.b32.xlu0 %v16880_v9, %s20125_s0  ;;  %9844 = vmatprep.subr.mxu0 %v6196_v6  ;;  %v6341_v5 = vsel %vm20184_vm8, %v6310_v35, %v6312_v49  ;;  %vm20190_vm8 = vmmov %vm20189_vm3 }
 0x81c   : > { %7757 = vrot.lane.b32.xlu1 %v16893_v51, %s20125_s0  ;;  %9845 = vmatpush1.msra.mxu0 %v6195_v17 }
 0x81d   : > { %v17305_v43 = vpop.permute.xlu0 %6313 }
 0x81e   : > { %v6019_v27 = vpop.permute.xlu1 %6018  ;;  %v6342_v16 = vsel %vm20186_vm9, %v6312_v49, %v17305_v43  ;;  %vm20188_vm9 = vmmov %vm20187_vm7 }
 0x81f   : > { %7469 = vrot.lane.b32.xlu0 %v16893_v51, %s20130_s13  ;;  %9919 = vmatprep.subr.mxu1 %v6342_v16  ;;  %v6051_v3 = vsel %vm6042_vm10, %v16902_v48, %v6019_v27 }
 0x820   : > { %7471 = vrot.lane.b32.xlu1 %v17284_v36, %s20130_s13  ;;  %9920 = vmatpush1.msra.mxu1 %v6341_v5 }
 0x821   : > { %v6021_v54 = vpop.permute.xlu0 %6020 }
 0x822   : > { %v6168_v61 = vpop.permute.xlu1 %6167  ;;  %v6052_v53 = vsel %vm6042_vm10, %v6019_v27, %v6021_v54 }
 0x823   : > { %7618 = vrot.lane.b32.xlu0 %v17321_v23, %s20128_s19  ;;  %9846 = vmatprep.subr.mxu0 %v6052_v53  ;;  %v6197_v60 = vsel %vm1816_vm6, %v6166_v13, %v6168_v61 }
 0x824   : > { %7620 = vrot.lane.b32.xlu1 %v17324_v41, %s20128_s19  ;;  %9847 = vmatpush1.msra.mxu0 %v6051_v3 }
 0x825   : > { %v17333_v63 = vpop.permute.xlu0 %6169 }
 0x826   : > { %v5874_v40 = vpop.permute.xlu1 %5873  ;;  %v6198_v30 = vsel %vm1816_vm6, %v6168_v61, %v17333_v63 }
 0x827   : > { %7324 = vrot.lane.b32.xlu0 %v16893_v51, %s20132_s15  ;;  %9921 = vmatprep.subr.mxu1 %v6198_v30  ;;  %v5906_v35 = vsel %vm5897_vm5, %v16918_v0, %v5874_v40 }
 0x828   : > { %7326 = vrot.lane.b32.xlu1 %v17284_v36, %s20132_s15  ;;  %9922 = vmatpush1.msra.mxu1 %v6197_v60 }
 0x829   : > { %v5876_v48 = vpop.permute.xlu0 %5875 }
 0x82a   : > { %v6023_v52 = vpop.permute.xlu1 %6022  ;;  %v5907_v37 = vsel %vm5897_vm5, %v5874_v40, %v5876_v48 }
 0x82b   : > { %7473 = vrot.lane.b32.xlu0 %v17289_v57, %s20130_s13  ;;  %9848 = vmatprep.subr.mxu0 %v5907_v37  ;;  %v6053_v50 = vsel %vm6042_vm10, %v6021_v54, %v6023_v52 }
 0x82c   : > { %7475 = vrot.lane.b32.xlu1 %v17321_v23, %s20130_s13  ;;  %9849 = vmatpush1.msra.mxu0 %v5906_v35 }
 0x82d   : > { %v17349_v20 = vpop.permute.xlu0 %6024 }
 0x82e   : > { %v5730_v8 = vpop.permute.xlu1 %5729  ;;  %v6054_v42 = vsel %vm6042_vm10, %v6023_v52, %v17349_v20 }
 0x82f   : > { %7180 = vrot.lane.b32.xlu0 %v16893_v51, %s20135_s14  ;;  %9923 = vmatprep.subr.mxu1 %v6054_v42  ;;  %v5761_v32 = vsel %vm20188_vm9, %v16934_v59, %v5730_v8 }
 0x830   : > { %7182 = vrot.lane.b32.xlu1 %v17284_v36, %s20135_s14  ;;  %9924 = vmatpush1.msra.mxu1 %v6053_v50 }
 0x831   : > { %v5732_v0 = vpop.permute.xlu0 %5731 }
 0x832   : > { %v5878_v4 = vpop.permute.xlu1 %5877  ;;  %v5762_v45 = vsel %vm20187_vm7, %v5730_v8, %v5732_v0  ;;  %vm20191_vm7 = vcmask 490496  }
 0x833   : > { %7328 = vrot.lane.b32.xlu0 %v17289_v57, %s20132_s15  ;;  %9850 = vmatprep.subr.mxu0 %v5762_v45  ;;  %v5908_v6 = vsel %vm5897_vm5, %v5876_v48, %v5878_v4  ;;  %vm20192_vm9 = vmmov %vm20191_vm7 }
 0x834   : > { %7330 = vrot.lane.b32.xlu1 %v17321_v23, %s20132_s15  ;;  %9851 = vmatpush1.msra.mxu0 %v5761_v32 }
 0x835   : > { %v17365_v14 = vpop.permute.xlu0 %5879 }
 0x836   : > { %v5586_v13 = vpop.permute.xlu1 %5585  ;;  %v5909_v49 = vsel %vm5897_vm5, %v5878_v4, %v17365_v14 }
 0x837   : > { %7036 = vrot.lane.b32.xlu0 %v16893_v51, %s20136_s1  ;;  %9925 = vmatprep.subr.mxu1 %v5909_v49  ;;  %v5617_v27 = vsel %vm656_vm14, %v16945_v31, %v5586_v13 }
 0x838   : > { %7038 = vrot.lane.b32.xlu1 %v17284_v36, %s20136_s1  ;;  %9926 = vmatpush1.msra.mxu1 %v5908_v6 }
 0x839   : > { %v5588_v59 = vpop.permute.xlu0 %5587 }
 0x83a   : > { %v5734_v17 = vpop.permute.xlu1 %5733  ;;  %v5618_v39 = vsel %vm656_vm14, %v5586_v13, %v5588_v59 }
 0x83b   : > { %7184 = vrot.lane.b32.xlu0 %v17289_v57, %s20135_s14  ;;  %9852 = vmatprep.subr.mxu0 %v5618_v39  ;;  %v5763_v31 = vsel %vm20190_vm8, %v5732_v0, %v5734_v17 }
 0x83c   : > { %7186 = vrot.lane.b32.xlu1 %v17321_v23, %s20135_s14  ;;  %9853 = vmatpush1.msra.mxu0 %v5617_v27 }
 0x83d   : > { %v17381_v16 = vpop.permute.xlu0 %5735  ;;  %9854 = vmatprep.subr.mxu0 %v16439_v11 }
 0x83e   : > { %v5590_v33 = vpop.permute.xlu1 %5589  ;;  %9855 = vmatpush1.msra.mxu0 %v16423_v26  ;;  %v5764_v5 = vsel %vm20189_vm3, %v5734_v17, %v17381_v16  ;;  %vm20193_vm3 = vcmask 506880  }
 0x83f   : > { %6892 = vrot.lane.b32.xlu0 %v16893_v51, %s20139_s2  ;;  %9927 = vmatprep.subr.mxu1 %v5764_v5  ;;  %v5619_v26 = vsel %vm656_vm14, %v5588_v59, %v5590_v33  ;;  %vm20194_vm8 = vmmov %vm20193_vm3 }
 0x840   : > { %6894 = vrot.lane.b32.xlu1 %v17284_v36, %s20139_s2  ;;  %9928 = vmatpush1.msra.mxu1 %v5763_v31 }
 0x841   : > { %v17392_v54 = vpop.permute.xlu0 %5591 }
 0x842   : > { %v8911_v61 = vpop.permute.xlu1 %8910  ;;  %v5620_v11 = vsel %vm656_vm14, %v5590_v33, %v17392_v54 }
 0x843   : > { %7040 = vrot.lane.b32.xlu0 %v17289_v57, %s20136_s1  ;;  %9929 = vmatprep.subr.mxu1 %v5620_v11  ;;  %v8942_v30 = vsel %vm2541_vm0, %v16970_v19, %v8911_v61 }
 0x844   : > { %7042 = vrot.lane.b32.xlu1 %v17321_v23, %s20136_s1  ;;  %9930 = vmatpush1.msra.mxu1 %v5619_v26 }
 0x845   : > { %v8913_v53 = vpop.permute.xlu0 %8912  ;;  %9931 = vmatprep.subr.mxu1 %v16856_v12 }
 0x846   : > { %v8766_v3 = vpop.permute.xlu1 %8765  ;;  %9932 = vmatpush1.msra.mxu1 %v16843_v58  ;;  %v8943_v40 = vsel %vm2541_vm0, %v8911_v61, %v8913_v53 }
 0x847   : > { %6748 = vrot.lane.b32.xlu0 %v16893_v51, %s20140_s17  ;;  %9870 = vmatprep.subr.mxu0 %v8943_v40  ;;  %v8798_v58 = vsel %vm8789_vm13, %v16986_v1, %v8766_v3 }
 0x848   : > { %6750 = vrot.lane.b32.xlu1 %v17284_v36, %s20140_s17  ;;  %9871 = vmatpush2.msra.mxu0 %v8942_v30 }
 0x849   : > { %v8768_v60 = vpop.permute.xlu0 %8767 }
 0x84a   : > { %v8915_v48 = vpop.permute.xlu1 %8914  ;;  %v8799_v12 = vsel %vm8789_vm13, %v8766_v3, %v8768_v60 }
 0x84b   : > { %6896 = vrot.lane.b32.xlu0 %v17289_v57, %s20139_s2  ;;  %9872 = vmatprep.subr.mxu0 %v8799_v12  ;;  %v8944_v35 = vsel %vm2541_vm0, %v8913_v53, %v8915_v48 }
 0x84c   : > { %6898 = vrot.lane.b32.xlu1 %v17321_v23, %s20139_s2  ;;  %9873 = vmatpush2.msra.mxu0 %v8798_v58 }
 0x84d   : > { %v17417_v19 = vpop.permute.xlu0 %8916 }
 0x84e   : > { %v8621_v52 = vpop.permute.xlu1 %8620  ;;  %v8945_v37 = vsel %vm2541_vm0, %v8915_v48, %v17417_v19 }
 0x84f   : > { %6603 = vrot.lane.b32.xlu0 %v16893_v51, %s20143_s11  ;;  %9947 = vmatprep.subr.mxu1 %v8945_v37  ;;  %v8653_v50 = vsel %vm20192_vm9, %v17002_v25, %v8621_v52  ;;  %vm20195_vm9 = vmmov %vm20191_vm7 }
 0x850   : > { %6605 = vrot.lane.b32.xlu1 %v17284_v36, %s20143_s11  ;;  %9948 = vmatpush2.msra.mxu1 %v8944_v35 }
 0x851   : > { %v8623_v1 = vpop.permute.xlu0 %8622 }
 0x852   : > { %v8770_v8 = vpop.permute.xlu1 %8769  ;;  %v8654_v42 = vsel %vm20191_vm7, %v8621_v52, %v8623_v1 }
 0x853   : > { %6752 = vrot.lane.b32.xlu0 %v17289_v57, %s20140_s17  ;;  %9874 = vmatprep.subr.mxu0 %v8654_v42  ;;  %v8800_v32 = vsel %vm8789_vm13, %v8768_v60, %v8770_v8 }
 0x854   : > { %6754 = vrot.lane.b32.xlu1 %v17321_v23, %s20140_s17  ;;  %9875 = vmatpush2.msra.mxu0 %v8653_v50 }
 0x855   : > { %v17433_v0 = vpop.permute.xlu0 %8771 }
 0x856   : > { %v8476_v4 = vpop.permute.xlu1 %8475  ;;  %v8801_v45 = vsel %vm8789_vm13, %v8770_v8, %v17433_v0 }
 0x857   : > { %6459 = vrot.lane.b32.xlu0 %v16893_v51, %s20146_s18  ;;  %9949 = vmatprep.subr.mxu1 %v8801_v45  ;;  %v8508_v6 = vsel %vm20194_vm8, %v17026_v18, %v8476_v4 }
 0x858   : > { %6461 = vrot.lane.b32.xlu1 %v17284_v36, %s20146_s18  ;;  %9950 = vmatpush2.msra.mxu1 %v8800_v32 }
 0x859   : > { %v8478_v25 = vpop.permute.xlu0 %8477 }
 0x85a   : > { %v8625_v13 = vpop.permute.xlu1 %8624  ;;  %v8509_v49 = vsel %vm20193_vm3, %v8476_v4, %v8478_v25  ;;  %vm20196_vm3 = vcmask 523264  }
 0x85b   : > { %6607 = vrot.lane.b32.xlu0 %v17289_v57, %s20143_s11  ;;  %9876 = vmatprep.subr.mxu0 %v8509_v49  ;;  %v8655_v27 = vsel %vm20195_vm9, %v8623_v1, %v8625_v13  ;;  %vm20197_vm8 = vmmov %vm20196_vm3 }
 0x85c   : > { %6609 = vrot.lane.b32.xlu1 %v17321_v23, %s20143_s11  ;;  %9877 = vmatpush2.msra.mxu0 %v8508_v6 }
 0x85d   : > { %v17449_v59 = vpop.permute.xlu0 %8626 }
 0x85e   : > { %v17451_v17 = vpop.permute.xlu1 %5404  ;;  %v8656_v39 = vsel %vm20191_vm7, %v8625_v13, %v17449_v59  ;;  %vm20198_vm7 = vcmask 506880  }
 0x85f   : > { %6315 = vrot.lane.b32.xlu0 %v16893_v51, %s20063_s16  ;;  %9951 = vmatprep.subr.mxu1 %v8656_v39  ;;  %vm20199_vm9 = vmmov %vm20198_vm7 }
 0x860   : > { %6317 = vrot.lane.b32.xlu1 %v17284_v36, %s20063_s16  ;;  %9952 = vmatpush2.msra.mxu1 %v8655_v27 }
 0x861   : > { %v8331_v18 = vpop.permute.xlu0 %8330 }
 0x862   : > { %v8333_v33 = vpop.permute.xlu1 %8332  ;;  %v8363_v5 = vsel %vm20196_vm3, %v17050_v28, %v8331_v18  ;;  %vm20200_vm3 = vcmask 850944  }
 0x863   : > { %6463 = vrot.lane.b32.xlu0 %v17289_v57, %s20146_s18  ;;  %v8364_v31 = vsel %vm20197_vm8, %v8331_v18, %v8333_v33  ;;  %vm20201_vm8 = vmmov %vm20200_vm3 }
 0x864   : > { %6465 = vrot.lane.b32.xlu1 %v17321_v23, %s20146_s18  ;;  %9878 = vmatprep.subr.mxu0 %v8364_v31 }
 0x865   : > { %9879 = vmatpush2.msra.mxu0 %v8363_v5  ;;  %v8480_v61 = vpop.permute.xlu0 %8479 }
 0x866   : > { %v17467_v11 = vpop.permute.xlu1 %8481  ;;  %v8510_v26 = vsel %vm20198_vm7, %v8478_v25, %v8480_v61  ;;  %vm20202_vm7 = vcmask 523264  }
 0x867   : > { %6171 = vrot.lane.b32.xlu0 %v16893_v51, %s20064_s22  ;;  %v8511_v28 = vsel %vm20199_vm9, %v8480_v61, %v17467_v11  ;;  %vm20203_vm9 = vmmov %vm20202_vm7  ;;  %v17537_v61 = vld [vmem:[%s19112_s3] sm:$0xff] }
 0x868   : > { %6173 = vrot.lane.b32.xlu1 %v17284_v36, %s20064_s22  ;;  %9953 = vmatprep.subr.mxu1 %v8511_v28 }
 0x869   : > { %9954 = vmatpush2.msra.mxu1 %v8510_v26  ;;  %v8187_v53 = vpop.permute.xlu0 %8186  ;;  %v17547_v26 = vld [vmem:[%s19112_s3 + $0x18] sm:$0xff] }
 0x86a   : > { %v8189_v3 = vpop.permute.xlu1 %8188  ;;  %v8218_v40 = vsel %vm20200_vm3, %v17066_v24, %v8187_v53 }
 0x86b   : > { %6319 = vrot.lane.b32.xlu0 %v17289_v57, %s20063_s16  ;;  %v8219_v30 = vsel %vm20201_vm8, %v8187_v53, %v8189_v3  ;;  %vm20204_vm8 = vmmov %vm20200_vm3 }
 0x86c   : > { %6321 = vrot.lane.b32.xlu1 %v17321_v23, %s20063_s16  ;;  %9880 = vmatprep.subr.mxu0 %v8219_v30 }
 0x86d   : > { %9881 = vmatpush2.msra.mxu0 %v8218_v40  ;;  %v8335_v60 = vpop.permute.xlu0 %8334  ;;  %v17558_v40 = vld [vmem:[%s19112_s3 + $0x10] sm:$0xff] }
 0x86e   : > { %v17483_v48 = vpop.permute.xlu1 %8336  ;;  %v8365_v12 = vsel %vm20202_vm7, %v8333_v33, %v8335_v60  ;;  %vm20205_vm7 = vcmask 916480  }
 0x86f   : > { %6026 = vrot.lane.b32.xlu0 %v16893_v51, %s20097_s23  ;;  %v8366_v24 = vsel %vm20203_vm9, %v8335_v60, %v17483_v48  ;;  %vm20206_vm9 = vmmov %vm20205_vm7 }
 0x870   : > { %6028 = vrot.lane.b32.xlu1 %v17284_v36, %s20097_s23  ;;  %9955 = vmatprep.subr.mxu1 %v8366_v24 }
 0x871   : > { %9956 = vmatpush2.msra.mxu1 %v8365_v12  ;;  %v8042_v58 = vpop.permute.xlu0 %8041 }
 0x872   : > { %v8044_v52 = vpop.permute.xlu1 %8043  ;;  %v8074_v37 = vsel %vm8065_vm11, %v17082_v15, %v8042_v58 }
 0x873   : > { %6175 = vrot.lane.b32.xlu0 %v17289_v57, %s20064_s22  ;;  %v8075_v35 = vsel %vm8065_vm11, %v8042_v58, %v8044_v52 }
 0x874   : > { %6177 = vrot.lane.b32.xlu1 %v17321_v23, %s20064_s22  ;;  %9882 = vmatprep.subr.mxu0 %v8075_v35 }
 0x875   : > { %9883 = vmatpush2.msra.mxu0 %v8074_v37  ;;  %v8191_v1 = vpop.permute.xlu0 %8190 }
 0x876   : > { %v17499_v8 = vpop.permute.xlu1 %8192  ;;  %v8220_v42 = vsel %vm20200_vm3, %v8189_v3, %v8191_v1  ;;  %vm20207_vm3 = vcmask 195584  }
 0x877   : > { %5881 = vrot.lane.b32.xlu0 %v16893_v51, %s20099_s27  ;;  %v8221_v15 = vsel %vm20204_vm8, %v8191_v1, %v17499_v8  ;;  %vm20208_vm8 = vmmov %vm20207_vm3 }
 0x878   : > { %5883 = vrot.lane.b32.xlu1 %v17284_v36, %s20099_s27  ;;  %9957 = vmatprep.subr.mxu1 %v8221_v15 }
 0x879   : > { %9958 = vmatpush2.msra.mxu1 %v8220_v42  ;;  %v7897_v50 = vpop.permute.xlu0 %7896 }
 0x87a   : > { %v7899_v4 = vpop.permute.xlu1 %7898  ;;  %v7929_v45 = vsel %vm7920_vm15, %v17098_v46, %v7897_v50 }
 0x87b   : > { %6030 = vrot.lane.b32.xlu0 %v17289_v57, %s20097_s23  ;;  %v7930_v32 = vsel %vm7920_vm15, %v7897_v50, %v7899_v4 }
 0x87c   : > { %6032 = vrot.lane.b32.xlu1 %v17321_v23, %s20097_s23  ;;  %9884 = vmatprep.subr.mxu0 %v7930_v32 }
 0x87d   : > { %9885 = vmatpush2.msra.mxu0 %v7929_v45  ;;  %v8046_v25 = vpop.permute.xlu0 %8045 }
 0x87e   : > { %v17515_v13 = vpop.permute.xlu1 %8047  ;;  %v8076_v49 = vsel %vm8065_vm11, %v8044_v52, %v8046_v25 }
 0x87f   : > { %5737 = vrot.lane.b32.xlu0 %v16893_v51, %s20065_s28  ;;  %v8077_v46 = vsel %vm8065_vm11, %v8046_v25, %v17515_v13 }
 0x880   : > { %5739 = vrot.lane.b32.xlu1 %v17284_v36, %s20065_s28  ;;  %9959 = vmatprep.subr.mxu1 %v8077_v46 }
 0x881   : > { %9960 = vmatpush2.msra.mxu1 %v8076_v49  ;;  %v7752_v6 = vpop.permute.xlu0 %7751 }
 0x882   : > { %v7754_v39 = vpop.permute.xlu1 %7753  ;;  %v7784_v27 = vsel %vm7775_vm4, %v17125_v44, %v7752_v6 }
 0x883   : > { %5885 = vrot.lane.b32.xlu0 %v17289_v57, %s20099_s27  ;;  %v7785_v18 = vsel %vm7775_vm4, %v7752_v6, %v7754_v39 }
 0x884   : > { %5887 = vrot.lane.b32.xlu1 %v17321_v23, %s20099_s27  ;;  %9886 = vmatprep.subr.mxu0 %v7785_v18 }
 0x885   : > { %9887 = vmatpush2.msra.mxu0 %v7784_v27  ;;  %v7901_v33 = vpop.permute.xlu0 %7900 }
 0x886   : > { %v17531_v5 = vpop.permute.xlu1 %7902  ;;  %v7931_v31 = vsel %vm7920_vm15, %v7899_v4, %v7901_v33  ;;  %9889 = vmatmul.mubr.f32.vlgmr.msra.gmra.mxu0 %v17537_v61 }
 0x887   : > { %5593 = vrot.lane.b32.xlu0 %v16893_v51, %s20066_s30  ;;  %v7932_v44 = vsel %vm7920_vm15, %v7901_v33, %v17531_v5  ;;  %12186 = vmatprep.mubr.msk.f32.mxu0 %vm4415_vm1, %v17547_v26 }
 0x888   : > { %5595 = vrot.lane.b32.xlu1 %v17284_v36, %s20066_s30  ;;  %9961 = vmatprep.subr.mxu1 %v7932_v44 }
 0x889   : > { %9962 = vmatpush2.msra.mxu1 %v7931_v31  ;;  %v7615_v28 = vpop.permute.xlu0 %7614 }
 0x88a   : > { %v7617_v53 = vpop.permute.xlu1 %7616  ;;  %v7643_v3 = vsel %vm20205_vm7, %v17144_v2, %v7615_v28  ;;  %9895 = vmatmul.mubr.f32.gmra.mxu0 %v17558_v40 }
 0x88b   : > { %5741 = vrot.lane.b32.xlu0 %v17289_v57, %s20065_s28  ;;  %v7644_v30 = vsel %vm20206_vm9, %v7615_v28, %v7617_v53  ;;  %12189 = vmatprep.mubr.msk.f32.mxu0 %vm4415_vm1, %v17115_v62  ;;  %vm20209_vm9 = vmmov %vm20205_vm7 }
 0x88c   : > { %5743 = vrot.lane.b32.xlu1 %v17321_v23, %s20065_s28  ;;  %9978 = vmatprep.subr.mxu0 %v7644_v30 }
 0x88d   : > { %9979 = vmatpush1.msra.mxu0 %v7643_v3  ;;  %v7756_v2 = vpop.permute.xlu0 %7755 }
 0x88e   : > { %v17568_v60 = vpop.permute.xlu1 %7757  ;;  %v7786_v12 = vsel %vm7775_vm4, %v7754_v39, %v7756_v2 }
 0x88f   : > { %5597 = vrot.lane.b32.xlu0 %v17289_v57, %s20066_s30  ;;  %v7787_v24 = vsel %vm7775_vm4, %v7756_v2, %v17568_v60 }
 0x890   : > { %5599 = vrot.lane.b32.xlu1 %v17321_v23, %s20066_s30  ;;  %9963 = vmatprep.subr.mxu1 %v7787_v24 }
 0x891   : > { %9964 = vmatpush2.msra.mxu1 %v7786_v12  ;;  %v7470_v58 = vpop.permute.xlu0 %7469 }
 0x892   : > { %v7472_v52 = vpop.permute.xlu1 %7471  ;;  %v7498_v37 = vsel %vm20207_vm3, %v17163_v47, %v7470_v58  ;;  %9966 = vmatmul.mubr.f32.vlgmr.msra.gmra.mxu1 %v17537_v61  ;;  %vm20210_vm3 = vcmask 211968  }
 0x893   : > { %8918 = vrot.lane.b32.xlu0 %v17284_v36, %s20100_s20  ;;  %v7499_v35 = vsel %vm20208_vm8, %v7470_v58, %v7472_v52  ;;  %12188 = vmatprep.mubr.msk.f32.mxu1 %vm4415_vm1, %v17547_v26  ;;  %vm20211_vm8 = vmmov %vm20210_vm3 }
 0x894   : > { %8920 = vrot.lane.b32.xlu1 %v17289_v57, %s20100_s20  ;;  %9980 = vmatprep.subr.mxu0 %v7499_v35 }
 0x895   : > { %9981 = vmatpush1.msra.mxu0 %v7498_v37  ;;  %v7619_v1 = vpop.permute.xlu0 %7618 }
 0x896   : > { %v17587_v42 = vpop.permute.xlu1 %7620  ;;  %v7645_v47 = vsel %vm20205_vm7, %v7617_v53, %v7619_v1  ;;  %9972 = vmatmul.mubr.f32.gmra.mxu1 %v17558_v40  ;;  %vm20212_vm7 = vcmask 195584  }
 0x897   : > { %8773 = vrot.lane.b32.xlu0 %v17284_v36, %s20101_s26  ;;  %v7646_v15 = vsel %vm20209_vm9, %v7619_v1, %v17587_v42  ;;  %12191 = vmatprep.mubr.msk.f32.mxu1 %vm4415_vm1, %v17115_v62  ;;  %vm20213_vm9 = vmmov %vm20212_vm7 }
 0x898   : > { %8775 = vrot.lane.b32.xlu1 %v17289_v57, %s20101_s26  ;;  %10055 = vmatprep.subr.mxu1 %v7646_v15 }
 0x899   : > { %10056 = vmatpush1.msra.mxu1 %v7645_v47  ;;  %v7325_v50 = vpop.permute.xlu0 %7324 }
 0x89a   : > { %v7327_v4 = vpop.permute.xlu1 %7326  ;;  %v7353_v45 = vsel %vm20210_vm3, %v17179_v21, %v7325_v50  ;;  %vm20214_vm3 = vcmask 228352  }
 0x89b   : > { %8922 = vrot.lane.b32.xlu0 %v17321_v23, %s20100_s20  ;;  %v7354_v32 = vsel %vm20211_vm8, %v7325_v50, %v7327_v4  ;;  %vm20215_vm8 = vmmov %vm20214_vm3 }
 0x89c   : > { %8924 = vrot.lane.b32.xlu1 %v17324_v41, %s20100_s20  ;;  %9982 = vmatprep.subr.mxu0 %v7354_v32 }
 0x89d   : > { %9983 = vmatpush1.msra.mxu0 %v7353_v45  ;;  %v7474_v62 = vpop.permute.xlu0 %7473 }
 0x89e   : > { %v17606_v25 = vpop.permute.xlu1 %7475  ;;  %v7500_v49 = vsel %vm20212_vm7, %v7472_v52, %v7474_v62  ;;  %vm20216_vm7 = vcmask 211968  }
 0x89f   : > { %8628 = vrot.lane.b32.xlu0 %v17284_v36, %s20102_s25  ;;  %v7501_v21 = vsel %vm20213_vm9, %v7474_v62, %v17606_v25  ;;  %vm20217_vm9 = vmmov %vm20216_vm7 }
 0x8a0   : > { %8630 = vrot.lane.b32.xlu1 %v17289_v57, %s20102_s25  ;;  %10057 = vmatprep.subr.mxu1 %v7501_v21 }
 0x8a1   : > { %10058 = vmatpush1.msra.mxu1 %v7500_v49  ;;  %v7181_v46 = vpop.permute.xlu0 %7180 }
 0x8a2   : > { %v7183_v6 = vpop.permute.xlu1 %7182  ;;  %v7208_v39 = vsel %vm20214_vm3, %v17197_v56, %v7181_v46  ;;  %vm20218_vm3 = vcmask 244736  }
 0x8a3   : > { %8777 = vrot.lane.b32.xlu0 %v17321_v23, %s20101_s26  ;;  %v7209_v27 = vsel %vm20215_vm8, %v7181_v46, %v7183_v6  ;;  %vm20219_vm8 = vmmov %vm20218_vm3 }
 0x8a4   : > { %8779 = vrot.lane.b32.xlu1 %v17324_v41, %s20101_s26  ;;  %9984 = vmatprep.subr.mxu0 %v7209_v27 }
 0x8a5   : > { %9985 = vmatpush1.msra.mxu0 %v7208_v39  ;;  %v7329_v18 = vpop.permute.xlu0 %7328 }
 0x8a6   : > { %v17622_v33 = vpop.permute.xlu1 %7330  ;;  %v7355_v31 = vsel %vm20216_vm7, %v7327_v4, %v7329_v18  ;;  %vm20220_vm7 = vcmask 228352  }
 0x8a7   : > { %8483 = vrot.lane.b32.xlu0 %v17284_v36, %s20105_s12  ;;  %v7356_v56 = vsel %vm20217_vm9, %v7329_v18, %v17622_v33  ;;  %vm20221_vm9 = vmmov %vm20220_vm7 }
 0x8a8   : > { %8485 = vrot.lane.b32.xlu1 %v17289_v57, %s20105_s12  ;;  %10059 = vmatprep.subr.mxu1 %v7356_v56 }
 0x8a9   : > { %10060 = vmatpush1.msra.mxu1 %v7355_v31  ;;  %v7037_v44 = vpop.permute.xlu0 %7036 }
 0x8aa   : > { %v7039_v28 = vpop.permute.xlu1 %7038  ;;  %v7064_v53 = vsel %vm20218_vm3, %v17213_v7, %v7037_v44  ;;  %vm20222_vm3 = vcmask 261120  }
 0x8ab   : > { %8632 = vrot.lane.b32.xlu0 %v17321_v23, %s20102_s25  ;;  %v7065_v3 = vsel %vm20219_vm8, %v7037_v44, %v7039_v28  ;;  %vm20223_vm8 = vmmov %vm20222_vm3 }
 0x8ac   : > { %8634 = vrot.lane.b32.xlu1 %v17324_v41, %s20102_s25  ;;  %9986 = vmatprep.subr.mxu0 %v7065_v3 }
 0x8ad   : > { %9987 = vmatpush1.msra.mxu0 %v7064_v53  ;;  %v7185_v30 = vpop.permute.xlu0 %7184 }
 0x8ae   : > { %v17638_v2 = vpop.permute.xlu1 %7186  ;;  %v7210_v12 = vsel %vm20220_vm7, %v7183_v6, %v7185_v30  ;;  %vm20224_vm7 = vcmask 244736  }
 0x8af   : > { %8338 = vrot.lane.b32.xlu0 %v17284_v36, %s20113_s21  ;;  %v7211_v7 = vsel %vm20221_vm9, %v7185_v30, %v17638_v2  ;;  %vm20225_vm9 = vmmov %vm20224_vm7 }
 0x8b0   : > { %8340 = vrot.lane.b32.xlu1 %v17289_v57, %s20113_s21  ;;  %10061 = vmatprep.subr.mxu1 %v7211_v7 }
 0x8b1   : > { %10062 = vmatpush1.msra.mxu1 %v7210_v12  ;;  %v6893_v24 = vpop.permute.xlu0 %6892 }
 0x8b2   : > { %v6895_v58 = vpop.permute.xlu1 %6894  ;;  %v6920_v52 = vsel %vm20222_vm3, %v17229_v55, %v6893_v24 }
 0x8b3   : > { %8487 = vrot.lane.b32.xlu0 %v17321_v23, %s20105_s12  ;;  %v6921_v37 = vsel %vm20223_vm8, %v6893_v24, %v6895_v58  ;;  %vm20226_vm8 = vmmov %vm20222_vm3 }
 0x8b4   : > { %8489 = vrot.lane.b32.xlu1 %v17324_v41, %s20105_s12  ;;  %9988 = vmatprep.subr.mxu0 %v6921_v37 }
 0x8b5   : > { %9989 = vmatpush1.msra.mxu0 %v6920_v52  ;;  %v7041_v35 = vpop.permute.xlu0 %7040 }
 0x8b6   : > { %v17654_v1 = vpop.permute.xlu1 %7042  ;;  %v7066_v47 = vsel %vm20224_vm7, %v7039_v28, %v7041_v35  ;;  %vm20227_vm7 = vcmask 850944  }
 0x8b7   : > { %8194 = vrot.lane.b32.xlu0 %v17284_v36, %s20110_s29  ;;  %v7067_v55 = vsel %vm20225_vm9, %v7041_v35, %v17654_v1  ;;  %v5424_v24 = vsel %vm20227_vm7, %v17037_v34, %v17451_v17  ;;  %vm20228_vm9 = vcmask 637952   ;;  %v19406_v17 = vmov 0.0  }
 0x8b8   : > { %8196 = vrot.lane.b32.xlu1 %v17289_v57, %s20110_s29  ;;  %10063 = vmatprep.subr.mxu1 %v7067_v55  ;;  %v17722_v35 = vmax.f32 %v16753_v29, %v5424_v24 }
 0x8b9   : > { %10064 = vmatpush1.msra.mxu1 %v7066_v47  ;;  %v6749_v15 = vpop.permute.xlu0 %6748 }
 0x8ba   : > { %v6751_v50 = vpop.permute.xlu1 %6750  ;;  %v6776_v4 = vsel %vm4415_vm1, %v17245_v38, %v6749_v15 }
 0x8bb   : > { %8342 = vrot.lane.b32.xlu0 %v17321_v23, %s20113_s21  ;;  %v6777_v45 = vsel %vm4415_vm1, %v6749_v15, %v6751_v50 }
 0x8bc   : > { %8344 = vrot.lane.b32.xlu1 %v17324_v41, %s20113_s21  ;;  %9990 = vmatprep.subr.mxu0 %v6777_v45 }
 0x8bd   : > { %9991 = vmatpush1.msra.mxu0 %v6776_v4  ;;  %v6897_v32 = vpop.permute.xlu0 %6896 }
 0x8be   : > { %v17670_v62 = vpop.permute.xlu1 %6898  ;;  %v6922_v49 = vsel %vm20222_vm3, %v6895_v58, %v6897_v32  ;;  %vm20229_vm3 = vmmov %vm20228_vm9 }
 0x8bf   : > { %8049 = vrot.lane.b32.xlu0 %v17284_v36, %s20122_s24  ;;  %v6923_v38 = vsel %vm20226_vm8, %v6897_v32, %v17670_v62  ;;  %vm20230_vm8 = vmmov %vm20229_vm3 }
 0x8c0   : > { %8051 = vrot.lane.b32.xlu1 %v17289_v57, %s20122_s24  ;;  %10065 = vmatprep.subr.mxu1 %v6923_v38  ;;  %vm20231_vm7 = vmmov %vm20229_vm3 }
 0x8c1   : > { %10066 = vmatpush1.msra.mxu1 %v6922_v49  ;;  %v6604_v21 = vpop.permute.xlu0 %6603 }
 0x8c2   : > { %v6606_v46 = vpop.permute.xlu1 %6605  ;;  %v6632_v6 = vsel %vm6619_vm12, %v17261_v22, %v6604_v21 }
 0x8c3   : > { %8198 = vrot.lane.b32.xlu0 %v17321_v23, %s20110_s29  ;;  %v6633_v39 = vsel %vm6619_vm12, %v6604_v21, %v6606_v46 }
 0x8c4   : > { %8200 = vrot.lane.b32.xlu1 %v17324_v41, %s20110_s29  ;;  %9992 = vmatprep.subr.mxu0 %v6633_v39 }
 0x8c5   : > { %9993 = vmatpush1.msra.mxu0 %v6632_v6  ;;  %v6753_v27 = vpop.permute.xlu0 %6752 }
 0x8c6   : > { %v17686_v18 = vpop.permute.xlu1 %6754  ;;  %v6778_v31 = vsel %vm4415_vm1, %v6751_v50, %v6753_v27 }
 0x8c7   : > { %7904 = vrot.lane.b32.xlu0 %v17284_v36, %s20180_s7  ;;  %v6779_v22 = vsel %vm4415_vm1, %v6753_v27, %v17686_v18 }
 0x8c8   : > { %7906 = vrot.lane.b32.xlu1 %v17289_v57, %s20180_s7  ;;  %10067 = vmatprep.subr.mxu1 %v6779_v22 }
 0x8c9   : > { %10068 = vmatpush1.msra.mxu1 %v6778_v31  ;;  %v6460_v56 = vpop.permute.xlu0 %6459 }
 0x8ca   : > { %v6462_v44 = vpop.permute.xlu1 %6461  ;;  %v6487_v28 = vsel %vm2396_vm2, %v17286_v10, %v6460_v56 }
 0x8cb   : > { %8053 = vrot.lane.b32.xlu0 %v17321_v23, %s20122_s24  ;;  %v6488_v53 = vsel %vm2396_vm2, %v6460_v56, %v6462_v44 }
 0x8cc   : > { %8055 = vrot.lane.b32.xlu1 %v17324_v41, %s20122_s24  ;;  %9994 = vmatprep.subr.mxu0 %v6488_v53 }
 0x8cd   : > { %9995 = vmatpush1.msra.mxu0 %v6487_v28  ;;  %v6608_v3 = vpop.permute.xlu0 %6607 }
 0x8ce   : > { %v17702_v30 = vpop.permute.xlu1 %6609  ;;  %v6634_v12 = vsel %vm6619_vm12, %v6606_v46, %v6608_v3 }
 0x8cf   : > { %7759 = vrot.lane.b32.xlu0 %v17284_v36, %s20125_s0  ;;  %v6635_v10 = vsel %vm6619_vm12, %v6608_v3, %v17702_v30 }
 0x8d0   : > { %7761 = vrot.lane.b32.xlu1 %v17289_v57, %s20125_s0  ;;  %10069 = vmatprep.subr.mxu1 %v6635_v10 }
 0x8d1   : > { %10070 = vmatpush1.msra.mxu1 %v6634_v12  ;;  %v6316_v7 = vpop.permute.xlu0 %6315 }
 0x8d2   : > { %v6318_v58 = vpop.permute.xlu1 %6317  ;;  %v6343_v52 = vsel %vm20228_vm9, %v17305_v43, %v6316_v7  ;;  %vm20232_vm9 = vcmask 1014784  }
 0x8d3   : > { %7908 = vrot.lane.b32.xlu0 %v17321_v23, %s20180_s7  ;;  %v6344_v37 = vsel %vm20229_vm3, %v6316_v7, %v6318_v58  ;;  %vm20233_vm3 = vmmov %vm20232_vm9 }
 0x8d4   : > { %7910 = vrot.lane.b32.xlu1 %v17324_v41, %s20180_s7  ;;  %9996 = vmatprep.subr.mxu0 %v6344_v37 }
 0x8d5   : > { %9997 = vmatpush1.msra.mxu0 %v6343_v52  ;;  %v6464_v47 = vpop.permute.xlu0 %6463 }
 0x8d6   : > { %v17724_v55 = vpop.permute.xlu1 %6465  ;;  %v6489_v34 = vsel %vm2396_vm2, %v6462_v44, %v6464_v47 }
 0x8d7   : > { %7622 = vrot.lane.b32.xlu0 %v17722_v35, %s20128_s19  ;;  %v6490_v43 = vsel %vm2396_vm2, %v6464_v47, %v17724_v55 }
 0x8d8   : > { %12425 = vrot.lane.b32.xlu1 %v19406_v17, %s20128_s19  ;;  %10071 = vmatprep.subr.mxu1 %v6490_v43 }
 0x8d9   : > { %10072 = vmatpush1.msra.mxu1 %v6489_v34  ;;  %v6172_v29 = vpop.permute.xlu0 %6171 }
 0x8da   : > { %v6174_v15 = vpop.permute.xlu1 %6173  ;;  %v6199_v50 = vsel %vm1816_vm6, %v17333_v63, %v6172_v29 }
 0x8db   : > { %7763 = vrot.lane.b32.xlu0 %v17321_v23, %s20125_s0  ;;  %v6200_v4 = vsel %vm1816_vm6, %v6172_v29, %v6174_v15 }
 0x8dc   : > { %7765 = vrot.lane.b32.xlu1 %v17324_v41, %s20125_s0  ;;  %9998 = vmatprep.subr.mxu0 %v6200_v4 }
 0x8dd   : > { %9999 = vmatpush1.msra.mxu0 %v6199_v50  ;;  %v6320_v45 = vpop.permute.xlu0 %6319 }
 0x8de   : > { %v17740_v32 = vpop.permute.xlu1 %6321  ;;  %v6345_v49 = vsel %vm20230_vm8, %v6318_v58, %v6320_v45  ;;  %vm20234_vm8 = vmmov %vm20233_vm3 }
 0x8df   : > { %7477 = vrot.lane.b32.xlu0 %v17324_v41, %s20130_s13  ;;  %v6346_v63 = vsel %vm20231_vm7, %v6320_v45, %v17740_v32  ;;  %vm20235_vm7 = vmmov %vm20233_vm3 }
 0x8e0   : > { %7479 = vrot.lane.b32.xlu1 %v17722_v35, %s20130_s13  ;;  %10073 = vmatprep.subr.mxu1 %v6346_v63 }
 0x8e1   : > { %10074 = vmatpush1.msra.mxu1 %v6345_v49  ;;  %v6027_v38 = vpop.permute.xlu0 %6026 }
 0x8e2   : > { %v6029_v21 = vpop.permute.xlu1 %6028  ;;  %v6055_v46 = vsel %vm6042_vm10, %v17349_v20, %v6027_v38 }
 0x8e3   : > { %7628 = vrot.lane.b32.xlu0 %v19406_v17, %s20128_s19  ;;  %v6056_v6 = vsel %vm6042_vm10, %v6027_v38, %v6029_v21 }
 0x8e4   : > { %7332 = vrot.lane.b32.xlu1 %v17324_v41, %s20132_s15  ;;  %10000 = vmatprep.subr.mxu0 %v6056_v6 }
 0x8e5   : > { %10001 = vmatpush1.msra.mxu0 %v6055_v46  ;;  %v6176_v39 = vpop.permute.xlu0 %6175 }
 0x8e6   : > { %v17756_v27 = vpop.permute.xlu1 %6177  ;;  %v6201_v31 = vsel %vm1816_vm6, %v6174_v15, %v6176_v39 }
 0x8e7   : > { %7334 = vrot.lane.b32.xlu0 %v17722_v35, %s20132_s15  ;;  %v6202_v20 = vsel %vm1816_vm6, %v6176_v39, %v17756_v27 }
 0x8e8   : > { %12430 = vrot.lane.b32.xlu1 %v19406_v17, %s20130_s13  ;;  %10075 = vmatprep.subr.mxu1 %v6202_v20 }
 0x8e9   : > { %10076 = vmatpush1.msra.mxu1 %v6201_v31  ;;  %v5882_v22 = vpop.permute.xlu0 %5881 }
 0x8ea   : > { %v5884_v56 = vpop.permute.xlu1 %5883  ;;  %v5910_v44 = vsel %vm5897_vm5, %v17365_v14, %v5882_v22 }
 0x8eb   : > { %7188 = vrot.lane.b32.xlu0 %v17324_v41, %s20135_s14  ;;  %v5911_v28 = vsel %vm5897_vm5, %v5882_v22, %v5884_v56 }
 0x8ec   : > { %7190 = vrot.lane.b32.xlu1 %v17722_v35, %s20135_s14  ;;  %10002 = vmatprep.subr.mxu0 %v5911_v28 }
 0x8ed   : > { %10003 = vmatpush1.msra.mxu0 %v5910_v44  ;;  %v6031_v53 = vpop.permute.xlu0 %6030 }
 0x8ee   : > { %v17772_v3 = vpop.permute.xlu1 %6032  ;;  %v6057_v12 = vsel %vm6042_vm10, %v6029_v21, %v6031_v53 }
 0x8ef   : > { %12435 = vrot.lane.b32.xlu0 %v19406_v17, %s20132_s15  ;;  %v6058_v14 = vsel %vm6042_vm10, %v6031_v53, %v17772_v3 }
 0x8f0   : > { %7044 = vrot.lane.b32.xlu1 %v17324_v41, %s20136_s1  ;;  %10077 = vmatprep.subr.mxu1 %v6058_v14 }
 0x8f1   : > { %10078 = vmatpush1.msra.mxu1 %v6057_v12  ;;  %v5738_v10 = vpop.permute.xlu0 %5737 }
 0x8f2   : > { %v5740_v7 = vpop.permute.xlu1 %5739  ;;  %v5765_v24 = vsel %vm20232_vm9, %v17381_v16, %v5738_v10  ;;  %vm20236_vm9 = vcmask 490496  }
 0x8f3   : > { %7046 = vrot.lane.b32.xlu0 %v17722_v35, %s20136_s1  ;;  %v5766_v58 = vsel %vm20233_vm3, %v5738_v10, %v5740_v7  ;;  %vm20237_vm3 = vmmov %vm20236_vm9 }
 0x8f4   : > { %12440 = vrot.lane.b32.xlu1 %v19406_v17, %s20135_s14  ;;  %10004 = vmatprep.subr.mxu0 %v5766_v58 }
 0x8f5   : > { %10005 = vmatpush1.msra.mxu0 %v5765_v24  ;;  %v5886_v52 = vpop.permute.xlu0 %5885 }
 0x8f6   : > { %v17788_v37 = vpop.permute.xlu1 %5887  ;;  %v5912_v47 = vsel %vm5897_vm5, %v5884_v56, %v5886_v52 }
 0x8f7   : > { %6900 = vrot.lane.b32.xlu0 %v17324_v41, %s20139_s2  ;;  %v5913_v16 = vsel %vm5897_vm5, %v5886_v52, %v17788_v37 }
 0x8f8   : > { %6902 = vrot.lane.b32.xlu1 %v17722_v35, %s20139_s2  ;;  %10079 = vmatprep.subr.mxu1 %v5913_v16 }
 0x8f9   : > { %10080 = vmatpush1.msra.mxu1 %v5912_v47  ;;  %v5594_v34 = vpop.permute.xlu0 %5593 }
 0x8fa   : > { %v5596_v43 = vpop.permute.xlu1 %5595  ;;  %v5621_v29 = vsel %vm656_vm14, %v17392_v54, %v5594_v34 }
 0x8fb   : > { %12445 = vrot.lane.b32.xlu0 %v19406_v17, %s20136_s1  ;;  %v5622_v15 = vsel %vm656_vm14, %v5594_v34, %v5596_v43 }
 0x8fc   : > { %6756 = vrot.lane.b32.xlu1 %v17324_v41, %s20140_s17  ;;  %10006 = vmatprep.subr.mxu0 %v5622_v15 }
 0x8fd   : > { %10007 = vmatpush1.msra.mxu0 %v5621_v29  ;;  %v5742_v50 = vpop.permute.xlu0 %5741 }
 0x8fe   : > { %10008 = vmatprep.subr.mxu0 %v16893_v51  ;;  %v17805_v4 = vpop.permute.xlu1 %5743  ;;  %v5767_v45 = vsel %vm20234_vm8, %v5740_v7, %v5742_v50  ;;  %vm20238_vm8 = vcmask 506880  }
 0x8ff   : > { %10009 = vmatpush1.msra.mxu0 %v16880_v9  ;;  %6758 = vrot.lane.b32.xlu0 %v17722_v35, %s20140_s17  ;;  %v5768_v54 = vsel %vm20235_vm7, %v5742_v50, %v17805_v4  ;;  %vm20239_vm7 = vmmov %vm20238_vm8 }
 0x900   : > { %12450 = vrot.lane.b32.xlu1 %v19406_v17, %s20139_s2  ;;  %10081 = vmatprep.subr.mxu1 %v5768_v54 }
 0x901   : > { %10082 = vmatpush1.msra.mxu1 %v5767_v45  ;;  %v5598_v49 = vpop.permute.xlu0 %5597 }
 0x902   : > { %v17815_v63 = vpop.permute.xlu1 %5599  ;;  %v5623_v51 = vsel %vm656_vm14, %v5596_v43, %v5598_v49 }
 0x903   : > { %6611 = vrot.lane.b32.xlu0 %v17324_v41, %s20143_s11  ;;  %v5624_v9 = vsel %vm656_vm14, %v5598_v49, %v17815_v63 }
 0x904   : > { %6613 = vrot.lane.b32.xlu1 %v17722_v35, %s20143_s11  ;;  %10083 = vmatprep.subr.mxu1 %v5624_v9 }
 0x905   : > { %10084 = vmatpush1.msra.mxu1 %v5623_v51  ;;  %v8919_v38 = vpop.permute.xlu0 %8918 }
 0x906   : > { %10085 = vmatprep.subr.mxu1 %v17289_v57  ;;  %v8921_v21 = vpop.permute.xlu1 %8920  ;;  %v8946_v46 = vsel %vm2541_vm0, %v17417_v19, %v8919_v38 }
 0x907   : > { %10086 = vmatpush1.msra.mxu1 %v17284_v36  ;;  %12455 = vrot.lane.b32.xlu0 %v19406_v17, %s20140_s17  ;;  %v8947_v6 = vsel %vm2541_vm0, %v8919_v38, %v8921_v21  ;;  %s12615_s17 = smov 35  }
 0x908   : > { %6467 = vrot.lane.b32.xlu1 %v17324_v41, %s20146_s18  ;;  %10024 = vmatprep.subr.mxu0 %v8947_v6 }
 0x909   : > { %10025 = vmatpush2.msra.mxu0 %v8946_v46  ;;  %v8774_v39 = vpop.permute.xlu0 %8773 }
 0x90a   : > { %v8776_v31 = vpop.permute.xlu1 %8775  ;;  %v8802_v57 = vsel %vm8789_vm13, %v17433_v0, %v8774_v39 }
 0x90b   : > { %6469 = vrot.lane.b32.xlu0 %v17722_v35, %s20146_s18  ;;  %v8803_v36 = vsel %vm8789_vm13, %v8774_v39, %v8776_v31 }
 0x90c   : > { %12460 = vrot.lane.b32.xlu1 %v19406_v17, %s20143_s11  ;;  %10026 = vmatprep.subr.mxu0 %v8803_v36  ;;  %s12613_s11 = smov 34  }
 0x90d   : > { %10027 = vmatpush2.msra.mxu0 %v8802_v57  ;;  %v8923_v19 = vpop.permute.xlu0 %8922 }
 0x90e   : > { %v17840_v20 = vpop.permute.xlu1 %8924  ;;  %v8948_v22 = vsel %vm2541_vm0, %v8921_v21, %v8923_v19 }
 0x90f   : > { %6323 = vrot.lane.b32.xlu0 %v17324_v41, %s20063_s16  ;;  %v8949_v0 = vsel %vm2541_vm0, %v8923_v19, %v17840_v20 }
 0x910   : > { %6325 = vrot.lane.b32.xlu1 %v17722_v35, %s20063_s16  ;;  %10101 = vmatprep.subr.mxu1 %v8949_v0 }
 0x911   : > { %10102 = vmatpush2.msra.mxu1 %v8948_v22  ;;  %v8629_v56 = vpop.permute.xlu0 %8628 }
 0x912   : > { %v8631_v44 = vpop.permute.xlu1 %8630  ;;  %v8657_v28 = vsel %vm20236_vm9, %v17449_v59, %v8629_v56  ;;  %vm20240_vm9 = vmmov %vm20237_vm3 }
 0x913   : > { %12465 = vrot.lane.b32.xlu0 %v19406_v17, %s20146_s18  ;;  %v8658_v53 = vsel %vm20237_vm3, %v8629_v56, %v8631_v44  ;;  %s12616_s18 = smov 123  }
 0x914   : > { %6179 = vrot.lane.b32.xlu1 %v17324_v41, %s20064_s22  ;;  %10028 = vmatprep.subr.mxu0 %v8658_v53 }
 0x915   : > { %10029 = vmatpush2.msra.mxu0 %v8657_v28  ;;  %v8778_v12 = vpop.permute.xlu0 %8777 }
 0x916   : > { %v17856_v14 = vpop.permute.xlu1 %8779  ;;  %v8804_v10 = vsel %vm8789_vm13, %v8776_v31, %v8778_v12 }
 0x917   : > { %6181 = vrot.lane.b32.xlu0 %v17722_v35, %s20064_s22  ;;  %v8805_v59 = vsel %vm8789_vm13, %v8778_v12, %v17856_v14 }
 0x918   : > { %12470 = vrot.lane.b32.xlu1 %v19406_v17, %s20063_s16  ;;  %10103 = vmatprep.subr.mxu1 %v8805_v59 }
 0x919   : > { %10104 = vmatpush2.msra.mxu1 %v8804_v10  ;;  %v8484_v7 = vpop.permute.xlu0 %8483 }
 0x91a   : > { %v8486_v24 = vpop.permute.xlu1 %8485  ;;  %v8512_v58 = vsel %vm20238_vm8, %v17467_v11, %v8484_v7  ;;  %vm20241_vm8 = vcmask 523264  }
 0x91b   : > { %6034 = vrot.lane.b32.xlu0 %v17324_v41, %s20097_s23  ;;  %v8513_v52 = vsel %vm20239_vm7, %v8484_v7, %v8486_v24  ;;  %vm20242_vm7 = vmmov %vm20241_vm8 }
 0x91c   : > { %6036 = vrot.lane.b32.xlu1 %v17722_v35, %s20097_s23  ;;  %10030 = vmatprep.subr.mxu0 %v8513_v52 }
 0x91d   : > { %10031 = vmatpush2.msra.mxu0 %v8512_v58  ;;  %v8633_v47 = vpop.permute.xlu0 %8632 }
 0x91e   : > { %v17872_v16 = vpop.permute.xlu1 %8634  ;;  %v8659_v34 = vsel %vm20240_vm9, %v8631_v44, %v8633_v47  ;;  %vm20243_vm9 = vcmask 506880  }
 0x91f   : > { %12475 = vrot.lane.b32.xlu0 %v19406_v17, %s20064_s22  ;;  %v8660_v11 = vsel %vm20237_vm3, %v8633_v47, %v17872_v16  ;;  %vm20244_vm3 = vmmov %vm20243_vm9 }
 0x920   : > { %5889 = vrot.lane.b32.xlu1 %v17324_v41, %s20099_s27  ;;  %10105 = vmatprep.subr.mxu1 %v8660_v11 }
 0x921   : > { %10106 = vmatpush2.msra.mxu1 %v8659_v34  ;;  %v8339_v43 = vpop.permute.xlu0 %8338 }
 0x922   : > { %v8341_v29 = vpop.permute.xlu1 %8340  ;;  %v8367_v15 = vsel %vm20241_vm8, %v17483_v48, %v8339_v43  ;;  %vm20245_vm8 = vcmask 850944  }
 0x923   : > { %5891 = vrot.lane.b32.xlu0 %v17722_v35, %s20099_s27  ;;  %v8368_v50 = vsel %vm20242_vm7, %v8339_v43, %v8341_v29  ;;  %vm20246_vm7 = vmmov %vm20245_vm8 }
 0x924   : > { %12480 = vrot.lane.b32.xlu1 %v19406_v17, %s20097_s23  ;;  %10032 = vmatprep.subr.mxu0 %v8368_v50 }
 0x925   : > { %10033 = vmatpush2.msra.mxu0 %v8367_v15  ;;  %v8488_v45 = vpop.permute.xlu0 %8487 }
 0x926   : > { %v17888_v54 = vpop.permute.xlu1 %8489  ;;  %v8514_v49 = vsel %vm20243_vm9, %v8486_v24, %v8488_v45  ;;  %vm20247_vm9 = vcmask 523264  }
 0x927   : > { %5745 = vrot.lane.b32.xlu0 %v17324_v41, %s20065_s28  ;;  %v8515_v48 = vsel %vm20244_vm3, %v8488_v45, %v17888_v54  ;;  %vm20248_vm3 = vmmov %vm20247_vm9  ;;  %v12553_v45 = vld [vmem:[%s19112_s3 + $0x8] sm:$0xff] }
 0x928   : > { %5747 = vrot.lane.b32.xlu1 %v17722_v35, %s20065_s28  ;;  %10107 = vmatprep.subr.mxu1 %v8515_v48 }
 0x929   : > { %10108 = vmatpush2.msra.mxu1 %v8514_v49  ;;  %v8195_v51 = vpop.permute.xlu0 %8194 }
 0x92a   : > { %v8197_v9 = vpop.permute.xlu1 %8196  ;;  %v8222_v38 = vsel %vm20245_vm8, %v17499_v8, %v8195_v51  ;;  %vm20249_vm8 = vmmov %vm20246_vm7 }
 0x92b   : > { %12485 = vrot.lane.b32.xlu0 %v19406_v17, %s20099_s27  ;;  %v8223_v21 = vsel %vm20246_vm7, %v8195_v51, %v8197_v9 }
 0x92c   : > { %5601 = vrot.lane.b32.xlu1 %v17324_v41, %s20066_s30  ;;  %10034 = vmatprep.subr.mxu0 %v8223_v21 }
 0x92d   : > { %10035 = vmatpush2.msra.mxu0 %v8222_v38  ;;  %v8343_v46 = vpop.permute.xlu0 %8342 }
 0x92e   : > { %v17904_v6 = vpop.permute.xlu1 %8344  ;;  %v8369_v39 = vsel %vm20247_vm9, %v8341_v29, %v8343_v46  ;;  %vm20250_vm9 = vcmask 916480  }
 0x92f   : > { %5603 = vrot.lane.b32.xlu0 %v17722_v35, %s20066_s30  ;;  %v8370_v8 = vsel %vm20248_vm3, %v8343_v46, %v17904_v6  ;;  %vm20251_vm3 = vmmov %vm20250_vm9 }
 0x930   : > { %12490 = vrot.lane.b32.xlu1 %v19406_v17, %s20065_s28  ;;  %10109 = vmatprep.subr.mxu1 %v8370_v8  ;;  %v17988_v8 = vpop.f32.mrf.mxu0 }
 0x931   : > { %10110 = vmatpush2.msra.mxu1 %v8369_v39  ;;  %v8050_v31 = vpop.permute.xlu0 %8049 }
 0x932   : > { %v8052_v57 = vpop.permute.xlu1 %8051  ;;  %v8078_v36 = vsel %vm8065_vm11, %v17515_v13, %v8050_v31 }
 0x933   : > { %12495 = vrot.lane.b32.xlu0 %v19406_v17, %s20066_s30  ;;  %v8079_v19 = vsel %vm8065_vm11, %v8050_v31, %v8052_v57 }
 0x934   : > { %8926 = vrot.lane.b32.xlu1 %v17722_v35, %s20100_s20  ;;  %10036 = vmatprep.subr.mxu0 %v8079_v19 }
 0x935   : > { %10037 = vmatpush2.msra.mxu0 %v8078_v36  ;;  %v8199_v22 = vpop.permute.xlu0 %8198 }
 0x936   : > { %v17920_v0 = vpop.permute.xlu1 %8200  ;;  %v8224_v56 = vsel %vm20249_vm8, %v8197_v9, %v8199_v22  ;;  %vm20252_vm8 = vcmask 195584  }
 0x937   : > { %12500 = vrot.lane.b32.xlu0 %v19406_v17, %s20100_s20  ;;  %v8225_v13 = vsel %vm20246_vm7, %v8199_v22, %v17920_v0  ;;  %vm20253_vm7 = vmmov %vm20252_vm8 }
 0x938   : > { %8781 = vrot.lane.b32.xlu1 %v17722_v35, %s20101_s26  ;;  %10111 = vmatprep.subr.mxu1 %v8225_v13 }
 0x939   : > { %10112 = vmatpush2.msra.mxu1 %v8224_v56  ;;  %v7905_v44 = vpop.permute.xlu0 %7904 }
 0x93a   : > { %v7907_v28 = vpop.permute.xlu1 %7906  ;;  %v7933_v53 = vsel %vm7920_vm15, %v17531_v5, %v7905_v44 }
 0x93b   : > { %12505 = vrot.lane.b32.xlu0 %v19406_v17, %s20101_s26  ;;  %v7934_v12 = vsel %vm7920_vm15, %v7905_v44, %v7907_v28 }
 0x93c   : > { %8932 = vrot.lane.b32.xlu1 %v19406_v17, %s20100_s20  ;;  %10038 = vmatprep.subr.mxu0 %v7934_v12 }
 0x93d   : > { %10039 = vmatpush2.msra.mxu0 %v7933_v53  ;;  %v8054_v10 = vpop.permute.xlu0 %8053 }
 0x93e   : > { %v17936_v59 = vpop.permute.xlu1 %8055  ;;  %v8080_v7 = vsel %vm8065_vm11, %v8052_v57, %v8054_v10 }
 0x93f   : > { %8636 = vrot.lane.b32.xlu0 %v17722_v35, %s20102_s25  ;;  %v8081_v5 = vsel %vm8065_vm11, %v8054_v10, %v17936_v59 }
 0x940   : > { %12510 = vrot.lane.b32.xlu1 %v19406_v17, %s20102_s25  ;;  %10113 = vmatprep.subr.mxu1 %v8081_v5 }
 0x941   : > { %10114 = vmatpush2.msra.mxu1 %v8080_v7  ;;  %v7760_v24 = vpop.permute.xlu0 %7759 }
 0x942   : > { %v7762_v58 = vpop.permute.xlu1 %7761  ;;  %v7788_v52 = vsel %vm7775_vm4, %v17568_v60, %v7760_v24 }
 0x943   : > { %8787 = vrot.lane.b32.xlu0 %v19406_v17, %s20101_s26  ;;  %v7789_v47 = vsel %vm7775_vm4, %v7760_v24, %v7762_v58 }
 0x944   : > { %8491 = vrot.lane.b32.xlu1 %v17722_v35, %s20105_s12  ;;  %10040 = vmatprep.subr.mxu0 %v7789_v47 }
 0x945   : > { %10041 = vmatpush2.msra.mxu0 %v7788_v52  ;;  %v7909_v34 = vpop.permute.xlu0 %7908 }
 0x946   : > { %10043 = vmatmul.mubr.f32.vlgmr.msra.gmra.mxu0 %v17537_v61  ;;  %v17953_v11 = vpop.permute.xlu1 %7910  ;;  %v7935_v43 = vsel %vm7920_vm15, %v7907_v28, %v7909_v34 }
 0x947   : > { %12515 = vrot.lane.b32.xlu0 %v19406_v17, %s20105_s12  ;;  %v7936_v60 = vsel %vm7920_vm15, %v7909_v34, %v17953_v11  ;;  %12190 = vmatprep.mubr.msk.f32.mxu0 %vm4415_vm1, %v17547_v26 }
 0x948   : > { %8642 = vrot.lane.b32.xlu1 %v19406_v17, %s20102_s25  ;;  %10115 = vmatprep.subr.mxu1 %v7936_v60 }
 0x949   : > { %10116 = vmatpush2.msra.mxu1 %v7935_v43  ;;  %v7623_v29 = vpop.permute.xlu0 %7622 }
 0x94a   : > { %10049 = vmatmul.mubr.f32.gmra.mxu0 %v17558_v40  ;;  %v12426_v15 = vpop.permute.xlu1 %12425  ;;  %v7647_v9 = vsel %vm20251_vm3, %v17587_v42, %v7623_v29 }
 0x94b   : > { %v12427_v50 = vunpack.i.l.bf16 %v12426_v15  ;;  %8346 = vrot.lane.b32.xlu0 %v17722_v35, %s20113_s21  ;;  %12193 = vmatprep.mubr.msk.f32.mxu0 %vm4415_vm1, %v12553_v45  ;;  %v12428_v31 = vunpack.i.h.bf16 %v12426_v15 }
 0x94c   : > { %12520 = vrot.lane.b32.xlu1 %v19406_v17, %s20113_s21 }
 0x94d   : > { %v7764_v49 = vpop.permute.xlu0 %7763  ;;  %v7648_v48 = vsel %vm20250_vm9, %v7623_v29, %v12427_v50  ;;  %vm20254_vm9 = vmmov %vm20251_vm3  ;;  %v7649_v22 = vsel %vm20251_vm3, %v12427_v50, %v12428_v31 }
 0x94e   : > { %v17974_v51 = vpop.permute.xlu1 %7765  ;;  %10132 = vmatprep.subr.mxu0 %v7648_v48  ;;  %v7790_v38 = vsel %vm7775_vm4, %v7762_v58, %v7764_v49 }
 0x94f   : > { %10133 = vmatpush1.msra.mxu0 %v7647_v9  ;;  %8497 = vrot.lane.b32.xlu0 %v19406_v17, %s20105_s12  ;;  %v7791_v21 = vsel %vm7775_vm4, %v7764_v49, %v17974_v51 }
 0x950   : > { %8202 = vrot.lane.b32.xlu1 %v17722_v35, %s20110_s29  ;;  %10117 = vmatprep.subr.mxu1 %v7791_v21 }
 0x951   : > { %10118 = vmatpush2.msra.mxu1 %v7790_v38  ;;  %v7478_v46 = vpop.permute.xlu0 %7477 }
 0x952   : > { %10120 = vmatmul.mubr.f32.vlgmr.msra.gmra.mxu1 %v17537_v61  ;;  %v7480_v39 = vpop.permute.xlu1 %7479  ;;  %v7502_v42 = vsel %vm20252_vm8, %v17606_v25, %v7478_v46  ;;  %v17997_v61 = vpop.f32.mrf.mxu0  ;;  %vm20255_vm8 = vcmask 211968  }
 0x953   : > { %12525 = vrot.lane.b32.xlu0 %v19406_v17, %s20110_s29  ;;  %v7503_v57 = vsel %vm20253_vm7, %v7478_v46, %v7480_v39  ;;  %12192 = vmatprep.mubr.msk.f32.mxu1 %vm4415_vm1, %v17547_v26  ;;  %vm20256_vm7 = vmmov %vm20255_vm8 }
 0x954   : > { %8352 = vrot.lane.b32.xlu1 %v19406_v17, %s20113_s21  ;;  %10134 = vmatprep.subr.mxu0 %v7503_v57  ;;  %v18004_v26 = vpop.f32.mrf.mxu0 }
 0x955   : > { %10135 = vmatpush1.msra.mxu0 %v7502_v42  ;;  %v7629_v36 = vpop.permute.xlu0 %7628 }
 0x956   : > { %10126 = vmatmul.mubr.f32.gmra.mxu1 %v17558_v40  ;;  %v7333_v25 = vpop.permute.xlu1 %7332  ;;  %v7650_v19 = vsel %vm20254_vm9, %v12428_v31, %v7629_v36  ;;  %v18008_v13 = vpop.f32.mrf.mxu0  ;;  %vm20257_vm9 = vcmask 195584   ;;  %v9499_v31 = vld [vmem:[%s19113_s4 + $0x8] sm:$0xff] }
 0x957   : > { %8057 = vrot.lane.b32.xlu0 %v17722_v35, %s20122_s24  ;;  %10209 = vmatprep.subr.mxu1 %v7650_v19  ;;  %v7357_v12 = vsel %vm20256_vm7, %v17622_v33, %v7333_v25  ;;  %vm20258_vm3 = vmmov %vm20257_vm9 }
 0x958   : > { %12530 = vrot.lane.b32.xlu1 %v19406_v17, %s20122_s24  ;;  %10210 = vmatpush1.msra.mxu1 %v7649_v22  ;;  %v9736_v10 = vpop.f32.mrf.mxu0  ;;  %v9498_v22 = vld [vmem:[%s19113_s4] sm:$0xff] }
 0x959   : > { %v7335_v56 = vpop.permute.xlu0 %7334  ;;  %12195 = vmatprep.mubr.msk.f32.mxu1 %vm4415_vm1, %v12553_v45 }
 0x95a   : > { %v12431_v40 = vpop.permute.xlu1 %12430  ;;  %v7358_v44 = vsel %vm20255_vm8, %v7333_v25, %v7335_v56  ;;  %v18020_v58 = vpop.f32.mrf.mxu0  ;;  %vm20259_vm8 = vcmask 228352  }
 0x95b   : > { %v12433_v28 = vunpack.i.h.bf16 %v12431_v40  ;;  %v12432_v53 = vunpack.i.l.bf16 %v12431_v40  ;;  %8208 = vrot.lane.b32.xlu0 %v19406_v17, %s20110_s29  ;;  %10136 = vmatprep.subr.mxu0 %v7358_v44  ;;  %vm20260_vm7 = vmmov %vm20259_vm8  ;;  %s12617_s29 = smov 1  }
 0x95c   : > { %7912 = vrot.lane.b32.xlu1 %v17722_v35, %s20180_s7  ;;  %10137 = vmatpush1.msra.mxu0 %v7357_v12  ;;  %v9742_v34 = vpop.f32.mrf.mxu0 }
 0x95d   : > { %v7189_v7 = vpop.permute.xlu0 %7188  ;;  %v7505_v5 = vsel %vm20257_vm9, %v12432_v53, %v12433_v28  ;;  %v7504_v24 = vsel %vm20258_vm3, %v7480_v39, %v12432_v53  ;;  %vm20261_vm9 = vcmask 211968  }
 0x95e   : > { %v7191_v52 = vpop.permute.xlu1 %7190  ;;  %10211 = vmatprep.subr.mxu1 %v7505_v5  ;;  %v7212_v47 = vsel %vm20259_vm8, %v17638_v2, %v7189_v7  ;;  %v18029_v60 = vpop.f32.mrf.mxu0  ;;  %vm20262_vm3 = vmmov %vm20261_vm9  ;;  %vm20263_vm8 = vcmask 244736  }
 0x95f   : > { %10212 = vmatpush1.msra.mxu1 %v7504_v24  ;;  %12535 = vrot.lane.b32.xlu0 %v19406_v17, %s20180_s7  ;;  %v7213_v33 = vsel %vm20260_vm7, %v7189_v7, %v7191_v52  ;;  %vm20264_vm7 = vmmov %vm20263_vm8 }
 0x960   : > { %8063 = vrot.lane.b32.xlu1 %v19406_v17, %s20122_s24  ;;  %10138 = vmatprep.subr.mxu0 %v7213_v33  ;;  %v18033_v2 = vpop.f32.mrf.mxu0  ;;  %s20303_s24 = sld [smem:[#allocation231_spill]] }
 0x961   : > { %10139 = vmatpush1.msra.mxu0 %v7212_v47  ;;  %v12436_v43 = vpop.permute.xlu0 %12435 }
 0x962   : > { %v12438_v29 = vunpack.i.h.bf16 %v12436_v43  ;;  %v12437_v15 = vunpack.i.l.bf16 %v12436_v43  ;;  %v7045_v50 = vpop.permute.xlu1 %7044  ;;  %v9892_v9 = vpop.f32.mrf.mxu0 }
 0x963   : > { %7767 = vrot.lane.b32.xlu0 %v17722_v35, %s20125_s0  ;;  %v7068_v42 = vsel %vm20264_vm7, %v17654_v1, %v7045_v50 }
 0x964   : > { %12540 = vrot.lane.b32.xlu1 %v19406_v17, %s20125_s0  ;;  %v7360_v45 = vsel %vm20261_vm9, %v12437_v15, %v12438_v29  ;;  %v7359_v49 = vsel %vm20262_vm3, %v7335_v56, %v12437_v15  ;;  %v18049_v57 = vpop.f32.mrf.mxu0  ;;  %vm20265_vm9 = vcmask 228352  }
 0x965   : > { %v7047_v48 = vpop.permute.xlu0 %7046  ;;  %10213 = vmatprep.subr.mxu1 %v7360_v45  ;;  %vm20266_vm3 = vmmov %vm20265_vm9 }
 0x966   : > { %v12441_v38 = vpop.permute.xlu1 %12440  ;;  %10214 = vmatpush1.msra.mxu1 %v7359_v49  ;;  %v7069_v21 = vsel %vm20263_vm8, %v7045_v50, %v7047_v48  ;;  %vm20267_vm8 = vcmask 261120   ;;  %v9898_v40 = vpop.f32.mrf.mxu0 }
 0x967   : > { %v12443_v46 = vunpack.i.h.bf16 %v12441_v38  ;;  %v12442_v39 = vunpack.i.l.bf16 %v12441_v38  ;;  %7918 = vrot.lane.b32.xlu0 %v19406_v17, %s20180_s7  ;;  %10140 = vmatprep.subr.mxu0 %v7069_v21  ;;  %vm20268_vm7 = vmmov %vm20267_vm8 }
 0x968   : > { %7773 = vrot.lane.b32.xlu1 %v19406_v17, %s20125_s0  ;;  %10141 = vmatpush1.msra.mxu0 %v7068_v42 }
 0x969   : > { %v6901_v36 = vpop.permute.xlu0 %6900  ;;  %v7215_v25 = vsel %vm20265_vm9, %v12442_v39, %v12443_v46  ;;  %v7214_v19 = vsel %vm20266_vm3, %v7191_v52, %v12442_v39  ;;  %vm20269_vm9 = vcmask 244736  }
 0x96a   : > { %v6903_v1 = vpop.permute.xlu1 %6902  ;;  %10215 = vmatprep.subr.mxu1 %v7215_v25  ;;  %v6924_v56 = vsel %vm20267_vm8, %v17670_v62, %v6901_v36  ;;  %vm20270_vm3 = vmmov %vm20269_vm9 }
 0x96b   : > { %10216 = vmatpush1.msra.mxu1 %v7214_v19  ;;  %9507 = vperm.xlu0 %12423, %v9499_v31   ;;  %v6925_v44 = vsel %vm20268_vm7, %v6901_v36, %v6903_v1  ;;  %vm20271_vm8 = vmmov %vm20268_vm7 }
 0x96c   : > { %9502 = vperm.xlu1 %12544, %v9498_v22   ;;  %10142 = vmatprep.subr.mxu0 %v6925_v44 }
 0x96d   : > { %10143 = vmatpush1.msra.mxu0 %v6924_v56  ;;  %v12446_v28 = vpop.permute.xlu0 %12445 }
 0x96e   : > { %v12448_v53 = vunpack.i.h.bf16 %v12446_v28  ;;  %v12447_v12 = vunpack.i.l.bf16 %v12446_v28  ;;  %v6757_v10 = vpop.permute.xlu1 %6756 }
 0x96f   : > { %v6780_v34 = vsel %vm4415_vm1, %v17686_v18, %v6757_v10 }
 0x970   : > { %v7071_v7 = vsel %vm20269_vm9, %v12447_v12, %v12448_v53  ;;  %v7070_v5 = vsel %vm20270_vm3, %v7047_v48, %v12447_v12  ;;  %vm20272_vm9 = vcmask 637952  }
 0x971   : > { %v6759_v24 = vpop.permute.xlu0 %6758  ;;  %10217 = vmatprep.subr.mxu1 %v7071_v7  ;;  %vm20273_vm3 = vmmov %vm20272_vm9 }
 0x972   : > { %v12451_v52 = vpop.permute.xlu1 %12450  ;;  %10218 = vmatpush1.msra.mxu1 %v7070_v5  ;;  %v6781_v62 = vsel %vm4415_vm1, %v6757_v10, %v6759_v24 }
 0x973   : > { %v12453_v47 = vunpack.i.h.bf16 %v12451_v52  ;;  %v12452_v33 = vunpack.i.l.bf16 %v12451_v52  ;;  %10144 = vmatprep.subr.mxu0 %v6781_v62 }
 0x974   : > { %10145 = vmatpush1.msra.mxu0 %v6780_v34 }
 0x975   : > { %v6612_v43 = vpop.permute.xlu0 %6611  ;;  %v6927_v29 = vsel %vm20271_vm8, %v12452_v33, %v12453_v47  ;;  %v6926_v15 = vsel %vm20268_vm7, %v6903_v1, %v12452_v33  ;;  %vm20275_vm8 = vmmov %vm20273_vm3 }
 0x976   : > { %v6614_v50 = vpop.permute.xlu1 %6613  ;;  %10219 = vmatprep.subr.mxu1 %v6927_v29  ;;  %v6636_v45 = vsel %vm6619_vm12, %v17702_v30, %v6612_v43 }
 0x977   : > { %10220 = vmatpush1.msra.mxu1 %v6926_v15  ;;  %v6637_v49 = vsel %vm6619_vm12, %v6612_v43, %v6614_v50 }
 0x978   : > { %10146 = vmatprep.subr.mxu0 %v6637_v49 }
 0x979   : > { %10147 = vmatpush1.msra.mxu0 %v6636_v45  ;;  %v12456_v48 = vpop.permute.xlu0 %12455 }
 0x97a   : > { %v12458_v9 = vunpack.i.h.bf16 %v12456_v48  ;;  %v12457_v38 = vunpack.i.l.bf16 %v12456_v48  ;;  %v6468_v18 = vpop.permute.xlu1 %6467 }
 0x97b   : > { %v6491_v25 = vsel %vm2396_vm2, %v17724_v55, %v6468_v18 }
 0x97c   : > { %v6783_v21 = vsel %vm4415_vm1, %v12457_v38, %v12458_v9  ;;  %v6782_v46 = vsel %vm4415_vm1, %v6759_v24, %v12457_v38 }
 0x97d   : > { %v6470_v39 = vpop.permute.xlu0 %6469  ;;  %10221 = vmatprep.subr.mxu1 %v6783_v21 }
 0x97e   : > { %v12461_v42 = vpop.permute.xlu1 %12460  ;;  %10222 = vmatpush1.msra.mxu1 %v6782_v46  ;;  %v6492_v31 = vsel %vm2396_vm2, %v6468_v18, %v6470_v39 }
 0x97f   : > { %v12463_v30 = vunpack.i.h.bf16 %v12461_v42  ;;  %v12462_v36 = vunpack.i.l.bf16 %v12461_v42  ;;  %10148 = vmatprep.subr.mxu0 %v6492_v31 }
 0x980   : > { %10149 = vmatpush1.msra.mxu0 %v6491_v25 }
 0x981   : > { %v6324_v19 = vpop.permute.xlu0 %6323  ;;  %v6639_v22 = vsel %vm6619_vm12, %v12462_v36, %v12463_v30  ;;  %v6638_v1 = vsel %vm6619_vm12, %v6614_v50, %v12462_v36  ;;  %vm20274_vm12 = vmmov %vm20273_vm3 }
 0x982   : > { %v6326_v56 = vpop.permute.xlu1 %6325  ;;  %10223 = vmatprep.subr.mxu1 %v6639_v22  ;;  %v6347_v40 = vsel %vm20272_vm9, %v17740_v32, %v6324_v19 }
 0x983   : > { %10224 = vmatpush1.msra.mxu1 %v6638_v1  ;;  %v6348_v44 = vsel %vm20273_vm3, %v6324_v19, %v6326_v56 }
 0x984   : > { %10150 = vmatprep.subr.mxu0 %v6348_v44 }
 0x985   : > { %10151 = vmatpush1.msra.mxu0 %v6347_v40  ;;  %v12466_v28 = vpop.permute.xlu0 %12465 }
 0x986   : > { %v12468_v53 = vunpack.i.h.bf16 %v12466_v28  ;;  %v12467_v12 = vunpack.i.l.bf16 %v12466_v28  ;;  %v6180_v55 = vpop.permute.xlu1 %6179 }
 0x987   : > { %v6203_v47 = vsel %vm1816_vm6, %v17756_v27, %v6180_v55 }
 0x988   : > { %v6494_v10 = vsel %vm2396_vm2, %v12467_v12, %v12468_v53  ;;  %v6493_v7 = vsel %vm2396_vm2, %v6470_v39, %v12467_v12  ;;  %vm20276_vm2 = vcmask 1014784  }
 0x989   : > { %v6182_v5 = vpop.permute.xlu0 %6181  ;;  %10225 = vmatprep.subr.mxu1 %v6494_v10  ;;  %vm20277_vm7 = vmmov %vm20276_vm2 }
 0x98a   : > { %v12471_v24 = vpop.permute.xlu1 %12470  ;;  %10226 = vmatpush1.msra.mxu1 %v6493_v7  ;;  %v6204_v52 = vsel %vm1816_vm6, %v6180_v55, %v6182_v5  ;;  %vm20278_vm9 = vmmov %vm20276_vm2 }
 0x98b   : > { %v12473_v32 = vunpack.i.h.bf16 %v12471_v24  ;;  %v12472_v62 = vunpack.i.l.bf16 %v12471_v24  ;;  %10152 = vmatprep.subr.mxu0 %v6204_v52  ;;  %vm20279_vm3 = vmmov %vm20276_vm2 }
 0x98c   : > { %10153 = vmatpush1.msra.mxu0 %v6203_v47 }
 0x98d   : > { %v6035_v33 = vpop.permute.xlu0 %6034  ;;  %v6350_v34 = vsel %vm20274_vm12, %v12472_v62, %v12473_v32  ;;  %v6349_v43 = vsel %vm20275_vm8, %v6326_v56, %v12472_v62 }
 0x98e   : > { %v6037_v29 = vpop.permute.xlu1 %6036  ;;  %10227 = vmatprep.subr.mxu1 %v6350_v34  ;;  %v6059_v15 = vsel %vm6042_vm10, %v17772_v3, %v6035_v33 }
 0x98f   : > { %10228 = vmatpush1.msra.mxu1 %v6349_v43  ;;  %v6060_v50 = vsel %vm6042_vm10, %v6035_v33, %v6037_v29 }
 0x990   : > { %10154 = vmatprep.subr.mxu0 %v6060_v50 }
 0x991   : > { %10155 = vmatpush1.msra.mxu0 %v6059_v15  ;;  %v12476_v45 = vpop.permute.xlu0 %12475 }
 0x992   : > { %v12478_v49 = vunpack.i.h.bf16 %v12476_v45  ;;  %v12477_v48 = vunpack.i.l.bf16 %v12476_v45  ;;  %v5890_v27 = vpop.permute.xlu1 %5889 }
 0x993   : > { %v5914_v42 = vsel %vm5897_vm5, %v17788_v37, %v5890_v27 }
 0x994   : > { %v6206_v9 = vsel %vm1816_vm6, %v12477_v48, %v12478_v49  ;;  %v6205_v38 = vsel %vm1816_vm6, %v6182_v5, %v12477_v48 }
 0x995   : > { %v5892_v18 = vpop.permute.xlu0 %5891  ;;  %10229 = vmatprep.subr.mxu1 %v6206_v9 }
 0x996   : > { %v12481_v21 = vpop.permute.xlu1 %12480  ;;  %10230 = vmatpush1.msra.mxu1 %v6205_v38  ;;  %v5915_v46 = vsel %vm5897_vm5, %v5890_v27, %v5892_v18 }
 0x997   : > { %v12483_v3 = vunpack.i.h.bf16 %v12481_v21  ;;  %v12482_v39 = vunpack.i.l.bf16 %v12481_v21  ;;  %10156 = vmatprep.subr.mxu0 %v5915_v46 }
 0x998   : > { %10157 = vmatpush1.msra.mxu0 %v5914_v42 }
 0x999   : > { %v5746_v31 = vpop.permute.xlu0 %5745  ;;  %v6062_v30 = vsel %vm6042_vm10, %v12482_v39, %v12483_v3  ;;  %v6061_v36 = vsel %vm6042_vm10, %v6037_v29, %v12482_v39 }
 0x99a   : > { %v5748_v25 = vpop.permute.xlu1 %5747  ;;  %10231 = vmatprep.subr.mxu1 %v6062_v30  ;;  %v5769_v19 = vsel %vm20276_vm2, %v17805_v4, %v5746_v31  ;;  %vm20284_vm2 = vcmask 506880  }
 0x99b   : > { %10232 = vmatpush1.msra.mxu1 %v6061_v36  ;;  %v5770_v22 = vsel %vm20277_vm7, %v5746_v31, %v5748_v25  ;;  %vm20285_vm7 = vmmov %vm20284_vm2 }
 0x99c   : > { %10158 = vmatprep.subr.mxu0 %v5770_v22 }
 0x99d   : > { %10159 = vmatpush1.msra.mxu0 %v5769_v19  ;;  %v12486_v1 = vpop.permute.xlu0 %12485 }
 0x99e   : > { %v12488_v56 = vunpack.i.h.bf16 %v12486_v1  ;;  %v12487_v40 = vunpack.i.l.bf16 %v12486_v1  ;;  %v5602_v37 = vpop.permute.xlu1 %5601 }
 0x99f   : > { %v5625_v7 = vsel %vm656_vm14, %v17815_v63, %v5602_v37 }
 0x9a0   : > { %v5917_v44 = vsel %vm5897_vm5, %v12487_v40, %v12488_v56  ;;  %v5916_v28 = vsel %vm5897_vm5, %v5892_v18, %v12487_v40  ;;  %vm20280_vm5 = vcmask 490496  }
 0x9a1   : > { %v5604_v53 = vpop.permute.xlu0 %5603  ;;  %10233 = vmatprep.subr.mxu1 %v5917_v44  ;;  %vm20281_vm12 = vmmov %vm20280_vm5 }
 0x9a2   : > { %v12491_v12 = vpop.permute.xlu1 %12490  ;;  %10234 = vmatpush1.msra.mxu1 %v5916_v28  ;;  %v5626_v55 = vsel %vm656_vm14, %v5602_v37, %v5604_v53 }
 0x9a3   : > { %v12493_v4 = vunpack.i.h.bf16 %v12491_v12  ;;  %v12492_v10 = vunpack.i.l.bf16 %v12491_v12  ;;  %10160 = vmatprep.subr.mxu0 %v5626_v55 }
 0x9a4   : > { %10161 = vmatpush1.msra.mxu0 %v5625_v7 }
 0x9a5   : > { %v12496_v5 = vpop.permute.xlu0 %12495  ;;  %10162 = vmatprep.subr.mxu0 %v17324_v41  ;;  %v5772_v24 = vsel %vm20278_vm9, %v12492_v10, %v12493_v4  ;;  %v5771_v52 = vsel %vm20279_vm3, %v5748_v25, %v12492_v10  ;;  %vm20288_vm3 = vmmov %vm20284_vm2 }
 0x9a6   : > { %v12498_v32 = vunpack.i.h.bf16 %v12496_v5  ;;  %v12497_v62 = vunpack.i.l.bf16 %v12496_v5  ;;  %v8927_v47 = vpop.permute.xlu1 %8926  ;;  %10235 = vmatprep.subr.mxu1 %v5772_v24  ;;  %10163 = vmatpush1.msra.mxu0 %v17321_v23 }
 0x9a7   : > { %10236 = vmatpush1.msra.mxu1 %v5771_v52  ;;  %v8950_v23 = vsel %vm2541_vm0, %v17840_v20, %v8927_v47 }
 0x9a8   : > { %v5628_v33 = vsel %vm656_vm14, %v12497_v62, %v12498_v32  ;;  %v5627_v34 = vsel %vm656_vm14, %v5604_v53, %v12497_v62  ;;  %v18135_v32 = vpop.f32.mrf.mxu1 }
 0x9a9   : > { %v12501_v63 = vpop.permute.xlu0 %12500  ;;  %10237 = vmatprep.subr.mxu1 %v5628_v33 }
 0x9aa   : > { %v12502_v43 = vunpack.i.l.bf16 %v12501_v63  ;;  %v8782_v29 = vpop.permute.xlu1 %8781  ;;  %10238 = vmatpush1.msra.mxu1 %v5627_v34  ;;  %v12503_v41 = vunpack.i.h.bf16 %v12501_v63 }
 0x9ab   : > { %10239 = vmatprep.subr.mxu1 %v19406_v17 }
 0x9ac   : > { %10240 = vmatpush1.msra.mxu1 %v17722_v35  ;;  %v8951_v15 = vsel %vm2541_vm0, %v8927_v47, %v12502_v43  ;;  %v8952_v27 = vsel %vm2541_vm0, %v12502_v43, %v12503_v41  ;;  %v8806_v35 = vsel %vm8789_vm13, %v17856_v14, %v8782_v29  ;;  %v18142_v43 = vpop.f32.mrf.mxu1 }
 0x9ad   : > { %v12506_v50 = vpop.permute.xlu0 %12505  ;;  %10178 = vmatprep.subr.mxu0 %v8951_v15 }
 0x9ae   : > { %v12507_v45 = vunpack.i.l.bf16 %v12506_v50  ;;  %v8933_v49 = vpop.permute.xlu1 %8932  ;;  %10179 = vmatpush2.msra.mxu0 %v8950_v23  ;;  %v12508_v21 = vunpack.i.h.bf16 %v12506_v50 }
 0x9af   : > { %v8953_v48 = vsel %vm2541_vm0, %v12503_v41, %v8933_v49  ;;  %vm20282_vm0 = vmmov %vm20280_vm5 }
 0x9b0   : > { %10255 = vmatprep.subr.mxu1 %v8953_v48  ;;  %v8807_v9 = vsel %vm8789_vm13, %v8782_v29, %v12507_v45  ;;  %v8808_v30 = vsel %vm8789_vm13, %v12507_v45, %v12508_v21  ;;  %vm20283_vm8 = vmmov %vm20282_vm0  ;;  %v9665_v48 = vpop.f32.mrf.mxu1 }
 0x9b1   : > { %10256 = vmatpush2.msra.mxu1 %v8952_v27  ;;  %v8637_v38 = vpop.permute.xlu0 %8636  ;;  %10180 = vmatprep.subr.mxu0 %v8807_v9 }
 0x9b2   : > { %v12511_v18 = vpop.permute.xlu1 %12510  ;;  %10181 = vmatpush2.msra.mxu0 %v8806_v35  ;;  %v8661_v42 = vsel %vm20281_vm12, %v17872_v16, %v8637_v38 }
 0x9b3   : > { %v12512_v20 = vunpack.i.l.bf16 %v12511_v18  ;;  %v12513_v36 = vunpack.i.h.bf16 %v12511_v18  ;;  %v9667_v18 = vpop.f32.mrf.mxu1 }
 0x9b5   : > { %v8788_v46 = vpop.permute.xlu0 %8787  ;;  %v8662_v3 = vsel %vm20280_vm5, %v8637_v38, %v12512_v20  ;;  %v8663_v1 = vsel %vm20283_vm8, %v12512_v20, %v12513_v36  ;;  %vm20289_vm5 = vmmov %vm20284_vm2  ;;  %vm20292_vm8 = vcmask 850944  }
 0x9b6   : > { %v8492_v39 = vpop.permute.xlu1 %8491  ;;  %10182 = vmatprep.subr.mxu0 %v8662_v3  ;;  %v8809_v31 = vsel %vm8789_vm13, %v12508_v21, %v8788_v46  ;;  %vm20286_vm13 = vcmask 523264  }
 0x9b7   : > { %10183 = vmatpush2.msra.mxu0 %v8661_v42  ;;  %10257 = vmatprep.subr.mxu1 %v8809_v31  ;;  %v8516_v40 = vsel %vm20285_vm7, %v17888_v54, %v8492_v39  ;;  %vm20287_vm9 = vmmov %vm20286_vm13  ;;  %v18154_v42 = vpop.f32.mrf.mxu1 }
 0x9b8   : > { %10258 = vmatpush2.msra.mxu1 %v8808_v30  ;;  %vm20290_vm12 = vmmov %vm20287_vm9 }
 0x9b9   : > { %v12516_v14 = vpop.permute.xlu0 %12515 }
 0x9ba   : > { %v12517_v25 = vunpack.i.l.bf16 %v12516_v14  ;;  %v8643_v19 = vpop.permute.xlu1 %8642  ;;  %v12518_v44 = vunpack.i.h.bf16 %v12516_v14 }
 0x9bb   : > { %v8664_v22 = vsel %vm20282_vm0, %v12513_v36, %v8643_v19  ;;  %vm20291_vm0 = vmmov %vm20287_vm9 }
 0x9bc   : > { %10259 = vmatprep.subr.mxu1 %v8664_v22  ;;  %v8517_v56 = vsel %vm20284_vm2, %v8492_v39, %v12517_v25  ;;  %v8518_v7 = vsel %vm20289_vm5, %v12517_v25, %v12518_v44  ;;  %vm20293_vm2 = vmmov %vm20292_vm8  ;;  %v18157_v22 = vpop.f32.mrf.mxu1  ;;  %vm12100_vm5 = vcmask 31744  }
 0x9bd   : > { %10260 = vmatpush2.msra.mxu1 %v8663_v1  ;;  %v8347_v16 = vpop.permute.xlu0 %8346  ;;  %10184 = vmatprep.subr.mxu0 %v8517_v56  ;;  %vm20294_vm7 = vmmov %vm20293_vm2 }
 0x9be   : > { %v12521_v37 = vpop.permute.xlu1 %12520  ;;  %10185 = vmatpush2.msra.mxu0 %v8516_v40  ;;  %v8371_v4 = vsel %vm20287_vm9, %v17904_v6, %v8347_v16  ;;  %vm12014_vm9 = vcmask 687104  }
 0x9bf   : > { %v12522_v28 = vunpack.i.l.bf16 %v12521_v37  ;;  %v12523_v5 = vunpack.i.h.bf16 %v12521_v37  ;;  %v12555_v37 = vld [vmem:[%s19112_s3 + $0x18] sm:$0xff] }
 0x9c1   : > { %v8498_v53 = vpop.permute.xlu0 %8497  ;;  %v8372_v12 = vsel %vm20286_vm13, %v8347_v16, %v12522_v28  ;;  %v8373_v47 = vsel %vm20291_vm0, %v12522_v28, %v12523_v5  ;;  %vm20295_vm13 = vmmov %vm20293_vm2  ;;  %v12554_v16 = vld [vmem:[%s19112_s3] sm:$0xff]  ;;  %v12556_v28 = vld [vmem:[%s19112_s3 + $0x10] sm:$0xff] }
 0x9c2   : > { %v8203_v55 = vpop.permute.xlu1 %8202  ;;  %10186 = vmatprep.subr.mxu0 %v8372_v12  ;;  %v8519_v10 = vsel %vm20288_vm3, %v12518_v44, %v8498_v53  ;;  %v9819_v44 = vpop.f32.mrf.mxu1  ;;  %vm12102_vm3 = vcmask 25600  }
 0x9c3   : > { %10187 = vmatpush2.msra.mxu0 %v8371_v4  ;;  %10261 = vmatprep.subr.mxu1 %v8519_v10  ;;  %v8226_v34 = vsel %vm20293_vm2, %v17920_v0, %v8203_v55 }
 0x9c4   : > { %10262 = vmatpush2.msra.mxu1 %v8518_v7  ;;  %v9821_v53 = vpop.f32.mrf.mxu1 }
 0x9c5   : > { %v12526_v54 = vpop.permute.xlu0 %12525 }
 0x9c6   : > { %v12527_v24 = vunpack.i.l.bf16 %v12526_v54  ;;  %v8353_v52 = vpop.permute.xlu1 %8352  ;;  %v12528_v29 = vunpack.i.h.bf16 %v12526_v54  ;;  %v18178_v12 = vpop.f32.mrf.mxu1 }
 0x9c7   : > { %v8374_v62 = vsel %vm20290_vm12, %v12523_v5, %v8353_v52 }
 0x9c8   : > { %10263 = vmatprep.subr.mxu1 %v8374_v62  ;;  %v8227_v6 = vsel %vm20292_vm8, %v8203_v55, %v12527_v24  ;;  %v8228_v0 = vsel %vm20295_vm13, %v12527_v24, %v12528_v29  ;;  %v18195_v52 = vpop.f32.mrf.mxu1 }
 0x9c9   : > { %10264 = vmatpush2.msra.mxu1 %v8373_v47  ;;  %v8058_v33 = vpop.permute.xlu0 %8057  ;;  %10188 = vmatprep.subr.mxu0 %v8227_v6 }
 0x9ca   : > { %v12531_v63 = vpop.permute.xlu1 %12530  ;;  %10189 = vmatpush2.msra.mxu0 %v8226_v34  ;;  %v8082_v45 = vsel %vm8065_vm11, %v17936_v59, %v8058_v33 }
 0x9cb   : > { %v12532_v41 = vunpack.i.l.bf16 %v12531_v63  ;;  %v12533_v27 = vunpack.i.h.bf16 %v12531_v63 }
 0x9cd   : > { %v8209_v15 = vpop.permute.xlu0 %8208  ;;  %v8083_v50 = vsel %vm8065_vm11, %v8058_v33, %v12532_v41  ;;  %v8084_v20 = vsel %vm8065_vm11, %v12532_v41, %v12533_v27  ;;  %v18209_v33 = vpop.f32.mrf.mxu1 }
 0x9ce   : > { %v7913_v23 = vpop.permute.xlu1 %7912  ;;  %10190 = vmatprep.subr.mxu0 %v8083_v50  ;;  %v8229_v49 = vsel %vm20294_vm7, %v12528_v29, %v8209_v15 }
 0x9cf   : > { %10191 = vmatpush2.msra.mxu0 %v8082_v45  ;;  %10265 = vmatprep.subr.mxu1 %v8229_v49  ;;  %v7937_v3 = vsel %vm7920_vm15, %v17953_v11, %v7913_v23  ;;  %v9975_v15 = vpop.f32.mrf.mxu1 }
 0x9d0   : > { %10266 = vmatpush2.msra.mxu1 %v8228_v0 }
 0x9d1   : > { %v12536_v9 = vpop.permute.xlu0 %12535 }
 0x9d2   : > { %v12537_v38 = vunpack.i.l.bf16 %v12536_v9  ;;  %v8064_v35 = vpop.permute.xlu1 %8063  ;;  %v12538_v31 = vunpack.i.h.bf16 %v12536_v9 }
 0x9d3   : > { %v8085_v21 = vsel %vm8065_vm11, %v12533_v27, %v8064_v35  ;;  %vm11558_vm11 = vcmask 130048  }
 0x9d4   : > { %10267 = vmatprep.subr.mxu1 %v8085_v21  ;;  %v7938_v59 = vsel %vm7920_vm15, %v7913_v23, %v12537_v38  ;;  %v7939_v11 = vsel %vm7920_vm15, %v12537_v38, %v12538_v31 }
 0x9d5   : > { %10268 = vmatpush2.msra.mxu1 %v8084_v20  ;;  %v7768_v46 = vpop.permute.xlu0 %7767  ;;  %10192 = vmatprep.subr.mxu0 %v7938_v59 }
 0x9d6   : > { %v12541_v39 = vpop.permute.xlu1 %12540  ;;  %10193 = vmatpush2.msra.mxu0 %v7937_v3  ;;  %v7792_v1 = vsel %vm7775_vm4, %v17974_v51, %v7768_v46 }
 0x9d7   : > { %v12542_v30 = vunpack.i.l.bf16 %v12541_v39  ;;  %v12543_v36 = vunpack.i.h.bf16 %v12541_v39 }
 0x9d9   : > { %v7919_v14 = vpop.permute.xlu0 %7918  ;;  %v7793_v25 = vsel %vm7775_vm4, %v7768_v46, %v12542_v30  ;;  %v7794_v51 = vsel %vm7775_vm4, %v12542_v30, %v12543_v36 }
 0x9da   : > { %v7774_v19 = vpop.permute.xlu1 %7773  ;;  %10194 = vmatprep.subr.mxu0 %v7793_v25  ;;  %v7940_v56 = vsel %vm7920_vm15, %v12538_v31, %v7919_v14  ;;  %vm11212_vm15 = vcmask 23568  }
 0x9db   : > { %10195 = vmatpush2.msra.mxu0 %v7792_v1  ;;  %10269 = vmatprep.subr.mxu1 %v7940_v56  ;;  %v7795_v40 = vsel %vm7775_vm4, %v12543_v36, %v7774_v19  ;;  %vm12622_vm4 = vmmov 0  }
 0x9dc   : > { %10197 = vmatmul.mubr.f32.vlgmr.msra.gmra.mxu0 %v12554_v16  ;;  %10270 = vmatpush2.msra.mxu1 %v7939_v11 }
 0x9dd   : > { %10271 = vmatprep.subr.mxu1 %v7795_v40  ;;  %12194 = vmatprep.mubr.msk.f32.mxu0 %vm4415_vm1, %v12555_v37 }
 0x9de   : > { %10272 = vmatpush2.msra.mxu1 %v7794_v51  ;;  %11604 = vmatprep.subr.mxu0 %v19406_v17 }
 0x9df   : > { %10274 = vmatmul.mubr.f32.vlgmr.msra.gmra.mxu1 %v12554_v16  ;;  %12268 = vmatprep.subr.mxu1 %v19406_v17 }
 0x9e0   : > { %10203 = vmatmul.mubr.f32.gmra.mxu0 %v12556_v28  ;;  %12196 = vmatprep.mubr.msk.f32.mxu1 %vm4415_vm1, %v12555_v37  ;;  %vm10994_vm1 = vcmask 7168  }
 0x9e3   : > { %10280 = vmatmul.mubr.f32.gmra.mxu1 %v12556_v28 }
 0x9e6   : > { %v18180_v55 = vpop.permute.xlu0 %9507 }
 0x9e7   : > { %v18184_v4 = vadd.f32 %v18008_v13, %v18180_v55  ;;  %v18187_v10 = vadd.f32 %v9665_v48, %v18180_v55  ;;  %v9668_v54 = vadd.f32 %v9667_v18, %v18180_v55  ;;  %v18193_v24 = vadd.f32 %v9819_v44, %v18180_v55  ;;  %v18211_v34 = vpop.permute.xlu1 %9502 }
 0x9e8   : > { %v9897_v13 = vadd.f32 %v18049_v57, %v18180_v55  ;;  %v18207_v6 = vadd.f32 %v9821_v53, %v18180_v55  ;;  %v18220_v57 = vadd.f32 %v18135_v32, %v18211_v34  ;;  %v18224_v41 = vadd.f32 %v17997_v61, %v18211_v34 }
 0x9e9   : > { %v10307_v7 = vmax.f32 %v18184_v4, 0.0  ;;  %v10308_v5 = vmax.f32 %v18187_v10, 0.0  ;;  %v10309_v62 = vmax.f32 %v9668_v54, 0.0  ;;  %v10312_v47 = vmax.f32 %v18193_v24, 0.0 }
 0x9ea   : > { %v10314_v63 = vmax.f32 %v9897_v13, 0.0  ;;  %v10313_v29 = vmax.f32 %v18207_v6, 0.0  ;;  %v18231_v50 = vadd.f32 %v9975_v15, %v18180_v55  ;;  %v10288_v23 = vmax.f32 %v18220_v57, 0.0 }
 0x9eb   : > { %10526 = vrot.lane.b32.xlu0 %v10307_v7, %s20066_s30  ;;  %10528 = vrot.lane.b32.xlu1 %v10308_v5, %s20066_s30  ;;  %v10287_v45 = vmax.f32 %v18224_v41, 0.0  ;;  %v9662_v32 = vadd.f32 %v18142_v43, %v18211_v34  ;;  %v18255_v18 = vadd.f32 %v18154_v42, %v18211_v34  ;;  %v18262_v20 = vadd.f32 %v18157_v22, %v18211_v34 }
 0x9ec   : > { %v10317_v61 = vmax.f32 %v18231_v50, 0.0  ;;  %v9891_v59 = vadd.f32 %v18033_v2, %v18211_v34  ;;  %v18292_v28 = vadd.f32 %v18195_v52, %v18211_v34 }
 0x9ed   : > { %v10289_v49 = vmax.f32 %v9662_v32, 0.0  ;;  %v10292_v46 = vmax.f32 %v18255_v18, 0.0  ;;  %v10293_v39 = vmax.f32 %v18262_v20, 0.0 }
 0x9ee   : > { %v10294_v42 = vmax.f32 %v9891_v59, 0.0 }
 0x9ef   : > { %10530 = vrot.lane.b32.xlu0 %v10309_v62, %s20066_s30  ;;  %10536 = vrot.lane.b32.xlu1 %v10312_v47, %s20066_s30 }
 0x9f3   : > { %10538 = vrot.lane.b32.xlu0 %v10313_v29, %s20066_s30  ;;  %10540 = vrot.lane.b32.xlu1 %v10314_v63, %s20066_s30  ;;  %v10297_v63 = vmax.f32 %v18292_v28, 0.0 }
 0x9f7   : > { %10488 = vrot.lane.b32.xlu1 %v10288_v23, %s20066_s30  ;;  %10486 = vrot.lane.b32.xlu0 %v10287_v45, %s20066_s30 }
 0x9fb   : > { %10546 = vrot.lane.b32.xlu1 %v10317_v61, %s20066_s30  ;;  %10490 = vrot.lane.b32.xlu0 %v10289_v49, %s20066_s30 }
 0xa06   : > { %v10044_v48 = vpop.f32.mrf.mxu0 }
 0xa07   : > { %v18295_v54 = vadd.f32 %v10044_v48, %v18211_v34 }
 0xa08   : > { %v10046_v0 = vpop.f32.mrf.mxu0 }
 0xa09   : > { %v10047_v13 = vadd.f32 %v10046_v0, %v18211_v34  ;;  %v10298_v15 = vmax.f32 %v18295_v54, 0.0 }
 0xa0a   : > { %v10050_v43 = vpop.f32.mrf.mxu0 }
 0xa0b   : > { %v18249_v27 = vadd.f32 %v10050_v43, %v18180_v55  ;;  %v10299_v32 = vmax.f32 %v10047_v13, 0.0 }
 0xa0c   : > { %v10052_v9 = vpop.f32.mrf.mxu0 }
 0xa0d   : > { %v10318_v38 = vmax.f32 %v18249_v27, 0.0  ;;  %v10053_v35 = vadd.f32 %v10052_v9, %v18180_v55 }
 0xa0f   : > { %v10319_v21 = vmax.f32 %v10053_v35, 0.0  ;;  %10548 = vrot.lane.b32.xlu0 %v10318_v38, %s20066_s30 }
 0xa11   : > { %10550 = vrot.lane.b32.xlu1 %v10319_v21, %s20066_s30  ;;  %v18327_v21 = vadd.f32 %v18004_v26, %v18180_v55  ;;  %v18342_v26 = vadd.f32 %v17988_v8, %v18211_v34  ;;  %v18358_v8 = vadd.f32 %v18020_v58, %v18211_v34  ;;  %v18375_v58 = vadd.f32 %v18178_v12, %v18211_v34 }
 0xa12   : > { %v10121_v3 = vpop.f32.mrf.mxu1 }
 0xa13   : > { %10496 = vrot.lane.b32.xlu0 %v10292_v46, %s20066_s30 }
 0xa14   : > { %v18272_v31 = vpop.f32.mrf.mxu1 }
 0xa15   : > { %10498 = vrot.lane.b32.xlu1 %v10293_v39, %s20066_s30 }
 0xa16   : > { %v10127_v30 = vpop.f32.mrf.mxu1 }
 0xa17   : > { %10500 = vrot.lane.b32.xlu0 %v10294_v42, %s20066_s30  ;;  %v18336_v42 = vadd.f32 %v18029_v60, %v18180_v55 }
 0xa18   : > { %v10129_v36 = vpop.f32.mrf.mxu1 }
 0xa5d   : > { %v18301_v62 = vpop.permute.xlu0 %10526  ;;  %v10529_v49 = vpop.permute.xlu1 %10528 }
 0xa5e   : > { %v10584_v12 = vsel %vm656_vm14, %v18301_v62, %v10529_v49 }
 0xa5f   : > { %v18398_v13 = vmax.f32 %v10307_v7, %v10584_v12 }
 0xa61   : > { %v10531_v0 = vpop.permute.xlu0 %10530  ;;  %v18329_v59 = vpop.permute.xlu1 %10536 }
 0xa65   : > { %v10539_v30 = vpop.permute.xlu0 %10538  ;;  %v10541_v60 = vpop.permute.xlu1 %10540 }
 0xa66   : > { %v10590_v4 = vsel %vm656_vm14, %v10539_v30, %v10541_v60 }
 0xa67   : > { %v10666_v12 = vmax.f32 %v10313_v29, %v10590_v4 }
 0xa9c   : > { %v10198_v2 = vpop.f32.mrf.mxu0 }
 0xa9d   : > { %v18307_v52 = vadd.f32 %v10198_v2, %v18211_v34  ;;  %v10306_v2 = vmax.f32 %v18327_v21, 0.0 }
 0xa9e   : > { %v10200_v14 = vpop.f32.mrf.mxu0 }
 0xa9f   : > { %v10275_v25 = vpop.f32.mrf.mxu1  ;;  %v18313_v48 = vadd.f32 %v10200_v14, %v18211_v34  ;;  %v10302_v43 = vmax.f32 %v18307_v52, 0.0  ;;  %v10311_v14 = vmax.f32 %v18336_v42, 0.0 }
 0xaa0   : > { %v10204_v19 = vpop.f32.mrf.mxu0  ;;  %v10276_v9 = vadd.f32 %v10275_v25, %v18211_v34  ;;  %v18350_v25 = vadd.f32 %v18209_v33, %v18180_v55 }
 0xaa1   : > { %v18279_v22 = vadd.f32 %v10204_v19, %v18180_v55  ;;  %v10277_v1 = vpop.f32.mrf.mxu1  ;;  %v10303_v35 = vmax.f32 %v18313_v48, 0.0  ;;  %v10286_v19 = vmax.f32 %v18342_v26, 0.0 }
 0xaa2   : > { %v10206_v56 = vpop.f32.mrf.mxu0  ;;  %v10304_v3 = vmax.f32 %v10276_v9, 0.0  ;;  %v18361_v1 = vadd.f32 %v10129_v36, %v18180_v55  ;;  %v10316_v33 = vmax.f32 %v18350_v25, 0.0 }
 0xaa3   : > { %v10322_v11 = vmax.f32 %v18279_v22, 0.0  ;;  %v18283_v16 = vadd.f32 %v10206_v56, %v18180_v55  ;;  %v10281_v40 = vpop.f32.mrf.mxu1  ;;  %v18363_v56 = vpop.permute.xlu0 %10486 }
 0xaa4   : > { %v10282_v37 = vadd.f32 %v10281_v40, %v18180_v55  ;;  %v10291_v40 = vmax.f32 %v18358_v8, 0.0  ;;  %v18379_v55 = vadd.f32 %v18272_v31, %v18211_v34  ;;  %v10321_v36 = vmax.f32 %v18361_v1, 0.0 }
 0xaa5   : > { %v10323_v51 = vmax.f32 %v18283_v16, 0.0  ;;  %10556 = vrot.lane.b32.xlu1 %v10322_v11, %s20066_s30  ;;  %v10283_v44 = vpop.f32.mrf.mxu1  ;;  %v10585_v31 = vsel %vm656_vm14, %v10529_v49, %v10531_v0 }
 0xaa6   : > { %v10324_v53 = vmax.f32 %v10282_v37, 0.0  ;;  %v10489_v37 = vpop.permute.xlu1 %10488  ;;  %v10301_v34 = vmax.f32 %v18379_v55, 0.0  ;;  %v10661_v17 = vmax.f32 %v10308_v5, %v10585_v31 }
 0xaa7   : > { %10558 = vrot.lane.b32.xlu0 %v10323_v51, %s20066_s30  ;;  %v10491_v44 = vpop.permute.xlu0 %10490  ;;  %v10565_v0 = vsel %vm656_vm14, %v18363_v56, %v10489_v37 }
 0xaa8   : > { %v10566_v5 = vsel %vm656_vm14, %v10489_v37, %v10491_v44  ;;  %v18428_v24 = vmax.f32 %v10287_v45, %v10565_v0 }
 0xaa9   : > { %10560 = vrot.lane.b32.xlu1 %v10324_v53, %s20066_s30  ;;  %v10296_v53 = vmax.f32 %v18375_v58, 0.0 }
 0xaab   : > { %10506 = vrot.lane.b32.xlu0 %v10297_v63, %s20066_s30  ;;  %v10549_v9 = vpop.permute.xlu0 %10548 }
 0xaad   : > { %10508 = vrot.lane.b32.xlu1 %v10298_v15, %s20066_s30 }
 0xaaf   : > { %10510 = vrot.lane.b32.xlu0 %v10299_v32, %s20066_s30  ;;  %v18400_v32 = vpop.permute.xlu1 %10546  ;;  %v18421_v10 = vpop.permute.xlu0 %10496 }
 0xab1   : > { %10516 = vrot.lane.b32.xlu1 %v10302_v43, %s20066_s30 }
 0xab3   : > { %10518 = vrot.lane.b32.xlu0 %v10303_v35, %s20066_s30  ;;  %v10551_v49 = vpop.permute.xlu1 %10550  ;;  %v10501_v41 = vpop.permute.xlu0 %10500 }
 0xab4   : > { %v10595_v29 = vsel %vm656_vm14, %v10549_v9, %v10551_v49 }
 0xab5   : > { %10520 = vrot.lane.b32.xlu1 %v10304_v3, %s20066_s30  ;;  %v10589_v3 = vsel %vm656_vm14, %v18329_v59, %v10539_v30  ;;  %v10671_v57 = vmax.f32 %v10318_v38, %v10595_v29 }
 0xab6   : > { %v18414_v7 = vmax.f32 %v10312_v47, %v10589_v3  ;;  %v10642_v47 = vmax.f32 %v10288_v23, %v10566_v5 }
 0xab7   : > { %10524 = vrot.lane.b32.xlu0 %v10306_v2, %s20066_s30  ;;  %v10499_v6 = vpop.permute.xlu1 %10498 }
 0xab8   : > { %v10570_v45 = vsel %vm656_vm14, %v18421_v10, %v10499_v6  ;;  %v10571_v23 = vsel %vm656_vm14, %v10499_v6, %v10501_v41 }
 0xab9   : > { %10534 = vrot.lane.b32.xlu1 %v10311_v14, %s20066_s30  ;;  %v18452_v60 = vmax.f32 %v10292_v46, %v10570_v45  ;;  %v10647_v50 = vmax.f32 %v10293_v39, %v10571_v23 }
 0xabb   : > { %10484 = vrot.lane.b32.xlu0 %v10286_v19, %s20066_s30 }
 0xabd   : > { %10544 = vrot.lane.b32.xlu1 %v10316_v33, %s20066_s30 }
 0xabf   : > { %10494 = vrot.lane.b32.xlu0 %v10291_v40, %s20066_s30 }
 0xac1   : > { %10554 = vrot.lane.b32.xlu1 %v10321_v36, %s20066_s30 }
 0xac3   : > { %10504 = vrot.lane.b32.xlu0 %v10296_v53, %s20066_s30 }
 0xac5   : > { %10514 = vrot.lane.b32.xlu1 %v10301_v34, %s20066_s30 }
 0xac7   : > { %10802 = vrot.lane.b32.xlu0 %v18398_v13, %s20064_s22 }
 0xac9   : > { %10804 = vrot.lane.b32.xlu1 %v10661_v17, %s20064_s22  ;;  %v10594_v17 = vsel %vm656_vm14, %v18400_v32, %v10549_v9 }
 0xaca   : > { %v18440_v30 = vmax.f32 %v10317_v61, %v10594_v17 }
 0xacb   : > { %10812 = vrot.lane.b32.xlu0 %v18414_v7, %s20064_s22 }
 0xacd   : > { %10814 = vrot.lane.b32.xlu1 %v10666_v12, %s20064_s22 }
 0xacf   : > { %10762 = vrot.lane.b32.xlu0 %v18428_v24, %s20064_s22 }
 0xad1   : > { %10764 = vrot.lane.b32.xlu1 %v10642_v47, %s20064_s22 }
 0xad3   : > { %10822 = vrot.lane.b32.xlu0 %v18440_v30, %s20064_s22 }
 0xad5   : > { %10824 = vrot.lane.b32.xlu1 %v10671_v57, %s20064_s22 }
 0xad7   : > { %10772 = vrot.lane.b32.xlu0 %v18452_v60, %s20064_s22 }
 0xad9   : > { %10774 = vrot.lane.b32.xlu1 %v10647_v50, %s20064_s22 }
 0xb17   : > { %v10557_v61 = vpop.permute.xlu1 %10556 }
 0xb19   : > { %v10559_v27 = vpop.permute.xlu0 %10558 }
 0xb1a   : > { %v10599_v38 = vsel %vm656_vm14, %v10557_v61, %v10559_v27 }
 0xb1b   : > { %v18463_v37 = vmax.f32 %v10322_v11, %v10599_v38  ;;  %v10561_v18 = vpop.permute.xlu1 %10560 }
 0xb1c   : > { %v10600_v46 = vsel %vm656_vm14, %v10559_v27, %v10561_v18 }
 0xb1d   : > { %v10676_v20 = vmax.f32 %v10323_v51, %v10600_v46  ;;  %v10507_v39 = vpop.permute.xlu0 %10506  ;;  %10832 = vrot.lane.b32.xlu0 %v18463_v37, %s20064_s22 }
 0xb1f   : > { %v10509_v44 = vpop.permute.xlu1 %10508  ;;  %10834 = vrot.lane.b32.xlu1 %v10676_v20, %s20064_s22 }
 0xb20   : > { %v10575_v31 = vsel %vm656_vm14, %v10507_v39, %v10509_v44 }
 0xb21   : > { %v18474_v22 = vmax.f32 %v10297_v63, %v10575_v31  ;;  %v10511_v11 = vpop.permute.xlu0 %10510 }
 0xb22   : > { %v10576_v9 = vsel %vm656_vm14, %v10509_v44, %v10511_v11 }
 0xb23   : > { %v10652_v16 = vmax.f32 %v10298_v15, %v10576_v9  ;;  %10782 = vrot.lane.b32.xlu0 %v18474_v22, %s20064_s22  ;;  %v10517_v51 = vpop.permute.xlu1 %10516 }
 0xb25   : > { %v10519_v3 = vpop.permute.xlu0 %10518  ;;  %10784 = vrot.lane.b32.xlu1 %v10652_v16, %s20064_s22 }
 0xb26   : > { %v10580_v4 = vsel %vm656_vm14, %v10517_v51, %v10519_v3 }
 0xb27   : > { %v18485_v28 = vmax.f32 %v10302_v43, %v10580_v4  ;;  %v10521_v63 = vpop.permute.xlu1 %10520 }
 0xb28   : > { %v10581_v49 = vsel %vm656_vm14, %v10519_v3, %v10521_v63 }
 0xb29   : > { %v10657_v54 = vmax.f32 %v10303_v35, %v10581_v49  ;;  %v10525_v15 = vpop.permute.xlu0 %10524  ;;  %10792 = vrot.lane.b32.xlu0 %v18485_v28, %s20064_s22 }
 0xb2a   : > { %v10583_v0 = vsel %vm656_vm14, %v10525_v15, %v18301_v62 }
 0xb2b   : > { %v18496_v12 = vmax.f32 %v10306_v2, %v10583_v0  ;;  %10794 = vrot.lane.b32.xlu1 %v10657_v54, %s20064_s22  ;;  %v10535_v52 = vpop.permute.xlu1 %10534 }
 0xb2c   : > { %v10588_v43 = vsel %vm656_vm14, %v10535_v52, %v18329_v59 }
 0xb2d   : > { %v18503_v48 = vmax.f32 %v10311_v14, %v10588_v43  ;;  %v10485_v35 = vpop.permute.xlu0 %10484  ;;  %10800 = vrot.lane.b32.xlu0 %v18496_v12, %s20064_s22 }
 0xb2e   : > { %v10564_v62 = vsel %vm656_vm14, %v10485_v35, %v18363_v56 }
 0xb2f   : > { %v18511_v21 = vmax.f32 %v10286_v19, %v10564_v62  ;;  %10810 = vrot.lane.b32.xlu1 %v18503_v48, %s20064_s22  ;;  %v10545_v2 = vpop.permute.xlu1 %10544 }
 0xb30   : > { %v10593_v59 = vsel %vm656_vm14, %v10545_v2, %v18400_v32 }
 0xb31   : > { %v18519_v42 = vmax.f32 %v10316_v33, %v10593_v59  ;;  %v10495_v14 = vpop.permute.xlu0 %10494  ;;  %10760 = vrot.lane.b32.xlu0 %v18511_v21, %s20064_s22 }
 0xb32   : > { %v10569_v26 = vsel %vm656_vm14, %v10495_v14, %v18421_v10 }
 0xb33   : > { %v18527_v19 = vmax.f32 %v10291_v40, %v10569_v26  ;;  %10820 = vrot.lane.b32.xlu1 %v18519_v42, %s20064_s22  ;;  %v10555_v56 = vpop.permute.xlu1 %10554 }
 0xb34   : > { %v10598_v32 = vsel %vm656_vm14, %v10555_v56, %v10557_v61 }
 0xb35   : > { %v18534_v25 = vmax.f32 %v10321_v36, %v10598_v32  ;;  %v10505_v33 = vpop.permute.xlu0 %10504  ;;  %10770 = vrot.lane.b32.xlu0 %v18527_v19, %s20064_s22 }
 0xb36   : > { %v10574_v10 = vsel %vm656_vm14, %v10505_v33, %v10507_v39 }
 0xb37   : > { %v18541_v8 = vmax.f32 %v10296_v53, %v10574_v10  ;;  %10830 = vrot.lane.b32.xlu1 %v18534_v25, %s20064_s22  ;;  %v10515_v40 = vpop.permute.xlu1 %10514 }
 0xb38   : > { %v10579_v5 = vsel %vm656_vm14, %v10515_v40, %v10517_v51  ;;  %vm11103_vm14 = vcmask 15368  }
 0xb39   : > { %v18548_v1 = vmax.f32 %v10301_v34, %v10579_v5  ;;  %v10803_v36 = vpop.permute.xlu0 %10802  ;;  %10780 = vrot.lane.b32.xlu0 %v18541_v8, %s20064_s22 }
 0xb3b   : > { %10790 = vrot.lane.b32.xlu1 %v18548_v1, %s20064_s22  ;;  %v10805_v58 = vpop.permute.xlu1 %10804  ;;  %s12607_s22 = smov 63  }
 0xb3c   : > { %v10860_v53 = vsel %vm1816_vm6, %v10803_v36, %v10805_v58 }
 0xb3d   : > { %v18556_v17 = vmax.f32 %v18398_v13, %v10860_v53  ;;  %v10813_v47 = vpop.permute.xlu0 %10812 }
 0xb3f   : > { %11075 = vrot.lane.b32.xlu0 %v18556_v17, %s20102_s25  ;;  %v10815_v55 = vpop.permute.xlu1 %10814 }
 0xb40   : > { %v10865_v34 = vsel %vm1816_vm6, %v10813_v47, %v10815_v55  ;;  %v20300_v55 = vmov 0.0  }
 0xb41   : > { %v18562_v6 = vmax.f32 %v18414_v7, %v10865_v34  ;;  %v10763_v29 = vpop.permute.xlu0 %10762  ;;  %12298 = vmatprep.mubr.msk.f32.mxu1 %vm12622_vm4, %v20300_v55 }
 0xb43   : > { %11184 = vrot.lane.b32.xlu1 %v18562_v6, %s12605_s9  ;;  %v10765_v41 = vpop.permute.xlu1 %10764 }
 0xb44   : > { %v10841_v45 = vsel %vm1816_vm6, %v10763_v29, %v10765_v41 }
 0xb45   : > { %v18567_v13 = vmax.f32 %v18428_v24, %v10841_v45  ;;  %v10823_v57 = vpop.permute.xlu0 %10822 }
 0xb47   : > { %11073 = vrot.lane.b32.xlu0 %v18567_v13, %s20102_s25  ;;  %v10825_v23 = vpop.permute.xlu1 %10824  ;;  %s12606_s25 = smov 65  }
 0xb48   : > { %v10870_v50 = vsel %vm1816_vm6, %v10823_v57, %v10825_v23  ;;  %v11481_v23 = vld [vmem:[%s19115_s6 + $0x68] sm:$0xff] }
 0xb49   : > { %v18573_v7 = vmax.f32 %v18440_v30, %v10870_v50  ;;  %v10773_v61 = vpop.permute.xlu0 %10772 }
 0xb4b   : > { %11293 = vrot.lane.b32.xlu1 %v18573_v7, %s20105_s12  ;;  %v10775_v27 = vpop.permute.xlu1 %10774 }
 0xb4c   : > { %v10846_v38 = vsel %vm1816_vm6, %v10773_v61, %v10775_v27 }
 0xb4d   : > { %v18579_v24 = vmax.f32 %v18452_v60, %v10846_v38  ;;  %v11479_v38 = vld [vmem:[%s19115_s6 + $0x58] sm:$0xff] }
 0xb4f   : > { %11182 = vrot.lane.b32.xlu0 %v18579_v24, %s12605_s9  ;;  %s12621_s9 = smov 59  }
 0xb53   : > { %11063 = vrot.lane.b32.xlu0 %v18556_v17, %s20113_s21 }
 0xb57   : > { %11172 = vrot.lane.b32.xlu0 %v18562_v6, %s12606_s25 }
 0xb5b   : > { %11061 = vrot.lane.b32.xlu0 %v18567_v13, %s20113_s21  ;;  %s12608_s21 = smov 66  }
 0xb5f   : > { %11170 = vrot.lane.b32.xlu0 %v18579_v24, %s12606_s25 }
 0xb8f   : > { %v10833_v30 = vpop.permute.xlu0 %10832 }
 0xb91   : > { %v10835_v18 = vpop.permute.xlu1 %10834 }
 0xb92   : > { %v10875_v46 = vsel %vm1816_vm6, %v10833_v30, %v10835_v18 }
 0xb93   : > { %v18590_v60 = vmax.f32 %v18463_v37, %v10875_v46  ;;  %v11477_v46 = vld [vmem:[%s19115_s6 + $0x48] sm:$0xff] }
 0xb95   : > { %11402 = vrot.lane.b32.xlu1 %v18590_v60, %s12607_s22  ;;  %v10783_v20 = vpop.permute.xlu0 %10782 }
 0xb97   : > { %v10785_v39 = vpop.permute.xlu1 %10784 }
 0xb98   : > { %v10851_v44 = vsel %vm1816_vm6, %v10783_v20, %v10785_v39  ;;  %v11472_v39 = vld [vmem:[%s19115_s6 + $0x20] sm:$0xff] }
 0xb99   : > { %v18595_v31 = vmax.f32 %v18474_v22, %v10851_v44 }
 0xb9b   : > { %v10793_v11 = vpop.permute.xlu0 %10792  ;;  %11291 = vrot.lane.b32.xlu1 %v18595_v31, %s20105_s12  ;;  %s12609_s12 = smov 25  }
 0xb9d   : > { %v10795_v9 = vpop.permute.xlu1 %10794 }
 0xb9e   : > { %v10856_v16 = vsel %vm1816_vm6, %v10793_v11, %v10795_v9  ;;  %v11470_v9 = vld [vmem:[%s19115_s6 + $0x10] sm:$0xff] }
 0xb9f   : > { %v18601_v37 = vmax.f32 %v18485_v28, %v10856_v16  ;;  %v10801_v51 = vpop.permute.xlu0 %10800 }
 0xba0   : > { %v10859_v3 = vsel %vm1816_vm6, %v10801_v51, %v10803_v36 }
 0xba1   : > { %v18605_v4 = vmax.f32 %v18496_v12, %v10859_v3  ;;  %11400 = vrot.lane.b32.xlu1 %v18601_v37, %s12607_s22  ;;  %v10811_v22 = vpop.permute.xlu1 %10810 }
 0xba2   : > { %v10864_v63 = vsel %vm1816_vm6, %v10811_v22, %v10813_v47  ;;  %v11482_v47 = vld [vmem:[%s19115_s6 + $0x70] sm:$0xff] }
 0xba3   : > { %v10761_v49 = vpop.permute.xlu0 %10760  ;;  %11051 = vrot.lane.b32.xlu0 %v18605_v4, %s20130_s13  ;;  %10996 = vst.msk [vmem:[#allocation8 + $0x8] sm:$0xff] %vm10994_vm1, %v18605_v4  ;;  %v18615_v54 = vmax.f32 %v18503_v48, %v10864_v63  ;;  %v11471_v63 = vld [vmem:[%s19115_s6 + $0x18] sm:$0xff] }
 0xba4   : > { %v10840_v28 = vsel %vm1816_vm6, %v10761_v49, %v10763_v29  ;;  %v11421_v29 = vld [vmem:[%s20301_s10 + $0x8] sm:$0xff] }
 0xba5   : > { %v18618_v15 = vmax.f32 %v18511_v21, %v10840_v28  ;;  %11281 = vrot.lane.b32.xlu1 %v18573_v7, %s12608_s21  ;;  %v10821_v0 = vpop.permute.xlu1 %10820  ;;  %12197 = vmatprep.mubr.msk.f32.mxu0 %vm11558_vm11, %v11421_v29 }
 0xba6   : > { %v10869_v62 = vsel %vm1816_vm6, %v10821_v0, %v10823_v57 }
 0xba7   : > { %v10771_v12 = vpop.permute.xlu0 %10770  ;;  %11160 = vrot.lane.b32.xlu0 %v18615_v54, %s12609_s12  ;;  %10995 = vst.msk [vmem:[#allocation8] sm:$0xff] %vm10994_vm1, %v18618_v15  ;;  %v18637_v59 = vmax.f32 %v18519_v42, %v10869_v62 }
 0xba8   : > { %v10845_v52 = vsel %vm1816_vm6, %v10771_v12, %v10773_v61  ;;  %v11476_v61 = vld [vmem:[%s19115_s6 + $0x40] sm:$0xff] }
 0xba9   : > { %11390 = vrot.lane.b32.xlu1 %v18590_v60, %s12610_s5  ;;  %v10831_v43 = vpop.permute.xlu1 %10830  ;;  %v18629_v48 = vmax.f32 %v18527_v19, %v10845_v52 }
 0xbaa   : > { %v10874_v14 = vsel %vm1816_vm6, %v10831_v43, %v10833_v30  ;;  %v11474_v30 = vld [vmem:[%s19115_s6 + $0x30] sm:$0xff] }
 0xbab   : > { %11049 = vrot.lane.b32.xlu0 %v18618_v15, %s20130_s13  ;;  %v10781_v35 = vpop.permute.xlu0 %10780  ;;  %v18646_v19 = vmax.f32 %v18534_v25, %v10874_v14  ;;  %s20296_s13 = smov 29  }
 0xbac   : > { %v10850_v42 = vsel %vm1816_vm6, %v10781_v35, %v10783_v20 }
 0xbad   : > { %11279 = vrot.lane.b32.xlu1 %v18595_v31, %s12608_s21  ;;  %v10791_v21 = vpop.permute.xlu1 %10790  ;;  %v18654_v32 = vmax.f32 %v18541_v8, %v10850_v42 }
 0xbae   : > { %v10855_v25 = vsel %vm1816_vm6, %v10791_v21, %v10793_v11  ;;  %vm11321_vm6 = vcmask 31768  }
 0xbaf   : > { %11158 = vrot.lane.b32.xlu0 %v18629_v48, %s12609_s12  ;;  %v10931_v10 = vmax.f32 %v18548_v1, %v10855_v25 }
 0xbb1   : > { %v11076_v2 = vpop.permute.xlu0 %11075  ;;  %11388 = vrot.lane.b32.xlu1 %v18601_v37, %s12610_s5 }
 0xbb2   : > { %11080 = vst.msk [vmem:[#allocation8 + $0x78] sm:$0xff] %vm10994_vm1, %v11076_v2 }
 0xbb3   : > { %11039 = vrot.lane.b32.xlu0 %v18605_v4, %s20135_s14 }
 0xbb5   : > { %11269 = vrot.lane.b32.xlu1 %v18637_v59, %s20132_s15  ;;  %v11185_v26 = vpop.permute.xlu1 %11184 }
 0xbb6   : > { %11189 = vst.msk [vmem:[#allocation8 + $0x78] sm:$0xff] %vm11103_vm14, %v11185_v26 }
 0xbb7   : > { %11148 = vrot.lane.b32.xlu0 %v18615_v54, %s20296_s13 }
 0xbb9   : > { %v11074_v56 = vpop.permute.xlu0 %11073  ;;  %11378 = vrot.lane.b32.xlu1 %v18646_v19, %s12611_s8 }
 0xbba   : > { %11079 = vst.msk [vmem:[#allocation8 + $0x70] sm:$0xff] %vm10994_vm1, %v11074_v56 }
 0xbbb   : > { %11037 = vrot.lane.b32.xlu0 %v18618_v15, %s20135_s14  ;;  %s12612_s14 = smov 33  }
 0xbbd   : > { %11267 = vrot.lane.b32.xlu1 %v18654_v32, %s20132_s15  ;;  %v11294_v33 = vpop.permute.xlu1 %11293  ;;  %s20297_s15 = smov 31  }
 0xbbe   : > { %11298 = vst.msk [vmem:[#allocation8 + $0x78] sm:$0xff] %vm11212_vm15, %v11294_v33 }
 0xbbf   : > { %11146 = vrot.lane.b32.xlu0 %v18629_v48, %s20296_s13 }
 0xbc1   : > { %v11183_v40 = vpop.permute.xlu0 %11182  ;;  %11376 = vrot.lane.b32.xlu1 %v10931_v10, %s12611_s8 }
 0xbc2   : > { %11188 = vst.msk [vmem:[#allocation8 + $0x70] sm:$0xff] %vm11103_vm14, %v11183_v40 }
 0xbc3   : > { %11027 = vrot.lane.b32.xlu0 %v18605_v4, %s20139_s2 }
 0xbc5   : > { %v11064_v8 = vpop.permute.xlu0 %11063  ;;  %11257 = vrot.lane.b32.xlu1 %v18637_v59, %s20136_s1 }
 0xbc6   : > { %11068 = vst.msk [vmem:[#allocation8 + $0x68] sm:$0xff] %vm10994_vm1, %v11064_v8  ;;  %v12002_v8 = vld [vmem:[%s20303_s24] sm:$0xff] }
 0xbc7   : > { %11136 = vrot.lane.b32.xlu0 %v18615_v54, %s12612_s14 }
 0xbc9   : > { %v11173_v5 = vpop.permute.xlu0 %11172  ;;  %11366 = vrot.lane.b32.xlu1 %v18646_v19, %s20297_s15 }
 0xbca   : > { %11177 = vst.msk [vmem:[#allocation8 + $0x68] sm:$0xff] %vm11103_vm14, %v11173_v5 }
 0xbcb   : > { %11025 = vrot.lane.b32.xlu0 %v18618_v15, %s20139_s2  ;;  %s12614_s2 = smov 121  }
 0xbcd   : > { %v11062_v1 = vpop.permute.xlu0 %11061  ;;  %11255 = vrot.lane.b32.xlu1 %v18654_v32, %s20136_s1  ;;  %s20298_s1 = smov 125  }
 0xbce   : > { %11067 = vst.msk [vmem:[#allocation8 + $0x60] sm:$0xff] %vm10994_vm1, %v11062_v1 }
 0xbcf   : > { %11134 = vrot.lane.b32.xlu0 %v18629_v48, %s12612_s14 }
 0xbd1   : > { %v11171_v36 = vpop.permute.xlu0 %11170  ;;  %11364 = vrot.lane.b32.xlu1 %v10931_v10, %s20297_s15  ;;  %s20305_s15 = sld [smem:[#allocation230_spill]] }
 0xbd2   : > { %11176 = vst.msk [vmem:[#allocation8 + $0x60] sm:$0xff] %vm11103_vm14, %v11171_v36 }
 0xbd3   : > { %11015 = vrot.lane.b32.xlu0 %v18605_v4, %s20097_s23 }
 0xbd5   : > { %11245 = vrot.lane.b32.xlu1 %v18637_v59, %s12613_s11 }
 0xbd7   : > { %11124 = vrot.lane.b32.xlu0 %v18615_v54, %s12614_s2 }
 0xbd9   : > { %11354 = vrot.lane.b32.xlu1 %v18646_v19, %s12615_s17 }
 0xbdb   : > { %11013 = vrot.lane.b32.xlu0 %v18618_v15, %s20097_s23  ;;  %s20299_s23 = smov 127  }
 0xbdd   : > { %11243 = vrot.lane.b32.xlu1 %v18654_v32, %s12613_s11  ;;  %s20306_s11 = sld [smem:[#allocation10_spill]] }
 0xbdf   : > { %11122 = vrot.lane.b32.xlu0 %v18629_v48, %s12614_s2  ;;  %s20304_s2 = sld [smem:[#allocation228_spill]] }
 0xbe1   : > { %11352 = vrot.lane.b32.xlu1 %v10931_v10, %s12615_s17 }
 0xbe3   : > { %11003 = vrot.lane.b32.xlu0 %v18605_v4, %s20065_s28  ;;  %v11468_v4 = vld [vmem:[%s19115_s6] sm:$0xff] }
 0xbe5   : > { %11233 = vrot.lane.b32.xlu1 %v18637_v59, %s20099_s27 }
 0xbe7   : > { %11112 = vrot.lane.b32.xlu0 %v18615_v54, %s20298_s1 }
 0xbe9   : > { %11342 = vrot.lane.b32.xlu1 %v18646_v19, %s12616_s18 }
 0xbeb   : > { %11001 = vrot.lane.b32.xlu0 %v18618_v15, %s20065_s28  ;;  %s12618_s28 = smov 2   ;;  %v11469_v15 = vld [vmem:[%s19115_s6 + $0x8] sm:$0xff] }
 0xbed   : > { %11231 = vrot.lane.b32.xlu1 %v18654_v32, %s20099_s27  ;;  %s12619_s27 = smov 57  }
 0xbef   : > { %11110 = vrot.lane.b32.xlu0 %v18629_v48, %s20298_s1 }
 0xbf1   : > { %11340 = vrot.lane.b32.xlu1 %v10931_v10, %s12616_s18  ;;  %s12228_s18 = sshll.u32 %s20306_s11, 4 }
 0xbf3   : > { %11219 = vrot.lane.b32.xlu0 %v18654_v32, %s20066_s30 }
 0xbf5   : > { %11221 = vrot.lane.b32.xlu1 %v18637_v59, %s20066_s30  ;;  %s12620_s30 = smov 3  }
 0xbf7   : > { %11328 = vrot.lane.b32.xlu0 %v10931_v10, %s20299_s23 }
 0xbf9   : > { %11330 = vrot.lane.b32.xlu1 %v18646_v19, %s20299_s23 }
 0xbfb   : > { %11097 = vrot.lane.b32.xlu0 %v18629_v48, %s12617_s29 }
 0xbfd   : > { %11099 = vrot.lane.b32.xlu1 %v18615_v54, %s12617_s29 }
 0xbff   : > { %11087 = vrot.lane.b32.xlu0 %v18556_v17, %s20100_s20 }
 0xc01   : > { %11208 = vrot.lane.b32.xlu1 %v18637_v59, %s12618_s28 }
 0xc03   : > { %11196 = vrot.lane.b32.xlu0 %v18562_v6, %s12619_s27  ;;  %v11480_v6 = vld [vmem:[%s19115_s6 + $0x60] sm:$0xff] }
 0xc05   : > { %11317 = vrot.lane.b32.xlu1 %v18646_v19, %s12620_s30 }
 0xc07   : > { %11085 = vrot.lane.b32.xlu0 %v18567_v13, %s20100_s20  ;;  %v11403_v58 = vpop.permute.xlu1 %11402  ;;  %v11478_v13 = vld [vmem:[%s19115_s6 + $0x50] sm:$0xff] }
 0xc08   : > { %11407 = vst.msk [vmem:[#allocation8 + $0x78] sm:$0xff] %vm11321_vm6, %v11403_v58 }
 0xc09   : > { %11206 = vrot.lane.b32.xlu1 %v18654_v32, %s12618_s28  ;;  %s20307_s28 = sld [smem:[#allocation232_spill]] }
 0xc0b   : > { %11194 = vrot.lane.b32.xlu0 %v18579_v24, %s12619_s27 }
 0xc0d   : > { %11315 = vrot.lane.b32.xlu1 %v10931_v10, %s12620_s30  ;;  %v11292_v53 = vpop.permute.xlu1 %11291 }
 0xc0e   : > { %11297 = vst.msk [vmem:[#allocation8 + $0x70] sm:$0xff] %vm11212_vm15, %v11292_v53 }
 0xc0f   : > { %11303 = vrot.lane.b32.xlu0 %v18595_v31, %s20101_s26  ;;  %v11465_v17 = vld [vmem:[#allocation8 + $0x78] sm:$0xff]  ;;  %s386_s27 = scalar_lea.vmem %s20307_s28, %s12228_s18 }
 0xc10   : > { %11605 = vmatpush1.msra.mxu0 %v11465_v17  ;;  %v11475_v31 = vld [vmem:[%s19115_s6 + $0x38] sm:$0xff] }
 0xc11   : > { %11305 = vrot.lane.b32.xlu1 %v18573_v7, %s20101_s26  ;;  %11606 = vmatprep.subr.mxu0 %v20300_v55 }
 0xc13   : > { %11555 = vperm.xlu0 %12423, %v11482_v47   ;;  %v11401_v34 = vpop.permute.xlu1 %11400 }
 0xc14   : > { %11406 = vst.msk [vmem:[#allocation8 + $0x70] sm:$0xff] %vm11321_vm6, %v11401_v34 }
 0xc15   : > { %v11052_v41 = vpop.permute.xlu0 %11051  ;;  %11414 = vrot.lane.b32.xlu1 %v18590_v60, %s12621_s9 }
 0xc16   : > { %11056 = vst.msk [vmem:[#allocation8 + $0x58] sm:$0xff] %vm10994_vm1, %v11052_v41 }
 0xc17   : > { %11545 = vperm.xlu0 %12423, %v11480_v6   ;;  %v11282_v45 = vpop.permute.xlu1 %11281  ;;  %v12003_v6 = vld [vmem:[%s20303_s24 + $0x8] sm:$0x3] }
 0xc18   : > { %11286 = vst.msk [vmem:[#allocation8 + $0x68] sm:$0xff] %vm11212_vm15, %v11282_v45 }
 0xc19   : > { %v11161_v57 = vpop.permute.xlu0 %11160  ;;  %11412 = vrot.lane.b32.xlu1 %v18601_v37, %s12621_s9  ;;  %v11473_v37 = vld [vmem:[%s19115_s6 + $0x28] sm:$0xff]  ;;  %s20302_s9 = sld [smem:[#allocation229_spill]] }
 0xc1a   : > { %11165 = vst.msk [vmem:[#allocation8 + $0x58] sm:$0xff] %vm11103_vm14, %v11161_v57 }
 0xc1b   : > { %11535 = vperm.xlu0 %12423, %v11478_v13   ;;  %v11391_v50 = vpop.permute.xlu1 %11390  ;;  %v11464_v7 = vld [vmem:[#allocation8 + $0x70] sm:$0xff] }
 0xc1c   : > { %11395 = vst.msk [vmem:[#allocation8 + $0x68] sm:$0xff] %vm11321_vm6, %v11391_v50  ;;  %11607 = vmatpush1.msra.mxu0 %v11464_v7 }
 0xc1d   : > { %v11050_v27 = vpop.permute.xlu0 %11049  ;;  %11550 = vperm.xlu1 %12544, %v11481_v23   ;;  %11608 = vmatprep.subr.mxu0 %v20300_v55 }
 0xc1e   : > { %11055 = vst.msk [vmem:[#allocation8 + $0x50] sm:$0xff] %vm10994_vm1, %v11050_v27 }
 0xc1f   : > { %11525 = vperm.xlu0 %12423, %v11476_v61   ;;  %v11280_v24 = vpop.permute.xlu1 %11279  ;;  %v11779_v28 = vld [vmem:[%s20302_s9 + $0x48] sm:$0xff]  ;;  %v11777_v52 = vld [vmem:[%s20302_s9 + $0x38] sm:$0xff]  ;;  %v11780_v48 = vld [vmem:[%s20302_s9 + $0x50] sm:$0xf] }
 0xc20   : > { %11285 = vst.msk [vmem:[#allocation8 + $0x60] sm:$0xff] %vm11212_vm15, %v11280_v24  ;;  %v11775_v62 = vld [vmem:[%s20302_s9 + $0x28] sm:$0xff]  ;;  %v11778_v2 = vld [vmem:[%s20302_s9 + $0x40] sm:$0xff]  ;;  %v11773_v26 = vld [vmem:[%s20302_s9 + $0x18] sm:$0xff] }
 0xc21   : > { %v11159_v18 = vpop.permute.xlu0 %11158  ;;  %11540 = vperm.xlu1 %12544, %v11479_v38   ;;  %v11776_v42 = vld [vmem:[%s20302_s9 + $0x30] sm:$0xff]  ;;  %v11771_v32 = vld [vmem:[%s20302_s9 + $0x8] sm:$0xff]  ;;  %v11774_v33 = vld [vmem:[%s20302_s9 + $0x20] sm:$0xff] }
 0xc22   : > { %11164 = vst.msk [vmem:[#allocation8 + $0x50] sm:$0xff] %vm11103_vm14, %v11159_v18  ;;  %v11772_v1 = vld [vmem:[%s20302_s9 + $0x10] sm:$0xff]  ;;  %v11770_v53 = vld [vmem:[%s20302_s9] sm:$0xff] }
 0xc23   : > { %11515 = vperm.xlu0 %12423, %v11474_v30   ;;  %v11389_v60 = vpop.permute.xlu1 %11388  ;;  %v11463_v20 = vld [vmem:[#allocation8 + $0x68] sm:$0xff] }
 0xc24   : > { %11394 = vst.msk [vmem:[#allocation8 + $0x60] sm:$0xff] %vm11321_vm6, %v11389_v60  ;;  %11609 = vmatpush1.msra.mxu0 %v11463_v20 }
 0xc25   : > { %v11040_v44 = vpop.permute.xlu0 %11039  ;;  %11530 = vperm.xlu1 %12544, %v11477_v46   ;;  %11610 = vmatprep.subr.mxu0 %v20300_v55 }
 0xc26   : > { %11044 = vst.msk [vmem:[#allocation8 + $0x48] sm:$0xff] %vm10994_vm1, %v11040_v44 }
 0xc27   : > { %11505 = vperm.xlu0 %12423, %v11472_v39   ;;  %v11270_v11 = vpop.permute.xlu1 %11269 }
 0xc28   : > { %11274 = vst.msk [vmem:[#allocation8 + $0x58] sm:$0xff] %vm11212_vm15, %v11270_v11 }
 0xc29   : > { %v11149_v16 = vpop.permute.xlu0 %11148  ;;  %11520 = vperm.xlu1 %12544, %v11475_v31  }
 0xc2a   : > { %11153 = vst.msk [vmem:[#allocation8 + $0x48] sm:$0xff] %vm11103_vm14, %v11149_v16 }
 0xc2b   : > { %11495 = vperm.xlu0 %12423, %v11470_v9   ;;  %v11379_v51 = vpop.permute.xlu1 %11378  ;;  %v11462_v3 = vld [vmem:[#allocation8 + $0x60] sm:$0xff] }
 0xc2c   : > { %11383 = vst.msk [vmem:[#allocation8 + $0x58] sm:$0xff] %vm11321_vm6, %v11379_v51  ;;  %11611 = vmatpush1.msra.mxu0 %v11462_v3 }
 0xc2d   : > { %v11038_v22 = vpop.permute.xlu0 %11037  ;;  %11510 = vperm.xlu1 %12544, %v11473_v37   ;;  %11612 = vmatprep.subr.mxu0 %v20300_v55 }
 0xc2e   : > { %11043 = vst.msk [vmem:[#allocation8 + $0x40] sm:$0xff] %vm10994_vm1, %v11038_v22 }
 0xc2f   : > { %11485 = vperm.xlu0 %12423, %v11468_v4   ;;  %v11268_v49 = vpop.permute.xlu1 %11267 }
 0xc30   : > { %11273 = vst.msk [vmem:[#allocation8 + $0x50] sm:$0xff] %vm11212_vm15, %v11268_v49 }
 0xc31   : > { %v11147_v54 = vpop.permute.xlu0 %11146  ;;  %11500 = vperm.xlu1 %12544, %v11471_v63  }
 0xc32   : > { %11152 = vst.msk [vmem:[#allocation8 + $0x40] sm:$0xff] %vm11103_vm14, %v11147_v54 }
 0xc33   : > { %11828 = vperm.xlu0 %12423, %v11779_v28   ;;  %v11377_v0 = vpop.permute.xlu1 %11376  ;;  %v11461_v12 = vld [vmem:[#allocation8 + $0x58] sm:$0xff] }
 0xc34   : > { %11382 = vst.msk [vmem:[#allocation8 + $0x50] sm:$0xff] %vm11321_vm6, %v11377_v0  ;;  %11613 = vmatpush1.msra.mxu0 %v11461_v12 }
 0xc35   : > { %v11028_v43 = vpop.permute.xlu0 %11027  ;;  %11490 = vperm.xlu1 %12544, %v11469_v15   ;;  %11614 = vmatprep.subr.mxu0 %v20300_v55 }
 0xc36   : > { %11032 = vst.msk [vmem:[#allocation8 + $0x38] sm:$0xff] %vm10994_vm1, %v11028_v43 }
 0xc37   : > { %11818 = vperm.xlu0 %12423, %v11777_v52   ;;  %v11258_v35 = vpop.permute.xlu1 %11257 }
 0xc38   : > { %11262 = vst.msk [vmem:[#allocation8 + $0x48] sm:$0xff] %vm11212_vm15, %v11258_v35  ;;  %v11420_v35 = vld [vmem:[%s20301_s10] sm:$0xff] }
 0xc39   : > { %v11137_v21 = vpop.permute.xlu0 %11136  ;;  %11833 = vperm.xlu1 %12544, %v11780_v48  }
 0xc3a   : > { %11141 = vst.msk [vmem:[#allocation8 + $0x38] sm:$0xff] %vm11103_vm14, %v11137_v21  ;;  %v11423_v21 = vld [vmem:[%s20301_s10 + $0x18] sm:$0xff] }
 0xc3b   : > { %11808 = vperm.xlu0 %12423, %v11775_v62   ;;  %v11367_v59 = vpop.permute.xlu1 %11366  ;;  %v11460_v14 = vld [vmem:[#allocation8 + $0x50] sm:$0xff] }
 0xc3c   : > { %11371 = vst.msk [vmem:[#allocation8 + $0x48] sm:$0xff] %vm11321_vm6, %v11367_v59  ;;  %11615 = vmatpush1.msra.mxu0 %v11460_v14  ;;  %v11425_v59 = vld [vmem:[%s20301_s10 + $0x28] sm:$0xff]  ;;  %v11424_v14 = vld [vmem:[%s20301_s10 + $0x20] sm:$0xff] }
 0xc3d   : > { %v11026_v19 = vpop.permute.xlu0 %11025  ;;  %11823 = vperm.xlu1 %12544, %v11778_v2   ;;  %11616 = vmatprep.subr.mxu0 %v20300_v55  ;;  %v11422_v2 = vld [vmem:[%s20301_s10 + $0x10] sm:$0xff] }
 0xc3e   : > { %11031 = vst.msk [vmem:[#allocation8 + $0x30] sm:$0xff] %vm10994_vm1, %v11026_v19  ;;  %v11426_v19 = vld [vmem:[%s20301_s10 + $0x30] sm:$0xff] }
 0xc3f   : > { %11798 = vperm.xlu0 %12423, %v11773_v26   ;;  %v11256_v56 = vpop.permute.xlu1 %11255  ;;  %v11427_v26 = vld [vmem:[%s20301_s10 + $0x38] sm:$0xff] }
 0xc40   : > { %11261 = vst.msk [vmem:[#allocation8 + $0x40] sm:$0xff] %vm11212_vm15, %v11256_v56  ;;  %v11428_v56 = vld [vmem:[%s20301_s10 + $0x40] sm:$0xff] }
 0xc41   : > { %v11135_v25 = vpop.permute.xlu0 %11134  ;;  %11813 = vperm.xlu1 %12544, %v11776_v42   ;;  %v11429_v42 = vld [vmem:[%s20301_s10 + $0x48] sm:$0xff] }
 0xc42   : > { %11140 = vst.msk [vmem:[#allocation8 + $0x30] sm:$0xff] %vm11103_vm14, %v11135_v25  ;;  %v11430_v25 = vld [vmem:[%s20301_s10 + $0x50] sm:$0xff] }
 0xc43   : > { %11788 = vperm.xlu0 %12423, %v11771_v32   ;;  %v11365_v10 = vpop.permute.xlu1 %11364  ;;  %v11459_v40 = vld [vmem:[#allocation8 + $0x48] sm:$0xff]  ;;  %v11431_v32 = vld [vmem:[%s20301_s10 + $0x58] sm:$0xff] }
 0xc44   : > { %11370 = vst.msk [vmem:[#allocation8 + $0x40] sm:$0xff] %vm11321_vm6, %v11365_v10  ;;  %11617 = vmatpush1.msra.mxu0 %v11459_v40  ;;  %v11432_v10 = vld [vmem:[%s20301_s10 + $0x60] sm:$0xff]  ;;  %v11435_v40 = vld [vmem:[%s20301_s10 + $0x78] sm:$0xff] }
 0xc45   : > { %v11016_v5 = vpop.permute.xlu0 %11015  ;;  %11803 = vperm.xlu1 %12544, %v11774_v33   ;;  %11618 = vmatprep.subr.mxu0 %v20300_v55  ;;  %v11433_v33 = vld [vmem:[%s20301_s10 + $0x68] sm:$0xff] }
 0xc46   : > { %11020 = vst.msk [vmem:[#allocation8 + $0x28] sm:$0xff] %vm10994_vm1, %v11016_v5  ;;  %v11437_v5 = vld [vmem:[%s20301_s10 + $0x88] sm:$0xff] }
 0xc47   : > { %12006 = vperm.xlu0 %12423, %v12002_v8   ;;  %v11246_v36 = vpop.permute.xlu1 %11245  ;;  %v11434_v8 = vld [vmem:[%s20301_s10 + $0x70] sm:$0xff] }
 0xc48   : > { %11250 = vst.msk [vmem:[#allocation8 + $0x38] sm:$0xff] %vm11212_vm15, %v11246_v36  ;;  %v11439_v36 = vld [vmem:[%s20301_s10 + $0x98] sm:$0xff] }
 0xc49   : > { %v11125_v58 = vpop.permute.xlu0 %11124  ;;  %11793 = vperm.xlu1 %12544, %v11772_v1   ;;  %v11436_v1 = vld [vmem:[%s20301_s10 + $0x80] sm:$0xff] }
 0xc4a   : > { %11129 = vst.msk [vmem:[#allocation8 + $0x28] sm:$0xff] %vm11103_vm14, %v11125_v58  ;;  %v11438_v58 = vld [vmem:[%s20301_s10 + $0x90] sm:$0xff] }
 0xc4b   : > { %v11355_v17 = vpop.permute.xlu1 %11354  ;;  %v11458_v47 = vld [vmem:[#allocation8 + $0x40] sm:$0xff] }
 0xc4c   : > { %11359 = vst.msk [vmem:[#allocation8 + $0x38] sm:$0xff] %vm11321_vm6, %v11355_v17  ;;  %11619 = vmatpush1.msra.mxu0 %v11458_v47  ;;  %v11440_v17 = vld [vmem:[%s20301_s10 + $0xa0] sm:$0xff]  ;;  %v11443_v47 = vld [vmem:[%s20301_s10 + $0xb8] sm:$0xff] }
 0xc4d   : > { %v11014_v34 = vpop.permute.xlu0 %11013  ;;  %11783 = vperm.xlu1 %12544, %v11770_v53   ;;  %11620 = vmatprep.subr.mxu0 %v20300_v55  ;;  %v11441_v53 = vld [vmem:[%s20301_s10 + $0xa8] sm:$0xff] }
 0xc4e   : > { %11019 = vst.msk [vmem:[#allocation8 + $0x20] sm:$0xff] %vm10994_vm1, %v11014_v34  ;;  %v11442_v34 = vld [vmem:[%s20301_s10 + $0xb0] sm:$0xff] }
 0xc4f   : > { %v11244_v29 = vpop.permute.xlu1 %11243 }
 0xc50   : > { %11249 = vst.msk [vmem:[#allocation8 + $0x30] sm:$0xff] %vm11212_vm15, %v11244_v29  ;;  %v11444_v29 = vld [vmem:[%s20301_s10 + $0xc0] sm:$0xff] }
 0xc51   : > { %v11123_v41 = vpop.permute.xlu0 %11122  ;;  %12011 = vperm.xlu1 %12544, %v12003_v6   ;;  %v11445_v6 = vld [vmem:[%s20301_s10 + $0xc8] sm:$0xff] }
 0xc52   : > { %11128 = vst.msk [vmem:[#allocation8 + $0x20] sm:$0xff] %vm11103_vm14, %v11123_v41  ;;  %v11447_v41 = vld [vmem:[%s20301_s10 + $0xd8] sm:$0xff] }
 0xc53   : > { %v11353_v45 = vpop.permute.xlu1 %11352  ;;  %v11457_v13 = vld [vmem:[#allocation8 + $0x38] sm:$0xff] }
 0xc54   : > { %11358 = vst.msk [vmem:[#allocation8 + $0x30] sm:$0xff] %vm11321_vm6, %v11353_v45  ;;  %11621 = vmatpush1.msra.mxu0 %v11457_v13  ;;  %v11446_v45 = vld [vmem:[%s20301_s10 + $0xd0] sm:$0xff]  ;;  %v11449_v13 = vld [vmem:[%s20301_s10 + $0xe8] sm:$0xff] }
 0xc55   : > { %v11004_v57 = vpop.permute.xlu0 %11003  ;;  %11622 = vmatprep.subr.mxu0 %v20300_v55 }
 0xc56   : > { %11008 = vst.msk [vmem:[#allocation8 + $0x18] sm:$0xff] %vm10994_vm1, %v11004_v57  ;;  %v11448_v57 = vld [vmem:[%s20301_s10 + $0xe0] sm:$0xff] }
 0xc57   : > { %v11234_v23 = vpop.permute.xlu1 %11233 }
 0xc58   : > { %11238 = vst.msk [vmem:[#allocation8 + $0x28] sm:$0xff] %vm11212_vm15, %v11234_v23 }
 0xc59   : > { %v11113_v50 = vpop.permute.xlu0 %11112 }
 0xc5a   : > { %11117 = vst.msk [vmem:[#allocation8 + $0x18] sm:$0xff] %vm11103_vm14, %v11113_v50 }
 0xc5b   : > { %v11343_v7 = vpop.permute.xlu1 %11342  ;;  %v11456_v61 = vld [vmem:[#allocation8 + $0x30] sm:$0xff] }
 0xc5c   : > { %11347 = vst.msk [vmem:[#allocation8 + $0x28] sm:$0xff] %vm11321_vm6, %v11343_v7  ;;  %11623 = vmatpush1.msra.mxu0 %v11456_v61 }
 0xc5d   : > { %v11002_v27 = vpop.permute.xlu0 %11001  ;;  %11624 = vmatprep.subr.mxu0 %v20300_v55 }
 0xc5e   : > { %11007 = vst.msk [vmem:[#allocation8 + $0x10] sm:$0xff] %vm10994_vm1, %v11002_v27 }
 0xc5f   : > { %v11232_v38 = vpop.permute.xlu1 %11231 }
 0xc60   : > { %11237 = vst.msk [vmem:[#allocation8 + $0x20] sm:$0xff] %vm11212_vm15, %v11232_v38 }
 0xc61   : > { %v11111_v24 = vpop.permute.xlu0 %11110 }
 0xc62   : > { %11116 = vst.msk [vmem:[#allocation8 + $0x10] sm:$0xff] %vm11103_vm14, %v11111_v24 }
 0xc63   : > { %v11341_v30 = vpop.permute.xlu1 %11340  ;;  %v11455_v18 = vld [vmem:[#allocation8 + $0x28] sm:$0xff] }
 0xc64   : > { %11346 = vst.msk [vmem:[#allocation8 + $0x20] sm:$0xff] %vm11321_vm6, %v11341_v30  ;;  %11625 = vmatpush1.msra.mxu0 %v11455_v18 }
 0xc65   : > { %v11220_v46 = vpop.permute.xlu0 %11219  ;;  %11626 = vmatprep.subr.mxu0 %v20300_v55 }
 0xc66   : > { %11225 = vst.msk [vmem:[#allocation8 + $0x10] sm:$0xff] %vm11212_vm15, %v11220_v46 }
 0xc67   : > { %v11222_v60 = vpop.permute.xlu1 %11221 }
 0xc68   : > { %11226 = vst.msk [vmem:[#allocation8 + $0x18] sm:$0xff] %vm11212_vm15, %v11222_v60 }
 0xc69   : > { %v11329_v20 = vpop.permute.xlu0 %11328 }
 0xc6a   : > { %11334 = vst.msk [vmem:[#allocation8 + $0x10] sm:$0xff] %vm11321_vm6, %v11329_v20 }
 0xc6b   : > { %v11331_v39 = vpop.permute.xlu1 %11330  ;;  %v11454_v44 = vld [vmem:[#allocation8 + $0x20] sm:$0xff] }
 0xc6c   : > { %11335 = vst.msk [vmem:[#allocation8 + $0x18] sm:$0xff] %vm11321_vm6, %v11331_v39  ;;  %11627 = vmatpush1.msra.mxu0 %v11454_v44 }
 0xc6d   : > { %v11098_v31 = vpop.permute.xlu0 %11097  ;;  %11628 = vmatprep.subr.mxu0 %v20300_v55 }
 0xc6e   : > { %11104 = vst.msk [vmem:[#allocation8] sm:$0xff] %vm11103_vm14, %v11098_v31 }
 0xc6f   : > { %v11100_v11 = vpop.permute.xlu1 %11099 }
 0xc70   : > { %11105 = vst.msk [vmem:[#allocation8 + $0x8] sm:$0xff] %vm11103_vm14, %v11100_v11 }
 0xc71   : > { %v11088_v9 = vpop.permute.xlu0 %11087  ;;  %v11452_v3 = vld [vmem:[#allocation8 + $0x10] sm:$0xff] }
 0xc72   : > { %11092 = vst.msk [vmem:[#allocation8 + $0x88] sm:$0xff] %vm10994_vm1, %v11088_v9 }
 0xc73   : > { %v11209_v16 = vpop.permute.xlu1 %11208  ;;  %v11453_v37 = vld [vmem:[#allocation8 + $0x18] sm:$0xff] }
 0xc74   : > { %11214 = vst.msk [vmem:[#allocation8 + $0x8] sm:$0xff] %vm11212_vm15, %v11209_v16  ;;  %11629 = vmatpush1.msra.mxu0 %v11453_v37 }
 0xc75   : > { %v11197_v51 = vpop.permute.xlu0 %11196  ;;  %11630 = vmatprep.subr.mxu0 %v20300_v55 }
 0xc76   : > { %11201 = vst.msk [vmem:[#allocation8 + $0x88] sm:$0xff] %vm11103_vm14, %v11197_v51  ;;  %11631 = vmatpush1.msra.mxu0 %v11452_v3 }
 0xc77   : > { %v11318_v4 = vpop.permute.xlu1 %11317  ;;  %11632 = vmatprep.subr.mxu0 %v20300_v55 }
 0xc78   : > { %11323 = vst.msk [vmem:[#allocation8 + $0x8] sm:$0xff] %vm11321_vm6, %v11318_v4 }
 0xc79   : > { %v11086_v22 = vpop.permute.xlu0 %11085 }
 0xc7a   : > { %11091 = vst.msk [vmem:[#allocation8 + $0x80] sm:$0xff] %vm10994_vm1, %v11086_v22 }
 0xc7b   : > { %v11207_v63 = vpop.permute.xlu1 %11206 }
 0xc7c   : > { %11213 = vst.msk [vmem:[#allocation8] sm:$0xff] %vm11212_vm15, %v11207_v63 }
 0xc7d   : > { %v11195_v49 = vpop.permute.xlu0 %11194 }
 0xc7e   : > { %11200 = vst.msk [vmem:[#allocation8 + $0x80] sm:$0xff] %vm11103_vm14, %v11195_v49 }
 0xc7f   : > { %v11316_v28 = vpop.permute.xlu1 %11315  ;;  %v11451_v54 = vld [vmem:[#allocation8 + $0x8] sm:$0xff] }
 0xc80   : > { %11322 = vst.msk [vmem:[#allocation8] sm:$0xff] %vm11321_vm6, %v11316_v28  ;;  %11633 = vmatpush1.msra.mxu0 %v11451_v54 }
 0xc81   : > { %v11304_v15 = vpop.permute.xlu0 %11303  ;;  %11634 = vmatprep.subr.mxu0 %v20300_v55 }
 0xc82   : > { %11309 = vst.msk [vmem:[#allocation8 + $0x80] sm:$0xff] %vm11212_vm15, %v11304_v15 }
 0xc83   : > { %v11306_v0 = vpop.permute.xlu1 %11305 }
 0xc84   : > { %11310 = vst.msk [vmem:[#allocation8 + $0x88] sm:$0xff] %vm11212_vm15, %v11306_v0 }
 0xc87   : > { %v11415_v12 = vpop.permute.xlu1 %11414  ;;  %v11450_v52 = vld [vmem:[#allocation8] sm:$0xff] }
 0xc88   : > { %11419 = vst.msk [vmem:[#allocation8 + $0x88] sm:$0xff] %vm11321_vm6, %v11415_v12  ;;  %11635 = vmatpush1.msra.mxu0 %v11450_v52 }
 0xc89   : > { %11664 = vmatprep.subr.mxu0 %v20300_v55 }
 0xc8b   : > { %v11413_v43 = vpop.permute.xlu1 %11412 }
 0xc8c   : > { %11418 = vst.msk [vmem:[#allocation8 + $0x80] sm:$0xff] %vm11321_vm6, %v11413_v43 }
 0xc8e   : > { %v11556_v3 = vpop.permute.xlu0 %11555 }
 0xc8f   : > { %v11467_v48 = vld [vmem:[#allocation8 + $0x88] sm:$0xff] }
 0xc90   : > { %11665 = vmatpush2.msra.mxu0 %v11467_v48 }
 0xc91   : > { %11666 = vmatprep.subr.mxu0 %v20300_v55 }
 0xc92   : > { %v11546_v28 = vpop.permute.xlu0 %11545 }
 0xc93   : > { %v11466_v62 = vld [vmem:[#allocation8 + $0x80] sm:$0xff] }
 0xc94   : > { %11667 = vmatpush2.msra.mxu0 %v11466_v62 }
 0xc95   : > { %11669 = vmatmul.mubr.f32.vlgmr.msra.gmra.mxu0 %v11420_v35 }
 0xc96   : > { %12198 = vmatprep.mubr.msk.f32.mxu0 %vm11558_vm11, %v11423_v21  ;;  %v11536_v52 = vpop.permute.xlu0 %11535 }
 0xc98   : > { %v11551_v63 = vpop.permute.xlu1 %11550 }
 0xc99   : > { %11674 = vmatmul.mubr.f32.gmra.mxu0 %v11422_v2 }
 0xc9a   : > { %12199 = vmatprep.mubr.msk.f32.mxu0 %vm11558_vm11, %v11425_v59  ;;  %v11526_v59 = vpop.permute.xlu0 %11525 }
 0xc9c   : > { %v11541_v0 = vpop.permute.xlu1 %11540 }
 0xc9d   : > { %11679 = vmatmul.mubr.f32.gmra.mxu0 %v11424_v14 }
 0xc9e   : > { %12200 = vmatprep.mubr.msk.f32.mxu0 %vm11558_vm11, %v11427_v26 }
 0xca0   : > { %v11531_v35 = vpop.permute.xlu1 %11530 }
 0xca1   : > { %11684 = vmatmul.mubr.f32.gmra.mxu0 %v11426_v19 }
 0xca2   : > { %12201 = vmatprep.mubr.msk.f32.mxu0 %vm11558_vm11, %v11429_v42 }
 0xca5   : > { %11689 = vmatmul.mubr.f32.gmra.mxu0 %v11428_v56 }
 0xca6   : > { %12202 = vmatprep.mubr.msk.f32.mxu0 %vm11558_vm11, %v11431_v32  ;;  %v11521_v32 = vpop.permute.xlu1 %11520 }
 0xca9   : > { %11694 = vmatmul.mubr.f32.gmra.mxu0 %v11430_v25 }
 0xcaa   : > { %12203 = vmatprep.mubr.msk.f32.mxu0 %vm11558_vm11, %v11433_v33 }
 0xcad   : > { %11699 = vmatmul.mubr.f32.gmra.mxu0 %v11432_v10  ;;  %v11516_v10 = vpop.permute.xlu0 %11515 }
 0xcae   : > { %12204 = vmatprep.mubr.msk.f32.mxu0 %vm11558_vm11, %v11435_v40 }
 0xcb1   : > { %11704 = vmatmul.mubr.f32.gmra.mxu0 %v11434_v8 }
 0xcb2   : > { %12205 = vmatprep.mubr.msk.f32.mxu0 %vm11558_vm11, %v11437_v5 }
 0xcb5   : > { %11709 = vmatmul.mubr.f32.gmra.mxu0 %v11436_v1 }
 0xcb6   : > { %12206 = vmatprep.mubr.msk.f32.mxu0 %vm11558_vm11, %v11439_v36  ;;  %v11511_v36 = vpop.permute.xlu1 %11510 }
 0xcb9   : > { %11714 = vmatmul.mubr.f32.gmra.mxu0 %v11438_v58 }
 0xcba   : > { %12207 = vmatprep.mubr.msk.f32.mxu0 %vm11558_vm11, %v11441_v53 }
 0xcbd   : > { %11719 = vmatmul.mubr.f32.gmra.mxu0 %v11440_v17  ;;  %v11506_v17 = vpop.permute.xlu0 %11505 }
 0xcbe   : > { %12208 = vmatprep.mubr.msk.f32.mxu0 %vm11558_vm11, %v11443_v47 }
 0xcc1   : > { %11724 = vmatmul.mubr.f32.gmra.mxu0 %v11442_v34 }
 0xcc2   : > { %12209 = vmatprep.mubr.msk.f32.mxu0 %vm11558_vm11, %v11445_v6 }
 0xcc5   : > { %11729 = vmatmul.mubr.f32.gmra.mxu0 %v11444_v29 }
 0xcc6   : > { %12210 = vmatprep.mubr.msk.f32.mxu0 %vm11558_vm11, %v11447_v41  ;;  %v11501_v41 = vpop.permute.xlu1 %11500 }
 0xcc9   : > { %11734 = vmatmul.mubr.f32.gmra.mxu0 %v11446_v45 }
 0xcca   : > { %12211 = vmatprep.mubr.msk.f32.mxu0 %vm11558_vm11, %v11449_v13 }
 0xccd   : > { %11739 = vmatmul.mubr.f32.gmra.mxu0 %v11448_v57  ;;  %v11496_v57 = vpop.permute.xlu0 %11495 }
 0xd55   : > { %v18998_v23 = vpop.f32.mrf.mxu0 }
 0xd57   : > { %v11672_v50 = vpop.f32.mrf.mxu0 }
 0xd59   : > { %v19000_v7 = vpop.f32.mrf.mxu0 }
 0xd5b   : > { %v11677_v61 = vpop.f32.mrf.mxu0 }
 0xd5d   : > { %v19002_v27 = vpop.f32.mrf.mxu0 }
 0xd5f   : > { %v11682_v38 = vpop.f32.mrf.mxu0 }
 0xd60   : > { %v11681_v38 = vadd.f32 %v19002_v27, %v11496_v57 }
 0xd61   : > { %v19004_v24 = vpop.f32.mrf.mxu0 }
 0xd62   : > { %v11686_v50 = vadd.f32 %v19004_v24, %v11501_v41 }
 0xd63   : > { %v11687_v30 = vpop.f32.mrf.mxu0 }
 0xd65   : > { %v19006_v18 = vpop.f32.mrf.mxu0 }
 0xd66   : > { %v11691_v45 = vadd.f32 %v19006_v18, %v11506_v17 }
 0xd67   : > { %v11692_v46 = vpop.f32.mrf.mxu0 }
 0xd68   : > { %v11748_v30 = vmax.f32 %v11691_v45, 0.0  ;;  %v11491_v46 = vpop.permute.xlu1 %11490 }
 0xd69   : > { %v11695_v60 = vpop.f32.mrf.mxu0  ;;  %v11676_v18 = vadd.f32 %v19000_v7, %v11491_v46  ;;  %v11759_v7 = vld [vmem:[%s20304_s2] sm:$0xff] }
 0xd6a   : > { %v11696_v6 = vadd.f32 %v11695_v60, %v11511_v36  ;;  %v11747_v60 = vmax.f32 %v11686_v50, 0.0 }
 0xd6b   : > { %v11697_v20 = vpop.f32.mrf.mxu0 }
 0xd6c   : > { %v11749_v61 = vmax.f32 %v11696_v6, 0.0  ;;  %v11486_v20 = vpop.permute.xlu0 %11485 }
 0xd6d   : > { %v11700_v39 = vpop.f32.mrf.mxu0  ;;  %v11671_v24 = vadd.f32 %v18998_v23, %v11486_v20  ;;  %v11760_v23 = vld [vmem:[%s20304_s2 + $0x8] sm:$0xff] }
 0xd6e   : > { %v11701_v47 = vadd.f32 %v11700_v39, %v11516_v10  ;;  %v11746_v39 = vmax.f32 %v11681_v38, 0.0 }
 0xd6f   : > { %v11702_v44 = vpop.f32.mrf.mxu0  ;;  %v11744_v27 = vmax.f32 %v11671_v24, 0.0 }
 0xd70   : > { %v11750_v13 = vmax.f32 %v11701_v47, 0.0  ;;  %v11745_v44 = vmax.f32 %v11676_v18, 0.0 }
 0xd71   : > { %v11705_v31 = vpop.f32.mrf.mxu0 }
 0xd72   : > { %v11706_v58 = vadd.f32 %v11705_v31, %v11521_v32  ;;  %v11761_v31 = vld [vmem:[%s20304_s2 + $0x10] sm:$0xff] }
 0xd73   : > { %v11707_v11 = vpop.f32.mrf.mxu0 }
 0xd74   : > { %v11751_v29 = vmax.f32 %v11706_v58, 0.0  ;;  %v11762_v11 = vld [vmem:[%s20304_s2 + $0x18] sm:$0xff] }
 0xd75   : > { %v11710_v9 = vpop.f32.mrf.mxu0 }
 0xd76   : > { %v11711_v5 = vadd.f32 %v11710_v9, %v11526_v59  ;;  %v11763_v9 = vld [vmem:[%s20304_s2 + $0x20] sm:$0xff]  ;;  %v11834_v59 = vpop.permute.xlu1 %11833 }
 0xd77   : > { %v11712_v16 = vpop.f32.mrf.mxu0 }
 0xd78   : > { %v11752_v34 = vmax.f32 %v11711_v5, 0.0  ;;  %v11764_v16 = vld [vmem:[%s20304_s2 + $0x28] sm:$0xff] }
 0xd79   : > { %v11715_v37 = vpop.f32.mrf.mxu0 }
 0xd7a   : > { %v11716_v40 = vadd.f32 %v11715_v37, %v11531_v35  ;;  %v11765_v37 = vld [vmem:[%s20304_s2 + $0x30] sm:$0xff] }
 0xd7b   : > { %v11717_v51 = vpop.f32.mrf.mxu0 }
 0xd7c   : > { %v11753_v53 = vmax.f32 %v11716_v40, 0.0  ;;  %v11766_v51 = vld [vmem:[%s20304_s2 + $0x38] sm:$0xff] }
 0xd7d   : > { %v11720_v4 = vpop.f32.mrf.mxu0 }
 0xd7e   : > { %v11721_v25 = vadd.f32 %v11720_v4, %v11536_v52  ;;  %v11768_v4 = vld [vmem:[%s20304_s2 + $0x48] sm:$0xff] }
 0xd7f   : > { %v11722_v22 = vpop.f32.mrf.mxu0 }
 0xd80   : > { %v11754_v1 = vmax.f32 %v11721_v25, 0.0  ;;  %v11769_v22 = vld [vmem:[%s20304_s2 + $0x50] sm:$0xf] }
 0xd81   : > { %v11725_v49 = vpop.f32.mrf.mxu0 }
 0xd82   : > { %v11726_v42 = vadd.f32 %v11725_v49, %v11541_v0 }
 0xd83   : > { %v11727_v54 = vpop.f32.mrf.mxu0 }
 0xd84   : > { %v11755_v8 = vmax.f32 %v11726_v42, 0.0 }
 0xd85   : > { %v11730_v15 = vpop.f32.mrf.mxu0 }
 0xd86   : > { %v11731_v26 = vadd.f32 %v11730_v15, %v11546_v28 }
 0xd87   : > { %v11732_v12 = vpop.f32.mrf.mxu0 }
 0xd88   : > { %v11756_v33 = vmax.f32 %v11731_v26, 0.0 }
 0xd89   : > { %v11735_v43 = vpop.f32.mrf.mxu0 }
 0xd8a   : > { %v11736_v21 = vadd.f32 %v11735_v43, %v11551_v63  ;;  %v12000_v63 = vld [vmem:[%s20305_s15] sm:$0xff] }
 0xd8b   : > { %v11737_v48 = vpop.f32.mrf.mxu0 }
 0xd8c   : > { %v11757_v56 = vmax.f32 %v11736_v21, 0.0 }
 0xd8d   : > { %v11740_v62 = vpop.f32.mrf.mxu0 }
 0xd8e   : > { %v11741_v2 = vadd.f32 %v11740_v62, %v11556_v3  ;;  %v11767_v3 = vld [vmem:[%s20304_s2 + $0x40] sm:$0xff] }
 0xd8f   : > { %v11742_v14 = vpop.f32.mrf.mxu0 }
 0xd90   : > { %v11758_v19 = vmax.f32 %v11741_v2, 0.0 }
 0xd92   : > { %12269 = vmatpush3.msra.mxu1 %v11758_v19  ;;  %v11829_v19 = vpop.permute.xlu0 %11828 }
 0xd93   : > { %12270 = vmatprep.subr.mxu1 %v20300_v55 }
 0xd94   : > { %12271 = vmatpush3.msra.mxu1 %v11757_v56  ;;  %v11824_v56 = vpop.permute.xlu1 %11823 }
 0xd95   : > { %12272 = vmatprep.subr.mxu1 %v20300_v55 }
 0xd96   : > { %12273 = vmatpush3.msra.mxu1 %v11756_v33  ;;  %v11819_v33 = vpop.permute.xlu0 %11818 }
 0xd97   : > { %12274 = vmatprep.subr.mxu1 %v20300_v55 }
 0xd98   : > { %12275 = vmatpush3.msra.mxu1 %v11755_v8  ;;  %v11814_v40 = vpop.permute.xlu1 %11813 }
 0xd99   : > { %12276 = vmatprep.subr.mxu1 %v20300_v55 }
 0xd9a   : > { %12277 = vmatpush3.msra.mxu1 %v11754_v1  ;;  %v11809_v17 = vpop.permute.xlu0 %11808 }
 0xd9b   : > { %12278 = vmatprep.subr.mxu1 %v20300_v55 }
 0xd9c   : > { %12279 = vmatpush3.msra.mxu1 %v11753_v53  ;;  %v11804_v6 = vpop.permute.xlu1 %11803 }
 0xd9d   : > { %12280 = vmatprep.subr.mxu1 %v20300_v55 }
 0xd9e   : > { %12281 = vmatpush3.msra.mxu1 %v11752_v34  ;;  %v11799_v57 = vpop.permute.xlu0 %11798 }
 0xd9f   : > { %12282 = vmatprep.subr.mxu1 %v20300_v55 }
 0xda0   : > { %12283 = vmatpush3.msra.mxu1 %v11751_v29  ;;  %v11794_v38 = vpop.permute.xlu1 %11793 }
 0xda1   : > { %12284 = vmatprep.subr.mxu1 %v20300_v55 }
 0xda2   : > { %12285 = vmatpush3.msra.mxu1 %v11750_v13  ;;  %v11789_v20 = vpop.permute.xlu0 %11788 }
 0xda3   : > { %12286 = vmatprep.subr.mxu1 %v20300_v55 }
 0xda4   : > { %12287 = vmatpush3.msra.mxu1 %v11749_v61 }
 0xda5   : > { %12288 = vmatprep.subr.mxu1 %v20300_v55 }
 0xda6   : > { %12289 = vmatpush3.msra.mxu1 %v11748_v30 }
 0xda7   : > { %12290 = vmatprep.subr.mxu1 %v20300_v55 }
 0xda8   : > { %12291 = vmatpush3.msra.mxu1 %v11747_v60 }
 0xda9   : > { %12292 = vmatprep.subr.mxu1 %v20300_v55 }
 0xdaa   : > { %12293 = vmatpush3.msra.mxu1 %v11746_v39 }
 0xdab   : > { %12294 = vmatprep.subr.mxu1 %v20300_v55 }
 0xdac   : > { %12295 = vmatpush3.msra.mxu1 %v11745_v44  ;;  %v11784_v44 = vpop.permute.xlu1 %11783 }
 0xdad   : > { %12296 = vmatprep.subr.mxu1 %v20300_v55 }
 0xdae   : > { %12297 = vmatpush3.msra.mxu1 %v11744_v27 }
 0xdaf   : > { %12299 = vmatmul.mubr.msk.f32.vlgmr.msra.gmra.mxu1 %vm6042_vm10, %v11759_v7 }
 0xdb0   : > { %12301 = vmatprep.mubr.msk.f32.mxu1 %vm12622_vm4, %v20300_v55 }
 0xdb3   : > { %12302 = vmatmul.mubr.msk.f32.gmra.mxu1 %vm6042_vm10, %v11760_v23 }
 0xdb4   : > { %12304 = vmatprep.mubr.msk.f32.mxu1 %vm12622_vm4, %v20300_v55 }
 0xdb7   : > { %12305 = vmatmul.mubr.msk.f32.gmra.mxu1 %vm6042_vm10, %v11761_v31 }
 0xdb8   : > { %12307 = vmatprep.mubr.msk.f32.mxu1 %vm12622_vm4, %v20300_v55 }
 0xdbb   : > { %12308 = vmatmul.mubr.msk.f32.gmra.mxu1 %vm6042_vm10, %v11762_v11  ;;  %v12001_v11 = vld [vmem:[%s20305_s15 + $0x8] sm:$0x3] }
 0xdbc   : > { %12310 = vmatprep.mubr.msk.f32.mxu1 %vm12622_vm4, %v20300_v55 }
 0xdbf   : > { %12311 = vmatmul.mubr.msk.f32.gmra.mxu1 %vm6042_vm10, %v11763_v9  ;;  %v12012_v9 = vpop.permute.xlu1 %12011 }
 0xdc0   : > { %12313 = vmatprep.mubr.msk.f32.mxu1 %vm12622_vm4, %v20300_v55 }
 0xdc3   : > { %12314 = vmatmul.mubr.msk.f32.gmra.mxu1 %vm6042_vm10, %v11764_v16 }
 0xdc4   : > { %12316 = vmatprep.mubr.msk.f32.mxu1 %vm12622_vm4, %v20300_v55 }
 0xdc7   : > { %12317 = vmatmul.mubr.msk.f32.gmra.mxu1 %vm6042_vm10, %v11765_v37 }
 0xdc8   : > { %12319 = vmatprep.mubr.msk.f32.mxu1 %vm12622_vm4, %v20300_v55 }
 0xdcb   : > { %12320 = vmatmul.mubr.msk.f32.gmra.mxu1 %vm6042_vm10, %v11766_v51  ;;  %v12007_v51 = vpop.permute.xlu0 %12006 }
 0xdcc   : > { %12322 = vmatprep.mubr.msk.f32.mxu1 %vm12622_vm4, %v20300_v55 }
 0xdcf   : > { %12323 = vmatmul.mubr.msk.f32.gmra.mxu1 %vm6042_vm10, %v11767_v3 }
 0xdd0   : > { %12325 = vmatprep.mubr.msk.f32.mxu1 %vm12622_vm4, %v20300_v55 }
 0xdd3   : > { %12326 = vmatmul.mubr.msk.f32.gmra.mxu1 %vm6042_vm10, %v11768_v4 }
 0xdd4   : > { %12328 = vmatprep.mubr.msk.f32.mxu1 %vm12622_vm4, %v20300_v55 }
 0xdd7   : > { %12329 = vmatmul.mubr.msk.f32.gmra.mxu1 %vm6042_vm10, %v11769_v22  ;;  %vm12021_vm10 = vcmask 1043456  }
 0xdd8   : > { %12353 = vmatprep.mubr.msk.f32.mxu1 %vm12014_vm9, %v12000_v63 }
 0xe6f   : > { %v19095_v49 = vpop.f32.mrf.mxu1 }
 0xe70   : > { %v11936_v27 = vadd.f32 %v19095_v49, %v11784_v44 }
 0xe71   : > { %v12300_v28 = vpop.f32.mrf.mxu1 }
 0xe72   : > { %v11989_v31 = vmax.f32 %v11936_v27, 0.0 }
 0xe73   : > { %v11940_v54 = vpop.f32.mrf.mxu1 }
 0xe74   : > { %v11941_v24 = vadd.f32 %v11940_v54, %v11789_v20 }
 0xe75   : > { %v12303_v15 = vpop.f32.mrf.mxu1 }
 0xe76   : > { %v11990_v23 = vmax.f32 %v11941_v24, 0.0 }
 0xe77   : > { %v11945_v0 = vpop.f32.mrf.mxu1 }
 0xe78   : > { %v11946_v18 = vadd.f32 %v11945_v0, %v11794_v38 }
 0xe79   : > { %v12306_v55 = vpop.f32.mrf.mxu1 }
 0xe7a   : > { %v11991_v7 = vmax.f32 %v11946_v18, 0.0 }
 0xe7b   : > { %v11950_v12 = vpop.f32.mrf.mxu1 }
 0xe7c   : > { %v11951_v30 = vadd.f32 %v11950_v12, %v11799_v57 }
 0xe7d   : > { %v12309_v52 = vpop.f32.mrf.mxu1 }
 0xe7e   : > { %v11992_v39 = vmax.f32 %v11951_v30, 0.0 }
 0xe7f   : > { %v11955_v43 = vpop.f32.mrf.mxu1 }
 0xe80   : > { %v11956_v50 = vadd.f32 %v11955_v43, %v11804_v6 }
 0xe81   : > { %v12312_v48 = vpop.f32.mrf.mxu1 }
 0xe82   : > { %v11993_v60 = vmax.f32 %v11956_v50, 0.0 }
 0xe83   : > { %v11960_v35 = vpop.f32.mrf.mxu1 }
 0xe84   : > { %v11961_v45 = vadd.f32 %v11960_v35, %v11809_v17 }
 0xe85   : > { %v12315_v62 = vpop.f32.mrf.mxu1 }
 0xe86   : > { %v11994_v46 = vmax.f32 %v11961_v45, 0.0 }
 0xe87   : > { %v11965_v21 = vpop.f32.mrf.mxu1 }
 0xe88   : > { %v11966_v29 = vadd.f32 %v11965_v21, %v11814_v40 }
 0xe89   : > { %v12318_v2 = vpop.f32.mrf.mxu1 }
 0xe8a   : > { %v11995_v61 = vmax.f32 %v11966_v29, 0.0 }
 0xe8b   : > { %v11970_v14 = vpop.f32.mrf.mxu1 }
 0xe8c   : > { %v11971_v47 = vadd.f32 %v11970_v14, %v11819_v33 }
 0xe8d   : > { %v12321_v26 = vpop.f32.mrf.mxu1 }
 0xe8e   : > { %v11996_v13 = vmax.f32 %v11971_v47, 0.0 }
 0xe8f   : > { %v11975_v42 = vpop.f32.mrf.mxu1 }
 0xe90   : > { %v11976_v58 = vadd.f32 %v11975_v42, %v11824_v56 }
 0xe91   : > { %v12324_v32 = vpop.f32.mrf.mxu1 }
 0xe92   : > { %v11997_v41 = vmax.f32 %v11976_v58, 0.0 }
 0xe93   : > { %v11980_v25 = vpop.f32.mrf.mxu1 }
 0xe94   : > { %v11981_v5 = vadd.f32 %v11980_v25, %v11829_v19 }
 0xe95   : > { %v12327_v10 = vpop.f32.mrf.mxu1 }
 0xe96   : > { %v11998_v34 = vmax.f32 %v11981_v5, 0.0 }
 0xe97   : > { %v11985_v8 = vpop.f32.mrf.mxu1 }
 0xe98   : > { %v11986_v1 = vadd.f32 %v11985_v8, %v11834_v59 }
 0xe99   : > { %v12330_v36 = vpop.f32.mrf.mxu1 }
 0xe9a   : > { %v11999_v53 = vmax.f32 %v11986_v1, 0.0 }
 0xe9c   : > { %12331 = vmatprep.subr.msk.mxu1 %vm12021_vm10, %v11999_v53 }
 0xe9d   : > { %12332 = vmatpush3.msk.msra.mxu1 %vm12021_vm10, %v11999_v53 }
 0xe9e   : > { %12333 = vmatprep.subr.mxu1 %v11998_v34 }
 0xe9f   : > { %12334 = vmatpush3.msra.mxu1 %v11998_v34 }
 0xea0   : > { %12335 = vmatprep.subr.mxu1 %v11997_v41 }
 0xea1   : > { %12336 = vmatpush3.msra.mxu1 %v11997_v41 }
 0xea2   : > { %12337 = vmatprep.subr.mxu1 %v11996_v13 }
 0xea3   : > { %12338 = vmatpush3.msra.mxu1 %v11996_v13 }
 0xea4   : > { %12339 = vmatprep.subr.mxu1 %v11995_v61 }
 0xea5   : > { %12340 = vmatpush3.msra.mxu1 %v11995_v61 }
 0xea6   : > { %12341 = vmatprep.subr.mxu1 %v11994_v46 }
 0xea7   : > { %12342 = vmatpush3.msra.mxu1 %v11994_v46 }
 0xea8   : > { %12343 = vmatprep.subr.mxu1 %v11993_v60 }
 0xea9   : > { %12344 = vmatpush3.msra.mxu1 %v11993_v60 }
 0xeaa   : > { %12345 = vmatprep.subr.mxu1 %v11992_v39 }
 0xeab   : > { %12346 = vmatpush3.msra.mxu1 %v11992_v39 }
 0xeac   : > { %12347 = vmatprep.subr.mxu1 %v11991_v7 }
 0xead   : > { %12348 = vmatpush3.msra.mxu1 %v11991_v7 }
 0xeae   : > { %12349 = vmatprep.subr.mxu1 %v11990_v23 }
 0xeaf   : > { %12350 = vmatpush3.msra.mxu1 %v11990_v23 }
 0xeb0   : > { %12351 = vmatprep.subr.mxu1 %v11989_v31 }
 0xeb1   : > { %12352 = vmatpush3.msra.mxu1 %v11989_v31 }
 0xeb2   : > { %12354 = vmatmul.mubr.msk.f32.vlgmr.msra.gmra.mxu1 %vm12014_vm9, %v12001_v11 }
 0xf72   : > { %v12355_v16 = vpop.f32.mrf.mxu1 }
 0xf73   : > { %v12097_v37 = vadd.f32 %v12355_v16, %v12012_v9 }
 0xf74   : > { %v12091_v3 = vpop.f32.mrf.mxu1 }
 0xf75   : > { %12103 = vst.msk [vmem:[%s386_s27 + $0x8] sm:$0x3] %vm12102_vm3, %v12097_v37  ;;  %v12092_v4 = vadd.f32 %v12091_v3, %v12007_v51 }
 0xf77   : > { %12101 = vst.msk [vmem:[%s386_s27] sm:$0xff] %vm12100_vm5, %v12092_v4 }
 0xf78 PF: > { %s20308_s30 = sld [smem:[#allocation9_spill]] }
 0xf7e   : > { %s21_s17 = sadd.s32 1, %s20308_s30  }
 0xf7f   : > { %p18_p4 = scmp.ge.s32.totalorder %s21_s17, 4  }
 0xf81   :  { %20 = sbr.rel (!%p18_p4) target bundleno = 10 (0xa), region = 94 }

</bundles_post_ra>
